<compile_context>
chip_gen: v5e
topology: v5e:2x2
jax: 0.10.0
libtpu: 0.0.40
codegen_flags: <defaults>
</compile_context>

<pallas_src>
import math

import jax
import jax.numpy as jnp
from jax import lax
from jax.experimental import pallas as pl
from jax.experimental.pallas import tpu as pltpu


def _intensity(x, p):
    """I(x) with all scalar constants pre-folded.

    p = (neg_inv_tdamp, omega, gain, offset, phase, neg_inv_tau, beta, one_minus_beta)
      neg_inv_tdamp = -1/tdamp
      omega         = 2*pi/Period
      gain          = A*k*xi_g
      offset        = s0*xi_g
      phase         = l*pi/xi_g
      neg_inv_tau   = -1/tau
    """
    neg_inv_tdamp, omega, gain, offset, phase, neg_inv_tau, beta, one_m_beta = p
    # s*xi_g = exp(-x/tdamp) * cos(2*pi*x/Period) * (A*k*xi_g) + s0*xi_g
    sx = jnp.exp(x * neg_inv_tdamp) * jnp.cos(x * omega) * gain + offset
    frac2 = sx * sx + 1.0
    r = lax.rsqrt(frac2)                 # one EUP op replaces sqrt + reciprocal
    sn = jnp.sin((frac2 * r) * phase)    # sqrt(frac2) == frac2 * rsqrt(frac2)
    frac3 = jnp.exp(x * neg_inv_tau) * beta + one_m_beta
    return (sn * sn) * frac3 * (r * r)   # 1/frac2 == rsqrt(frac2)^2


def net_kernel(params_ref, i0_ref, inv_i0_ref, x_ref, o_ref):
    # params_ref: (8,) derived f32 scalars, untiled in SMEM.
    p = tuple(params_ref[i] for i in range(8))
    I = _intensity(x_ref[...], p)
    # (I - I0) / I0 with the full-tile divide replaced by a broadcast multiply
    # against the precomputed (1, tile_m) reciprocal row.
    o_ref[...] = (I - i0_ref[...]) * inv_i0_ref[...]


def _choose_tiles(N, M, itemsize=4, target_block_bytes=2 << 20, min_row_steps=8):
    """Byte-budgeted (tile_n, tile_m) satisfying the (8, 128) rule w/o padding."""
    if M % 128 == 0:
        tile_m = min(M, 2048)            # lane-dense, bounded for very wide M
    else:
        tile_m = M                       # full-dim lane block: no padding needed
    # Row tile from the byte budget (multiple of 8, >= 8). ~2 MiB per block ->
    # ~8 MiB for double-buffered in+out, within every chip's default VMEM scope.
    rows_budget = max(8, (target_block_bytes // (tile_m * itemsize)) // 8 * 8)
    # Keep the row grid >= min_row_steps when N allows it, so the "parallel"
    # row axis can actually be split across v7x's two TensorCores.
    rows_cap = max(8, ((pl.cdiv(N, min_row_steps)) + 7) // 8 * 8)
    tile_n = min(rows_budget, rows_cap)
    return tile_n, tile_m


def net_forward(x, params):
    """x: (N, M) float32, params: (9,) [k, s0, xi_g, l, beta, tau, A, tdamp, Period]."""
    x = x.astype(jnp.float32)
    N, M = x.shape
    k, s0, xi_g, l, beta, tau, A, tdamp, Period = (
        params[i].astype(jnp.float32) for i in range(9)
    )

    # Derived scalars computed once in the wrapper (removes per-element divides).
    derived = jnp.stack([
        -1.0 / tdamp,                 # neg_inv_tdamp
        (2.0 * math.pi) / Period,     # omega
        A * k * xi_g,                 # gain
        s0 * xi_g,                    # offset
        l * math.pi / xi_g,           # phase
        -1.0 / tau,                   # neg_inv_tau
        beta,
        1.0 - beta,
    ]).astype(jnp.float32)

    # Hoist the cancellation-sensitive first-row terms out of the hot loop:
    # a single tiny (1, M) XLA op, passed in as resident rows.
    p_tuple = tuple(derived[i] for i in range(8))
    I0 = _intensity(x[0:1, :], p_tuple)
    inv_I0 = 1.0 / I0

    tile_n, tile_m = _choose_tiles(N, M)
    grid = (pl.cdiv(N, tile_n), pl.cdiv(M, tile_m))

    out = pl.pallas_call(
        net_kernel,
        out_shape=jax.ShapeDtypeStruct((N, M), jnp.float32),
        grid=grid,
        in_specs=[
            # Derived scalars: whole (8,) array in SMEM, same for every step.
            pl.BlockSpec(memory_space=pltpu.MemorySpace.SMEM),
            # First-row terms: (1, tile_m), indexed only by the lane grid axis.
            pl.BlockSpec((1, tile_m), lambda i, j: (0, j)),
            pl.BlockSpec((1, tile_m), lambda i, j: (0, j)),
            # x tile.
            pl.BlockSpec((tile_n, tile_m), lambda i, j: (i, j)),
        ],
        out_specs=pl.BlockSpec((tile_n, tile_m), lambda i, j: (i, j)),
        compiler_params=pltpu.CompilerParams(
            dimension_semantics=("parallel", "parallel"),
        ),
        cost_estimate=pl.CostEstimate(
            flops=18 * N * M,
            transcendentals=5 * N * M,
            bytes_accessed=8 * N * M,
        ),
    )(derived, I0, inv_I0, x)
    return out


def net_reference(x, params):
    """Plain-JAX reference mirroring the PyTorch forward op-for-op (f32)."""
    k, s0, xi_g, l, beta, tau, A, tdamp, Period = (params[i] for i in range(9))
    d = jnp.exp(-x / tdamp) * (jnp.cos(x * (2.0 * math.pi) / Period) * A)
    s = d * k + s0
    frac2 = (s * xi_g) ** 2 + 1.0
    frac1 = jnp.sin(jnp.sqrt(frac2) / xi_g * l * math.pi) ** 2
    frac3 = jnp.exp(-x / tau) * beta + 1.0 - beta
    I = frac1 * frac3 / frac2
    I0 = I[0:1, :]
    return (I - I0) / I0


if __name__ == "__main__":
    # Deterministic scalar parameters (module __init__ uses module-level
    # constants k, s0, xi_g, l, beta, tau, A, tdamp, Period -- fixed here).
    params = jnp.array(
        [0.5,   # k
         0.1,   # s0
         0.3,   # xi_g
         2.0,   # l
         0.4,   # beta
         5.0,   # tau
         1.0,   # A
         10.0,  # tdamp
         3.0],  # Period
        dtype=jnp.float32,
    )

    key = jax.random.PRNGKey(0)
    # Small shape: 512 time samples x 256 lanes -> (8, 1) grid of 64x256 tiles.
    x = jax.random.uniform(key, (512, 256), dtype=jnp.float32, minval=0.0, maxval=10.0)

    out = jax.block_until_ready(jax.jit(net_forward)(x, params))
    ref = net_reference(x, params)

    assert out.shape == x.shape
    # (I - I0)/I0 is cancellation-sensitive; comparing two f32 formulations
    # (the f64 PyTorch module differs from either by a similar margin).
    assert jnp.allclose(out, ref, rtol=1e-4, atol=1e-4), "mismatch vs reference"

    print("KERNEL_OK")
</pallas_src>

<mosaic_0001>
module attributes {stable_mosaic.version = 11 : i64} {
  func.func @net_kernel(%arg0: i32, %arg1: i32, %arg2: memref<8xf32, #tpu.memory_space<smem>>, %arg3: memref<1x256xf32, #tpu.memory_space<vmem>>, %arg4: memref<1x256xf32, #tpu.memory_space<vmem>>, %arg5: memref<64x256xf32, #tpu.memory_space<vmem>>, %arg6: memref<64x256xf32, #tpu.memory_space<vmem>>) attributes {dimension_semantics = [#tpu.dimension_semantics<parallel>, #tpu.dimension_semantics<parallel>], iteration_bounds = array<i64: 8, 1>, scalar_prefetch = 0 : i64, scratch_operands = 0 : i64, tpu.core_type = #tpu.core_type<tc>, window_params = [{transform_indices = @transform_0, window_bounds = array<i64: 8>}, {transform_indices = @transform_1, window_bounds = array<i64: 1, 256>}, {transform_indices = @transform_2, window_bounds = array<i64: 1, 256>}, {transform_indices = @transform_3, window_bounds = array<i64: 64, 256>}, {transform_indices = @transform_4, window_bounds = array<i64: 64, 256>}]} {
    %c0 = arith.constant 0 : index
    %0 = memref.load %arg2[%c0] : memref<8xf32, #tpu.memory_space<smem>>
    %c1 = arith.constant 1 : index
    %1 = memref.load %arg2[%c1] : memref<8xf32, #tpu.memory_space<smem>>
    %c2 = arith.constant 2 : index
    %2 = memref.load %arg2[%c2] : memref<8xf32, #tpu.memory_space<smem>>
    %c3 = arith.constant 3 : index
    %3 = memref.load %arg2[%c3] : memref<8xf32, #tpu.memory_space<smem>>
    %c4 = arith.constant 4 : index
    %4 = memref.load %arg2[%c4] : memref<8xf32, #tpu.memory_space<smem>>
    %c5 = arith.constant 5 : index
    %5 = memref.load %arg2[%c5] : memref<8xf32, #tpu.memory_space<smem>>
    %c6 = arith.constant 6 : index
    %6 = memref.load %arg2[%c6] : memref<8xf32, #tpu.memory_space<smem>>
    %c7 = arith.constant 7 : index
    %7 = memref.load %arg2[%c7] : memref<8xf32, #tpu.memory_space<smem>>
    %c0_0 = arith.constant 0 : index
    %c0_1 = arith.constant 0 : index
    %8 = vector.load %arg5[%c0_0, %c0_1] : memref<64x256xf32, #tpu.memory_space<vmem>>, vector<64x256xf32>
    %9 = vector.broadcast %0 : f32 to vector<64x256xf32>
    %10 = arith.mulf %8, %9 : vector<64x256xf32>
    %11 = math.exp %10 : vector<64x256xf32>
    %12 = vector.broadcast %1 : f32 to vector<64x256xf32>
    %13 = arith.mulf %8, %12 : vector<64x256xf32>
    %14 = math.cos %13 : vector<64x256xf32>
    %15 = arith.mulf %11, %14 : vector<64x256xf32>
    %16 = vector.broadcast %2 : f32 to vector<64x256xf32>
    %17 = arith.mulf %15, %16 : vector<64x256xf32>
    %18 = vector.broadcast %3 : f32 to vector<64x256xf32>
    %19 = arith.addf %17, %18 : vector<64x256xf32>
    %20 = arith.mulf %19, %19 : vector<64x256xf32>
    %cst = arith.constant 1.000000e+00 : f32
    %21 = vector.broadcast %cst : f32 to vector<64x256xf32>
    %22 = arith.addf %20, %21 : vector<64x256xf32>
    %23 = math.rsqrt %22 : vector<64x256xf32>
    %24 = arith.mulf %22, %23 : vector<64x256xf32>
    %25 = vector.broadcast %4 : f32 to vector<64x256xf32>
    %26 = arith.mulf %24, %25 : vector<64x256xf32>
    %27 = math.sin %26 : vector<64x256xf32>
    %28 = vector.broadcast %5 : f32 to vector<64x256xf32>
    %29 = arith.mulf %8, %28 : vector<64x256xf32>
    %30 = math.exp %29 : vector<64x256xf32>
    %31 = vector.broadcast %6 : f32 to vector<64x256xf32>
    %32 = arith.mulf %30, %31 : vector<64x256xf32>
    %33 = vector.broadcast %7 : f32 to vector<64x256xf32>
    %34 = arith.addf %32, %33 : vector<64x256xf32>
    %35 = arith.mulf %27, %27 : vector<64x256xf32>
    %36 = arith.mulf %35, %34 : vector<64x256xf32>
    %37 = arith.mulf %23, %23 : vector<64x256xf32>
    %38 = arith.mulf %36, %37 : vector<64x256xf32>
    %c0_2 = arith.constant 0 : index
    %c0_3 = arith.constant 0 : index
    %39 = vector.load %arg3[%c0_2, %c0_3] : memref<1x256xf32, #tpu.memory_space<vmem>>, vector<1x256xf32>
    %40 = vector.broadcast %39 : vector<1x256xf32> to vector<64x256xf32>
    %41 = arith.subf %38, %40 : vector<64x256xf32>
    %c0_4 = arith.constant 0 : index
    %c0_5 = arith.constant 0 : index
    %42 = vector.load %arg4[%c0_4, %c0_5] : memref<1x256xf32, #tpu.memory_space<vmem>>, vector<1x256xf32>
    %43 = vector.broadcast %42 : vector<1x256xf32> to vector<64x256xf32>
    %44 = arith.mulf %41, %43 : vector<64x256xf32>
    %c0_6 = arith.constant 0 : index
    %c0_7 = arith.constant 0 : index
    %45 = vector.load %arg6[%c0_6, %c0_7] : memref<64x256xf32, #tpu.memory_space<vmem>>, vector<64x256xf32>
    tpu.vector_store %arg6[%c0_6, %c0_7], %44 {strides = array<i32>} : memref<64x256xf32, #tpu.memory_space<vmem>>, vector<64x256xf32>,
    return
  }
  func.func @transform_0(%arg0: i32, %arg1: i32) -> i32 {
    %c0_i32 = arith.constant 0 : i32
    %c0_i32_0 = arith.constant 0 : i32
    return %c0_i32 : i32
  }
  func.func @transform_1(%arg0: i32, %arg1: i32) -> (i32, i32) {
    %c0_i32 = arith.constant 0 : i32
    %c0_i32_0 = arith.constant 0 : i32
    return %c0_i32, %arg1 : i32, i32
  }
  func.func @transform_2(%arg0: i32, %arg1: i32) -> (i32, i32) {
    %c0_i32 = arith.constant 0 : i32
    %c0_i32_0 = arith.constant 0 : i32
    return %c0_i32, %arg1 : i32, i32
  }
  func.func @transform_3(%arg0: i32, %arg1: i32) -> (i32, i32) {
    %c0_i32 = arith.constant 0 : i32
    return %arg0, %arg1 : i32, i32
  }
  func.func @transform_4(%arg0: i32, %arg1: i32) -> (i32, i32) {
    %c0_i32 = arith.constant 0 : i32
    return %arg0, %arg1 : i32, i32
  }
}

</mosaic_0001>

<bundles_post_ra>
// kernel: net_forward.1
= control target key start
LH: loop header
LB: loop body
LE: loop exit
PB: predicated region body
PF: predicated region fallthrough
CT: control target
= control target key end

     0   :  { %s13325_s0 = inlined_call_operand.vmem [shape: f32[8], index: 0, kind: input, shape index: {}]   ;;  %s13326_s1 = inlined_call_operand.vmem [shape: f32[1,256], index: 1, kind: input, shape index: {}]   ;;  %s13327_s2 = inlined_call_operand.vmem [shape: f32[1,256], index: 2, kind: input, shape index: {}]   ;;  %s13328_s3 = inlined_call_operand.hbm [shape: f32[512,256], index: 3, kind: input, shape index: {}]   ;;  %s13329_s4 = inlined_call_operand.hbm [shape: f32[512,256], index: 4, kind: output, shape index: {}]  }
   0x1   :  { %13550 = sst [smem:[#allocation65_spill]] %s13325_s0 }
   0x2   :  { %9 = vsyncpa [#allocation5], 0 }
   0x3   :  { %10 = vsyncpa [#allocation3], 0 }
   0x4   :  { %12 = vsyncpa [#allocation3 + $0x1], 0 }
   0x5   :  { %13 = vsyncpa [#allocation4], 0 }
   0x6   :  { %15 = vsyncpa [#allocation4 + $0x1], 0  ;;  %s6445_s15 = smov 0   ;;  %s6447_s16 = smov 0  }
   0x7   :  { %s6449_s17 = smov 0   ;;  %s6451_s18 = smov 0  }
   0x8   :  { %s6453_s19 = smov 0   ;;  %s6455_s20 = smov 0  }
   0x9 LB: > { %s5951_s21 = sadd.s32 4294967295, %s6406_s20   ;;  %s5952_s22 = sadd.s32 4294967294, %s6406_s20   ;;  %s6406_s20 = sphi %s6455_s20, %s21_s20   ;;  %s6402_s19 = sphi %s6453_s19, %s14060_s19   ;;  %s6398_s18 = sphi %s6451_s18, %s14059_s18   ;;  %s6394_s17 = sphi %s6449_s17, %s14058_s17   ;;  %s6390_s16 = sphi %s6447_s16, %s14057_s16   ;;  %s6386_s15 = sphi %s6445_s15, %s14056_s15  }
   0xa   : > { %s115_s23 = sadd.s32 1, %s6394_s17  ;;  %p122_p0 = scmp.ne.s32.totalorder %s6394_s17, %s6390_s16 }
   0xb   : > { %p123_p1 = scmp.eq.s32.totalorder %s6406_s20, 0  ;;  %p128_p2 = scmp.ne.s32.totalorder %s6390_s16, %s6386_s15 }
   0xc   : > { %p6483_p3 = scmp.eq.s32.totalorder %s5951_s21, 0  ;;  %p154_p4 = scmp.eq.s32.totalorder %s5951_s21, 7 }
   0xd   : > { %p124_p5 = por %p123_p1, %p122_p0  ;;  %p160_p6 = scmp.eq.s32.totalorder %s5952_s22, 7 }
   0xe   : > { %p6489_p7 = por %p6483_p3, %p128_p2  ;;  %p6493_p8 = por %p154_p4, %p122_p0 }
   0xf   : > { %p6497_p9 = por %p160_p6, %p128_p2  ;;  %p5953_p10 = scmp.ge.s32.totalorder %s6406_s20, 1 }
  0x10   : > { %p167_p11 = scmp.lt.s32.totalorder %s6406_s20, 9  ;;  %s13556_s0 = sld [smem:[#allocation65_spill]] }
  0x11   : > { %s13554_s27 = scalar_select %p6497_p9, 1, 0 }
  0x12   : > { %p6506_p12 = pnand %p5953_p10, %p167_p11  ;;  %p6100_p13 = scmp.lt.s32.totalorder %s6406_s20, 8 }
  0x13   : > { %13555 = sst [smem:[#allocation11_spill]] %s13554_s27  ;;  %s33_s7 = sadd.s32 1, %s6402_s19 }
  0x14   : > { %p6087_p0 = pneg %p6506_p12  ;;  %p6513_p1 = pnand %p6100_p13, %p124_p5 }
  0x15   : > { %p35_p4 = scmp.ge.s32.totalorder %s33_s7, 8  ;;  %s206_s8 = sand.u32 1, %s6394_s17  }
  0x16   : > { %s179_s30 = sshll.u32 %s13556_s0, 4  ;;  %p6088_p2 = pnand %p6087_p0, %p6483_p3  ;;  %s180_s30 = int_to_ptr.vmem [resolvable:$true] %s179_s30 }
  0x17   : > { %s6408_s9 = smov [#allocation2]   ;;  %s14062_s7 = smov (%p35_p4, %s33_s7), 0 }
  0x18   : > { %6090 = dma.vmem_to_smem (!%p6088_p2), %s180_s30, 16, %s6408_s9, [#allocation5]  }
  0x19   : > { %s5958_s10 = sshll.u32 %s206_s8, 7  ;;  %s110_s11 = ssub.s32 %s6402_s19, %s14062_s7 }
  0x1a   : > { %p113_p6 = scmp.eq.s32.totalorder %s110_s11, 0  ;;  %s6076_s12 = sshll.u32 %s6402_s19, 7 }
  0x1b   : > { %s218_s21 = scalar_lea.hbm %s13328_s3, %s6076_s12  ;;  %s210_s22 = scalar_lea.vmem [#allocation6], %s5958_s10 }
  0x1c   : > { %s221_s28 = sshll.u32 %s210_s22, 4  ;;  %s219_s0 = sshll.u32 %s218_s21, 4  ;;  %s222_s28 = int_to_ptr.vmem [resolvable:$true] %s221_s28  ;;  %s220_s0 = int_to_ptr.hbm [resolvable:$true] %s219_s0 }
  0x1d   : > { %s6532_s29 = scalar_select %p113_p6, %s6394_s17, %s115_s23  }
  0x1e   : > { %s207_s30 = scalar_lea.sflag [#allocation3], %s206_s8  ;;  %s6409_s9 = smov 256  }
  0x1f   : > { %s6410_s27 = smov 16   ;;  %233 = sbr.rel (%p6506_p12) target bundleno = 1402 (0x57a), region = 36 }
  0x20   : > { %6094 = dma.hbm_to_vmem [thread:$0]  (!%p6513_p1), %s220_s0, 2048, %s222_s28, %s207_s30, %s6409_s9, %s6409_s9, %s6410_s27  }
  0x24   : > { %6373 = dma.done.wait (%p6483_p3), [#allocation5], 16  }
  0x25   : > { %6375 = vsyncadd (%p6483_p3), [#allocation5], 4294967280  ;;  %s6543_s23 = sand.u32 1, %s6390_s16  }
  0x26   : > { %s5964_s8 = sshll.u32 %s6543_s23, 7  ;;  %s241_s10 = scalar_lea.sflag [#allocation3], %s6543_s23 }
  0x27   : > { %s6549_s0 = scalar_lea.vmem [#allocation6], %s5964_s8 }
  0x28   : > { %6377 = dma.done.wait (%p6489_p7), %s241_s10, 2048  }
  0x29   : > { %6379 = vsyncadd (%p6489_p7), %s241_s10, 4294965248 }
  0x2a   : > { %250 = sfence }
  0x2b   : > { %s5966_s24 = sld [smem:[#allocation2 + $0x1]]  ;;  %v6556_v0 = vld [vmem:[%s6549_s0] sm:$0xff]  ;;  %v6568_v10 = vld [vmem:[%s6549_s0 + $0x8] sm:$0xff]  ;;  %v13342_v12 = vmov 2102212464   ;;  %s13262_s30 = scalar_lea.vmem [#allocation7], %s5964_s8 }
  0x2c   : > { %v13340_v14 = vmov 920167782   ;;  %v13338_v19 = vmov 1326507024   ;;  %v13344_v21 = vmov 683565275  }
  0x2d   : > { %v13336_v23 = vmov 2475754826   ;;  %v13334_v26 = vmov 2131351028   ;;  %s293_s25 = sld [smem:[#allocation2]]  ;;  %s6078_s9 = sshll.u32 %s6398_s18, 7 }
  0x2e   : > { %s9617_s27 = sld [smem:[#allocation2 + $0x2]]  ;;  %s5824_s18 = scalar_lea.hbm %s13329_s4, %s6078_s9 }
  0x2f   : > { %s9632_s5 = sld [smem:[#allocation2 + $0x3]] }
  0x30   : > { %s9878_s6 = sld [smem:[#allocation2 + $0x4]] }
  0x31   : > { %v6558_v1 = vstv %s5966_s24  ;;  %s12981_s11 = sld [smem:[#allocation2 + $0x5]]  ;;  %s5827_s24 = sshll.u32 %s5824_s18, 4  ;;  %s5828_s24 = int_to_ptr.hbm [resolvable:$true] %s5827_s24 }
  0x32   : > { %v6562_v2 = vmul.f32 %v6558_v1, %v6556_v0  ;;  %v6572_v11 = vmul.f32 %v6558_v1, %v6568_v10  ;;  %s13069_s12 = sld [smem:[#allocation2 + $0x6]] }
  0x33   : > { %s13081_s13 = sld [smem:[#allocation2 + $0x7]] }
  0x34   : > { %13559 = vst [vmem:[#allocation12_spill] sm:$0xff] %v6562_v2  ;;  %v386_v3 = vand.u32 2139095040, %v6562_v2  ;;  %v13333_v16 = vand.u32 2147483647, %v6562_v2  ;;  %v540_v33 = vand.u32 2139095040, %v6572_v11 }
  0x35   : > { %13560 = vst [vmem:[#allocation13_spill] sm:$0xff] %v6572_v11 }
  0x36   : > { %v387_v4 = vshrl.u32 %v386_v3, 23  ;;  %v390_v31 = vand.u32 8388607, %v13333_v16  ;;  %v541_v40 = vshrl.u32 %v540_v33, 23 }
  0x38   : > { %v5973_v5 = vadd.s32 4294967169, %v387_v4  ;;  %v391_v38 = vor.u32 8388608, %v390_v31  ;;  %v5976_v46 = vadd.s32 4294967169, %v541_v40 }
  0x3a   : > { %v393_v6 = vadd.s32 1, %v5973_v5  ;;  %v6622_v45 = vshll.u32 %v391_v38, 8  ;;  %v547_v51 = vadd.s32 1, %v5976_v46  ;;  %v6638_v5 = vld [vmem:[%s6549_s0 + $0x10] sm:$0xff] }
  0x3c   : > { %vm394_vm0 = vcmp.gt.s32.totalorder %v393_v6, 0  ;;  %v432_v49 = vand.u32 65535, %v6622_v45  ;;  %v433_v53 = vshrl.u32 %v6622_v45, 16  ;;  %vm548_vm5 = vcmp.gt.s32.totalorder %v547_v51, 0 }
  0x3d   : > { %v395_v7 = vsel %vm394_vm0, %v393_v6, 0  ;;  %v549_v58 = vsel %vm548_vm5, %v547_v51, 0 }
  0x3e   : > { %v397_v8 = vand.u32 31, %v395_v7  ;;  %v6578_v17 = vshrl.u32 %v395_v7, 5  ;;  %v551_v4 = vand.u32 31, %v549_v58 }
  0x40   : > { %v6565_v9 = vsub.s32 32, %v397_v8  ;;  %v409_v13 = vshll.u32 %v13342_v12, %v397_v8  ;;  %v412_v18 = vshll.u32 %v13340_v14, %v397_v8  ;;  %v400_v22 = vshll.u32 %v13344_v21, %v397_v8 }
  0x41   : > { %v403_v24 = vshll.u32 %v13336_v23, %v397_v8  ;;  %v406_v28 = vshll.u32 %v13334_v26, %v397_v8  ;;  %vm418_vm1 = vcmp.lt.s32.totalorder %v6578_v17, 4  ;;  %vm415_vm2 = vcmp.lt.s32.totalorder %v6578_v17, 1 }
  0x42   : > { %v410_v15 = vshrl.u32 %v13340_v14, %v6565_v9  ;;  %v413_v20 = vshrl.u32 %v13338_v19, %v6565_v9  ;;  %v401_v25 = vshrl.u32 %v13336_v23, %v6565_v9  ;;  %v404_v27 = vshrl.u32 %v13334_v26, %v6565_v9 }
  0x43   : > { %v407_v29 = vshrl.u32 %v13342_v12, %v6565_v9  ;;  %vm417_vm3 = vcmp.lt.s32.totalorder %v6578_v17, 3  ;;  %vm416_vm4 = vcmp.lt.s32.totalorder %v6578_v17, 2  ;;  %v557_v46 = vshll.u32 %v13336_v23, %v551_v4 }
  0x44   : > { %v411_v30 = vor.u32 %v410_v15, %v409_v13  ;;  %v414_v32 = vor.u32 %v413_v20, %v412_v18  ;;  %v6596_v34 = vor.u32 %v401_v25, %v400_v22  ;;  %v6598_v35 = vor.u32 %v404_v27, %v403_v24 }
  0x45   : > { %v6600_v36 = vor.u32 %v407_v29, %v406_v28  ;;  %v6644_v18 = vsub.s32 32, %v551_v4  ;;  %v6648_v20 = vmul.f32 %v6558_v1, %v6638_v5  ;;  %v13346_v24 = vmov 0  }
  0x46   : > { %v424_v37 = vsel %vm418_vm1, %v411_v30, 920167782  ;;  %v428_v39 = vsel %vm418_vm1, %v414_v32, 1326507024  ;;  %v423_v41 = vsel %vm415_vm2, %v6596_v34, %v6598_v35  ;;  %v13332_v28 = vand.u32 2147483647, %v6572_v11 }
  0x47   : > { %v425_v42 = vsel %vm417_vm3, %v6600_v36, %v424_v37  ;;  %v427_v43 = vsel %vm415_vm2, %v6598_v35, %v6600_v36  ;;  %v429_v44 = vsel %vm417_vm3, %v411_v30, %v428_v39  ;;  %13561 = vst [vmem:[#allocation14_spill] sm:$0xff] %v6648_v20  ;;  %v563_v29 = vshll.u32 %v13342_v12, %v551_v4 }
  0x48   : > { %v426_v47 = vsel %vm416_vm4, %v423_v41, %v425_v42  ;;  %v430_v48 = vsel %vm416_vm4, %v427_v43, %v429_v44  ;;  %v564_v31 = vshrl.u32 %v13340_v14, %v6644_v18  ;;  %v566_v32 = vshll.u32 %v13340_v14, %v551_v4 }
  0x49   : > { %v457_v50 = vshrl.u32 %v426_v47, 16  ;;  %v435_v52 = vshrl.u32 %v430_v48, 16  ;;  %v456_v54 = vand.u32 65535, %v426_v47  ;;  %v434_v56 = vand.u32 65535, %v430_v48 }
  0x4a   : > { %v567_v33 = vshrl.u32 %v13338_v19, %v6644_v18  ;;  %v6663_v39 = vshrl.u32 %v549_v58, 5  ;;  %v694_v40 = vand.u32 2139095040, %v6648_v20  ;;  %v544_v42 = vand.u32 8388607, %v13332_v28 }
  0x4b   : > { %v459_v55 = vmul.u32 %v457_v50, %v432_v49  ;;  %v6630_v57 = vmul.u32 %v435_v52, %v432_v49  ;;  %v458_v59 = vmul.u32 %v456_v54, %v432_v49  ;;  %v6632_v60 = vmul.u32 %v456_v54, %v433_v53 }
  0x4c   : > { %v436_v62 = vmul.u32 %v434_v56, %v432_v49  ;;  %v6634_v63 = vmul.u32 %v434_v56, %v433_v53  ;;  %v461_v15 = vmul.u32 %v457_v50, %v433_v53  ;;  %v439_v22 = vmul.u32 %v435_v52, %v433_v53 }
  0x4d   : > { %v462_v61 = vshll.u32 %v459_v55, 16  ;;  %v440_v3 = vshll.u32 %v6630_v57, 16  ;;  %v464_v6 = vshll.u32 %v6632_v60, 16  ;;  %v554_v43 = vshll.u32 %v13344_v21, %v551_v4 }
  0x4e   : > { %v442_v8 = vshll.u32 %v6634_v63, 16  ;;  %v555_v44 = vshrl.u32 %v13336_v23, %v6644_v18  ;;  %v558_v47 = vshrl.u32 %v13334_v26, %v6644_v18  ;;  %v560_v48 = vshll.u32 %v13334_v26, %v551_v4 }
  0x4f   : > { %vm466_vm6 = vc.u32 %v458_v59, %v462_v61  ;;  %v6641_v7 = vadd.s32 %v462_v61, %v458_v59  ;;  %vm444_vm7 = vc.u32 %v436_v62, %v440_v3  ;;  %v446_v13 = vadd.s32 %v440_v3, %v436_v62 }
  0x50   : > { %v467_v25 = vsel %vm466_vm6, 1, %v13346_v24  ;;  %v445_v27 = vsel %vm444_vm7, 1, %v13346_v24  ;;  %v561_v49 = vshrl.u32 %v13342_v12, %v6644_v18  ;;  %v463_v50 = vshrl.u32 %v459_v55, 16 }
  0x51   : > { %vm470_vm8 = vc.u32 %v6641_v7, %v464_v6  ;;  %vm448_vm9 = vc.u32 %v446_v13, %v442_v8  ;;  %v469_v30 = vadd.s32 %v467_v25, %v461_v15  ;;  %v447_v37 = vadd.s32 %v445_v27, %v439_v22 }
  0x52   : > { %v471_v38 = vsel %vm470_vm8, 1, %v13346_v24  ;;  %v449_v41 = vsel %vm448_vm9, 1, %v13346_v24  ;;  %v565_v52 = vor.u32 %v564_v31, %v563_v29  ;;  %v568_v53 = vor.u32 %v567_v33, %v566_v32 }
  0x53   : > { %v473_v51 = vadd.s32 %v471_v38, %v469_v30  ;;  %v441_v54 = vshrl.u32 %v6630_v57, 16  ;;  %v451_v56 = vadd.s32 %v449_v41, %v447_v37  ;;  %vm572_vm10 = vcmp.lt.s32.totalorder %v6663_v39, 4 }
  0x54   : > { %v465_v58 = vshrl.u32 %v6632_v60, 16  ;;  %v545_v59 = vor.u32 8388608, %v544_v42  ;;  %v695_v61 = vshrl.u32 %v694_v40, 23  ;;  %v6681_v62 = vor.u32 %v555_v44, %v554_v43 }
  0x55   : > { %v6683_v3 = vor.u32 %v558_v47, %v557_v46  ;;  %v6685_v4 = vor.u32 %v561_v49, %v560_v48  ;;  %vm569_vm11 = vcmp.lt.s32.totalorder %v6663_v39, 1  ;;  %v474_v55 = vadd.s32 %v473_v51, %v463_v50 }
  0x56   : > { %vm571_vm12 = vcmp.lt.s32.totalorder %v6663_v39, 3  ;;  %v578_v57 = vsel %vm572_vm10, %v565_v52, 920167782  ;;  %v582_v8 = vsel %vm572_vm10, %v568_v53, 1326507024  ;;  %v399_v13 = vshrl.u32 %v13344_v21, %v6565_v9 }
  0x57   : > { %v443_v15 = vshrl.u32 %v6634_v63, 16  ;;  %v452_v22 = vadd.s32 %v451_v56, %v441_v54  ;;  %v420_v25 = vsel %vm418_vm1, %v6600_v36, 2102212464  ;;  %vm570_vm13 = vcmp.lt.s32.totalorder %v6663_v39, 2 }
  0x58   : > { %v577_v27 = vsel %vm569_vm11, %v6681_v62, %v6683_v3  ;;  %v579_v29 = vsel %vm571_vm12, %v6685_v4, %v578_v57  ;;  %v581_v9 = vsel %vm569_vm11, %v6683_v3, %v6685_v4  ;;  %v583_v63 = vsel %vm571_vm12, %v565_v52, %v582_v8 }
  0x59   : > { %v475_v36 = vadd.s32 %v474_v55, %v465_v58  ;;  %v6713_v30 = vshll.u32 %v545_v59, 8  ;;  %v5979_v31 = vadd.s32 4294967169, %v695_v61  ;;  %v419_v32 = vsel %vm415_vm2, %v399_v13, %v6596_v34 }
  0x5a   : > { %v421_v33 = vsel %vm417_vm3, %v6598_v35, %v420_v25  ;;  %v6721_v37 = vadd.s32 %v452_v22, %v443_v15  ;;  %v6726_v38 = vadd.s32 %v6641_v7, %v464_v6  ;;  %v580_v40 = vsel %vm570_vm13, %v577_v27, %v579_v29  ;;  %v304_v25 = vld [vmem:[%s6549_s0 + $0x18] sm:$0xff] }
  0x5b   : > { %v584_v41 = vsel %vm570_vm13, %v581_v9, %v583_v63  ;;  %v422_v34 = vsel %vm416_vm4, %v419_v32, %v421_v33  ;;  %v479_v42 = vadd.s32 1, %v475_v36  ;;  %v701_v43 = vadd.s32 1, %v5979_v31 }
  0x5c   : > { %vm478_vm14 = vc.u32 %v6721_v37, %v6726_v38  ;;  %v586_v35 = vand.u32 65535, %v6713_v30  ;;  %v589_v60 = vshrl.u32 %v584_v41, 16  ;;  %v611_v44 = vshrl.u32 %v580_v40, 16 }
  0x5d   : > { %v476_v6 = vmul.u32 %v6622_v45, %v422_v34  ;;  %v480_v7 = vsel %vm478_vm14, %v479_v42, %v475_v36  ;;  %v587_v46 = vshrl.u32 %v6713_v30, 16  ;;  %v610_v47 = vand.u32 65535, %v580_v40 }
  0x5e   : > { %v588_v48 = vand.u32 65535, %v584_v41  ;;  %v6739_v49 = vmul.u32 %v589_v60, %v586_v35  ;;  %v6741_v17 = vmul.u32 %v611_v44, %v586_v35  ;;  %vm702_vm15 = vcmp.gt.s32.totalorder %v701_v43, 0 }
  0x5f   : > { %v481_v50 = vadd.s32 %v480_v7, %v476_v6  ;;  %v612_v51 = vmul.u32 %v610_v47, %v586_v35  ;;  %v6743_v52 = vmul.u32 %v610_v47, %v587_v46  ;;  %v703_v53 = vsel %vm702_vm15, %v701_v43, 0 }
  0x60   : > { %v590_v54 = vmul.u32 %v588_v48, %v586_v35  ;;  %v6745_v56 = vmul.u32 %v588_v48, %v587_v46  ;;  %v594_v45 = vshll.u32 %v6739_v49, 16  ;;  %v616_v58 = vshll.u32 %v6741_v17, 16  ;;  %v6797_v48 = vld [vmem:[%s6549_s0 + $0x20] sm:$0xff] }
  0x61   : > { %v482_v59 = vadd.s32 536870912, %v481_v50  ;;  %v705_v61 = vand.u32 31, %v703_v53  ;;  %v6749_v55 = vstv %s293_s25  ;;  %v618_v13 = vshll.u32 %v6743_v52, 16  ;;  %s5810_s25 = scalar_lea.sflag [#allocation4], %s6543_s23 }
  0x62   : > { %v596_v57 = vshll.u32 %v6745_v56, 16  ;;  %v600_v8 = vadd.s32 %v594_v45, %v590_v54  ;;  %v6753_v15 = vadd.s32 %v616_v58, %v612_v51  ;;  %vm598_vm0 = vc.u32 %v590_v54, %v594_v45 }
  0x63   : > { %vm620_vm1 = vc.u32 %v612_v51, %v616_v58  ;;  %v13331_v22 = vand.u32 2147483647, %v6648_v20  ;;  %v6757_v27 = vshrl.u32 %v482_v59, 30  ;;  %v6759_v29 = vsub.s32 32, %v705_v61  ;;  %v6800_v51 = vld [vmem:[%s6549_s0 + $0x28] sm:$0xff] }
  0x64   : > { %v6763_v9 = vmul.f32 %v6749_v55, %v6556_v0  ;;  %v593_v63 = vmul.u32 %v589_v60, %v587_v46  ;;  %v615_v36 = vmul.u32 %v611_v44, %v587_v46  ;;  %v599_v31 = vsel %vm598_vm0, 1, %v13346_v24 }
  0x65   : > { %13562 = vst [vmem:[#allocation15_spill] sm:$0xff] %v6757_v27  ;;  %vm602_vm2 = vc.u32 %v600_v8, %v596_v57  ;;  %v621_v32 = vsel %vm620_vm1, 1, %v13346_v24  ;;  %vm624_vm3 = vc.u32 %v6753_v15, %v618_v13  ;;  %v6772_v33 = vmul.f32 %v6749_v55, %v6568_v10 }
  0x66   : > { %v6776_v0 = vmul.f32 %v6749_v55, %v6638_v5  ;;  %v6779_v40 = vmul.f32 %v6558_v1, %v304_v25  ;;  %v698_v41 = vand.u32 8388607, %v13331_v22  ;;  %v484_v34 = vshll.u32 %v6757_v27, 30 }
  0x67   : > { %v6784_v42 = vshrl.u32 %v703_v53, 5  ;;  %v717_v43 = vshll.u32 %v13342_v12, %v705_v61  ;;  %v718_v10 = vshrl.u32 %v13340_v14, %v6759_v29  ;;  %v601_v35 = vadd.s32 %v599_v31, %v593_v63 }
  0x68   : > { %13563 = vst [vmem:[#allocation16_spill] sm:$0xff] %v6779_v40  ;;  %v603_v5 = vsel %vm602_vm2, 1, %v13346_v24  ;;  %v623_v60 = vadd.s32 %v621_v32, %v615_v36  ;;  %v625_v44 = vsel %vm624_vm3, 1, %v13346_v24  ;;  %v708_v6 = vshll.u32 %v13344_v21, %v705_v61 }
  0x69   : > { %v711_v7 = vshll.u32 %v13336_v23, %v705_v61  ;;  %v720_v46 = vshll.u32 %v13340_v14, %v705_v61  ;;  %v721_v47 = vshrl.u32 %v13338_v19, %v6759_v29  ;;  %v709_v53 = vshrl.u32 %v13336_v23, %v6759_v29 }
  0x6a   : > { %v712_v54 = vshrl.u32 %v13334_v26, %v6759_v29  ;;  %v714_v45 = vshll.u32 %v13334_v26, %v705_v61  ;;  %v715_v58 = vshrl.u32 %v13342_v12, %v6759_v29  ;;  %v6810_v59 = vmul.f32 %v6749_v55, %v304_v25 }
  0x6b   : > { %v6814_v57 = vmul.f32 %v6749_v55, %v6797_v48  ;;  %v6818_v8 = vmul.f32 %v6749_v55, %v6800_v51  ;;  %v719_v63 = vor.u32 %v718_v10, %v717_v43  ;;  %v6820_v36 = vsub.s32 %v481_v50, %v484_v34 }
  0x6c   : > { %v617_v31 = vshrl.u32 %v6741_v17, 16  ;;  %v627_v61 = vadd.s32 %v625_v44, %v623_v60  ;;  %vm726_vm4 = vcmp.lt.s32.totalorder %v6784_v42, 4  ;;  %v595_v32 = vshrl.u32 %v6739_v49, 16  ;;  %v6848_v60 = vld [vmem:[%s6549_s0 + $0x30] sm:$0xff]  ;;  %v6851_v44 = vld [vmem:[%s6549_s0 + $0x38] sm:$0xff] }
  0x6d   : > { %v605_v25 = vadd.s32 %v603_v5, %v601_v35  ;;  %v699_v22 = vor.u32 8388608, %v698_v41  ;;  %v722_v28 = vor.u32 %v721_v47, %v720_v46  ;;  %v6825_v16 = vor.u32 %v709_v53, %v708_v6 }
  0x6e   : > { %v6827_v26 = vor.u32 %v712_v54, %v711_v7  ;;  %v6829_v23 = vor.u32 %v715_v58, %v714_v45  ;;  %v848_v50 = vand.u32 2139095040, %v6779_v40  ;;  %v553_v17 = vshrl.u32 %v13344_v21, %v6644_v18 }
  0x6f   : > { %vm723_vm5 = vcmp.lt.s32.totalorder %v6784_v42, 1  ;;  %vm725_vm6 = vcmp.lt.s32.totalorder %v6784_v42, 3  ;;  %v732_v49 = vsel %vm726_vm4, %v719_v63, 920167782  ;;  %v487_v41 = vsub.s32 0, %v6820_v36 }
  0x70   : > { %v574_v34 = vsel %vm572_vm10, %v6685_v4, 2102212464  ;;  %v619_v43 = vshrl.u32 %v6743_v52, 16  ;;  %v628_v10 = vadd.s32 %v627_v61, %v617_v31  ;;  %vm486_vm7 = vcmp.lt.s32.totalorder %v6820_v36, 0  ;;  %v6878_v31 = vld [vmem:[%s6549_s0 + $0x40] sm:$0xff]  ;;  %v6881_v61 = vld [vmem:[%s6549_s0 + $0x48] sm:$0xff] }
  0x71   : > { %v597_v18 = vshrl.u32 %v6745_v56, 16  ;;  %v606_v35 = vadd.s32 %v605_v25, %v595_v32  ;;  %v736_v5 = vsel %vm726_vm4, %v722_v28, 1326507024  ;;  %vm724_vm8 = vcmp.lt.s32.totalorder %v6784_v42, 2  ;;  %v6884_v32 = vld [vmem:[%s6549_s0 + $0x50] sm:$0xff] }
  0x72   : > { %v731_v4 = vsel %vm723_vm5, %v6825_v16, %v6827_v26  ;;  %v733_v56 = vsel %vm725_vm6, %v6829_v23, %v732_v49  ;;  %v849_v6 = vshrl.u32 %v848_v50, 23  ;;  %v324_v28 = vmul.f32 %v6749_v55, %v6848_v60  ;;  %v6901_v50 = vld [vmem:[%s6549_s0 + $0x58] sm:$0xff] }
  0x73   : > { %v325_v7 = vmul.f32 %v6749_v55, %v6851_v44  ;;  %v573_v46 = vsel %vm569_vm11, %v553_v17, %v6681_v62  ;;  %v6868_v47 = vshll.u32 %v699_v22, 8  ;;  %v488_v53 = vsel %vm486_vm7, %v487_v41, %v6820_v36  ;;  %v6904_v17 = vld [vmem:[%s6549_s0 + $0x60] sm:$0xff] }
  0x74   : > { %v629_v54 = vadd.s32 %v628_v10, %v619_v43  ;;  %v735_v45 = vsel %vm723_vm5, %v6827_v26, %v6829_v23  ;;  %v737_v58 = vsel %vm725_vm6, %v719_v63, %v736_v5  ;;  %v575_v62 = vsel %vm571_vm12, %v6683_v3, %v574_v34  ;;  %v6921_v10 = vld [vmem:[%s6549_s0 + $0x68] sm:$0xff] }
  0x75   : > { %v6889_v22 = vadd.s32 %v606_v35, %v597_v18  ;;  %v6894_v25 = vadd.s32 %v6753_v15, %v618_v13  ;;  %v6898_v63 = vsel %vm724_vm8, %v731_v4, %v733_v56  ;;  %v326_v49 = vmul.f32 %v6749_v55, %v6878_v31  ;;  %13566 = vst [vmem:[#allocation19_spill] sm:$0xff] %v6921_v10  ;;  %v6924_v18 = vld [vmem:[%s6549_s0 + $0x70] sm:$0xff] }
  0x76   : > { %v327_v3 = vmul.f32 %v6749_v55, %v6881_v61  ;;  %v328_v52 = vmul.f32 %v6749_v55, %v6884_v32  ;;  %v5982_v13 = vadd.s32 4294967169, %v849_v6  ;;  %v329_v15 = vmul.f32 %v6749_v55, %v6901_v50  ;;  %13567 = vst [vmem:[#allocation20_spill] sm:$0xff] %v6924_v18  ;;  %v6931_v6 = vld [vmem:[%s6549_s0 + $0x78] sm:$0xff] }
  0x77   : > { %13564 = vst [vmem:[#allocation17_spill] sm:$0xff] %v6889_v22  ;;  %v330_v41 = vmul.f32 %v6749_v55, %v6904_v17  ;;  %v489_v34 = vclz %v488_v53  ;;  %v6918_v43 = vsel %vm724_vm8, %v735_v45, %v737_v58  ;;  %v576_v35 = vsel %vm570_vm13, %v573_v46, %v575_v62 }
  0x78   : > { %13565 = vst [vmem:[#allocation18_spill] sm:$0xff] %v6894_v25  ;;  %v633_v5 = vadd.s32 1, %v629_v54  ;;  %v740_v4 = vand.u32 65535, %v6868_v47  ;;  %v765_v56 = vshrl.u32 %v6898_v63, 16  ;;  %v331_v53 = vmul.f32 %v6749_v55, %v6921_v10 }
  0x79   : > { %13568 = vst [vmem:[#allocation21_spill] sm:$0xff] %v6931_v6  ;;  %v332_v45 = vmul.f32 %v6749_v55, %v6924_v18  ;;  %v334_v58 = vmul.f32 1.442695, %v6763_v9  ;;  %vm632_vm9 = vc.u32 %v6889_v22, %v6894_v25  ;;  %v6942_v39 = vmul.f32 %v6749_v55, %v6931_v6 }
  0x7a   : > { %v336_v46 = vmul.f32 1.442695, %v6772_v33  ;;  %v855_v19 = vadd.s32 1, %v5982_v13  ;;  %v338_v14 = vmul.f32 1.442695, %v6776_v0  ;;  %v5974_v21 = vadd.s32 4294967294, %v489_v34 }
  0x7b   : > { %v340_v12 = vmul.f32 1.442695, %v6810_v59  ;;  %v630_v24 = vmul.u32 %v6713_v30, %v576_v35  ;;  %v634_v9 = vsel %vm632_vm9, %v633_v5, %v629_v54  ;;  %v741_v20 = vshrl.u32 %v6868_v47, 16 }
  0x7c   : > { %v764_v11 = vand.u32 65535, %v6898_v63  ;;  %v6951_v27 = vmul.u32 %v765_v56, %v740_v4  ;;  %6163 = vpow2.f32 %v334_v58  ;;  %v342_v55 = vmul.f32 1.442695, %v6814_v57 }
  0x7d   : > { %v344_v33 = vmul.f32 1.442695, %v6818_v8  ;;  %v346_v13 = vmul.f32 1.442695, %v324_v28  ;;  %v348_v62 = vmul.f32 1.442695, %v325_v7  ;;  %6165 = vpow2.f32 %v336_v46 }
  0x7e   : > { %v742_v0 = vand.u32 65535, %v6918_v43  ;;  %v13569_v59 = vshrl.u32 %v6918_v43, 16  ;;  %vm856_vm10 = vcmp.gt.s32.totalorder %v855_v19, 0  ;;  %v6960_v30 = vmul.f32 1.442695, %v326_v49 }
  0x7f   : > { %v6962_v54 = vmul.f32 1.442695, %v327_v3  ;;  %v6964_v63 = vadd.s32 %v634_v9, %v630_v24  ;;  %vm5975_vm11 = vcmp.lt.s32.totalorder %v5974_v21, 0  ;;  %v766_v57 = vmul.u32 %v764_v11, %v740_v4 }
  0x80   : > { %v6958_v34 = vmul.u32 %v13569_v59, %v740_v4  ;;  %v6966_v35 = vmul.u32 %v764_v11, %v741_v20  ;;  %v770_v8 = vshll.u32 %v6951_v27, 16  ;;  %6167 = vpow2.f32 %v338_v14 }
  0x81   : > { %v6969_v28 = vmul.f32 1.442695, %v328_v52  ;;  %v6971_v7 = vmul.f32 1.442695, %v329_v15  ;;  %v857_v5 = vsel %vm856_vm10, %v855_v19, 0  ;;  %6169 = vpow2.f32 %v340_v12 }
  0x82   : > { %v744_v58 = vmul.u32 %v742_v0, %v740_v4  ;;  %v6973_v49 = vmul.u32 %v742_v0, %v741_v20  ;;  %v748_v3 = vshll.u32 %v6958_v34, 16  ;;  %v6976_v24 = vpop.eup %6163  ;;  %6171 = vpow2.f32 %v342_v55 }
  0x83   : > { %13570 = vst [vmem:[#allocation22_spill] sm:$0xff] %v6976_v24  ;;  %v6978_v46 = vmul.f32 1.442695, %v330_v41  ;;  %v6980_v11 = vsel %vm5975_vm11, 0, %v5974_v21  ;;  %v636_v14 = vadd.s32 536870912, %v6964_v63  ;;  %vm6984_vm12 = vc.u32 %v766_v57, %v770_v8  ;;  %v6990_v4 = vpop.eup %6165 }
  0x84   : > { %v6988_v12 = vadd.s32 %v770_v8, %v766_v57  ;;  %v859_v19 = vand.u32 31, %v857_v5  ;;  %13573 = vst [vmem:[#allocation23_spill] sm:$0xff] %v6990_v4  ;;  %6173 = vpow2.f32 %v344_v33  ;;  %v6992_v9 = vmul.f32 1.442695, %v331_v53 }
  0x85   : > { %v6994_v41 = vmul.f32 1.442695, %v332_v45  ;;  %v6998_v21 = vmul.f32 %v6558_v1, %v6797_v48  ;;  %6175 = vpow2.f32 %v346_v13  ;;  %v750_v55 = vshll.u32 %v6973_v49, 16 }
  0x86   : > { %v754_v0 = vadd.s32 %v748_v3, %v744_v58  ;;  %v769_v59 = vmul.u32 %v765_v56, %v741_v20  ;;  %v7001_v52 = vpop.eup %6167  ;;  %v497_v57 = vsub.s32 4294967266, %v6980_v11  ;;  %v7004_v8 = vshrl.u32 %v636_v14, 30 }
  0x87   : > { %13574 = vst [vmem:[#allocation24_spill] sm:$0xff] %v6994_v41  ;;  %vm752_vm13 = vc.u32 %v744_v58, %v748_v3  ;;  %v13578_v53 = vmov 0   ;;  %v7009_v33 = vpop.eup %6169  ;;  %6177 = vpow2.f32 %v348_v62  ;;  %v477_v48 = vadd.s32 %v6726_v38, %v6721_v37 }
  0x88   : > { %13575 = vst [vmem:[#allocation25_spill] sm:$0xff] %v6998_v21  ;;  %v775_v45 = vsel %vm6984_vm12, 1, %v13578_v53  ;;  %v13580_v13 = vshll.u32 %v6966_v35, 16  ;;  %v7016_v56 = vsub.s32 32, %v859_v19  ;;  %v493_v58 = vsub.s32 32, %v6980_v11 }
  0x89   : > { %13576 = vst [vmem:[#allocation26_spill] sm:$0xff] %v7001_v52  ;;  %v7018_v52 = vpop.eup %6171  ;;  %v494_v3 = vshll.u32 %v6820_v36, %v6980_v11  ;;  %v13582_v14 = vmov 683565275   ;;  %v13583_v62 = vshrl.u32 %v6918_v43, 16  ;;  %v753_v37 = vsel %vm752_vm13, 1, %v13578_v53 }
  0x8a   : > { %13577 = vst [vmem:[#allocation27_spill] sm:$0xff] %v7004_v8  ;;  %vm778_vm14 = vc.u32 %v6988_v12, %v13580_v13  ;;  %v707_v15 = vshrl.u32 %v13582_v14, %v6759_v29  ;;  %vm756_vm15 = vc.u32 %v754_v0, %v750_v55  ;;  %v777_v38 = vadd.s32 %v775_v45, %v769_v59  ;;  %v7029_v4 = vpop.eup %6173 }
  0x8b   : > { %13579 = vst [vmem:[#allocation28_spill] sm:$0xff] %v7009_v33  ;;  %v747_v33 = vmul.u32 %v13583_v62, %v741_v20  ;;  %v1002_v13 = vand.u32 2139095040, %v6998_v21  ;;  %v638_v24 = vshll.u32 %v7004_v8, 30  ;;  %v771_v25 = vshrl.u32 %v6951_v27, 16  ;;  %v7034_v11 = vpop.eup %6175 }
  0x8c   : > { %13581 = vst [vmem:[#allocation29_spill] sm:$0xff] %v7018_v52  ;;  %v498_v52 = vadd.s32 127, %v497_v57  ;;  %v779_v36 = vsel %vm778_vm14, 1, %v13578_v53  ;;  %v13586_v29 = vmov 2102212464   ;;  %v757_v57 = vsel %vm756_vm15, 1, %v13578_v53 }
  0x8d   : > { %13584 = vst [vmem:[#allocation30_spill] sm:$0xff] %v7029_v4  ;;  %v871_v43 = vshll.u32 %v13586_v29, %v859_v19  ;;  %v13587_v20 = vmov 920167782   ;;  %v13588_v0 = vmov 1326507024   ;;  %v755_v45 = vadd.s32 %v753_v37, %v747_v33  ;;  %v7046_v8 = vpop.eup %6177 }
  0x8e   : > { %13585 = vst [vmem:[#allocation31_spill] sm:$0xff] %v7034_v11  ;;  %v872_v62 = vshrl.u32 %v13587_v20, %v7016_v56  ;;  %v874_v55 = vshll.u32 %v13587_v20, %v859_v19  ;;  %v875_v59 = vshrl.u32 %v13588_v0, %v7016_v56  ;;  %v7044_v27 = vshrl.u32 %v857_v5, 5 }
  0x8f   : > { %13589 = vst [vmem:[#allocation32_spill] sm:$0xff] %v7046_v8  ;;  %v781_v11 = vadd.s32 %v779_v36, %v777_v38  ;;  %v862_v22 = vshll.u32 %v13582_v14, %v859_v19  ;;  %v13590_v6 = vmov 2475754826   ;;  %v1003_v10 = vshrl.u32 %v1002_v13, 23 }
  0x90   : > { %v865_v18 = vshll.u32 %v13590_v6, %v859_v19  ;;  %v863_v20 = vshrl.u32 %v13590_v6, %v7016_v56  ;;  %v13591_v0 = vmov 2131351028   ;;  %v869_v5 = vshrl.u32 %v13586_v29, %v7016_v56 }
  0x91   : > { %v866_v33 = vshrl.u32 %v13591_v0, %v7016_v56  ;;  %v868_v37 = vshll.u32 %v13591_v0, %v859_v19  ;;  %v495_v4 = vshrl.u32 %v477_v48, %v493_v58  ;;  %v7058_v8 = vsub.s32 %v6964_v63, %v638_v24 }
  0x92   : > { %v873_v38 = vor.u32 %v872_v62, %v871_v43  ;;  %v876_v36 = vor.u32 %v875_v59, %v874_v55  ;;  %v749_v14 = vshrl.u32 %v6958_v34, 16  ;;  %v759_v13 = vadd.s32 %v757_v57, %v755_v45 }
  0x93   : > { %v13592_v53 = vand.u32 2147483647, %v6779_v40  ;;  %vm880_vm0 = vcmp.lt.s32.totalorder %v7044_v27, 4  ;;  %v499_v41 = vshll.u32 %v498_v52, 23  ;;  %v728_v19 = vsel %vm726_vm4, %v6829_v23, 2102212464 }
  0x94   : > { %v773_v48 = vshrl.u32 %v6966_v35, 16  ;;  %v782_v58 = vadd.s32 %v781_v11, %v771_v25  ;;  %v7068_v63 = vor.u32 %v863_v20, %v862_v22  ;;  %v7070_v24 = vor.u32 %v866_v33, %v865_v18 }
  0x95   : > { %v852_v6 = vand.u32 8388607, %v13592_v53  ;;  %v7072_v43 = vor.u32 %v869_v5, %v868_v37  ;;  %v5985_v34 = vadd.s32 4294967169, %v1003_v10  ;;  %vm877_vm1 = vcmp.lt.s32.totalorder %v7044_v27, 1 }
  0x96   : > { %vm879_vm2 = vcmp.lt.s32.totalorder %v7044_v27, 3  ;;  %v886_v52 = vsel %vm880_vm0, %v873_v38, 920167782  ;;  %v890_v23 = vsel %vm880_vm0, %v876_v36, 1326507024  ;;  %v641_v53 = vsub.s32 0, %v7058_v8 }
  0x97   : > { %v751_v22 = vshrl.u32 %v6973_v49, 16  ;;  %v760_v25 = vadd.s32 %v759_v13, %v749_v14  ;;  %v853_v18 = vor.u32 8388608, %v852_v6  ;;  %v496_v11 = vor.u32 %v495_v4, %v494_v3 }
  0x98   : > { %v500_v20 = vor.u32 4788187, %v499_v41  ;;  %vm640_vm3 = vcmp.lt.s32.totalorder %v7058_v8, 0  ;;  %vm878_vm4 = vcmp.lt.s32.totalorder %v7044_v27, 2  ;;  %v885_v10 = vsel %vm877_vm1, %v7068_v63, %v7070_v24 }
  0x99   : > { %v887_v62 = vsel %vm879_vm2, %v7072_v43, %v886_v52  ;;  %v889_v6 = vsel %vm877_vm1, %v7070_v24, %v7072_v43  ;;  %v891_v49 = vsel %vm879_vm2, %v873_v38, %v890_v23  ;;  %v727_v4 = vsel %vm723_vm5, %v707_v15, %v6825_v16 }
  0x9a   : > { %v729_v41 = vsel %vm725_vm6, %v6827_v26, %v728_v19  ;;  %v783_v3 = vadd.s32 %v782_v58, %v773_v48  ;;  %v1009_v14 = vadd.s32 1, %v5985_v34  ;;  %v642_v55 = vsel %vm640_vm3, %v641_v53, %v7058_v8 }
  0x9b   : > { %v7104_v59 = vadd.s32 %v760_v25, %v751_v22  ;;  %v13593_v45 = vshll.u32 %v6966_v35, 16  ;;  %v7111_v33 = vshll.u32 %v853_v18, 8  ;;  %6179 = vpow2.f32 %v6960_v30 }
  0x9c   : > { %v364_v16 = vmul.f32 1.442695, %v6942_v39  ;;  %v7117_v26 = vsel %vm878_vm4, %v885_v10, %v887_v62  ;;  %v7121_v15 = vsel %vm878_vm4, %v889_v6, %v891_v49  ;;  %6181 = vpow2.f32 %v6962_v54  ;;  %v13606_v49 = vld [vmem:[#allocation24_spill] sm:$0xff] }
  0x9d   : > { %v7109_v57 = vadd.s32 %v6988_v12, %v13593_v45  ;;  %v7126_v35 = vmul.f32 %v6558_v1, %v6800_v51  ;;  %v501_v12 = vand.u32 2147483647, %v500_v20  ;;  %v503_v37 = vcvt.s32.f32 %v496_v11 }
  0x9e   : > { %v643_v5 = vclz %v642_v55  ;;  %v730_v39 = vsel %vm724_vm8, %v727_v4, %v729_v41  ;;  %v787_v30 = vadd.s32 1, %v783_v3  ;;  %vm1010_vm5 = vcmp.gt.s32.totalorder %v1009_v14, 0  ;;  %v13607_v4 = vld [vmem:[#allocation19_spill] sm:$0xff]  ;;  %v13609_v55 = vld [vmem:[#allocation20_spill] sm:$0xff] }
  0x9f   : > { %13594 = vst [vmem:[#allocation33_spill] sm:$0xff] %v7126_v35  ;;  %vm786_vm6 = vc.u32 %v7104_v59, %v7109_v57  ;;  %v894_v38 = vand.u32 65535, %v7111_v33  ;;  %v13367_v36 = vshrl.u32 %v7121_v15, 16  ;;  %v13366_v54 = vshrl.u32 %v7117_v26, 16 }
  0xa0   : > { %6183 = vpow2.f32 %v6969_v28  ;;  %v7138_v51 = vmul.f32 %v6558_v1, %v6848_v60  ;;  %v7142_v42 = vmul.f32 %v6558_v1, %v6851_v44  ;;  %v7146_v13 = vmul.f32 %v6558_v1, %v6878_v31 }
  0xa1   : > { %6185 = vpow2.f32 %v6971_v7  ;;  %v7151_v19 = vmul.f32 %v6558_v1, %v6881_v61  ;;  %v504_v48 = vmul.f32 %v503_v37, %v501_v12  ;;  %v1011_v28 = vsel %vm1010_vm5, %v1009_v14, 0  ;;  %v7153_v58 = vpop.eup %6179  ;;  %v13611_v12 = vld [vmem:[#allocation21_spill] sm:$0xff] }
  0xa2   : > { %13595 = vst [vmem:[#allocation34_spill] sm:$0xff] %v7138_v51  ;;  %v5977_v60 = vadd.s32 4294967294, %v643_v5  ;;  %v784_v34 = vmul.u32 %v6868_v47, %v730_v39  ;;  %v788_v52 = vsel %vm786_vm6, %v787_v30, %v783_v3  ;;  %v918_v44 = vand.u32 65535, %v7117_v26  ;;  %v7157_v23 = vpop.eup %6181  ;;  %v13613_v5 = vld [vmem:[#allocation17_spill] sm:$0xff]  ;;  %v13614_v39 = vld [vmem:[#allocation18_spill] sm:$0xff] }
  0xa3   : > { %13596 = vst [vmem:[#allocation35_spill] sm:$0xff] %v7142_v42  ;;  %v895_v31 = vshrl.u32 %v7111_v33, 16  ;;  %v896_v7 = vand.u32 65535, %v7121_v15  ;;  %v7163_v61 = vmul.u32 %v13367_v36, %v894_v38  ;;  %v7167_v53 = vmul.u32 %v13366_v54, %v894_v38 }
  0xa4   : > { %13597 = vst [vmem:[#allocation36_spill] sm:$0xff] %v7146_v13  ;;  %6187 = vpow2.f32 %v6978_v46  ;;  %v7172_v47 = vmul.f32 %v6558_v1, %v6884_v32  ;;  %v7176_v22 = vmul.f32 %v6558_v1, %v6901_v50  ;;  %v1013_v25 = vand.u32 31, %v1011_v28 }
  0xa5   : > { %13598 = vst [vmem:[#allocation37_spill] sm:$0xff] %v7151_v19  ;;  %6189 = vpow2.f32 %v6992_v9  ;;  %v7181_v18 = vmul.f32 %v6558_v1, %v6904_v17  ;;  %vm385_vm7 = vcmp.lt.s32.totalorder %v6562_v2, 0  ;;  %v505_v11 = vxor.u32 2147483648, %v504_v48 }
  0xa6   : > { %13599 = vst [vmem:[#allocation38_spill] sm:$0xff] %v7153_v58  ;;  %v7184_v20 = vpop.eup %6183  ;;  %vm5978_vm8 = vcmp.lt.s32.totalorder %v5977_v60, 0  ;;  %v7186_v46 = vadd.s32 %v788_v52, %v784_v34  ;;  %v920_v32 = vmul.u32 %v918_v44, %v894_v38  ;;  %v13365_v10 = vand.u32 2147483647, %v6998_v21 }
  0xa7   : > { %13600 = vst [vmem:[#allocation39_spill] sm:$0xff] %v7157_v23  ;;  %v7189_v50 = vpop.eup %6185  ;;  %v898_v62 = vmul.u32 %v896_v7, %v894_v38  ;;  %v902_v9 = vshll.u32 %v7163_v61, 16  ;;  %v7192_v6 = vmul.u32 %v918_v44, %v895_v31  ;;  %v924_v17 = vshll.u32 %v7167_v53, 16 }
  0xa8   : > { %13601 = vst [vmem:[#allocation40_spill] sm:$0xff] %v7172_v47  ;;  %6191 = vpow2.f32 %v13606_v49  ;;  %v7198_v41 = vmul.f32 %v6558_v1, %v13607_v4  ;;  %v7200_v3 = vmul.u32 %v896_v7, %v895_v31  ;;  %v7202_v14 = vsub.s32 32, %v1013_v25 }
  0xa9   : > { %13602 = vst [vmem:[#allocation41_spill] sm:$0xff] %v7176_v22  ;;  %6193 = vpow2.f32 %v364_v16  ;;  %v7206_v45 = vmul.f32 %v6558_v1, %v13609_v55  ;;  %v7210_v37 = vmul.f32 %v6558_v1, %v13611_v12  ;;  %v7214_v30 = vadd.s32 %v13614_v39, %v13613_v5 }
  0xaa   : > { %13603 = vst [vmem:[#allocation42_spill] sm:$0xff] %v7181_v18  ;;  %v7216_v38 = vpop.eup %6187  ;;  %v13616_v34 = vand.u32 2147483647, %v6562_v2  ;;  %v506_v16 = vsel %vm385_vm7, %v505_v11, %v504_v48  ;;  %v7227_v44 = vsel %vm5978_vm8, 0, %v5977_v60  ;;  %v790_v1 = vadd.s32 536870912, %v7186_v46 }
  0xab   : > { %13604 = vst [vmem:[#allocation43_spill] sm:$0xff] %v7184_v20  ;;  %v1006_v7 = vand.u32 8388607, %v13365_v10  ;;  %v7232_v49 = vpop.eup %6189  ;;  %vm906_vm10 = vc.u32 %v898_v62, %v902_v9  ;;  %vm928_vm11 = vc.u32 %v920_v32, %v924_v17  ;;  %v7235_v55 = vshrl.u32 %v1011_v28, 5 }
  0xac   : > { %13605 = vst [vmem:[#allocation44_spill] sm:$0xff] %v7189_v50  ;;  %vm7220_vm9 = vcmp.le.f32.partialorder %v13616_v34, 0.7853982  ;;  %v904_v12 = vshll.u32 %v7200_v3, 16  ;;  %v7238_v5 = vadd.s32 %v924_v17, %v920_v32  ;;  %v13620_v48 = vmov 920167782  }
  0xad   : > { %13608 = vst [vmem:[#allocation24_spill] sm:$0xff] %v7198_v41  ;;  %v1028_v60 = vshll.u32 %v13620_v48, %v1013_v25  ;;  %v13621_v11 = vmov 1326507024   ;;  %v908_v34 = vadd.s32 %v902_v9, %v898_v62  ;;  %v1025_v10 = vshll.u32 %v13586_v29, %v1013_v25 }
  0xae   : > { %13610 = vst [vmem:[#allocation19_spill] sm:$0xff] %v7206_v45  ;;  %v1029_v39 = vshrl.u32 %v13621_v11, %v7202_v14  ;;  %v1026_v54 = vshrl.u32 %v13620_v48, %v7202_v14  ;;  %v1156_v4 = vand.u32 2139095040, %v7126_v35  ;;  %v7247_v36 = vpop.eup %6191  ;;  %v13623_v28 = vshrl.u32 %v7121_v15, 16 }
  0xaf   : > { %13612 = vst [vmem:[#allocation20_spill] sm:$0xff] %v7210_v37  ;;  %v13624_v32 = vmov 0   ;;  %v7255_v62 = vpop.eup %6193  ;;  %v13627_v9 = vmov 2475754826   ;;  %v1020_v58 = vshrl.u32 %v13591_v0, %v7202_v14  ;;  %v1022_v37 = vshll.u32 %v13591_v0, %v1013_v25 }
  0xb0   : > { %13615 = vst [vmem:[#allocation21_spill] sm:$0xff] %v7216_v38  ;;  %v907_v17 = vsel %vm906_vm10, 1, %v13624_v32  ;;  %v13625_v38 = vshrl.u32 %v7117_v26, 16  ;;  %v929_v20 = vsel %vm928_vm11, 1, %v13624_v32  ;;  %v1019_v23 = vshll.u32 %v13627_v9, %v1013_v25 }
  0xb1   : > { %13619 = vst [vmem:[#allocation17_spill] sm:$0xff] %v7232_v49  ;;  %v901_v49 = vmul.u32 %v13623_v28, %v895_v31  ;;  %v1023_v15 = vshrl.u32 %v13586_v29, %v7202_v14  ;;  %v13628_v28 = vshll.u32 %v7192_v6, 16  ;;  %v13629_v26 = vmov 683565275  }
  0xb2   : > { %13622 = vst [vmem:[#allocation18_spill] sm:$0xff] %v7247_v36  ;;  %v923_v50 = vmul.u32 %v13625_v38, %v895_v31  ;;  %v1016_v31 = vshll.u32 %v13629_v26, %v1013_v25  ;;  %v1017_v38 = vshrl.u32 %v13627_v9, %v7202_v14  ;;  %vm910_vm13 = vc.u32 %v908_v34, %v904_v12 }
  0xb3   : > { %13626 = vst [vmem:[#allocation45_spill] sm:$0xff] %v7255_v62  ;;  %vm932_vm12 = vc.u32 %v7238_v5, %v13628_v28  ;;  %v1030_v62 = vor.u32 %v1029_v39, %v1028_v60  ;;  %v1027_v36 = vor.u32 %v1026_v54, %v1025_v10  ;;  %vm1034_vm14 = vcmp.lt.s32.totalorder %v7235_v55, 4 }
  0xb4   : > { %v1157_v45 = vshrl.u32 %v1156_v4, 23  ;;  %v651_v41 = vsub.s32 4294967266, %v7227_v44  ;;  %v7271_v18 = vshrl.u32 %v790_v1, 30  ;;  %v931_v22 = vadd.s32 %v929_v20, %v923_v50 }
  0xb5   : > { %vm1031_vm15 = vcmp.lt.s32.totalorder %v7235_v55, 1  ;;  %v909_v47 = vadd.s32 %v907_v17, %v901_v49  ;;  %v933_v28 = vsel %vm932_vm12, 1, %v13624_v32  ;;  %v7275_v25 = vor.u32 %v1020_v58, %v1019_v23 }
  0xb6   : > { %13630 = vst [vmem:[#allocation46_spill] sm:$0xff] %v7271_v18  ;;  %v7277_v19 = vor.u32 %v1023_v15, %v1022_v37  ;;  %v911_v12 = vsel %vm910_vm13, 1, %v13624_v32  ;;  %v7280_v54 = vor.u32 %v1017_v38, %v1016_v31  ;;  %vm1033_vm3 = vcmp.lt.s32.totalorder %v7235_v55, 3 }
  0xb7   : > { %v1044_v10 = vsel %vm1034_vm14, %v1030_v62, 1326507024  ;;  %v7288_v20 = vsel %vm7220_vm9, %v6562_v2, %v506_v16  ;;  %v1007_v50 = vor.u32 8388608, %v1006_v7  ;;  %v1040_v58 = vsel %vm1034_vm14, %v1027_v36, 920167782 }
  0xb8   : > { %v5988_v23 = vadd.s32 4294967169, %v1157_v45  ;;  %v647_v37 = vsub.s32 32, %v7227_v44  ;;  %v903_v1 = vshrl.u32 %v7163_v61, 16  ;;  %v925_v49 = vshrl.u32 %v7167_v53, 16 }
  0xb9   : > { %v935_v4 = vadd.s32 %v933_v28, %v931_v22  ;;  %v913_v60 = vadd.s32 %v911_v12, %v909_v47  ;;  %vm1032_vm5 = vcmp.lt.s32.totalorder %v7235_v55, 2  ;;  %v1043_v16 = vsel %vm1031_vm15, %v7275_v25, %v7277_v19  ;;  %v13631_v47 = vld [vmem:[#allocation15_spill] sm:$0xff] }
  0xba   : > { %v1045_v7 = vsel %vm1033_vm3, %v1027_v36, %v1044_v10  ;;  %v652_v39 = vadd.s32 127, %v651_v41  ;;  %v792_v45 = vshll.u32 %v7271_v18, 30  ;;  %v1039_v61 = vsel %vm1031_vm15, %v7280_v54, %v7275_v25 }
  0xbb   : > { %v1041_v53 = vsel %vm1033_vm3, %v7277_v19, %v1040_v58  ;;  %v507_v22 = vsub.s32 4, %v13631_v47  ;;  %v7313_v34 = vmul.f32 %v7288_v20, %v7288_v20  ;;  %v7315_v17 = vshll.u32 %v1007_v50, 8 }
  0xbc   : > { %v1163_v36 = vadd.s32 1, %v5988_v23  ;;  %v861_v41 = vshrl.u32 %v13629_v26, %v7016_v56  ;;  %v927_v62 = vshrl.u32 %v7192_v6, 16  ;;  %v936_v15 = vadd.s32 %v935_v4, %v925_v49 }
  0xbd   : > { %v1046_v31 = vsel %vm1032_vm5, %v1043_v16, %v1045_v7  ;;  %v882_v38 = vsel %vm880_vm0, %v7072_v43, 2102212464  ;;  %v905_v28 = vshrl.u32 %v7200_v3, 16  ;;  %v914_v12 = vadd.s32 %v913_v60, %v903_v1 }
  0xbe   : > { %v1042_v10 = vsel %vm1032_vm5, %v1039_v61, %v1041_v53  ;;  %v648_v50 = vshll.u32 %v7058_v8, %v7227_v44  ;;  %v649_v56 = vshrl.u32 %v7214_v30, %v647_v37  ;;  %v653_v58 = vshll.u32 %v652_v39, 23 }
  0xbf   : > { %v7332_v23 = vsub.s32 %v7186_v46, %v792_v45  ;;  %v508_v49 = vsel %vm385_vm7, %v507_v22, %v13631_v47  ;;  %v1048_v43 = vand.u32 65535, %v7315_v17  ;;  %v1051_v3 = vshrl.u32 %v1046_v31, 16 }
  0xc0   : > { %vm1164_vm0 = vcmp.gt.s32.totalorder %v1163_v36, 0  ;;  %v881_v1 = vsel %vm877_vm1, %v861_v41, %v7068_v63  ;;  %v883_v8 = vsel %vm879_vm2, %v7070_v24, %v882_v38  ;;  %v937_v30 = vadd.s32 %v936_v15, %v927_v62  ;;  %v13635_v62 = vld [vmem:[#allocation27_spill] sm:$0xff] }
  0xc1   : > { %v1073_v44 = vshrl.u32 %v1042_v10, 16  ;;  %v512_v46 = vmul.f32 -0.001358992, %v7313_v34  ;;  %v519_v37 = vmul.f32 -0.00019511016, %v7313_v34  ;;  %v7346_v4 = vadd.s32 %v914_v12, %v905_v28 }
  0xc2   : > { %v13633_v60 = vshll.u32 %v7192_v6, 16  ;;  %v650_v7 = vor.u32 %v649_v56, %v648_v50  ;;  %v654_v39 = vor.u32 4788187, %v653_v58  ;;  %vm794_vm1 = vcmp.lt.s32.totalorder %v7332_v23, 0 }
  0xc3   : > { %13632 = vst [vmem:[#allocation15_spill] sm:$0xff] %v7346_v4  ;;  %v1165_v63 = vsel %vm1164_vm0, %v1163_v36, 0  ;;  %v795_v24 = vsub.s32 0, %v7332_v23  ;;  %v884_v45 = vsel %vm878_vm4, %v881_v1, %v883_v8  ;;  %v1050_v61 = vand.u32 65535, %v1046_v31 }
  0xc4   : > { %v7351_v16 = vadd.s32 %v7238_v5, %v13633_v60  ;;  %v7357_v53 = vmul.u32 %v1051_v3, %v1048_v43  ;;  %v941_v47 = vadd.s32 1, %v937_v30  ;;  %v1049_v22 = vshrl.u32 %v7315_v17, 16 }
  0xc5   : > { %v1072_v6 = vand.u32 65535, %v1042_v10  ;;  %v7360_v41 = vmul.u32 %v1073_v44, %v1048_v43  ;;  %v510_v5 = vsel %vm7220_vm9, 0, %v508_v49  ;;  %v661_v15 = vsub.s32 4, %v13635_v62 }
  0xc6   : > { %13634 = vst [vmem:[#allocation47_spill] sm:$0xff] %v7351_v16  ;;  %vm940_vm2 = vc.u32 %v7346_v4, %v7351_v16  ;;  %v1167_v36 = vand.u32 31, %v1165_v63  ;;  %v513_v27 = vadd.f32 0.041655596, %v512_v46  ;;  %v520_v38 = vadd.f32 0.008332121, %v519_v37 }
  0xc7   : > { %v655_v31 = vand.u32 2147483647, %v654_v39  ;;  %v657_v28 = vcvt.s32.f32 %v650_v7  ;;  %v796_v12 = vsel %vm794_vm1, %v795_v24, %v7332_v23  ;;  %v938_v10 = vmul.u32 %v7111_v33, %v884_v45  ;;  %v13636_v46 = vld [vmem:[#allocation13_spill] sm:$0xff] }
  0xc8   : > { %v1052_v50 = vmul.u32 %v1050_v61, %v1048_v43  ;;  %v1056_v52 = vshll.u32 %v7357_v53, 16  ;;  %v942_v56 = vsel %vm940_vm2, %v941_v47, %v937_v30  ;;  %v7372_v58 = vmul.u32 %v1050_v61, %v1049_v22 }
  0xc9   : > { %v1074_v49 = vmul.u32 %v1072_v6, %v1048_v43  ;;  %v1078_v1 = vshll.u32 %v7360_v41, 16  ;;  %v7375_v8 = vand.u32 3, %v510_v5  ;;  %vm539_vm4 = vcmp.lt.s32.totalorder %v13636_v46, 0 }
  0xca   : > { %v7378_v37 = vmul.u32 %v1072_v6, %v1049_v22  ;;  %v7380_v60 = vsub.s32 32, %v1167_v36  ;;  %v514_v7 = vmul.f32 %v513_v27, %v7313_v34  ;;  %v521_v33 = vmul.f32 %v520_v38, %v7313_v34 }
  0xcb   : > { %v7384_v39 = vmul.f32 %v657_v28, %v655_v31  ;;  %v7389_v43 = vsel %vm539_vm4, %v661_v15, %v13635_v62  ;;  %v797_v30 = vclz %v796_v12  ;;  %v7391_v24 = vadd.s32 %v942_v56, %v938_v10 }
  0xcc   : > { %vm1060_vm6 = vc.u32 %v1052_v50, %v1056_v52  ;;  %v1310_v45 = vand.u32 2139095040, %v7138_v51  ;;  %v1055_v61 = vmul.u32 %v1051_v3, %v1049_v22  ;;  %v1058_v47 = vshll.u32 %v7372_v58, 16 }
  0xcd   : > { %v1077_v6 = vmul.u32 %v1073_v44, %v1049_v22  ;;  %vm1082_vm7 = vc.u32 %v1074_v49, %v1078_v1  ;;  %v13386_v5 = vshll.u32 %v7378_v37, 16  ;;  %v7396_v27 = vadd.s32 %v1078_v1, %v1074_v49 }
  0xce   : > { %v1179_v38 = vshll.u32 %v13586_v29, %v1167_v36  ;;  %v1180_v62 = vshrl.u32 %v13620_v48, %v7380_v60  ;;  %v1061_v15 = vsel %vm1060_vm6, 1, %v13624_v32  ;;  %v1062_v31 = vadd.s32 %v1056_v52, %v1052_v50 }
  0xcf   : > { %v7403_v12 = vshrl.u32 %v1165_v63, 5  ;;  %v1083_v3 = vsel %vm1082_vm7, 1, %v13624_v32  ;;  %v1170_v44 = vshll.u32 %v13629_v26, %v1167_v36  ;;  %v1173_v22 = vshll.u32 %v13627_v9, %v1167_v36 }
  0xd0   : > { %v1311_v10 = vshrl.u32 %v1310_v45, 23  ;;  %v1171_v56 = vshrl.u32 %v13627_v9, %v7380_v60  ;;  %v1174_v49 = vshrl.u32 %v13591_v0, %v7380_v60  ;;  %v1176_v1 = vshll.u32 %v13591_v0, %v1167_v36 }
  0xd1   : > { %v1177_v50 = vshrl.u32 %v13586_v29, %v7380_v60  ;;  %v13637_v63 = vand.u32 2147483647, %v13636_v46  ;;  %vm1086_vm9 = vc.u32 %v7396_v27, %v13386_v5  ;;  %v1181_v45 = vor.u32 %v1180_v62, %v1179_v38 }
  0xd2   : > { %v1182_v28 = vshll.u32 %v13620_v48, %v1167_v36  ;;  %v1183_v21 = vshrl.u32 %v13621_v11, %v7380_v60  ;;  %v5980_v2 = vadd.s32 4294967294, %v797_v30  ;;  %v944_v13 = vadd.s32 536870912, %v7391_v24 }
  0xd3   : > { %vm7417_vm8 = vcmp.le.f32.partialorder %v13637_v63, 0.7853982  ;;  %v13640_v40 = vand.u32 2147483647, %v7126_v35  ;;  %vm1188_vm10 = vcmp.lt.s32.totalorder %v7403_v12, 4  ;;  %v1063_v63 = vadd.s32 %v1061_v15, %v1055_v61 }
  0xd4   : > { %vm1064_vm11 = vc.u32 %v1062_v31, %v1058_v47  ;;  %v1085_v16 = vadd.s32 %v1083_v3, %v1077_v6  ;;  %v5991_v4 = vadd.s32 4294967169, %v1311_v10  ;;  %v1087_v5 = vsel %vm1086_vm9, 1, %v13624_v32 }
  0xd5   : > { %v1160_v18 = vand.u32 8388607, %v13640_v40  ;;  %v7432_v38 = vor.u32 %v1171_v56, %v1170_v44  ;;  %v7434_v36 = vor.u32 %v1174_v49, %v1173_v22  ;;  %v7436_v62 = vor.u32 %v1177_v50, %v1176_v1 }
  0xd6   : > { %v1184_v30 = vor.u32 %v1183_v21, %v1182_v28  ;;  %vm1185_vm12 = vcmp.lt.s32.totalorder %v7403_v12, 1  ;;  %vm1187_vm13 = vcmp.lt.s32.totalorder %v7403_v12, 3  ;;  %v1194_v40 = vsel %vm1188_vm10, %v1181_v45, 920167782 }
  0xd7   : > { %v515_v61 = vadd.f32 -0.4999988, %v514_v7  ;;  %v522_v47 = vadd.f32 -0.16666654, %v521_v33  ;;  %v1065_v6 = vsel %vm1064_vm11, 1, %v13624_v32  ;;  %v1161_v15 = vor.u32 8388608, %v1160_v18 }
  0xd8   : > { %vm5981_vm0 = vcmp.lt.s32.totalorder %v5980_v2, 0  ;;  %v7443_v31 = vshrl.u32 %v944_v13, 30  ;;  %v1079_v3 = vshrl.u32 %v7360_v41, 16  ;;  %v1317_v44 = vadd.s32 1, %v5991_v4 }
  0xd9   : > { %v1089_v22 = vadd.s32 %v1087_v5, %v1085_v16  ;;  %vm1186_vm1 = vcmp.lt.s32.totalorder %v7403_v12, 2  ;;  %v1193_v21 = vsel %vm1185_vm12, %v7432_v38, %v7434_v36  ;;  %v1195_v7 = vsel %vm1187_vm13, %v7436_v62, %v1194_v40 }
  0xda   : > { %13641 = vst [vmem:[#allocation27_spill] sm:$0xff] %v7443_v31  ;;  %v659_v18 = vxor.u32 2147483648, %v7384_v39  ;;  %v1057_v13 = vshrl.u32 %v7357_v53, 16  ;;  %v1067_v33 = vadd.s32 %v1065_v6, %v1063_v63  ;;  %v1198_v4 = vsel %vm1188_vm10, %v1184_v30, 1326507024 }
  0xdb   : > { %v516_v16 = vmul.f32 %v515_v61, %v7313_v34  ;;  %v800_v5 = vsel %vm5981_vm0, 0, %v5980_v2  ;;  %v7462_v28 = vshll.u32 %v1161_v15, 8  ;;  %v946_v10 = vshll.u32 %v7443_v31, 30 }
  0xdc   : > { %v1015_v56 = vshrl.u32 %v13629_v26, %v7202_v14  ;;  %v7469_v53 = vsel %vm1186_vm1, %v1193_v21, %v1195_v7  ;;  %vm1318_vm2 = vcmp.gt.s32.totalorder %v1317_v44, 0  ;;  %v1081_v49 = vshrl.u32 %v7378_v37, 16 }
  0xdd   : > { %v1090_v1 = vadd.s32 %v1089_v22, %v1079_v3  ;;  %v1197_v2 = vsel %vm1185_vm12, %v7434_v36, %v7436_v62  ;;  %v1199_v50 = vsel %vm1187_vm13, %v1181_v45, %v1198_v4  ;;  %v523_v63 = vmul.f32 %v522_v47, %v7313_v34 }
  0xde   : > { %v660_v14 = vsel %vm539_vm4, %v659_v18, %v7384_v39  ;;  %v1059_v30 = vshrl.u32 %v7372_v58, 16  ;;  %v1068_v40 = vadd.s32 %v1067_v33, %v1057_v13  ;;  %v1036_v61 = vsel %vm1034_vm14, %v7277_v19, 2102212464 }
  0xdf   : > { %v1202_v6 = vand.u32 65535, %v7462_v28  ;;  %v13387_v15 = vshrl.u32 %v7469_v53, 16  ;;  %v1319_v3 = vsel %vm1318_vm2, %v1317_v44, 0  ;;  %v785_v45 = vadd.s32 %v7109_v57, %v7104_v59 }
  0xe0   : > { %v801_v34 = vsub.s32 32, %v800_v5  ;;  %v805_v47 = vsub.s32 4294967266, %v800_v5  ;;  %v7492_v39 = vsel %vm1186_vm1, %v1197_v2, %v1199_v50  ;;  %v7497_v58 = vsel %vm7417_vm8, %v13636_v46, %v660_v14 }
  0xe1   : > { %v7500_v19 = vsub.s32 %v7391_v24, %v946_v10  ;;  %v1035_v44 = vsel %vm1031_vm15, %v1015_v56, %v7280_v54  ;;  %v1091_v22 = vadd.s32 %v1090_v1, %v1081_v49  ;;  %v1037_v59 = vsel %vm1033_vm3, %v7275_v25, %v1036_v61 }
  0xe2   : > { %v7508_v57 = vadd.s32 %v1068_v40, %v1059_v30  ;;  %v13643_v21 = vshll.u32 %v7378_v37, 16  ;;  %v1321_v18 = vand.u32 31, %v1319_v3  ;;  %v524_v13 = vadd.f32 1.0, %v523_v63 }
  0xe3   : > { %v1205_v24 = vshrl.u32 %v7492_v39, 16  ;;  %v1226_v33 = vand.u32 65535, %v7469_v53  ;;  %v7519_v54 = vmul.u32 %v13387_v15, %v1202_v6  ;;  %v7523_v25 = vmul.f32 %v7497_v58, %v7497_v58 }
  0xe4   : > { %13642 = vst [vmem:[#allocation48_spill] sm:$0xff] %v7508_v57  ;;  %v7513_v7 = vadd.s32 %v7396_v27, %v13643_v21  ;;  %v802_v4 = vshll.u32 %v7332_v23, %v800_v5  ;;  %v803_v37 = vshrl.u32 %v785_v45, %v801_v34  ;;  %v806_v10 = vadd.s32 127, %v805_v47 }
  0xe5   : > { %v7526_v27 = vadd.f32 1.0, %v516_v16  ;;  %v949_v56 = vsub.s32 0, %v7500_v19  ;;  %v1038_v49 = vsel %vm1032_vm5, %v1035_v44, %v1037_v59  ;;  %v1095_v1 = vadd.s32 1, %v1091_v22 }
  0xe6   : > { %13644 = vst [vmem:[#allocation49_spill] sm:$0xff] %v7513_v7  ;;  %vm948_vm14 = vcmp.lt.s32.totalorder %v7500_v19, 0  ;;  %vm1094_vm15 = vc.u32 %v7508_v57, %v7513_v7  ;;  %v1204_v2 = vand.u32 65535, %v7492_v39  ;;  %v7535_v50 = vsub.s32 32, %v1321_v18 }
  0xe7   : > { %v1203_v23 = vshrl.u32 %v7462_v28, 16  ;;  %v7538_v5 = vmul.u32 %v1205_v24, %v1202_v6  ;;  %v1228_v16 = vmul.u32 %v1226_v33, %v1202_v6  ;;  %v1232_v63 = vshll.u32 %v7519_v54, 16 }
  0xe8   : > { %v7542_v55 = vmul.f32 %v524_v13, %v7288_v20  ;;  %v673_v14 = vmul.f32 -0.00019511016, %v7523_v25  ;;  %v7545_v30 = vor.u32 %v803_v37, %v802_v4  ;;  %v807_v40 = vshll.u32 %v806_v10, 23 }
  0xe9   : > { %v950_v61 = vsel %vm948_vm14, %v949_v56, %v7500_v19  ;;  %v1092_v45 = vmul.u32 %v7315_v17, %v1038_v49  ;;  %v1096_v34 = vsel %vm1094_vm15, %v1095_v1, %v1091_v22  ;;  %v13395_v47 = vand.u32 2147483647, %v7138_v51 }
  0xea   : > { %v1206_v39 = vmul.u32 %v1204_v2, %v1202_v6  ;;  %v7550_v44 = vshrl.u32 %v1319_v3, 5  ;;  %v1333_v59 = vshll.u32 %v13586_v29, %v1321_v18  ;;  %v1334_v20 = vshrl.u32 %v13620_v48, %v7535_v50 }
  0xeb   : > { %v7555_v21 = vmul.u32 %v1204_v2, %v1203_v23  ;;  %v1210_v13 = vshll.u32 %v7538_v5, 16  ;;  %v7558_v4 = vmul.u32 %v1226_v33, %v1203_v23  ;;  %vm7560_vm3 = vc.u32 %v1228_v16, %v1232_v63 }
  0xec   : > { %v1324_v17 = vshll.u32 %v13629_v26, %v1321_v18  ;;  %v1325_v6 = vshrl.u32 %v13627_v9, %v7535_v50  ;;  %v1327_v3 = vshll.u32 %v13627_v9, %v1321_v18  ;;  %v1328_v22 = vshrl.u32 %v13591_v0, %v7535_v50 }
  0xed   : > { %v1330_v10 = vshll.u32 %v13591_v0, %v1321_v18  ;;  %v1331_v33 = vshrl.u32 %v13586_v29, %v7535_v50  ;;  %v1336_v56 = vshll.u32 %v13620_v48, %v1321_v18  ;;  %v1337_v49 = vshrl.u32 %v13621_v11, %v7535_v50 }
  0xee   : > { %v951_v1 = vclz %v950_v61  ;;  %v7576_v2 = vadd.s32 %v1096_v34, %v1092_v45  ;;  %v1314_v41 = vand.u32 8388607, %v13395_v47  ;;  %v1335_v15 = vor.u32 %v1334_v20, %v1333_v59 }
  0xef   : > { %v1212_v35 = vshll.u32 %v7555_v21, 16  ;;  %v1234_v31 = vshll.u32 %v7558_v4, 16  ;;  %v7582_v46 = vadd.s32 %v1232_v63, %v1228_v16  ;;  %vm1342_vm5 = vcmp.lt.s32.totalorder %v7550_v44, 4 }
  0xf0   : > { %vm1214_vm4 = vc.u32 %v1206_v39, %v1210_v13  ;;  %v1216_v18 = vadd.s32 %v1210_v13, %v1206_v39  ;;  %v13647_v7 = vshrl.u32 %v7469_v53, 16  ;;  %v1237_v61 = vsel %vm7560_vm3, 1, %v13624_v32 }
  0xf1   : > { %v7590_v45 = vor.u32 %v1325_v6, %v1324_v17  ;;  %v7592_v34 = vor.u32 %v1328_v22, %v1327_v3  ;;  %v7594_v59 = vor.u32 %v1331_v33, %v1330_v10  ;;  %v1338_v20 = vor.u32 %v1337_v49, %v1336_v56  ;;  %v13648_v56 = vld [vmem:[#allocation14_spill] sm:$0xff] }
  0xf2   : > { %v1231_v57 = vmul.u32 %v13647_v7, %v1203_v23  ;;  %v1209_v16 = vmul.u32 %v1205_v24, %v1203_v23  ;;  %vm1339_vm6 = vcmp.lt.s32.totalorder %v7550_v44, 1  ;;  %vm1341_vm7 = vcmp.lt.s32.totalorder %v7550_v44, 3 }
  0xf3   : > { %v1348_v53 = vsel %vm1342_vm5, %v1335_v15, 920167782  ;;  %v808_v7 = vor.u32 4788187, %v807_v40  ;;  %v1215_v63 = vsel %vm1214_vm4, 1, %v13624_v32  ;;  %vm1240_vm9 = vc.u32 %v7582_v46, %v1234_v31 }
  0xf4   : > { %v1315_v39 = vor.u32 8388608, %v1314_v41  ;;  %v5983_v13 = vadd.s32 4294967294, %v951_v1  ;;  %v1098_v37 = vadd.s32 536870912, %v7576_v2  ;;  %vm1218_vm11 = vc.u32 %v1216_v18, %v1212_v35 }
  0xf5   : > { %v1239_v24 = vadd.s32 %v1237_v61, %v1231_v57  ;;  %vm1340_vm0 = vcmp.lt.s32.totalorder %v7550_v44, 2  ;;  %v1347_v23 = vsel %vm1339_vm6, %v7590_v45, %v7592_v34  ;;  %v1349_v40 = vsel %vm1341_vm7, %v7594_v59, %v1348_v53 }
  0xf6   : > { %v1352_v17 = vsel %vm1342_vm5, %v1338_v20, 1326507024  ;;  %v666_v41 = vmul.f32 -0.001358992, %v7523_v25  ;;  %v674_v6 = vadd.f32 0.008332121, %v673_v14  ;;  %v1217_v3 = vadd.s32 %v1215_v63, %v1209_v16 }
  0xf7   : > { %v1241_v35 = vsel %vm1240_vm9, 1, %v13624_v32  ;;  %v809_v57 = vand.u32 2147483647, %v808_v7  ;;  %v811_v22 = vcvt.s32.f32 %v7545_v30  ;;  %v1219_v10 = vsel %vm1218_vm11, 1, %v13624_v32 }
  0xf8   : > { %v7619_v33 = vshll.u32 %v1315_v39, 8  ;;  %vm693_vm2 = vcmp.lt.s32.totalorder %v13648_v56, 0  ;;  %v7622_v49 = vshrl.u32 %v1098_v37, 30  ;;  %v7626_v1 = vsel %vm1340_vm0, %v1347_v23, %v1349_v40 }
  0xf9   : > { %v1351_v14 = vsel %vm1339_vm6, %v7592_v34, %v7594_v59  ;;  %v1353_v30 = vsel %vm1341_vm7, %v1335_v15, %v1352_v17  ;;  %vm5984_vm14 = vcmp.lt.s32.totalorder %v5983_v13, 0  ;;  %v1233_v18 = vshrl.u32 %v7519_v54, 16 }
  0xfa   : > { %v1243_v61 = vadd.s32 %v1241_v35, %v1239_v24  ;;  %v1464_v20 = vand.u32 2139095040, %v7142_v42  ;;  %v533_v53 = vxor.u32 2147483648, %v7526_v27  ;;  %v1211_v7 = vshrl.u32 %v7538_v5, 16 }
  0xfb   : > { %v1221_v63 = vadd.s32 %v1219_v10, %v1217_v3  ;;  %v812_v39 = vmul.f32 %v811_v22, %v809_v57  ;;  %v7641_v37 = vsel %vm1340_vm0, %v1351_v14, %v1353_v30  ;;  %v1356_v15 = vand.u32 65535, %v7619_v33 }
  0xfc   : > { %v1381_v23 = vshrl.u32 %v7626_v1, 16  ;;  %v667_v54 = vadd.f32 0.041655596, %v666_v41  ;;  %v675_v24 = vmul.f32 %v674_v6, %v7523_v25  ;;  %v13649_v40 = vand.u32 2147483647, %v13648_v56 }
  0xfd   : > { %v7652_v5 = vsel %vm5984_vm14, 0, %v5983_v13  ;;  %v1100_v3 = vshll.u32 %v7622_v49, 30  ;;  %v1169_v35 = vshrl.u32 %v13629_v26, %v7380_v60  ;;  %v1235_v57 = vshrl.u32 %v7558_v4, 16 }
  0xfe   : > { %vm7648_vm15 = vcmp.le.f32.partialorder %v13649_v40, 0.7853982  ;;  %v1244_v22 = vadd.s32 %v1243_v61, %v1233_v18  ;;  %v1465_v10 = vshrl.u32 %v1464_v20, 23  ;;  %v1190_v41 = vsel %vm1188_vm10, %v7436_v62, 2102212464 }
  0xff   : > { %v1213_v6 = vshrl.u32 %v7555_v21, 16  ;;  %v1222_v14 = vadd.s32 %v1221_v63, %v1211_v7  ;;  %v1359_v30 = vshrl.u32 %v7641_v37, 16  ;;  %v813_v13 = vxor.u32 2147483648, %v812_v39 }
 0x100   : > { %v1357_v40 = vshrl.u32 %v7619_v33, 16  ;;  %v1380_v47 = vand.u32 65535, %v7626_v1  ;;  %v7665_v16 = vmul.u32 %v1381_v23, %v1356_v15  ;;  %vm532_vm3 = vcmp.eq.s32.totalorder %v7375_v8, 2 }
 0x101   : > { %v668_v60 = vmul.f32 %v667_v54, %v7523_v25  ;;  %v676_v18 = vadd.f32 -0.16666654, %v675_v24  ;;  %v959_v61 = vsub.s32 4294967266, %v7652_v5  ;;  %v7671_v62 = vsub.s32 %v7576_v2, %v1100_v3 }
 0x102   : > { %vm529_vm10 = vcmp.eq.s32.totalorder %v7375_v8, 0  ;;  %v1189_v21 = vsel %vm1185_vm12, %v1169_v35, %v7432_v38  ;;  %v1191_v1 = vsel %vm1187_vm13, %v7434_v36, %v1190_v41  ;;  %v1245_v20 = vadd.s32 %v1244_v22, %v1235_v57  ;;  %v13652_v57 = vld [vmem:[#allocation15_spill] sm:$0xff] }
 0x103   : > { %v5994_v7 = vadd.s32 4294967169, %v1465_v10  ;;  %v7680_v63 = vadd.s32 %v1222_v14, %v1213_v6  ;;  %v7685_v54 = vadd.s32 %v7582_v46, %v1234_v31  ;;  %v1358_v2 = vand.u32 65535, %v7641_v37  ;;  %v13653_v22 = vld [vmem:[#allocation47_spill] sm:$0xff] }
 0x104   : > { %v7688_v24 = vmul.u32 %v1359_v30, %v1356_v15  ;;  %v814_v38 = vsel %vm693_vm2, %v813_v13, %v812_v39  ;;  %v1382_v3 = vmul.u32 %v1380_v47, %v1356_v15  ;;  %v7692_v35 = vmul.u32 %v1380_v47, %v1357_v40 }
 0x105   : > { %v1386_v36 = vshll.u32 %v7665_v16, 16  ;;  %v939_v10 = vadd.s32 %v13653_v22, %v13652_v57  ;;  %v955_v4 = vsub.s32 32, %v7652_v5  ;;  %v960_v41 = vadd.s32 127, %v959_v61 }
 0x106   : > { %v1103_v46 = vsub.s32 0, %v7671_v62  ;;  %vm1102_vm12 = vcmp.lt.s32.totalorder %v7671_v62, 0  ;;  %v1192_v31 = vsel %vm1186_vm1, %v1189_v21, %v1191_v1  ;;  %v1249_v37 = vadd.s32 1, %v1245_v20 }
 0x107   : > { %v1471_v39 = vadd.s32 1, %v5994_v7  ;;  %vm1248_vm13 = vc.u32 %v7680_v63, %v7685_v54  ;;  %v1360_v47 = vmul.u32 %v1358_v2, %v1356_v15  ;;  %v7704_v6 = vmul.u32 %v1358_v2, %v1357_v40 }
 0x108   : > { %v1364_v14 = vshll.u32 %v7688_v24, 16  ;;  %vm528_vm4 = vcmp.lt.s32.totalorder %v7375_v8, 2  ;;  %v7711_v13 = vsel %vm7648_vm15, %v13648_v56, %v814_v38  ;;  %vm1390_vm1 = vc.u32 %v1382_v3, %v1386_v36 }
 0x109   : > { %v7714_v61 = vadd.s32 %v1386_v36, %v1382_v3  ;;  %v956_v21 = vshll.u32 %v7500_v19, %v7652_v5  ;;  %v957_v15 = vshrl.u32 %v939_v10, %v955_v4  ;;  %v961_v1 = vshll.u32 %v960_v41, 23 }
 0x10a   : > { %v1104_v7 = vsel %vm1102_vm12, %v1103_v46, %v7671_v62  ;;  %v1246_v2 = vmul.u32 %v7462_v28, %v1192_v31  ;;  %v1250_v57 = vsel %vm1248_vm13, %v1249_v37, %v1245_v20  ;;  %v1385_v22 = vmul.u32 %v1381_v23, %v1357_v40 }
 0x10b   : > { %vm1472_vm9 = vcmp.gt.s32.totalorder %v1471_v39, 0  ;;  %v1366_v38 = vshll.u32 %v7704_v6, 16  ;;  %vm1368_vm11 = vc.u32 %v1360_v47, %v1364_v14  ;;  %v1370_v12 = vadd.s32 %v1364_v14, %v1360_v47  ;;  %v13656_v14 = vld [vmem:[#allocation46_spill] sm:$0xff] }
 0x10c   : > { %v1391_v3 = vsel %vm1390_vm1, 1, %v13624_v32  ;;  %v534_v19 = vsel %vm532_vm3, %v533_v53, %v7542_v55  ;;  %v669_v5 = vadd.f32 -0.4999988, %v668_v60  ;;  %v1105_v36 = vclz %v1104_v7 }
 0x10d   : > { %v13654_v10 = vshll.u32 %v7692_v35, 16  ;;  %v13655_v28 = vxor.u32 2147483648, %v7542_v55  ;;  %v677_v20 = vmul.f32 %v676_v18, %v7523_v25  ;;  %v1363_v4 = vmul.u32 %v1359_v30, %v1357_v40 }
 0x10e   : > { %v1473_v41 = vsel %vm1472_vm9, %v1471_v39, 0  ;;  %v7740_v46 = vmul.f32 %v7711_v13, %v7711_v13  ;;  %v7742_v53 = vadd.s32 %v1250_v57, %v1246_v2  ;;  %v1369_v60 = vsel %vm1368_vm11, 1, %v13624_v32 }
 0x10f   : > { %vm1394_vm14 = vc.u32 %v7714_v61, %v13654_v10  ;;  %v531_v23 = vsel %vm529_vm10, %v7526_v27, %v13655_v28  ;;  %v1393_v31 = vadd.s32 %v1391_v3, %v1385_v22  ;;  %v958_v37 = vor.u32 %v957_v15, %v956_v21 }
 0x110   : > { %v962_v47 = vor.u32 4788187, %v961_v1  ;;  %vm1372_vm3 = vc.u32 %v1370_v12, %v1366_v38  ;;  %v1395_v55 = vsel %vm1394_vm14, 1, %v13624_v32  ;;  %v670_v27 = vmul.f32 %v669_v5, %v7523_v25 }
 0x111   : > { %v815_v18 = vsub.s32 4, %v13656_v14  ;;  %v5986_v30 = vadd.s32 4294967294, %v1105_v36  ;;  %v1475_v40 = vand.u32 31, %v1473_v41  ;;  %v678_v39 = vadd.f32 1.0, %v677_v20 }
 0x112   : > { %v13657_v7 = vsel %vm7417_vm8, 0, %v7389_v43  ;;  %v820_v57 = vmul.f32 -0.001358992, %v7740_v46  ;;  %v1371_v21 = vadd.s32 %v1369_v60, %v1363_v4  ;;  %v1252_v12 = vadd.s32 536870912, %v7742_v53 }
 0x113   : > { %v7752_v2 = vand.u32 3, %v13657_v7  ;;  %v1373_v15 = vsel %vm1372_vm3, 1, %v13624_v32  ;;  %v1387_v25 = vshrl.u32 %v7665_v16, 16  ;;  %v1397_v1 = vadd.s32 %v1395_v55, %v1393_v31 }
 0x114   : > { %v7760_v22 = vsel %vm528_vm4, %v531_v23, %v534_v19  ;;  %v963_v38 = vand.u32 2147483647, %v962_v47  ;;  %v965_v52 = vcvt.s32.f32 %v958_v37  ;;  %v1323_v43 = vshrl.u32 %v13629_v26, %v7535_v50 }
 0x115   : > { %v7764_v3 = vadd.f32 1.0, %v670_v27  ;;  %v7769_v5 = vsel %vm693_vm2, %v815_v18, %v13656_v14  ;;  %vm5987_vm8 = vcmp.lt.s32.totalorder %v5986_v30, 0  ;;  %v7771_v36 = vsub.s32 32, %v1475_v40 }
 0x116   : > { %v7774_v16 = vmul.f32 %v678_v39, %v7497_v58  ;;  %v827_v8 = vmul.f32 -0.00019511016, %v7740_v46  ;;  %v1365_v19 = vshrl.u32 %v7688_v24, 16  ;;  %v1375_v10 = vadd.s32 %v1373_v15, %v1371_v21 }
 0x117   : > { %v821_v28 = vadd.f32 0.041655596, %v820_v57  ;;  %v7778_v50 = vshrl.u32 %v1252_v12, 30  ;;  %v1389_v23 = vshrl.u32 %v7692_v35, 16  ;;  %v1398_v20 = vadd.s32 %v1397_v1, %v1387_v25  ;;  %v13661_v1 = vld [vmem:[#allocation36_spill] sm:$0xff] }
 0x118   : > { %v7781_v4 = vmul.f32 %v965_v52, %v963_v38  ;;  %v7783_v60 = vsel %vm5987_vm8, 0, %v5986_v30  ;;  %v1343_v58 = vsel %vm1339_vm6, %v1323_v43, %v7590_v45  ;;  %v1344_v31 = vsel %vm1342_vm5, %v7594_v59, 2102212464  ;;  %v13659_v30 = vld [vmem:[#allocation16_spill] sm:$0xff] }
 0x119   : > { %13658 = vst [vmem:[#allocation14_spill] sm:$0xff] %v7778_v50  ;;  %v1367_v24 = vshrl.u32 %v7704_v6, 16  ;;  %v13396_v37 = vand.u32 2147483647, %v7142_v42  ;;  %v1490_v47 = vshll.u32 %v13620_v48, %v1475_v40  ;;  %v1491_v55 = vshrl.u32 %v13621_v11, %v7771_v36 }
 0x11a   : > { %v1376_v27 = vadd.s32 %v1375_v10, %v1365_v19  ;;  %v7796_v14 = vshrl.u32 %v1473_v41, 5  ;;  %v1487_v18 = vshll.u32 %v13586_v29, %v1475_v40  ;;  %v1488_v45 = vshrl.u32 %v13620_v48, %v7771_v36 }
 0x11b   : > { %vm847_vm6 = vcmp.lt.s32.totalorder %v13659_v30, 0  ;;  %v1254_v59 = vshll.u32 %v7778_v50, 30  ;;  %v1345_v6 = vsel %vm1341_vm7, %v7592_v34, %v1344_v31  ;;  %v13660_v39 = vshll.u32 %v7692_v35, 16 }
 0x11c   : > { %v1399_v41 = vadd.s32 %v1398_v20, %v1389_v23  ;;  %v1481_v57 = vshll.u32 %v13627_v9, %v1475_v40  ;;  %v1482_v21 = vshrl.u32 %v13591_v0, %v7771_v36  ;;  %v1484_v12 = vshll.u32 %v13591_v0, %v1475_v40 }
 0x11d   : > { %v7809_v7 = vadd.s32 %v7714_v61, %v13660_v39  ;;  %v1485_v15 = vshrl.u32 %v13586_v29, %v7771_v36  ;;  %v1478_v25 = vshll.u32 %v13629_v26, %v1475_v40  ;;  %v1479_v34 = vshrl.u32 %v13627_v9, %v7771_v36  ;;  %v13666_v39 = vld [vmem:[#allocation48_spill] sm:$0xff] }
 0x11e   : > { %v1492_v35 = vor.u32 %v1491_v55, %v1490_v47  ;;  %v1618_v61 = vand.u32 2139095040, %v13661_v1  ;;  %v13662_v38 = vand.u32 2147483647, %v13659_v30  ;;  %v7827_v43 = vadd.s32 %v1376_v27, %v1367_v24  ;;  %v13665_v47 = vld [vmem:[#allocation12_spill] sm:$0xff] }
 0x11f   : > { %v1468_v19 = vand.u32 8388607, %v13396_v37  ;;  %v1489_v10 = vor.u32 %v1488_v45, %v1487_v18  ;;  %vm1496_vm7 = vcmp.lt.s32.totalorder %v7796_v14, 4  ;;  %v828_v40 = vadd.f32 0.008332121, %v827_v8 }
 0x120   : > { %vm7823_vm5 = vcmp.le.f32.partialorder %v13662_v38, 0.7853982  ;;  %v967_v23 = vxor.u32 2147483648, %v7781_v4  ;;  %v1113_v20 = vsub.s32 4294967266, %v7783_v60  ;;  %v1346_v31 = vsel %vm1340_vm0, %v1343_v58, %v1345_v6 }
 0x121   : > { %vm526_vm2 = vweird.f32 %v13665_v47  ;;  %vm686_vm10 = vcmp.eq.s32.totalorder %v7752_v2, 2  ;;  %v7839_v24 = vsub.s32 %v7742_v53, %v1254_v59  ;;  %v1403_v55 = vadd.s32 1, %v1399_v41 }
 0x122   : > { %v7841_v27 = vor.u32 %v1482_v21, %v1481_v57  ;;  %v7843_v18 = vor.u32 %v1485_v15, %v1484_v12  ;;  %vm683_vm12 = vcmp.eq.s32.totalorder %v7752_v2, 0  ;;  %v7846_v8 = vor.u32 %v1479_v34, %v1478_v25  ;;  %v13667_v57 = vld [vmem:[#allocation49_spill] sm:$0xff] }
 0x123   : > { %vm1493_vm13 = vcmp.lt.s32.totalorder %v7796_v14, 1  ;;  %vm1495_vm0 = vcmp.lt.s32.totalorder %v7796_v14, 3  ;;  %v1506_v44 = vsel %vm1496_vm7, %v1492_v35, 1326507024  ;;  %vm1402_vm4 = vc.u32 %v7827_v43, %v7809_v7 }
 0x124   : > { %v1469_v53 = vor.u32 8388608, %v1468_v19  ;;  %v1502_v58 = vsel %vm1496_vm7, %v1489_v10, 920167782  ;;  %v1619_v45 = vshrl.u32 %v1618_v61, 23  ;;  %v822_v59 = vmul.f32 %v821_v28, %v7740_v46 }
 0x125   : > { %v829_v6 = vmul.f32 %v828_v40, %v7740_v46  ;;  %v1093_v21 = vadd.s32 %v13667_v57, %v13666_v39  ;;  %v1109_v12 = vsub.s32 32, %v7783_v60  ;;  %vm682_vm1 = vcmp.lt.s32.totalorder %v7752_v2, 2 }
 0x126   : > { %v1400_v15 = vmul.u32 %v7619_v33, %v1346_v31  ;;  %vm1494_vm9 = vcmp.lt.s32.totalorder %v7796_v14, 2  ;;  %v1505_v25 = vsel %vm1493_vm13, %v7841_v27, %v7843_v18  ;;  %v1507_v28 = vsel %vm1495_vm0, %v1489_v10, %v1506_v44 }
 0x127   : > { %v1114_v34 = vadd.s32 127, %v1113_v20  ;;  %v1404_v35 = vsel %vm1402_vm4, %v1403_v55, %v1399_v41  ;;  %v1501_v61 = vsel %vm1493_vm13, %v7846_v8, %v7841_v27  ;;  %v1503_v33 = vsel %vm1495_vm0, %v7843_v18, %v1502_v58 }
 0x128   : > { %v968_v38 = vsel %vm847_vm6, %v967_v23, %v7781_v4  ;;  %v1257_v19 = vsub.s32 0, %v7839_v24  ;;  %v7881_v40 = vshll.u32 %v1469_v53, 8  ;;  %v5997_v10 = vadd.s32 4294967169, %v1619_v45  ;;  %v13668_v23 = vld [vmem:[#allocation13_spill] sm:$0xff] }
 0x129   : > { %v687_v41 = vxor.u32 2147483648, %v7764_v3  ;;  %v823_v20 = vadd.f32 -0.4999988, %v822_v59  ;;  %vm1256_vm11 = vcmp.lt.s32.totalorder %v7839_v24, 0  ;;  %v7887_v31 = vsel %vm1494_vm9, %v1505_v25, %v1507_v28 }
 0x12a   : > { %v684_v55 = vxor.u32 2147483648, %v7774_v16  ;;  %v830_v44 = vadd.f32 -0.16666654, %v829_v6  ;;  %v7890_v58 = vadd.s32 %v1404_v35, %v1400_v15  ;;  %v7894_v4 = vsel %vm1494_vm9, %v1501_v61, %v1503_v33 }
 0x12b   : > { %vm680_vm14 = vweird.f32 %v13668_v23  ;;  %v7900_v53 = vsel %vm7823_vm5, %v13659_v30, %v968_v38  ;;  %v1110_v45 = vshll.u32 %v7671_v62, %v7783_v60  ;;  %v1111_v59 = vshrl.u32 %v1093_v21, %v1109_v12 }
 0x12c   : > { %13669 = vst [vmem:[#allocation15_spill] sm:$0xff] %v7900_v53  ;;  %v1115_v39 = vshll.u32 %v1114_v34, 23  ;;  %v1258_v6 = vsel %vm1256_vm11, %v1257_v19, %v7839_v24  ;;  %v1510_v57 = vand.u32 65535, %v7881_v40  ;;  %v1513_v15 = vshrl.u32 %v7887_v31, 16 }
 0x12d   : > { %v1625_v25 = vadd.s32 1, %v5997_v10  ;;  %v7910_v28 = vsel %vm526_vm2, nan, %v7760_v22  ;;  %v688_v35 = vsel %vm686_vm10, %v687_v41, %v7774_v16  ;;  %v824_v62 = vmul.f32 %v823_v20, %v7740_v46 }
 0x12e   : > { %13670 = vst [vmem:[#allocation47_spill] sm:$0xff] %v7910_v28  ;;  %v1535_v60 = vshrl.u32 %v7894_v4, 16  ;;  %v685_v21 = vsel %vm683_vm12, %v7764_v3, %v684_v55  ;;  %v831_v12 = vmul.f32 %v830_v44, %v7740_v46  ;;  %v7923_v34 = vmul.f32 %v7900_v53, %v7900_v53 }
 0x12f   : > { %v1406_v22 = vadd.s32 536870912, %v7890_v58  ;;  %v818_v16 = vsel %vm7648_vm15, 0, %v7769_v5  ;;  %v1112_v47 = vor.u32 %v1111_v59, %v1110_v45  ;;  %v1116_v61 = vor.u32 4788187, %v1115_v39  ;;  %v13671_v5 = vld [vmem:[#allocation27_spill] sm:$0xff] }
 0x130   : > { %v1259_v33 = vclz %v1258_v6  ;;  %v1511_v38 = vshrl.u32 %v7881_v40, 16  ;;  %v1512_v19 = vand.u32 65535, %v7887_v31  ;;  %v7931_v3 = vmul.u32 %v1513_v15, %v1510_v57 }
 0x131   : > { %vm1626_vm3 = vcmp.gt.s32.totalorder %v1625_v25, 0  ;;  %v689_v46 = vsel %vm682_vm1, %v685_v21, %v688_v35  ;;  %v7935_v10 = vadd.f32 1.0, %v824_v62  ;;  %v1534_v41 = vand.u32 65535, %v7894_v4 }
 0x132   : > { %v7938_v20 = vmul.u32 %v1535_v60, %v1510_v57  ;;  %v832_v17 = vadd.f32 1.0, %v831_v12  ;;  %v969_v55 = vsub.s32 4, %v13671_v5  ;;  %v981_v44 = vmul.f32 -0.00019511016, %v7923_v34 }
 0x133   : > { %v7942_v45 = vshrl.u32 %v1406_v22, 30  ;;  %v1117_v31 = vand.u32 2147483647, %v1116_v61  ;;  %v1119_v59 = vcvt.s32.f32 %v1112_v47  ;;  %v5989_v39 = vadd.s32 4294967294, %v1259_v33 }
 0x134   : > { %v1627_v6 = vsel %vm1626_vm3, %v1625_v25, 0  ;;  %v974_v2 = vmul.f32 -0.001358992, %v7923_v34  ;;  %v1514_v35 = vmul.u32 %v1512_v19, %v1510_v57  ;;  %v7945_v62 = vmul.u32 %v1512_v19, %v1511_v38 }
 0x135   : > { %13672 = vst [vmem:[#allocation46_spill] sm:$0xff] %v7942_v45  ;;  %v1518_v4 = vshll.u32 %v7931_v3, 16  ;;  %v7948_v21 = vand.u32 3, %v818_v16  ;;  %v1536_v12 = vmul.u32 %v1534_v41, %v1510_v57  ;;  %v7950_v37 = vmul.u32 %v1534_v41, %v1511_v38 }
 0x136   : > { %v1540_v28 = vshll.u32 %v7938_v20, 16  ;;  %v7955_v22 = vsel %vm680_vm14, nan, %v689_v46  ;;  %v982_v47 = vadd.f32 0.008332121, %v981_v44  ;;  %v1408_v25 = vshll.u32 %v7942_v45, 30 }
 0x137   : > { %13673 = vst [vmem:[#allocation12_spill] sm:$0xff] %v7955_v22  ;;  %v1629_v61 = vand.u32 31, %v1627_v6  ;;  %v7959_v33 = vmul.f32 %v832_v17, %v7711_v13  ;;  %v7962_v16 = vmul.f32 %v1119_v59, %v1117_v31  ;;  %vm5990_vm15 = vcmp.lt.s32.totalorder %v5989_v39, 0 }
 0x138   : > { %v7967_v57 = vsel %vm847_vm6, %v969_v55, %v13671_v5  ;;  %v7969_v23 = vadd.f32 0.041655596, %v974_v2  ;;  %v1520_v46 = vshll.u32 %v7945_v62, 16  ;;  %v1524_v41 = vadd.s32 %v1518_v4, %v1514_v35 }
 0x139   : > { %vm1522_vm8 = vc.u32 %v1514_v35, %v1518_v4  ;;  %v13397_v44 = vshll.u32 %v7950_v37, 16  ;;  %vm1544_vm2 = vc.u32 %v1536_v12, %v1540_v28  ;;  %v7973_v13 = vadd.s32 %v1540_v28, %v1536_v12 }
 0x13a   : > { %v7976_v17 = vmul.f32 %v982_v47, %v7923_v34  ;;  %v7978_v31 = vsel %vm5990_vm15, 0, %v5989_v39  ;;  %v7981_v59 = vsub.s32 %v7890_v58, %v1408_v25  ;;  %v7983_v5 = vsub.s32 32, %v1629_v61 }
 0x13b   : > { %v1121_v55 = vxor.u32 2147483648, %v7962_v16  ;;  %v1247_v2 = vadd.s32 %v7685_v54, %v7680_v63  ;;  %v1517_v35 = vmul.u32 %v1513_v15, %v1511_v38  ;;  %v1539_v4 = vmul.u32 %v1535_v60, %v1511_v38  ;;  %v13675_v63 = vld [vmem:[#allocation25_spill] sm:$0xff] }
 0x13c   : > { %13674 = vst [vmem:[#allocation48_spill] sm:$0xff] %v7983_v5  ;;  %v1263_v28 = vsub.s32 32, %v7978_v31  ;;  %v1523_v12 = vsel %vm1522_vm8, 1, %v13624_v32  ;;  %vm1526_vm6 = vc.u32 %v1524_v41, %v1520_v46  ;;  %v1545_v39 = vsel %vm1544_vm2, 1, %v13624_v32 }
 0x13d   : > { %v1267_v47 = vsub.s32 4294967266, %v7978_v31  ;;  %vm1548_vm10 = vc.u32 %v7973_v13, %v13397_v44  ;;  %v7996_v25 = vshrl.u32 %v1627_v6, 5  ;;  %vm1001_vm12 = vcmp.lt.s32.totalorder %v13675_v63, 0 }
 0x13e   : > { %vm1410_vm4 = vcmp.lt.s32.totalorder %v7981_v59, 0  ;;  %v1411_v54 = vsub.s32 0, %v7981_v59  ;;  %v1641_v15 = vshll.u32 %v13586_v29, %v1629_v61  ;;  %v1642_v60 = vshrl.u32 %v13620_v48, %v7983_v5 }
 0x13f   : > { %v1525_v38 = vadd.s32 %v1523_v12, %v1517_v35  ;;  %v1527_v46 = vsel %vm1526_vm6, 1, %v13624_v32  ;;  %v1547_v41 = vadd.s32 %v1545_v39, %v1539_v4  ;;  %v1632_v19 = vshll.u32 %v13629_v26, %v1629_v61 }
 0x140   : > { %v1549_v6 = vsel %vm1548_vm10, 1, %v13624_v32  ;;  %v1633_v44 = vshrl.u32 %v13627_v9, %v7983_v5  ;;  %v1644_v58 = vshll.u32 %v13620_v48, %v1629_v61  ;;  %v1645_v22 = vshrl.u32 %v13621_v11, %v7983_v5 }
 0x141   : > { %v1635_v30 = vshll.u32 %v13627_v9, %v1629_v61  ;;  %v1636_v35 = vshrl.u32 %v13591_v0, %v7983_v5  ;;  %v1638_v12 = vshll.u32 %v13591_v0, %v1629_v61  ;;  %v1639_v4 = vshrl.u32 %v13586_v29, %v7983_v5 }
 0x142   : > { %vm840_vm1 = vcmp.eq.s32.totalorder %v7948_v21, 2  ;;  %v13676_v39 = vand.u32 2147483647, %v13675_v63  ;;  %v1264_v11 = vshll.u32 %v7839_v24, %v7978_v31  ;;  %v1265_v9 = vshrl.u32 %v1247_v2, %v1263_v28 }
 0x143   : > { %v13679_v48 = vand.u32 2147483647, %v13661_v1  ;;  %v1643_v50 = vor.u32 %v1642_v60, %v1641_v15  ;;  %v1412_v61 = vsel %vm1410_vm4, %v1411_v54, %v7981_v59  ;;  %v1541_v0 = vshrl.u32 %v7938_v20, 16 }
 0x144   : > { %vm8021_vm11 = vcmp.le.f32.partialorder %v13676_v39, 0.7853982  ;;  %v1551_v29 = vadd.s32 %v1549_v6, %v1547_v41  ;;  %vm1650_vm14 = vcmp.lt.s32.totalorder %v7996_v25, 4  ;;  %v1268_v39 = vadd.s32 127, %v1267_v47 }
 0x145   : > { %v1622_v45 = vand.u32 8388607, %v13679_v48  ;;  %v1519_v5 = vshrl.u32 %v7931_v3, 16  ;;  %v1529_v51 = vadd.s32 %v1527_v46, %v1525_v38  ;;  %v1646_v53 = vor.u32 %v1645_v22, %v1644_v58 }
 0x146   : > { %v1477_v24 = vshrl.u32 %v13629_v26, %v7771_v36  ;;  %v8037_v31 = vor.u32 %v1633_v44, %v1632_v19  ;;  %v8039_v48 = vor.u32 %v1636_v35, %v1635_v30  ;;  %v8041_v2 = vor.u32 %v1639_v4, %v1638_v12 }
 0x147   : > { %vm837_vm3 = vcmp.eq.s32.totalorder %v7948_v21, 0  ;;  %v1413_v20 = vclz %v1412_v61  ;;  %vm1647_vm15 = vcmp.lt.s32.totalorder %v7996_v25, 1  ;;  %vm1649_vm8 = vcmp.lt.s32.totalorder %v7996_v25, 3 }
 0x148   : > { %v1656_v3 = vsel %vm1650_vm14, %v1643_v50, 920167782  ;;  %v1498_v36 = vsel %vm1496_vm7, %v7843_v18, 2102212464  ;;  %v1543_v22 = vshrl.u32 %v7950_v37, 16  ;;  %v1552_v30 = vadd.s32 %v1551_v29, %v1541_v0 }
 0x149   : > { %v1623_v19 = vor.u32 8388608, %v1622_v45  ;;  %v1269_v44 = vshll.u32 %v1268_v39, 23  ;;  %v1521_v28 = vshrl.u32 %v7945_v62, 16  ;;  %v1530_v47 = vadd.s32 %v1529_v51, %v1519_v5  ;;  %v13682_v39 = vld [vmem:[#allocation37_spill] sm:$0xff] }
 0x14a   : > { %v1660_v58 = vsel %vm1650_vm14, %v1646_v53, 1326507024  ;;  %vm836_vm2 = vcmp.lt.s32.totalorder %v7948_v21, 2  ;;  %v1122_v54 = vsel %vm1001_vm12, %v1121_v55, %v7962_v16  ;;  %vm1648_vm6 = vcmp.lt.s32.totalorder %v7996_v25, 2 }
 0x14b   : > { %v1655_v29 = vsel %vm1647_vm15, %v8037_v31, %v8039_v48  ;;  %v1657_v0 = vsel %vm1649_vm8, %v8041_v2, %v1656_v3  ;;  %v1266_v51 = vor.u32 %v1265_v9, %v1264_v11  ;;  %v5992_v18 = vadd.s32 4294967294, %v1413_v20 }
 0x14c   : > { %v1497_v53 = vsel %vm1493_vm13, %v1477_v24, %v7846_v8  ;;  %v1499_v45 = vsel %vm1495_vm0, %v7841_v27, %v1498_v36  ;;  %v1553_v62 = vadd.s32 %v1552_v30, %v1543_v22  ;;  %v1659_v16 = vsel %vm1647_vm15, %v8039_v48, %v8041_v2 }
 0x14d   : > { %v1661_v5 = vsel %vm1649_vm8, %v1643_v50, %v1660_v58  ;;  %v8079_v55 = vshll.u32 %v1623_v19, 8  ;;  %v1270_v11 = vor.u32 4788187, %v1269_v44  ;;  %v8081_v9 = vadd.s32 %v1530_v47, %v1521_v28 }
 0x14e   : > { %v13680_v8 = vshll.u32 %v7950_v37, 16  ;;  %v8090_v27 = vsel %vm1648_vm6, %v1655_v29, %v1657_v0  ;;  %v838_v60 = vxor.u32 2147483648, %v7959_v33  ;;  %v13681_v38 = vxor.u32 2147483648, %v7935_v10 }
 0x14f   : > { %v976_v46 = vmul.f32 %v7969_v23, %v7923_v34  ;;  %v8103_v37 = vsel %vm8021_vm11, %v13675_v63, %v1122_v54  ;;  %v984_v41 = vadd.f32 -0.16666654, %v7976_v17  ;;  %v1500_v6 = vsel %vm1494_vm9, %v1497_v53, %v1499_v45 }
 0x150   : > { %v8086_v15 = vadd.s32 %v7973_v13, %v13680_v8  ;;  %v842_v50 = vsel %vm840_vm1, %v13681_v38, %v7959_v33  ;;  %v972_v13 = vsel %vm7823_vm5, 0, %v7967_v57  ;;  %v8113_v33 = vsel %vm1648_vm6, %v1659_v16, %v1661_v5 }
 0x151   : > { %vm5993_vm7 = vcmp.lt.s32.totalorder %v5992_v18, 0  ;;  %v1557_v23 = vadd.s32 1, %v1553_v62  ;;  %v1664_v35 = vand.u32 65535, %v8079_v55  ;;  %v1689_v12 = vshrl.u32 %v8090_v27, 16 }
 0x152   : > { %v8119_v4 = vmul.f32 %v8103_v37, %v8103_v37  ;;  %v1271_v52 = vand.u32 2147483647, %v1270_v11  ;;  %v1273_v57 = vcvt.s32.f32 %v1266_v51  ;;  %vm1556_vm5 = vc.u32 %v8081_v9, %v8086_v15 }
 0x153   : > { %v839_v14 = vsel %vm837_vm3, %v7935_v10, %v838_v60  ;;  %v977_v17 = vadd.f32 -0.4999988, %v976_v46  ;;  %v1667_v61 = vshrl.u32 %v8113_v33, 16  ;;  %v1772_v24 = vand.u32 2139095040, %v13682_v39 }
 0x154   : > { %v985_v20 = vmul.f32 %v984_v41, %v7923_v34  ;;  %v1128_v3 = vmul.f32 -0.001358992, %v8119_v4  ;;  %v8130_v36 = vsel %vm5993_vm7, 0, %v5992_v18  ;;  %v1554_v22 = vmul.u32 %v7881_v40, %v1500_v6 }
 0x155   : > { %v1558_v30 = vsel %vm1556_vm5, %v1557_v23, %v1553_v62  ;;  %v1665_v19 = vshrl.u32 %v8079_v55, 16  ;;  %v1688_v44 = vand.u32 65535, %v8090_v27  ;;  %v8135_v28 = vmul.u32 %v1689_v12, %v1664_v35  ;;  %v13683_v27 = vld [vmem:[#allocation33_spill] sm:$0xff] }
 0x156   : > { %v8139_v10 = vsel %vm836_vm2, %v839_v14, %v842_v50  ;;  %v1135_v47 = vmul.f32 -0.00019511016, %v8119_v4  ;;  %v1274_v58 = vmul.f32 %v1273_v57, %v1271_v52  ;;  %v1666_v54 = vand.u32 65535, %v8113_v33 }
 0x157   : > { %v8143_v29 = vand.u32 3, %v972_v13  ;;  %v1123_v40 = vsub.s32 4, %v7622_v49  ;;  %v8146_v0 = vmul.u32 %v1667_v61, %v1664_v35  ;;  %v1773_v51 = vshrl.u32 %v1772_v24, 23 }
 0x158   : > { %v978_v18 = vmul.f32 %v977_v17, %v7923_v34  ;;  %v986_v53 = vadd.f32 1.0, %v985_v20  ;;  %v1421_v45 = vsub.s32 4294967266, %v8130_v36  ;;  %v8150_v21 = vadd.s32 %v1558_v30, %v1554_v22 }
 0x159   : > { %v1129_v62 = vadd.f32 0.041655596, %v1128_v3  ;;  %v1690_v16 = vmul.u32 %v1688_v44, %v1664_v35  ;;  %v8152_v5 = vmul.u32 %v1688_v44, %v1665_v19  ;;  %v1694_v11 = vshll.u32 %v8135_v28, 16 }
 0x15a   : > { %v1136_v8 = vadd.f32 0.008332121, %v1135_v47  ;;  %vm1155_vm13 = vcmp.lt.s32.totalorder %v13683_v27, 0  ;;  %v1275_v60 = vxor.u32 2147483648, %v1274_v58  ;;  %v8156_v38 = vmul.u32 %v1666_v54, %v1665_v19 }
 0x15b   : > { %v13684_v50 = vand.u32 2147483647, %v13683_v27  ;;  %v1668_v46 = vmul.u32 %v1666_v54, %v1664_v35  ;;  %v1672_v13 = vshll.u32 %v8146_v0, 16  ;;  %v6000_v41 = vadd.s32 4294967169, %v1773_v51 }
 0x15c   : > { %v1401_v6 = vadd.s32 %v7809_v7, %v7827_v43  ;;  %v1417_v33 = vsub.s32 32, %v8130_v36  ;;  %v1422_v23 = vadd.s32 127, %v1421_v45  ;;  %v1560_v52 = vadd.s32 536870912, %v8150_v21  ;;  %v13687_v45 = vld [vmem:[#allocation15_spill] sm:$0xff] }
 0x15d   : > { %vm8160_vm0 = vcmp.le.f32.partialorder %v13684_v50, 0.7853982  ;;  %vm834_vm9 = vweird.f32 %v13648_v56  ;;  %v1130_v57 = vmul.f32 %v1129_v62, %v8119_v4  ;;  %v1696_v14 = vshll.u32 %v8152_v5, 16 }
 0x15e   : > { %vm1698_vm10 = vc.u32 %v1690_v16, %v1694_v11  ;;  %v8172_v17 = vadd.s32 %v1694_v11, %v1690_v16  ;;  %v1137_v35 = vmul.f32 %v1136_v8, %v8119_v4  ;;  %v1276_v24 = vsel %vm1155_vm13, %v1275_v60, %v1274_v58 }
 0x15f   : > { %v1418_v7 = vshll.u32 %v7981_v59, %v8130_v36  ;;  %v1674_v43 = vshll.u32 %v8156_v38, 16  ;;  %vm991_vm4 = vcmp.eq.s32.totalorder %v8143_v29, 0  ;;  %vm1676_vm1 = vc.u32 %v1668_v46, %v1672_v13 }
 0x160   : > { %v1678_v20 = vadd.s32 %v1672_v13, %v1668_v46  ;;  %v1693_v3 = vmul.u32 %v1689_v12, %v1665_v19  ;;  %v1779_v22 = vadd.s32 1, %v6000_v41  ;;  %v1419_v30 = vshrl.u32 %v1401_v6, %v1417_v33 }
 0x161   : > { %v1423_v44 = vshll.u32 %v1422_v23, 23  ;;  %v8181_v47 = vshrl.u32 %v1560_v52, 30  ;;  %v1699_v54 = vsel %vm1698_vm10, 1, %v13624_v32  ;;  %v979_v51 = vadd.f32 1.0, %v978_v18 }
 0x162   : > { %v987_v58 = vmul.f32 %v986_v53, %v13687_v45  ;;  %v1671_v62 = vmul.u32 %v1667_v61, %v1665_v19  ;;  %vm1702_vm3 = vc.u32 %v8172_v17, %v1696_v14  ;;  %v1124_v59 = vsel %vm1001_vm12, %v1123_v40, %v7622_v49 }
 0x163   : > { %v1131_v12 = vadd.f32 -0.4999988, %v1130_v57  ;;  %v1138_v36 = vadd.f32 -0.16666654, %v1137_v35  ;;  %v1677_v16 = vsel %vm1676_vm1, 1, %v13624_v32  ;;  %v8195_v11 = vsel %vm8160_vm0, %v13683_v27, %v1276_v24 }
 0x164   : > { %vm1680_vm2 = vc.u32 %v1678_v20, %v1674_v43  ;;  %v1701_v18 = vadd.s32 %v1699_v54, %v1693_v3  ;;  %vm1780_vm7 = vcmp.gt.s32.totalorder %v1779_v22, 0  ;;  %v1420_v61 = vor.u32 %v1419_v30, %v1418_v7  ;;  %v13689_v54 = vld [vmem:[#allocation34_spill] sm:$0xff] }
 0x165   : > { %v1424_v19 = vor.u32 4788187, %v1423_v44  ;;  %v1562_v53 = vshll.u32 %v8181_v47, 30  ;;  %v1703_v8 = vsel %vm1702_vm3, 1, %v13624_v32  ;;  %v992_v60 = vxor.u32 2147483648, %v987_v58 }
 0x166   : > { %v995_v49 = vxor.u32 2147483648, %v979_v51  ;;  %v1126_v40 = vsel %vm8021_vm11, 0, %v1124_v59  ;;  %v1679_v50 = vadd.s32 %v1677_v16, %v1671_v62  ;;  %v1132_v46 = vmul.f32 %v1131_v12, %v8119_v4  ;;  %v13690_v62 = vld [vmem:[#allocation48_spill] sm:$0xff] }
 0x167   : > { %v1139_v13 = vmul.f32 %v1138_v36, %v8119_v4  ;;  %v1681_v41 = vsel %vm1680_vm2, 1, %v13624_v32  ;;  %v1781_v6 = vsel %vm1780_vm7, %v1779_v22, 0  ;;  %vm994_vm12 = vcmp.eq.s32.totalorder %v8143_v29, 2 }
 0x168   : > { %v8207_v33 = vmul.f32 %v8195_v11, %v8195_v11  ;;  %v1695_v23 = vshrl.u32 %v8135_v28, 16  ;;  %v1705_v52 = vadd.s32 %v1703_v8, %v1701_v18  ;;  %v8213_v42 = vsel %vm834_vm9, nan, %v8139_v10 }
 0x169   : > { %13688 = vst [vmem:[#allocation49_spill] sm:$0xff] %v8213_v42  ;;  %v1425_v57 = vand.u32 2147483647, %v1424_v19  ;;  %v1427_v35 = vcvt.s32.f32 %v1420_v61  ;;  %v8216_v4 = vsub.s32 %v8150_v21, %v1562_v53  ;;  %v8218_v24 = vand.u32 3, %v1126_v40  ;;  %v13691_v61 = vld [vmem:[#allocation14_spill] sm:$0xff] }
 0x16a   : > { %v1673_v7 = vshrl.u32 %v8146_v0, 16  ;;  %v1683_v43 = vadd.s32 %v1681_v41, %v1679_v50  ;;  %v1783_v20 = vand.u32 31, %v1781_v6  ;;  %v8223_v28 = vsel %vm991_vm4, %v979_v51, %v992_v60  ;;  %v13692_v53 = vld [vmem:[#allocation46_spill] sm:$0xff]  ;;  %v13696_v50 = vld [vmem:[#allocation40_spill] sm:$0xff] }
 0x16b   : > { %v8225_v3 = vsel %vm994_vm12, %v995_v49, %v987_v58  ;;  %v8227_v56 = vadd.f32 1.0, %v1132_v46  ;;  %v1140_v10 = vadd.f32 1.0, %v1139_v13  ;;  %v1282_v22 = vmul.f32 -0.001358992, %v8207_v33 }
 0x16c   : > { %v1289_v21 = vmul.f32 -0.00019511016, %v8207_v33  ;;  %v1697_v30 = vshrl.u32 %v8152_v5, 16  ;;  %v1706_v44 = vadd.s32 %v1705_v52, %v1695_v23  ;;  %vm1309_vm11 = vcmp.lt.s32.totalorder %v13689_v54, 0 }
 0x16d   : > { %v1428_v0 = vmul.f32 %v1427_v35, %v1425_v57  ;;  %v1565_v45 = vsub.s32 0, %v8216_v4  ;;  %v1631_v51 = vshrl.u32 %v13629_v26, %v13690_v62  ;;  %v1652_v58 = vsel %vm1650_vm14, %v8041_v2, 2102212464 }
 0x16e   : > { %vm1564_vm5 = vcmp.lt.s32.totalorder %v8216_v4, 0  ;;  %v1675_v59 = vshrl.u32 %v8156_v38, 16  ;;  %v1684_v12 = vadd.s32 %v1683_v43, %v1673_v7  ;;  %v8241_v36 = vsub.s32 32, %v1783_v20 }
 0x16f   : > { %v8244_v16 = vmul.f32 %v1140_v10, %v8103_v37  ;;  %v1277_v19 = vsub.s32 4, %v13691_v61  ;;  %v1283_v60 = vadd.f32 0.041655596, %v1282_v22  ;;  %v1290_v49 = vadd.f32 0.008332121, %v1289_v21 }
 0x170   : > { %v13693_v2 = vand.u32 2147483647, %v13689_v54  ;;  %v1707_v38 = vadd.s32 %v1706_v44, %v1697_v30  ;;  %v1926_v46 = vand.u32 2139095040, %v13696_v50  ;;  %v1429_v13 = vxor.u32 2147483648, %v1428_v0 }
 0x171   : > { %v1566_v37 = vsel %vm1564_vm5, %v1565_v45, %v8216_v4  ;;  %v1651_v41 = vsel %vm1647_vm15, %v1631_v51, %v8037_v31  ;;  %v1653_v23 = vsel %vm1649_vm8, %v8039_v48, %v1652_v58  ;;  %v8263_v52 = vadd.s32 %v1684_v12, %v1675_v59 }
 0x172   : > { %vm8251_vm14 = vcmp.le.f32.partialorder %v13693_v2, 0.7853982  ;;  %v8268_v57 = vadd.s32 %v8172_v17, %v1696_v14  ;;  %v13697_v35 = vmov 920167782   ;;  %v13698_v43 = vmov 1326507024  }
 0x173   : > { %v1798_v7 = vshll.u32 %v13697_v35, %v1783_v20  ;;  %v1799_v10 = vshrl.u32 %v13698_v43, %v8241_v36  ;;  %v13414_v22 = vand.u32 2147483647, %v13682_v39  ;;  %v8274_v21 = vshrl.u32 %v1781_v6, 5 }
 0x174   : > { %v13699_v31 = vmov 2102212464   ;;  %v1796_v48 = vshrl.u32 %v13697_v35, %v8241_v36  ;;  %vm1148_vm15 = vcmp.eq.s32.totalorder %v8218_v24, 2  ;;  %v1567_v5 = vclz %v1566_v37 }
 0x175   : > { %v1795_v30 = vshll.u32 %v13699_v31, %v1783_v20  ;;  %v1654_v14 = vsel %vm1648_vm6, %v1651_v41, %v1653_v23  ;;  %v1711_v17 = vadd.s32 1, %v1707_v38  ;;  %v1927_v44 = vshrl.u32 %v1926_v46, 23 }
 0x176   : > { %vm1145_vm8 = vcmp.eq.s32.totalorder %v8218_v24, 0  ;;  %v13700_v45 = vmov 2475754826   ;;  %v13701_v6 = vmov 2131351028   ;;  %v1793_v59 = vshrl.u32 %v13699_v31, %v8241_v36 }
 0x177   : > { %v1789_v62 = vshll.u32 %v13700_v45, %v1783_v20  ;;  %v1790_v51 = vshrl.u32 %v13701_v6, %v8241_v36  ;;  %v1792_v58 = vshll.u32 %v13701_v6, %v1783_v20  ;;  %vm1710_vm9 = vc.u32 %v8263_v52, %v8268_v57 }
 0x178   : > { %v1786_v25 = vshll.u32 %v13629_v26, %v1783_v20  ;;  %v1787_v12 = vshrl.u32 %v13700_v45, %v8241_v36  ;;  %v1800_v2 = vor.u32 %v1799_v10, %v1798_v7  ;;  %vm990_vm6 = vcmp.lt.s32.totalorder %v8143_v29, 2 }
 0x179   : > { %v1291_v46 = vmul.f32 %v1290_v49, %v8207_v33  ;;  %v1776_v37 = vand.u32 8388607, %v13414_v22  ;;  %v1797_v41 = vor.u32 %v1796_v48, %v1795_v30  ;;  %vm1804_vm10 = vcmp.lt.s32.totalorder %v8274_v21, 4 }
 0x17a   : > { %v1284_v23 = vmul.f32 %v1283_v60, %v8207_v33  ;;  %v1430_v8 = vsel %vm1309_vm11, %v1429_v13, %v1428_v0  ;;  %v1708_v20 = vmul.u32 %v8079_v55, %v1654_v14  ;;  %v6003_v18 = vadd.s32 4294967169, %v1927_v44 }
 0x17b   : > { %vm1144_vm4 = vcmp.lt.s32.totalorder %v8218_v24, 2  ;;  %v5995_v7 = vadd.s32 4294967294, %v1567_v5  ;;  %v1712_v10 = vsel %vm1710_vm9, %v1711_v17, %v1707_v38  ;;  %v8304_v42 = vor.u32 %v1790_v51, %v1789_v62 }
 0x17c   : > { %v8306_v49 = vor.u32 %v1793_v59, %v1792_v58  ;;  %v8308_v22 = vor.u32 %v1787_v12, %v1786_v25  ;;  %vm1801_vm1 = vcmp.lt.s32.totalorder %v8274_v21, 1  ;;  %vm1803_vm3 = vcmp.lt.s32.totalorder %v8274_v21, 3 }
 0x17d   : > { %v1814_v0 = vsel %vm1804_vm10, %v1800_v2, 1326507024  ;;  %v1292_v60 = vadd.f32 -0.16666654, %v1291_v46  ;;  %v8317_v55 = vsel %vm8251_vm14, %v13689_v54, %v1430_v8  ;;  %v1777_v38 = vor.u32 8388608, %v1776_v37 }
 0x17e   : > { %v1810_v13 = vsel %vm1804_vm10, %v1797_v41, 920167782  ;;  %v1146_v30 = vxor.u32 2147483648, %v8244_v16  ;;  %v1278_v48 = vsel %vm1155_vm13, %v1277_v19, %v13691_v61  ;;  %v1285_v5 = vadd.f32 -0.4999988, %v1284_v23 }
 0x17f   : > { %v1933_v14 = vadd.s32 1, %v6003_v18  ;;  %v8325_v17 = vadd.s32 %v1712_v10, %v1708_v20  ;;  %vm1802_vm2 = vcmp.lt.s32.totalorder %v8274_v21, 2  ;;  %v1813_v8 = vsel %vm1801_vm1, %v8304_v42, %v8306_v49 }
 0x180   : > { %v1815_v44 = vsel %vm1803_vm3, %v1797_v41, %v1814_v0  ;;  %v8336_v62 = vmul.f32 %v8317_v55, %v8317_v55  ;;  %vm5996_vm7 = vcmp.lt.s32.totalorder %v5995_v7, 0  ;;  %v1809_v18 = vsel %vm1801_vm1, %v8308_v22, %v8304_v42 }
 0x181   : > { %v1811_v61 = vsel %vm1803_vm3, %v8306_v49, %v1810_v13  ;;  %v13702_v19 = vxor.u32 2147483648, %v8227_v56  ;;  %v1293_v58 = vmul.f32 %v1292_v60, %v8207_v33  ;;  %v13703_v59 = vsub.s32 4, %v13692_v53 }
 0x182   : > { %v8356_v12 = vshll.u32 %v1777_v38, 8  ;;  %v1147_v2 = vsel %vm1145_vm8, %v8227_v56, %v1146_v30  ;;  %v1280_v46 = vsel %vm8160_vm0, 0, %v1278_v48  ;;  %vm1934_vm13 = vcmp.gt.s32.totalorder %v1933_v14, 0 }
 0x183   : > { %v1150_v51 = vsel %vm1148_vm15, %v13702_v19, %v8244_v16  ;;  %v1432_v25 = vsel %vm1309_vm11, %v13703_v59, %v13692_v53  ;;  %v8365_v16 = vsel %vm1802_vm2, %v1813_v8, %v1815_v44  ;;  %v1286_v37 = vmul.f32 %v1285_v5, %v8207_v33  ;;  %v13706_v19 = vld [vmem:[#allocation41_spill] sm:$0xff] }
 0x184   : > { %v8368_v41 = vsel %vm5996_vm7, 0, %v5995_v7  ;;  %v1714_v53 = vadd.s32 536870912, %v8325_v17  ;;  %v8373_v23 = vsel %vm1802_vm2, %v1809_v18, %v1811_v61  ;;  %v8379_v34 = vsel %vm990_vm6, %v8223_v28, %v8225_v3 }
 0x185   : > { %13704 = vst [vmem:[#allocation13_spill] sm:$0xff] %v8379_v34  ;;  %v1434_v56 = vsel %vm8251_vm14, 0, %v1432_v25  ;;  %v1436_v20 = vmul.f32 -0.001358992, %v8336_v62  ;;  %v1443_v33 = vmul.f32 -0.00019511016, %v8336_v62  ;;  %v8389_v38 = vsel %vm1144_vm4, %v1147_v2, %v1150_v51 }
 0x186   : > { %v1294_v7 = vadd.f32 1.0, %v1293_v58  ;;  %v1818_v10 = vand.u32 65535, %v8356_v12  ;;  %v1821_v0 = vshrl.u32 %v8365_v16, 16  ;;  %v1935_v60 = vsel %vm1934_vm13, %v1933_v14, 0  ;;  %13705 = vst [vmem:[#allocation27_spill] sm:$0xff] %v8389_v38 }
 0x187   : > { %v8391_v29 = vand.u32 3, %v1280_v46  ;;  %v1575_v28 = vsub.s32 4294967266, %v8368_v41  ;;  %v1843_v3 = vshrl.u32 %v8373_v23, 16  ;;  %v8395_v40 = vadd.f32 1.0, %v1286_v37 }
 0x188   : > { %v8397_v13 = vshrl.u32 %v1714_v53, 30  ;;  %v1819_v30 = vshrl.u32 %v8356_v12, 16  ;;  %v1820_v48 = vand.u32 65535, %v8365_v16  ;;  %v1437_v5 = vadd.f32 0.041655596, %v1436_v20 }
 0x189   : > { %v1444_v14 = vadd.f32 0.008332121, %v1443_v33  ;;  %v8401_v8 = vand.u32 3, %v1434_v56  ;;  %v1937_v24 = vand.u32 31, %v1935_v60  ;;  %v8404_v44 = vmul.f32 %v1294_v7, %v8195_v11 }
 0x18a   : > { %v8406_v18 = vmul.u32 %v1821_v0, %v1818_v10  ;;  %v1842_v61 = vand.u32 65535, %v8373_v23  ;;  %v2080_v51 = vand.u32 2139095040, %v13706_v19  ;;  %v1555_v58 = vadd.s32 %v8086_v15, %v8081_v9 }
 0x18b   : > { %v1571_v59 = vsub.s32 32, %v8368_v41  ;;  %v8413_v25 = vadd.s32 127, %v1575_v28  ;;  %v8415_v2 = vmul.u32 %v1843_v3, %v1818_v10  ;;  %v1716_v11 = vshll.u32 %v8397_v13, 30 }
 0x18c   : > { %v8419_v16 = vmul.u32 %v1820_v48, %v1819_v30  ;;  %v8423_v53 = vmul.f32 %v1437_v5, %v8336_v62  ;;  %v8426_v23 = vmul.f32 %v1444_v14, %v8336_v62  ;;  %v1572_v9 = vshll.u32 %v8216_v4, %v8368_v41 }
 0x18d   : > { %v8430_v15 = vsub.s32 32, %v1937_v24  ;;  %v1822_v56 = vmul.u32 %v1820_v48, %v1818_v10  ;;  %v1826_v20 = vshll.u32 %v8406_v18, 16  ;;  %v8433_v33 = vmul.u32 %v1842_v61, %v1819_v30 }
 0x18e   : > { %v2081_v7 = vshrl.u32 %v2080_v51, 23  ;;  %v1573_v28 = vshrl.u32 %v1555_v58, %v1571_v59  ;;  %v1577_v46 = vshll.u32 %v8413_v25, 23  ;;  %v1844_v37 = vmul.u32 %v1842_v61, %v1818_v10 }
 0x18f   : > { %v1848_v5 = vshll.u32 %v8415_v2, 16  ;;  %v8438_v14 = vsub.s32 %v8325_v17, %v1716_v11  ;;  %v1828_v38 = vshll.u32 %v8419_v16, 16  ;;  %v13707_v4 = vand.u32 2147483647, %v13696_v50 }
 0x190   : > { %v8443_v48 = vshrl.u32 %v1935_v60, 5  ;;  %v1949_v34 = vshll.u32 %v13699_v31, %v1937_v24  ;;  %v1950_v51 = vshrl.u32 %v13697_v35, %v8430_v15  ;;  %v1952_v58 = vshll.u32 %v13697_v35, %v1937_v24 }
 0x191   : > { %v1930_v41 = vand.u32 8388607, %v13707_v4  ;;  %v1953_v10 = vshrl.u32 %v13698_v43, %v8430_v15  ;;  %vm8451_vm0 = vc.u32 %v1822_v56, %v1826_v20  ;;  %v1832_v61 = vadd.s32 %v1826_v20, %v1822_v56 }
 0x192   : > { %v6006_v25 = vadd.s32 4294967169, %v2081_v7  ;;  %vm8456_vm12 = vc.u32 %v1844_v37, %v1848_v5  ;;  %v8460_v11 = vadd.s32 %v1848_v5, %v1844_v37  ;;  %v1940_v4 = vshll.u32 %v13629_v26, %v1937_v24 }
 0x193   : > { %v1941_v54 = vshrl.u32 %v13700_v45, %v8430_v15  ;;  %v1943_v27 = vshll.u32 %v13700_v45, %v1937_v24  ;;  %v1944_v63 = vshrl.u32 %v13701_v6, %v8430_v15  ;;  %v1946_v56 = vshll.u32 %v13701_v6, %v1937_v24 }
 0x194   : > { %v1947_v20 = vshrl.u32 %v13699_v31, %v8430_v15  ;;  %vm1718_vm11 = vcmp.lt.s32.totalorder %v8438_v14, 0  ;;  %v1825_v7 = vmul.u32 %v1821_v0, %v1819_v30  ;;  %v1951_v37 = vor.u32 %v1950_v51, %v1949_v34 }
 0x195   : > { %v1954_v5 = vor.u32 %v1953_v10, %v1952_v58  ;;  %v1719_v59 = vsub.s32 0, %v8438_v14  ;;  %v1831_v50 = vsel %vm8451_vm0, 1, %v13624_v32  ;;  %vm1958_vm5 = vcmp.lt.s32.totalorder %v8443_v48, 4 }
 0x196   : > { %v2087_v39 = vadd.s32 1, %v6006_v25  ;;  %vm1834_vm14 = vc.u32 %v1832_v61, %v1828_v38  ;;  %v1847_v1 = vmul.u32 %v1843_v3, %v1819_v30  ;;  %v1853_v24 = vsel %vm8456_vm12, 1, %v13624_v32 }
 0x197   : > { %vm1955_vm15 = vcmp.lt.s32.totalorder %v8443_v48, 1  ;;  %v13712_v34 = vshll.u32 %v8433_v33, 16  ;;  %v8488_v51 = vor.u32 %v1941_v54, %v1940_v4  ;;  %v8490_v58 = vor.u32 %v1944_v63, %v1943_v27 }
 0x198   : > { %v8492_v10 = vor.u32 %v1947_v20, %v1946_v56  ;;  %v1833_v38 = vadd.s32 %v1831_v50, %v1825_v7  ;;  %vm1957_vm9 = vcmp.lt.s32.totalorder %v8443_v48, 3  ;;  %v1964_v3 = vsel %vm1958_vm5, %v1951_v37, 920167782 }
 0x199   : > { %vm8484_vm8 = vc.u32 %v8460_v11, %v13712_v34  ;;  %v1968_v30 = vsel %vm1958_vm5, %v1954_v5, 1326507024  ;;  %vm1299_vm6 = vcmp.eq.s32.totalorder %v8391_v29, 0  ;;  %vm1302_vm4 = vcmp.eq.s32.totalorder %v8391_v29, 2 }
 0x19a   : > { %v1574_v17 = vor.u32 %v1573_v28, %v1572_v9  ;;  %v1835_v54 = vsel %vm1834_vm14, 1, %v13624_v32  ;;  %v1931_v63 = vor.u32 8388608, %v1930_v41  ;;  %vm2088_vm7 = vcmp.gt.s32.totalorder %v2087_v39, 0 }
 0x19b   : > { %v1720_v27 = vsel %vm1718_vm11, %v1719_v59, %v8438_v14  ;;  %v1855_v50 = vadd.s32 %v1853_v24, %v1847_v1  ;;  %v1857_v61 = vsel %vm8484_vm8, 1, %v13624_v32  ;;  %vm1956_vm13 = vcmp.lt.s32.totalorder %v8443_v48, 2 }
 0x19c   : > { %v1963_v9 = vsel %vm1955_vm15, %v8488_v51, %v8490_v58  ;;  %v1965_v28 = vsel %vm1957_vm9, %v8492_v10, %v1964_v3  ;;  %v1967_v1 = vsel %vm1955_vm15, %v8490_v58, %v8492_v10  ;;  %v1969_v41 = vsel %vm1957_vm9, %v1951_v37, %v1968_v30 }
 0x19d   : > { %v1578_v59 = vor.u32 4788187, %v1577_v46  ;;  %v1827_v25 = vshrl.u32 %v8406_v18, 16  ;;  %v1837_v60 = vadd.s32 %v1835_v54, %v1833_v38  ;;  %v2089_v4 = vsel %vm2088_vm7, %v2087_v39, 0 }
 0x19e   : > { %v1439_v56 = vadd.f32 -0.4999988, %v8423_v53  ;;  %v1721_v20 = vclz %v1720_v27  ;;  %v1785_v7 = vshrl.u32 %v13629_v26, %v8241_v36  ;;  %v8526_v5 = vshll.u32 %v1931_v63, 8 }
 0x19f   : > { %v1849_v24 = vshrl.u32 %v8415_v2, 16  ;;  %v1859_v34 = vadd.s32 %v1857_v61, %v1855_v50  ;;  %v8531_v0 = vsel %vm1956_vm13, %v1963_v9, %v1965_v28  ;;  %v8535_v18 = vsel %vm1956_vm13, %v1967_v1, %v1969_v41 }
 0x1a0   : > { %v1300_v39 = vxor.u32 2147483648, %v8404_v44  ;;  %v1446_v46 = vadd.f32 -0.16666654, %v8426_v23  ;;  %v1806_v36 = vsel %vm1804_vm10, %v8306_v49, 2102212464  ;;  %v2091_v53 = vand.u32 31, %v2089_v4 }
 0x1a1   : > { %v1579_v37 = vand.u32 2147483647, %v1578_v59  ;;  %v1581_v2 = vcvt.s32.f32 %v1574_v17  ;;  %v1829_v38 = vshrl.u32 %v8419_v16, 16  ;;  %v1838_v3 = vadd.s32 %v1837_v60, %v1827_v25 }
 0x1a2   : > { %v1805_v30 = vsel %vm1801_vm1, %v1785_v7, %v8308_v22  ;;  %v1972_v54 = vand.u32 65535, %v8526_v5  ;;  %v1975_v63 = vshrl.u32 %v8535_v18, 16  ;;  %v1997_v23 = vshrl.u32 %v8531_v0, 16 }
 0x1a3   : > { %v8549_v27 = vadd.s32 4294967294, %v1721_v20  ;;  %v1807_v49 = vsel %vm1803_vm3, %v8304_v42, %v1806_v36  ;;  %v1851_v17 = vshrl.u32 %v8433_v33, 16  ;;  %v1860_v16 = vadd.s32 %v1859_v34, %v1849_v24 }
 0x1a4   : > { %v1973_v50 = vshrl.u32 %v8526_v5, 16  ;;  %v1974_v61 = vand.u32 65535, %v8535_v18  ;;  %v1996_v22 = vand.u32 65535, %v8531_v0  ;;  %v8558_v9 = vsub.s32 32, %v2091_v53 }
 0x1a5   : > { %v8563_v28 = vsel %vm1299_vm6, %v8395_v40, %v1300_v39  ;;  %v13715_v1 = vxor.u32 2147483648, %v8395_v40  ;;  %v8572_v41 = vadd.s32 %v1838_v3, %v1829_v38  ;;  %v13716_v59 = vshll.u32 %v8433_v33, 16 }
 0x1a6   : > { %v8580_v60 = vmul.f32 %v1439_v56, %v8336_v62  ;;  %v8583_v20 = vmul.f32 %v1446_v46, %v8336_v62  ;;  %v8585_v7 = vmul.u32 %v1975_v63, %v1972_v54  ;;  %v8587_v40 = vmul.u32 %v1997_v23, %v1972_v54 }
 0x1a7   : > { %v8570_v42 = vsel %vm1302_vm4, %v13715_v1, %v8404_v44  ;;  %v8577_v25 = vadd.s32 %v8460_v11, %v13716_v59  ;;  %v8589_v24 = vmul.f32 %v1581_v2, %v1579_v37  ;;  %vm5999_vm10 = vcmp.lt.s32.totalorder %v8549_v27, 0 }
 0x1a8   : > { %v8594_v44 = vsel %vm1802_vm2, %v1805_v30, %v1807_v49  ;;  %v1861_v33 = vadd.s32 %v1860_v16, %v1851_v17  ;;  %v8596_v11 = vmul.u32 %v1974_v61, %v1973_v50  ;;  %v1998_v56 = vmul.u32 %v1996_v22, %v1972_v54 }
 0x1a9   : > { %v2106_v34 = vshll.u32 %v13697_v35, %v2091_v53  ;;  %v2107_v62 = vshrl.u32 %v13698_v43, %v8558_v9  ;;  %vm1864_vm1 = vc.u32 %v8572_v41, %v8577_v25  ;;  %v13425_v0 = vand.u32 2147483647, %v13706_v19  ;;  %v13719_v43 = vld [vmem:[#allocation35_spill] sm:$0xff] }
 0x1aa   : > { %v8604_v18 = vshrl.u32 %v2089_v4, 5  ;;  %v2103_v21 = vshll.u32 %v13699_v31, %v2091_v53  ;;  %v2104_v39 = vshrl.u32 %v13697_v35, %v8558_v9  ;;  %v1976_v46 = vmul.u32 %v1974_v61, %v1972_v54 }
 0x1ab   : > { %v1980_v36 = vshll.u32 %v8585_v7, 16  ;;  %v8610_v37 = vmul.u32 %v1996_v22, %v1973_v50  ;;  %v2002_v2 = vshll.u32 %v8587_v40, 16  ;;  %v2097_v38 = vshll.u32 %v13700_v45, %v2091_v53 }
 0x1ac   : > { %v2098_v3 = vshrl.u32 %v13701_v6, %v8558_v9  ;;  %v2100_v4 = vshll.u32 %v13701_v6, %v2091_v53  ;;  %v2101_v30 = vshrl.u32 %v13699_v31, %v8558_v9  ;;  %vm1298_vm3 = vcmp.lt.s32.totalorder %v8391_v29, 2 }
 0x1ad   : > { %v1865_v49 = vadd.s32 1, %v1861_v33  ;;  %v2094_v54 = vshll.u32 %v13629_v26, %v2091_v53  ;;  %v2095_v17 = vshrl.u32 %v13700_v45, %v8558_v9  ;;  %v2108_v16 = vor.u32 %v2107_v62, %v2106_v34 }
 0x1ae   : > { %v1982_v61 = vshll.u32 %v8596_v11, 16  ;;  %v2084_v22 = vand.u32 8388607, %v13425_v0  ;;  %v2105_v1 = vor.u32 %v2104_v39, %v2103_v21  ;;  %vm2112_vm2 = vcmp.lt.s32.totalorder %v8604_v18, 4 }
 0x1af   : > { %vm8627_vm0 = vc.u32 %v1976_v46, %v1980_v36  ;;  %v2004_v6 = vshll.u32 %v8610_v37, 16  ;;  %vm2006_vm12 = vc.u32 %v1998_v56, %v2002_v2  ;;  %v8632_v53 = vadd.s32 %v2002_v2, %v1998_v56 }
 0x1b0   : > { %vm1463_vm11 = vcmp.lt.s32.totalorder %v13719_v43, 0  ;;  %v1986_v34 = vadd.s32 %v1980_v36, %v1976_v46  ;;  %v2001_v62 = vmul.u32 %v1997_v23, %v1973_v50  ;;  %v8635_v45 = vor.u32 %v2098_v3, %v2097_v38 }
 0x1b1   : > { %v8637_v19 = vor.u32 %v2101_v30, %v2100_v4  ;;  %v8639_v21 = vor.u32 %v2095_v17, %v2094_v54  ;;  %vm2109_vm14 = vcmp.lt.s32.totalorder %v8604_v18, 1  ;;  %vm2111_vm8 = vcmp.lt.s32.totalorder %v8604_v18, 3 }
 0x1b2   : > { %v2122_v39 = vsel %vm2112_vm2, %v2108_v16, 1326507024  ;;  %v1979_v0 = vmul.u32 %v1975_v63, %v1973_v50  ;;  %v2007_v56 = vsel %vm2006_vm12, 1, %v13624_v32  ;;  %v2085_v2 = vor.u32 8388608, %v2084_v22 }
 0x1b3   : > { %v2118_v23 = vsel %vm2112_vm2, %v2105_v1, 920167782  ;;  %v1724_v46 = vsel %vm5999_vm10, 0, %v8549_v27  ;;  %v1862_v36 = vmul.u32 %v8356_v12, %v8594_v44  ;;  %v1985_v38 = vsel %vm8627_vm0, 1, %v13624_v32 }
 0x1b4   : > { %vm2010_vm6 = vc.u32 %v8632_v53, %v2004_v6  ;;  %v13720_v63 = vand.u32 2147483647, %v13719_v43  ;;  %vm1988_vm7 = vc.u32 %v1986_v34, %v1982_v61  ;;  %vm2110_vm10 = vcmp.lt.s32.totalorder %v8604_v18, 2 }
 0x1b5   : > { %v2121_v12 = vsel %vm2109_vm14, %v8635_v45, %v8637_v19  ;;  %v2123_v27 = vsel %vm2111_vm8, %v2105_v1, %v2122_v39  ;;  %v1866_v44 = vsel %vm1864_vm1, %v1865_v49, %v1861_v33  ;;  %v2009_v3 = vadd.s32 %v2007_v56, %v2001_v62 }
 0x1b6   : > { %vm8661_vm4 = vcmp.le.f32.partialorder %v13720_v63, 0.7853982  ;;  %v2117_v4 = vsel %vm2109_vm14, %v8639_v21, %v8635_v45  ;;  %v2119_v30 = vsel %vm2111_vm8, %v8637_v19, %v2118_v23  ;;  %v1709_v54 = vadd.s32 %v8268_v57, %v8263_v52  ;;  %v13724_v63 = vld [vmem:[#allocation42_spill] sm:$0xff] }
 0x1b7   : > { %v1987_v17 = vadd.s32 %v1985_v38, %v1979_v0  ;;  %v2011_v16 = vsel %vm2010_vm6, 1, %v13624_v32  ;;  %v8685_v61 = vshll.u32 %v2085_v2, 8  ;;  %v1583_v33 = vxor.u32 2147483648, %v8589_v24 }
 0x1b8   : > { %v1725_v49 = vsub.s32 32, %v1724_v46  ;;  %v1989_v22 = vsel %vm1988_vm7, 1, %v13624_v32  ;;  %v8691_v1 = vsel %vm2110_vm10, %v2121_v12, %v2123_v27  ;;  %v8697_v59 = vsel %vm1298_vm3, %v8563_v28, %v8570_v42 }
 0x1b9   : > { %13723 = vst [vmem:[#allocation15_spill] sm:$0xff] %v8697_v59  ;;  %v1729_v52 = vsub.s32 4294967266, %v1724_v46  ;;  %v8699_v57 = vadd.s32 %v1866_v44, %v1862_v36  ;;  %v8703_v0 = vsel %vm2110_vm10, %v2117_v4, %v2119_v30  ;;  %v8706_v34 = vadd.f32 1.0, %v8580_v60 }
 0x1ba   : > { %v1448_v62 = vadd.f32 1.0, %v8583_v20  ;;  %v2003_v39 = vshrl.u32 %v8587_v40, 16  ;;  %v2013_v56 = vadd.s32 %v2011_v16, %v2009_v3  ;;  %v1981_v2 = vshrl.u32 %v8585_v7, 16 }
 0x1bb   : > { %v1991_v29 = vadd.s32 %v1989_v22, %v1987_v17  ;;  %v2126_v28 = vand.u32 65535, %v8685_v61  ;;  %v2129_v42 = vshrl.u32 %v8691_v1, 16  ;;  %v1584_v23 = vsel %vm1463_vm11, %v1583_v33, %v8589_v24 }
 0x1bc   : > { %v1726_v36 = vshll.u32 %v8438_v14, %v1724_v46  ;;  %v1727_v60 = vshrl.u32 %v1709_v54, %v1725_v49  ;;  %v2151_v38 = vshrl.u32 %v8703_v0, 16  ;;  %v1730_v20 = vadd.s32 127, %v1729_v52 }
 0x1bd   : > { %v1868_v40 = vadd.s32 536870912, %v8699_v57  ;;  %v1939_v7 = vshrl.u32 %v13629_v26, %v8430_v15  ;;  %v2234_v12 = vand.u32 2139095040, %v13724_v63  ;;  %v1960_v27 = vsel %vm1958_vm5, %v8492_v10, 2102212464 }
 0x1be   : > { %v1983_v44 = vshrl.u32 %v8596_v11, 16  ;;  %v2005_v24 = vshrl.u32 %v8610_v37, 16  ;;  %v2014_v14 = vadd.s32 %v2013_v56, %v2003_v39  ;;  %v1992_v46 = vadd.s32 %v1991_v29, %v1981_v2 }
 0x1bf   : > { %v2127_v3 = vshrl.u32 %v8685_v61, 16  ;;  %v2128_v4 = vand.u32 65535, %v8691_v1  ;;  %v8731_v30 = vmul.u32 %v2129_v42, %v2126_v28  ;;  %v8734_v15 = vmul.f32 %v1448_v62, %v8317_v55  ;;  %v13731_v1 = vld [vmem:[#allocation24_spill] sm:$0xff] }
 0x1c0   : > { %vm1456_vm1 = vcmp.eq.s32.totalorder %v8401_v8, 2  ;;  %v8740_v10 = vsel %vm8661_vm4, %v13719_v43, %v1584_v23  ;;  %v2150_v11 = vand.u32 65535, %v8703_v0  ;;  %v8743_v54 = vmul.u32 %v2151_v38, %v2126_v28 }
 0x1c1   : > { %13725 = vst [vmem:[#allocation48_spill] sm:$0xff] %v8740_v10  ;;  %v1728_v17 = vor.u32 %v1727_v60, %v1726_v36  ;;  %v1731_v16 = vshll.u32 %v1730_v20, 23  ;;  %v8745_v33 = vshrl.u32 %v1868_v40, 30  ;;  %v2235_v49 = vshrl.u32 %v2234_v12, 23 }
 0x1c2   : > { %v1959_v55 = vsel %vm1955_vm15, %v1939_v7, %v8488_v51  ;;  %v1961_v22 = vsel %vm1957_vm9, %v8490_v58, %v1960_v27  ;;  %v8756_v52 = vadd.s32 %v8632_v53, %v2004_v6  ;;  %v2015_v0 = vadd.s32 %v2014_v14, %v2005_v24 }
 0x1c3   : > { %13726 = vst [vmem:[#allocation14_spill] sm:$0xff] %v8745_v33  ;;  %v8758_v62 = vadd.s32 %v1992_v46, %v1983_v44  ;;  %v2130_v39 = vmul.u32 %v2128_v4, %v2126_v28  ;;  %v8760_v56 = vmul.u32 %v2128_v4, %v2127_v3  ;;  %v2134_v2 = vshll.u32 %v8731_v30, 16 }
 0x1c4   : > { %13727 = vst [vmem:[#allocation46_spill] sm:$0xff] %v8756_v52  ;;  %vm1453_vm5 = vcmp.eq.s32.totalorder %v8401_v8, 0  ;;  %v8766_v51 = vmul.f32 %v8740_v10, %v8740_v10  ;;  %v2152_v58 = vmul.u32 %v2150_v11, %v2126_v28  ;;  %v8768_v29 = vmul.u32 %v2150_v11, %v2127_v3 }
 0x1c5   : > { %13728 = vst [vmem:[#allocation50_spill] sm:$0xff] %v8758_v62  ;;  %v2156_v6 = vshll.u32 %v8743_v54, 16  ;;  %v1457_v37 = vxor.u32 2147483648, %v8706_v34  ;;  %v1732_v53 = vor.u32 4788187, %v1731_v16  ;;  %v1870_v23 = vshll.u32 %v8745_v33, 30 }
 0x1c6   : > { %v6009_v36 = vadd.s32 4294967169, %v2235_v49  ;;  %v1585_v60 = vsub.s32 4, %v8181_v47  ;;  %v1590_v20 = vmul.f32 -0.001358992, %v8766_v51  ;;  %v1962_v40 = vsel %vm1956_vm13, %v1959_v55, %v1961_v22 }
 0x1c7   : > { %v2019_v7 = vadd.s32 1, %v2015_v0  ;;  %v1735_v12 = vcvt.s32.f32 %v1728_v17  ;;  %vm2018_vm15 = vc.u32 %v8758_v62, %v8756_v52  ;;  %v2136_v28 = vshll.u32 %v8760_v56, 16 }
 0x1c8   : > { %vm8780_vm9 = vc.u32 %v2130_v39, %v2134_v2  ;;  %vm1452_vm3 = vcmp.lt.s32.totalorder %v8401_v8, 2  ;;  %v2140_v44 = vadd.s32 %v2134_v2, %v2130_v39  ;;  %v2158_v24 = vshll.u32 %v8768_v29, 16 }
 0x1c9   : > { %vm2160_vm0 = vc.u32 %v2152_v58, %v2156_v6  ;;  %v8786_v14 = vadd.s32 %v2156_v6, %v2152_v58  ;;  %v1733_v48 = vand.u32 2147483647, %v1732_v53  ;;  %v8789_v46 = vsub.s32 %v8699_v57, %v1870_v23 }
 0x1ca   : > { %v2016_v4 = vmul.u32 %v8526_v5, %v1962_v40  ;;  %v2241_v11 = vadd.s32 1, %v6009_v36  ;;  %v1454_v17 = vxor.u32 2147483648, %v8734_v15  ;;  %v2020_v16 = vsel %vm2018_vm15, %v2019_v7, %v2015_v0 }
 0x1cb   : > { %v2133_v49 = vmul.u32 %v2129_v42, %v2127_v3  ;;  %v2155_v55 = vmul.u32 %v2151_v38, %v2127_v3  ;;  %v1458_v22 = vsel %vm1456_vm1, %v1457_v37, %v8734_v15  ;;  %v1597_v39 = vmul.f32 -0.00019511016, %v8766_v51 }
 0x1cc   : > { %v2139_v57 = vsel %vm8780_vm9, 1, %v13624_v32  ;;  %v2161_v5 = vsel %vm2160_vm0, 1, %v13624_v32  ;;  %v1591_v2 = vadd.f32 0.041655596, %v1590_v20  ;;  %vm2142_vm13 = vc.u32 %v2140_v44, %v2136_v28 }
 0x1cd   : > { %vm2164_vm12 = vc.u32 %v8786_v14, %v2158_v24  ;;  %v2388_v42 = vand.u32 2139095040, %v13731_v1  ;;  %v1736_v38 = vmul.f32 %v1735_v12, %v1733_v48  ;;  %v1873_v3 = vsub.s32 0, %v8789_v46 }
 0x1ce   : > { %v8808_v15 = vadd.s32 %v2020_v16, %v2016_v4  ;;  %vm2242_vm6 = vcmp.gt.s32.totalorder %v2241_v11, 0  ;;  %v1586_v0 = vsel %vm1463_vm11, %v1585_v60, %v8181_v47  ;;  %vm1872_vm7 = vcmp.lt.s32.totalorder %v8789_v46, 0  ;;  %v13732_v47 = vld [vmem:[#allocation36_spill] sm:$0xff] }
 0x1cf   : > { %v2141_v58 = vadd.s32 %v2139_v57, %v2133_v49  ;;  %v2163_v6 = vadd.s32 %v2161_v5, %v2155_v55  ;;  %v1455_v37 = vsel %vm1453_vm5, %v8706_v34, %v1454_v17  ;;  %v1739_v53 = vsub.s32 4, %v8397_v13 }
 0x1d0   : > { %v2143_v23 = vsel %vm2142_vm13, 1, %v13624_v32  ;;  %v2165_v36 = vsel %vm2164_vm12, 1, %v13624_v32  ;;  %v1592_v20 = vmul.f32 %v1591_v2, %v8766_v51  ;;  %v1598_v40 = vadd.f32 0.008332121, %v1597_v39 }
 0x1d1   : > { %v2243_v7 = vsel %vm2242_vm6, %v2241_v11, 0  ;;  %v2389_v12 = vshrl.u32 %v2388_v42, 23  ;;  %vm1617_vm11 = vcmp.lt.s32.totalorder %v13732_v47, 0  ;;  %v1737_v60 = vxor.u32 2147483648, %v1736_v38 }
 0x1d2   : > { %v1874_v28 = vsel %vm1872_vm7, %v1873_v3, %v8789_v46  ;;  %v2022_v27 = vadd.s32 536870912, %v8808_v15  ;;  %v2135_v34 = vshrl.u32 %v8731_v30, 16  ;;  %v2145_v44 = vadd.s32 %v2143_v23, %v2141_v58 }
 0x1d3   : > { %v2157_v48 = vshrl.u32 %v8743_v54, 16  ;;  %v2167_v4 = vadd.s32 %v2165_v36, %v2163_v6  ;;  %v8828_v17 = vsel %vm1452_vm3, %v1455_v37, %v1458_v22  ;;  %v1588_v11 = vsel %vm8661_vm4, 0, %v1586_v0 }
 0x1d4   : > { %13733 = vst [vmem:[#allocation51_spill] sm:$0xff] %v8828_v17  ;;  %v13734_v16 = vand.u32 2147483647, %v13732_v47  ;;  %v13735_v49 = vmov 0  ;;  %v2245_v55 = vand.u32 31, %v2243_v7  ;;  %v1599_v30 = vmul.f32 %v1598_v40, %v8766_v51 }
 0x1d5   : > { %v1593_v39 = vadd.f32 -0.4999988, %v1592_v20  ;;  %v8842_v54 = vsel %vm1617_vm11, %v1739_v53, %v8397_v13  ;;  %v6012_v8 = vadd.s32 4294967169, %v2389_v12  ;;  %v1738_v50 = vsel %vm1617_vm11, %v1737_v60, %v1736_v38 }
 0x1d6   : > { %vm8834_vm1 = vcmp.le.f32.partialorder %v13734_v16, 0.7853982  ;;  %13738 = vst [vmem:[#allocation53_spill] sm:$0xff] %v8842_v54  ;;  %v1875_v22 = vclz %v1874_v28  ;;  %v8846_v57 = vshrl.u32 %v2022_v27, 30  ;;  %v2093_v5 = vshrl.u32 %v13629_v26, %v8558_v9 }
 0x1d7   : > { %v13736_v49 = vsel %vm8834_vm1, 4294967295, %v13735_v49  ;;  %v2137_v2 = vshrl.u32 %v8760_v56, 16  ;;  %v2146_v42 = vadd.s32 %v2145_v44, %v2135_v34  ;;  %v2159_v3 = vshrl.u32 %v8768_v29, 16 }
 0x1d8   : > { %13737 = vst [vmem:[#allocation52_spill] sm:$0xff] %v13736_v49  ;;  %v2168_v0 = vadd.s32 %v2167_v4, %v2157_v48  ;;  %v8852_v58 = vand.u32 3, %v1588_v11  ;;  %v2114_v38 = vsel %vm2112_vm2, %v8637_v19, 2102212464  ;;  %v2246_v6 = vsub.s32 32, %v2245_v55 }
 0x1d9   : > { %13739 = vst [vmem:[#allocation54_spill] sm:$0xff] %v8846_v57  ;;  %v8861_v37 = vmul.f32 %v1593_v39, %v8766_v51  ;;  %v1600_v9 = vadd.f32 -0.16666654, %v1599_v30  ;;  %v8866_v56 = vsel %vm8834_vm1, %v13732_v47, %v1738_v50  ;;  %v2395_v53 = vadd.s32 1, %v6012_v8 }
 0x1da   : > { %13740 = vst [vmem:[#allocation55_spill] sm:$0xff] %v8852_v58  ;;  %v6001_v23 = vadd.s32 4294967294, %v1875_v22  ;;  %v2024_v36 = vshll.u32 %v8846_v57, 30  ;;  %v2113_v20 = vsel %vm2109_vm14, %v2093_v5, %v8639_v21  ;;  %v13426_v19 = vand.u32 2147483647, %v13724_v63 }
 0x1db   : > { %13741 = vst [vmem:[#allocation56_spill] sm:$0xff] %v8861_v37  ;;  %v2115_v40 = vsel %vm2111_vm8, %v8635_v45, %v2114_v38  ;;  %v8876_v12 = vadd.s32 %v2146_v42, %v2137_v2  ;;  %v8881_v60 = vadd.s32 %v8786_v14, %v2158_v24  ;;  %v2169_v28 = vadd.s32 %v2168_v0, %v2159_v3  ;;  %v13749_v3 = vld [vmem:[#allocation19_spill] sm:$0xff] }
 0x1dc   : > { %13742 = vst [vmem:[#allocation57_spill] sm:$0xff] %v8866_v56  ;;  %v2257_v27 = vshll.u32 %v13699_v31, %v2245_v55  ;;  %v2258_v34 = vshrl.u32 %v13697_v35, %v2246_v6  ;;  %v2260_v21 = vshll.u32 %v13697_v35, %v2245_v55  ;;  %v13745_v44 = vmov 1326507024  }
 0x1dd   : > { %13743 = vst [vmem:[#allocation58_spill] sm:$0xff] %v8876_v12  ;;  %v2261_v48 = vshrl.u32 %v13745_v44, %v2246_v6  ;;  %v8887_v4 = vshrl.u32 %v2243_v7, 5  ;;  %v2248_v45 = vshll.u32 %v13629_v26, %v2245_v55  ;;  %v13746_v11 = vmov 2475754826  }
 0x1de   : > { %13744 = vst [vmem:[#allocation59_spill] sm:$0xff] %v8881_v60  ;;  %v2251_v16 = vshll.u32 %v13746_v11, %v2245_v55  ;;  %vm2396_vm2 = vcmp.gt.s32.totalorder %v2395_v53, 0  ;;  %v2249_v29 = vshrl.u32 %v13746_v11, %v2246_v6  ;;  %v13747_v24 = vmov 2131351028  }
 0x1df   : > { %v2252_v14 = vshrl.u32 %v13747_v24, %v2246_v6  ;;  %v2254_v39 = vshll.u32 %v13747_v24, %v2245_v55  ;;  %v2255_v30 = vshrl.u32 %v13699_v31, %v2246_v6  ;;  %v8897_v8 = vmul.f32 %v8866_v56, %v8866_v56 }
 0x1e0   : > { %v2116_v7 = vsel %vm2110_vm10, %v2113_v20, %v2115_v40  ;;  %v2173_v50 = vadd.s32 1, %v2169_v28  ;;  %v2238_v22 = vand.u32 8388607, %v13426_v19  ;;  %vm2172_vm14 = vc.u32 %v8876_v12, %v8881_v60 }
 0x1e1   : > { %v2259_v5 = vor.u32 %v2258_v34, %v2257_v27  ;;  %v2262_v2 = vor.u32 %v2261_v48, %v2260_v21  ;;  %v2397_v42 = vsel %vm2396_vm2, %v2395_v53, 0  ;;  %vm6002_vm8 = vcmp.lt.s32.totalorder %v6001_v23, 0 }
 0x1e2   : > { %v8906_v55 = vsub.s32 %v8808_v15, %v2024_v36  ;;  %vm2266_vm4 = vcmp.lt.s32.totalorder %v8887_v4, 4  ;;  %v2542_v0 = vand.u32 2139095040, %v13749_v3  ;;  %v2170_v18 = vmul.u32 %v8685_v61, %v2116_v7 }
 0x1e3   : > { %v2250_v38 = vor.u32 %v2249_v29, %v2248_v45  ;;  %v2253_v20 = vor.u32 %v2252_v14, %v2251_v16  ;;  %v2256_v40 = vor.u32 %v2255_v30, %v2254_v39  ;;  %v2174_v19 = vsel %vm2172_vm14, %v2173_v50, %v2169_v28 }
 0x1e4   : > { %13748 = vst [vmem:[#allocation60_spill] sm:$0xff] %v8906_v55  ;;  %v2239_v13 = vor.u32 8388608, %v2238_v22  ;;  %vm2263_vm10 = vcmp.lt.s32.totalorder %v8887_v4, 1  ;;  %v2399_v27 = vand.u32 31, %v2397_v42  ;;  %v8912_v34 = vsel %vm6002_vm8, 0, %v6001_v23 }
 0x1e5   : > { %vm2265_vm5 = vcmp.lt.s32.totalorder %v8887_v4, 3  ;;  %v2272_v15 = vsel %vm2266_vm4, %v2259_v5, 920167782  ;;  %v2276_v53 = vsel %vm2266_vm4, %v2262_v2, 1326507024  ;;  %vm2026_vm15 = vcmp.lt.s32.totalorder %v8906_v55, 0 }
 0x1e6   : > { %v2027_v61 = vsub.s32 0, %v8906_v55  ;;  %v2247_v36 = vshrl.u32 %v13629_v26, %v2246_v6  ;;  %v2543_v28 = vshrl.u32 %v2542_v0, 23  ;;  %v8922_v21 = vadd.s32 %v2174_v19, %v2170_v18 }
 0x1e7   : > { %vm2264_vm9 = vcmp.lt.s32.totalorder %v8887_v4, 2  ;;  %v2271_v23 = vsel %vm2263_vm10, %v2250_v38, %v2253_v20  ;;  %v2275_v48 = vsel %vm2263_vm10, %v2253_v20, %v2256_v40  ;;  %v2273_v45 = vsel %vm2265_vm5, %v2256_v40, %v2272_v15 }
 0x1e8   : > { %v2277_v16 = vsel %vm2265_vm5, %v2259_v5, %v2276_v53  ;;  %v8933_v29 = vshll.u32 %v2239_v13, 8  ;;  %v8935_v6 = vsub.s32 32, %v2399_v27  ;;  %v8938_v19 = vmul.f32 %v1600_v9, %v8766_v51 }
 0x1e9   : > { %v8941_v14 = vmul.f32 -0.001358992, %v8897_v8  ;;  %v8945_v39 = vadd.s32 %v8577_v25, %v8572_v41  ;;  %v8951_v7 = vsel %vm2026_vm15, %v2027_v61, %v8906_v55  ;;  %v8955_v13 = vsel %vm2263_vm10, %v2247_v36, %v2250_v38 }
 0x1ea   : > { %13750 = vst [vmem:[#allocation61_spill] sm:$0xff] %v8938_v19  ;;  %v2268_v51 = vsel %vm2266_vm4, %v2256_v40, 2102212464  ;;  %v6015_v9 = vadd.s32 4294967169, %v2543_v28  ;;  %v8960_v50 = vadd.s32 536870912, %v8922_v21  ;;  %v2274_v41 = vsel %vm2264_vm9, %v2271_v23, %v2273_v45 }
 0x1eb   : > { %13751 = vst [vmem:[#allocation62_spill] sm:$0xff] %v8941_v14  ;;  %v2278_v25 = vsel %vm2264_vm9, %v2275_v48, %v2277_v16  ;;  %v2280_v5 = vand.u32 65535, %v8933_v29  ;;  %v2281_v2 = vshrl.u32 %v8933_v29, 16  ;;  %v2414_v0 = vshll.u32 %v13697_v35, %v2399_v27 }
 0x1ec   : > { %v2415_v18 = vshrl.u32 %v13745_v44, %v8935_v6  ;;  %v2304_v38 = vand.u32 65535, %v2274_v41  ;;  %v8972_v40 = vshrl.u32 %v2397_v42, 5  ;;  %v2411_v15 = vshll.u32 %v13699_v31, %v2399_v27 }
 0x1ed   : > { %v2412_v53 = vshrl.u32 %v13697_v35, %v8935_v6  ;;  %v2282_v61 = vand.u32 65535, %v2278_v25  ;;  %v2283_v36 = vshrl.u32 %v2278_v25, 16  ;;  %v2305_v28 = vshrl.u32 %v2274_v41, 16 }
 0x1ee   : > { %v2549_v23 = vadd.s32 1, %v6015_v9  ;;  %v2405_v48 = vshll.u32 %v13746_v11, %v2399_v27  ;;  %v2406_v45 = vshrl.u32 %v13747_v24, %v8935_v6  ;;  %v2408_v16 = vshll.u32 %v13747_v24, %v2399_v27 }
 0x1ef   : > { %v2409_v42 = vshrl.u32 %v13699_v31, %v8935_v6  ;;  %v8985_v30 = vsel %vm2265_vm5, %v2253_v20, %v2268_v51  ;;  %v2402_v22 = vshll.u32 %v13629_v26, %v2399_v27  ;;  %v2403_v41 = vshrl.u32 %v13746_v11, %v8935_v6 }
 0x1f0   : > { %v2416_v9 = vor.u32 %v2415_v18, %v2414_v0  ;;  %v2306_v25 = vmul.u32 %v2304_v38, %v2280_v5  ;;  %v13752_v47 = vand.u32 2147483647, %v13731_v1  ;;  %v2413_v57 = vor.u32 %v2412_v53, %v2411_v15 }
 0x1f1   : > { %vm2420_vm3 = vcmp.lt.s32.totalorder %v8972_v40, 4  ;;  %v8993_v63 = vmul.u32 %v2283_v36, %v2280_v5  ;;  %v8995_v17 = vmul.u32 %v2282_v61, %v2281_v2  ;;  %v8997_v59 = vmul.u32 %v2305_v28, %v2280_v5 }
 0x1f2   : > { %v2392_v43 = vand.u32 8388607, %v13752_v47  ;;  %v8999_v20 = vmul.u32 %v2304_v38, %v2281_v2  ;;  %v2284_v27 = vmul.u32 %v2282_v61, %v2280_v5  ;;  %v9001_v51 = vor.u32 %v2406_v45, %v2405_v48 }
 0x1f3   : > { %v9003_v33 = vor.u32 %v2409_v42, %v2408_v16  ;;  %vm2550_vm0 = vcmp.gt.s32.totalorder %v2549_v23, 0  ;;  %v9005_v0 = vor.u32 %v2403_v41, %v2402_v22  ;;  %vm2417_vm13 = vcmp.lt.s32.totalorder %v8972_v40, 1 }
 0x1f4   : > { %vm2419_vm12 = vcmp.lt.s32.totalorder %v8972_v40, 3  ;;  %v2430_v47 = vsel %vm2420_vm3, %v2416_v9, 1326507024  ;;  %v2287_v18 = vmul.u32 %v2283_v36, %v2281_v2  ;;  %v9011_v15 = vmul.u32 %v2305_v28, %v2281_v2 }
 0x1f5   : > { %v2393_v38 = vor.u32 8388608, %v2392_v43  ;;  %v2426_v5 = vsel %vm2420_vm3, %v2413_v57, 920167782  ;;  %v2288_v53 = vshll.u32 %v8993_v63, 16  ;;  %v2290_v61 = vshll.u32 %v8995_v17, 16 }
 0x1f6   : > { %v2310_v22 = vshll.u32 %v8997_v59, 16  ;;  %v2551_v48 = vsel %vm2550_vm0, %v2549_v23, 0  ;;  %vm2418_vm6 = vcmp.lt.s32.totalorder %v8972_v40, 2  ;;  %v2429_v36 = vsel %vm2417_vm13, %v9001_v51, %v9003_v33 }
 0x1f7   : > { %v2431_v43 = vsel %vm2419_vm12, %v2413_v57, %v2430_v47  ;;  %v2425_v45 = vsel %vm2417_vm13, %v9005_v0, %v9001_v51  ;;  %v2427_v23 = vsel %vm2419_vm12, %v9003_v33, %v2426_v5  ;;  %v2553_v16 = vand.u32 31, %v2551_v48 }
 0x1f8   : > { %v9037_v9 = vshll.u32 %v2393_v38, 8  ;;  %vm2292_vm7 = vc.u32 %v2284_v27, %v2288_v53  ;;  %vm9039_vm11 = vc.u32 %v2306_v25, %v2310_v22  ;;  %v9045_v28 = vsel %vm2418_vm6, %v2429_v36, %v2431_v43 }
 0x1f9   : > { %v9047_v2 = vsub.s32 32, %v2553_v16  ;;  %v2294_v5 = vadd.s32 %v2288_v53, %v2284_v27  ;;  %v9049_v1 = vadd.s32 %v2310_v22, %v2306_v25  ;;  %v9053_v41 = vsel %vm2418_vm6, %v2425_v45, %v2427_v23 }
 0x1fa   : > { %13753 = vst [vmem:[#allocation63_spill] sm:$0xff] %v9037_v9  ;;  %v13756_v38 = vand.u32 2147483647, %v13749_v3  ;;  %v2556_v57 = vshll.u32 %v13629_v26, %v2553_v16  ;;  %v2559_v36 = vshll.u32 %v13746_v11, %v2553_v16  ;;  %v2293_v25 = vsel %vm2292_vm7, 1, %v13624_v32 }
 0x1fb   : > { %v2557_v56 = vshrl.u32 %v13746_v11, %v9047_v2  ;;  %v2560_v43 = vshrl.u32 %v13747_v24, %v9047_v2  ;;  %v2434_v27 = vand.u32 65535, %v9037_v9  ;;  %v9066_v22 = vshrl.u32 %v2551_v48, 5 }
 0x1fc   : > { %v2546_v42 = vand.u32 8388607, %v13756_v38  ;;  %v2562_v45 = vshll.u32 %v13747_v24, %v2553_v16  ;;  %v2563_v23 = vshrl.u32 %v13699_v31, %v9047_v2  ;;  %v2565_v38 = vshll.u32 %v13699_v31, %v2553_v16 }
 0x1fd   : > { %v2566_v3 = vshrl.u32 %v13697_v35, %v9047_v2  ;;  %vm2296_vm2 = vc.u32 %v2294_v5, %v2290_v61  ;;  %v2315_v54 = vsel %vm9039_vm11, 1, %v13624_v32  ;;  %v2459_v49 = vshrl.u32 %v9053_v41, 16 }
 0x1fe   : > { %v2547_v53 = vor.u32 8388608, %v2546_v42  ;;  %v9078_v48 = vor.u32 %v2557_v56, %v2556_v57  ;;  %v9080_v60 = vor.u32 %v2560_v43, %v2559_v36  ;;  %v2568_v12 = vshll.u32 %v13697_v35, %v2553_v16 }
 0x1ff   : > { %v2569_v10 = vshrl.u32 %v13745_v44, %v9047_v2  ;;  %v2295_v37 = vadd.s32 %v2293_v25, %v2287_v18  ;;  %v2436_v58 = vand.u32 65535, %v9045_v28  ;;  %v2567_v61 = vor.u32 %v2566_v3, %v2565_v38 }
 0x200   : > { %vm2571_vm14 = vcmp.lt.s32.totalorder %v9066_v22, 1  ;;  %v2297_v47 = vsel %vm2296_vm2, 1, %v13624_v32  ;;  %v13757_v5 = vshrl.u32 %v9045_v28, 16  ;;  %v9092_v56 = vor.u32 %v2563_v23, %v2562_v45 }
 0x201   : > { %v2570_v57 = vor.u32 %v2569_v10, %v2568_v12  ;;  %v2435_v16 = vshrl.u32 %v9037_v9, 16  ;;  %v2458_v36 = vand.u32 65535, %v9053_v41  ;;  %v9096_v43 = vmul.u32 %v2459_v49, %v2434_v27 }
 0x202   : > { %v9090_v42 = vmul.u32 %v13757_v5, %v2434_v27  ;;  %vm2573_vm8 = vcmp.lt.s32.totalorder %v9066_v22, 3  ;;  %vm2572_vm4 = vcmp.lt.s32.totalorder %v9066_v22, 2  ;;  %vm2574_vm10 = vcmp.lt.s32.totalorder %v9066_v22, 4  ;;  %v13771_v22 = vld [vmem:[#allocation63_spill] sm:$0xff] }
 0x203   : > { %v2579_v3 = vsel %vm2571_vm14, %v9078_v48, %v9080_v60  ;;  %v9105_v18 = vshll.u32 %v2547_v53, 8  ;;  %v2299_v10 = vadd.s32 %v2297_v47, %v2295_v37  ;;  %v13759_v12 = vshll.u32 %v8999_v20, 16 }
 0x204   : > { %v2438_v41 = vmul.u32 %v2436_v58, %v2434_v27  ;;  %v2580_v25 = vsel %vm2574_vm10, %v2567_v61, 920167782  ;;  %v2442_v45 = vshll.u32 %v9090_v42, 16  ;;  %v2583_v53 = vsel %vm2571_vm14, %v9080_v60, %v9092_v56 }
 0x205   : > { %13758 = vst [vmem:[#allocation64_spill] sm:$0xff] %v9105_v18  ;;  %vm2318_vm5 = vc.u32 %v9049_v1, %v13759_v12  ;;  %v2581_v23 = vsel %vm2573_vm8, %v9092_v56, %v2580_v25  ;;  %v2584_v37 = vsel %vm2574_vm10, %v2570_v57, 1326507024  ;;  %v2460_v38 = vmul.u32 %v2458_v36, %v2434_v27 }
 0x206   : > { %v9122_v47 = vmul.u32 %v2458_v36, %v2435_v16  ;;  %v2464_v5 = vshll.u32 %v9096_v43, 16  ;;  %v2582_v12 = vsel %vm2572_vm4, %v2579_v3, %v2581_v23  ;;  %v2317_v55 = vadd.s32 %v2315_v54, %v9011_v15 }
 0x207   : > { %v2319_v25 = vsel %vm2318_vm5, 1, %v13624_v32  ;;  %v2585_v52 = vsel %vm2573_vm8, %v2567_v61, %v2584_v37  ;;  %v2588_v62 = vand.u32 65535, %v9105_v18  ;;  %v9132_v44 = vmul.u32 %v2436_v58, %v2435_v16 }
 0x208   : > { %v2586_v27 = vsel %vm2572_vm4, %v2583_v53, %v2585_v52  ;;  %v2589_v57 = vshrl.u32 %v9105_v18, 16  ;;  %v2613_v36 = vshrl.u32 %v2582_v12, 16  ;;  %v13760_v24 = vshrl.u32 %v8993_v63, 16 }
 0x209   : > { %v2313_v54 = vshrl.u32 %v8999_v20, 16  ;;  %v2590_v15 = vand.u32 65535, %v2586_v27  ;;  %v2591_v23 = vshrl.u32 %v2586_v27, 16  ;;  %vm2446_vm15 = vc.u32 %v2438_v41, %v2442_v45 }
 0x20a   : > { %v2300_v3 = vadd.s32 %v2299_v10, %v13760_v24  ;;  %v9141_v37 = vadd.s32 %v2464_v5, %v2460_v38  ;;  %v2612_v58 = vand.u32 65535, %v2582_v12  ;;  %v2321_v11 = vadd.s32 %v2319_v25, %v2317_v55 }
 0x20b   : > { %vm2468_vm0 = vc.u32 %v2460_v38, %v2464_v5  ;;  %v2592_v35 = vmul.u32 %v2590_v15, %v2588_v62  ;;  %v9143_v52 = vmul.u32 %v2591_v23, %v2588_v62  ;;  %v2444_v53 = vshll.u32 %v9132_v44, 16 }
 0x20c   : > { %v2448_v31 = vadd.s32 %v2442_v45, %v2438_v41  ;;  %v9146_v63 = vmul.u32 %v2590_v15, %v2589_v57  ;;  %v2615_v24 = vmul.u32 %v2613_v36, %v2588_v62  ;;  %v13761_v10 = vshrl.u32 %v9045_v28, 16 }
 0x20d   : > { %v2447_v14 = vsel %vm2446_vm15, 1, %v13624_v32  ;;  %v2463_v61 = vmul.u32 %v2459_v49, %v2435_v16  ;;  %v2596_v18 = vshll.u32 %v9143_v52, 16  ;;  %v2469_v55 = vsel %vm2468_vm0, 1, %v13624_v32 }
 0x20e   : > { %v2441_v27 = vmul.u32 %v13761_v10, %v2435_v16  ;;  %v13762_v38 = vshll.u32 %v9122_v47, 16  ;;  %v2598_v41 = vshll.u32 %v9146_v63, 16  ;;  %v2614_v45 = vmul.u32 %v2612_v58, %v2588_v62 }
 0x20f   : > { %v2595_v12 = vmul.u32 %v2591_v23, %v2589_v57  ;;  %vm2600_vm11 = vc.u32 %v2592_v35, %v2596_v18  ;;  %v2602_v28 = vadd.s32 %v2596_v18, %v2592_v35  ;;  %v9161_v25 = vmul.u32 %v2612_v58, %v2589_v57 }
 0x210   : > { %vm9156_vm7 = vc.u32 %v9141_v37, %v13762_v38  ;;  %v13765_v49 = vshrl.u32 %v8997_v59, 16  ;;  %vm2450_vm2 = vc.u32 %v2448_v31, %v2444_v53  ;;  %v2601_v15 = vsel %vm2600_vm11, 1, %v13624_v32 }
 0x211   : > { %v2618_v10 = vshll.u32 %v2615_v24, 16  ;;  %v13766_v38 = vshrl.u32 %v8995_v17, 16  ;;  %v13767_v9 = vshll.u32 %v8999_v20, 16  ;;  %v2471_v23 = vadd.s32 %v2469_v55, %v2463_v61 }
 0x212   : > { %v2322_v16 = vadd.s32 %v2321_v11, %v13765_v49  ;;  %vm2604_vm5 = vc.u32 %v2602_v28, %v2598_v41  ;;  %v2449_v35 = vadd.s32 %v2447_v14, %v2441_v27  ;;  %v2473_v59 = vsel %vm9156_vm7, 1, %v13624_v32 }
 0x213   : > { %v9168_v19 = vadd.s32 %v2300_v3, %v13766_v38  ;;  %v9173_v62 = vadd.s32 %v9049_v1, %v13767_v9  ;;  %v2617_v31 = vmul.u32 %v2613_v36, %v2589_v57  ;;  %v2620_v11 = vshll.u32 %v9161_v25, 16 }
 0x214   : > { %v2451_v18 = vsel %vm2450_vm2, 1, %v13624_v32  ;;  %v2603_v17 = vadd.s32 %v2601_v15, %v2595_v12  ;;  %vm2622_vm15 = vc.u32 %v2614_v45, %v2618_v10  ;;  %v2624_v3 = vadd.s32 %v2618_v10, %v2614_v45 }
 0x215   : > { %v9181_v20 = vshrl.u32 %v8960_v50, 30  ;;  %v2270_v1 = vsel %vm2264_vm9, %v8955_v13, %v8985_v30  ;;  %v2323_v14 = vadd.s32 %v2322_v16, %v2313_v54  ;;  %v2605_v9 = vsel %vm2604_vm5, 1, %v13624_v32  ;;  %v13768_v54 = vld [vmem:[#allocation20_spill] sm:$0xff] }
 0x216   : > { %v2443_v57 = vshrl.u32 %v9090_v42, 16  ;;  %v2465_v36 = vshrl.u32 %v9096_v43, 16  ;;  %v2475_v61 = vadd.s32 %v2473_v59, %v2471_v23  ;;  %v2623_v58 = vsel %vm2622_vm15, 1, %v13624_v32 }
 0x217   : > { %v2453_v53 = vadd.s32 %v2451_v18, %v2449_v35  ;;  %v2619_v27 = vshrl.u32 %v2615_v24, 16  ;;  %v2625_v55 = vadd.s32 %v2623_v58, %v2617_v31  ;;  %vm2626_vm0 = vc.u32 %v2624_v3, %v2620_v11 }
 0x218   : > { %vm2326_vm7 = vc.u32 %v9168_v19, %v9173_v62  ;;  %v2597_v4 = vshrl.u32 %v9143_v52, 16  ;;  %v2607_v30 = vadd.s32 %v2605_v9, %v2603_v17  ;;  %v2627_v13 = vsel %vm2626_vm0, 1, %v13624_v32 }
 0x219   : > { %v2327_v50 = vadd.s32 1, %v2323_v14  ;;  %v2401_v42 = vshrl.u32 %v13629_v26, %v8935_v6  ;;  %v2629_v43 = vadd.s32 %v2627_v13, %v2625_v55  ;;  %v2696_v5 = vand.u32 2139095040, %v13768_v54 }
 0x21a   : > { %v2422_v24 = vsel %vm2420_vm3, %v9003_v33, 2102212464  ;;  %v2445_v41 = vshrl.u32 %v9132_v44, 16  ;;  %v2467_v45 = vshrl.u32 %v9122_v47, 16  ;;  %v2476_v12 = vadd.s32 %v2475_v61, %v2465_v36 }
 0x21b   : > { %v2454_v52 = vadd.s32 %v2453_v53, %v2443_v57  ;;  %v2621_v28 = vshrl.u32 %v9161_v25, 16  ;;  %v2630_v49 = vadd.s32 %v2629_v43, %v2619_v27  ;;  %v2697_v16 = vshrl.u32 %v2696_v5, 23 }
 0x21c   : > { %v2029_v15 = vclz %v8951_v7  ;;  %v2555_v6 = vshrl.u32 %v13629_v26, %v9047_v2  ;;  %v2599_v10 = vshrl.u32 %v9146_v63, 16  ;;  %v2608_v38 = vadd.s32 %v2607_v30, %v2597_v4  ;;  %v13772_v30 = vld [vmem:[#allocation61_spill] sm:$0xff] }
 0x21d   : > { %v2178_v33 = vshll.u32 %v9181_v20, 30  ;;  %v2324_v44 = vmul.u32 %v8933_v29, %v2270_v1  ;;  %v2576_v23 = vsel %vm2574_vm10, %v9092_v56, 2102212464  ;;  %v6018_v35 = vadd.s32 4294967169, %v2697_v16 }
 0x21e   : > { %v2328_v25 = vsel %vm2326_vm7, %v2327_v50, %v2323_v14  ;;  %v2421_v7 = vsel %vm2417_vm13, %v2401_v42, %v9005_v0  ;;  %v2423_v2 = vsel %vm2419_vm12, %v9001_v51, %v2422_v24  ;;  %v2477_v63 = vadd.s32 %v2476_v12, %v2467_v45 }
 0x21f   : > { %v9222_v59 = vadd.s32 %v2454_v52, %v2445_v41  ;;  %v13769_v29 = vshll.u32 %v9122_v47, 16  ;;  %v2631_v31 = vadd.s32 %v2630_v49, %v2621_v28  ;;  %v2703_v18 = vadd.s32 1, %v6018_v35 }
 0x220   : > { %v2575_v17 = vsel %vm2571_vm14, %v2555_v6, %v9078_v48  ;;  %v2577_v0 = vsel %vm2573_vm8, %v9080_v60, %v2576_v23  ;;  %v9235_v1 = vadd.s32 %v2608_v38, %v2599_v10  ;;  %v9237_v51 = vadd.s32 %v2624_v3, %v2620_v11 }
 0x221   : > { %v9227_v56 = vadd.s32 %v9141_v37, %v13769_v29  ;;  %v1751_v14 = vmul.f32 -0.00019511016, %v8897_v8  ;;  %v6004_v47 = vadd.s32 4294967294, %v2029_v15  ;;  %v9240_v9 = vadd.s32 %v2328_v25, %v2324_v44 }
 0x222   : > { %vm2704_vm9 = vcmp.gt.s32.totalorder %v2703_v18, 0  ;;  %v1883_v37 = vsub.s32 4294967266, %v8912_v34  ;;  %v2424_v57 = vsel %vm2418_vm6, %v2421_v7, %v2423_v2  ;;  %v2481_v48 = vadd.s32 1, %v2477_v63 }
 0x223   : > { %v2705_v36 = vsel %vm2704_vm9, %v2703_v18, 0  ;;  %vm2480_vm3 = vc.u32 %v9222_v59, %v9227_v56  ;;  %v2578_v60 = vsel %vm2572_vm4, %v2575_v17, %v2577_v0  ;;  %v2635_v11 = vadd.s32 1, %v2631_v31 }
 0x224   : > { %v2707_v3 = vand.u32 31, %v2705_v36  ;;  %v1880_v61 = vshll.u32 %v8789_v46, %v8912_v34  ;;  %v13770_v58 = vsub.s32 32, %v8912_v34  ;;  %v9255_v40 = vsub.s32 %v8922_v21, %v2178_v33  ;;  %v13773_v34 = vld [vmem:[#allocation64_spill] sm:$0xff]  ;;  %v13774_v21 = vld [vmem:[#allocation62_spill] sm:$0xff] }
 0x225   : > { %vm2634_vm13 = vc.u32 %v9235_v1, %v9237_v51  ;;  %vm6005_vm12 = vcmp.lt.s32.totalorder %v6004_v47, 0  ;;  %v2330_v27 = vadd.s32 536870912, %v9240_v9  ;;  %v2478_v55 = vmul.u32 %v13771_v22, %v2424_v57 }
 0x226   : > { %v1881_v53 = vshrl.u32 %v8945_v39, %v13770_v58  ;;  %v9261_v4 = vsub.s32 32, %v2707_v3  ;;  %v9264_v13 = vadd.f32 1.0, %v13772_v30  ;;  %v2482_v46 = vsel %vm2480_vm3, %v2481_v48, %v2477_v63 }
 0x227   : > { %v2632_v50 = vmul.u32 %v13773_v34, %v2578_v60  ;;  %v13453_v39 = vand.u32 2147483647, %v13768_v54  ;;  %v9269_v42 = vadd.f32 0.041655596, %v13774_v21  ;;  %v9271_v43 = vadd.f32 0.008332121, %v1751_v14 }
 0x228   : > { %v1884_v5 = vadd.s32 127, %v1883_v37  ;;  %v2636_v24 = vsel %vm2634_vm13, %v2635_v11, %v2631_v31  ;;  %v9273_v41 = vor.u32 %v1881_v53, %v1880_v61  ;;  %v9275_v45 = vsel %vm6005_vm12, 0, %v6004_v47  ;;  %v13780_v14 = vld [vmem:[#allocation50_spill] sm:$0xff] }
 0x229   : > { %vm2180_vm6 = vcmp.lt.s32.totalorder %v9255_v40, 0  ;;  %v2181_v12 = vsub.s32 0, %v9255_v40  ;;  %v9279_v52 = vshrl.u32 %v2330_v27, 30  ;;  %v9281_v28 = vadd.s32 %v2482_v46, %v2478_v55  ;;  %v13781_v47 = vld [vmem:[#allocation46_spill] sm:$0xff] }
 0x22a   : > { %v13775_v49 = vmov 2102212464   ;;  %v13776_v15 = vmov 920167782   ;;  %v9286_v10 = vadd.s32 %v2636_v24, %v2632_v50  ;;  %v2700_v38 = vand.u32 8388607, %v13453_v39 }
 0x22b   : > { %v2719_v16 = vshll.u32 %v13775_v49, %v2707_v3  ;;  %v2720_v6 = vshrl.u32 %v13776_v15, %v9261_v4  ;;  %v9290_v33 = vshrl.u32 %v2705_v36, 5  ;;  %v2722_v44 = vshll.u32 %v13776_v15, %v2707_v3 }
 0x22c   : > { %v13777_v23 = vmov 2475754826   ;;  %v13778_v25 = vmov 2131351028   ;;  %v2717_v63 = vshrl.u32 %v13775_v49, %v9261_v4  ;;  %v1885_v29 = vshll.u32 %v1884_v5, 23 }
 0x22d   : > { %v2713_v35 = vshll.u32 %v13777_v23, %v2707_v3  ;;  %v2714_v7 = vshrl.u32 %v13778_v25, %v9261_v4  ;;  %v2716_v2 = vshll.u32 %v13778_v25, %v2707_v3  ;;  %v2710_v31 = vshll.u32 %v13629_v26, %v2707_v3 }
 0x22e   : > { %v2711_v18 = vshrl.u32 %v13777_v23, %v9261_v4  ;;  %v13779_v17 = vmov 1326507024   ;;  %v2017_v37 = vadd.s32 %v13781_v47, %v13780_v14  ;;  %v2037_v57 = vsub.s32 4294967266, %v9275_v45 }
 0x22f   : > { %v2723_v0 = vshrl.u32 %v13779_v17, %v9261_v4  ;;  %v2484_v48 = vadd.s32 536870912, %v9281_v28  ;;  %v2721_v36 = vor.u32 %v2720_v6, %v2719_v16  ;;  %v2182_v60 = vsel %vm2180_vm6, %v2181_v12, %v9255_v40 }
 0x230   : > { %v2701_v11 = vor.u32 8388608, %v2700_v38  ;;  %vm2728_vm14 = vcmp.lt.s32.totalorder %v9290_v33, 4  ;;  %v2332_v61 = vshll.u32 %v9279_v52, 30  ;;  %v2638_v58 = vadd.s32 536870912, %v9286_v10 }
 0x231   : > { %v2724_v3 = vor.u32 %v2723_v0, %v2722_v44  ;;  %v9314_v53 = vor.u32 %v2714_v7, %v2713_v35  ;;  %v9316_v27 = vor.u32 %v2717_v63, %v2716_v2  ;;  %v1886_v22 = vor.u32 4788187, %v1885_v29  ;;  %v13782_v7 = vld [vmem:[#allocation60_spill] sm:$0xff] }
 0x232   : > { %v1889_v55 = vcvt.s32.f32 %v9273_v41  ;;  %v9319_v30 = vor.u32 %v2711_v18, %v2710_v31  ;;  %vm2725_vm8 = vcmp.lt.s32.totalorder %v9290_v33, 1  ;;  %v2033_v46 = vsub.s32 32, %v9275_v45 }
 0x233   : > { %v9323_v34 = vshrl.u32 %v2484_v48, 30  ;;  %vm2727_vm4 = vcmp.lt.s32.totalorder %v9290_v33, 3  ;;  %v2734_v50 = vsel %vm2728_vm14, %v2721_v36, 920167782  ;;  %v2038_v21 = vadd.s32 127, %v2037_v57 }
 0x234   : > { %v2183_v5 = vclz %v2182_v60  ;;  %v2738_v24 = vsel %vm2728_vm14, %v2724_v3, 1326507024  ;;  %v9330_v12 = vshll.u32 %v2701_v11, 8  ;;  %v9333_v41 = vsub.s32 %v9240_v9, %v2332_v61 }
 0x235   : > { %v9335_v16 = vshrl.u32 %v2638_v58, 30  ;;  %vm2726_vm10 = vcmp.lt.s32.totalorder %v9290_v33, 2  ;;  %v2737_v6 = vsel %vm2725_vm8, %v9314_v53, %v9316_v27  ;;  %v1887_v38 = vand.u32 2147483647, %v1886_v22 }
 0x236   : > { %v2733_v44 = vsel %vm2725_vm8, %v9319_v30, %v9314_v53  ;;  %v2735_v9 = vsel %vm2727_vm4, %v9316_v27, %v2734_v50  ;;  %v2739_v35 = vsel %vm2727_vm4, %v2721_v36, %v2738_v24  ;;  %v2034_v2 = vshll.u32 %v13782_v7, %v9275_v45 }
 0x237   : > { %v2035_v63 = vshrl.u32 %v2017_v37, %v2033_v46  ;;  %v2486_v29 = vshll.u32 %v9323_v34, 30  ;;  %v2743_v31 = vshrl.u32 %v9330_v12, 16  ;;  %v2039_v18 = vshll.u32 %v2038_v21, 23 }
 0x238   : > { %v9355_v0 = vadd.s32 4294967294, %v2183_v5  ;;  %v2740_v14 = vsel %vm2726_vm10, %v2737_v6, %v2739_v35  ;;  %v2742_v47 = vand.u32 65535, %v9330_v12  ;;  %v2335_v57 = vsub.s32 0, %v9333_v41 }
 0x239   : > { %v2640_v48 = vshll.u32 %v9335_v16, 30  ;;  %v2736_v45 = vsel %vm2726_vm10, %v2733_v44, %v2735_v9  ;;  %v2744_v37 = vand.u32 65535, %v2740_v14  ;;  %v9366_v36 = vmul.f32 %v9271_v43, %v8897_v8 }
 0x23a   : > { %vm2334_vm11 = vcmp.lt.s32.totalorder %v9333_v41, 0  ;;  %v2745_v60 = vshrl.u32 %v2740_v14, 16  ;;  %v2766_v11 = vand.u32 65535, %v2736_v45  ;;  %v9369_v3 = vmul.f32 %v1889_v55, %v1887_v38 }
 0x23b   : > { %v9371_v61 = vor.u32 %v2035_v63, %v2034_v2  ;;  %v9374_v58 = vsub.s32 %v9281_v28, %v2486_v29  ;;  %v2748_v22 = vmul.u32 %v2744_v37, %v2743_v31  ;;  %v9376_v46 = vor.u32 4788187, %v2039_v18  ;;  %v13783_v2 = vld [vmem:[#allocation37_spill] sm:$0xff] }
 0x23c   : > { %v2746_v50 = vmul.u32 %v2744_v37, %v2742_v47  ;;  %v2747_v21 = vmul.u32 %v2745_v60, %v2742_v47  ;;  %v2767_v5 = vshrl.u32 %v2736_v45, 16  ;;  %vm6008_vm2 = vcmp.lt.s32.totalorder %v9355_v0, 0 }
 0x23d   : > { %v2336_v43 = vsel %vm2334_vm11, %v2335_v57, %v9333_v41  ;;  %v9381_v24 = vsub.s32 %v9286_v10, %v2640_v48  ;;  %v2749_v55 = vmul.u32 %v2745_v60, %v2743_v31  ;;  %v2752_v38 = vshll.u32 %v2748_v22, 16 }
 0x23e   : > { %v2750_v6 = vshll.u32 %v2747_v21, 16  ;;  %v2768_v44 = vmul.u32 %v2766_v11, %v2742_v47  ;;  %v2769_v9 = vmul.u32 %v2767_v5, %v2742_v47  ;;  %vm2488_vm5 = vcmp.lt.s32.totalorder %v9374_v58, 0 }
 0x23f   : > { %v2489_v28 = vsub.s32 0, %v9374_v58  ;;  %v2709_v35 = vshrl.u32 %v13629_v26, %v9261_v4  ;;  %v2770_v7 = vmul.u32 %v2766_v11, %v2743_v31  ;;  %vm1771_vm15 = vcmp.lt.s32.totalorder %v13783_v2, 0 }
 0x240   : > { %vm2754_vm0 = vc.u32 %v2746_v50, %v2750_v6  ;;  %v2756_v63 = vadd.s32 %v2750_v6, %v2746_v50  ;;  %v2771_v29 = vmul.u32 %v2767_v5, %v2743_v31  ;;  %v2772_v10 = vshll.u32 %v2769_v9, 16 }
 0x241   : > { %vm2642_vm7 = vcmp.lt.s32.totalorder %v9381_v24, 0  ;;  %v2643_v18 = vsub.s32 0, %v9381_v24  ;;  %v2755_v14 = vsel %vm2754_vm0, 1, %v13624_v32  ;;  %v2774_v47 = vshll.u32 %v2770_v7, 16 }
 0x242   : > { %v2751_v57 = vshrl.u32 %v2747_v21, 16  ;;  %v2757_v48 = vadd.s32 %v2755_v14, %v2749_v55  ;;  %vm2758_vm9 = vc.u32 %v2756_v63, %v2752_v38  ;;  %vm2776_vm3 = vc.u32 %v2768_v44, %v2772_v10 }
 0x243   : > { %v2730_v4 = vsel %vm2728_vm14, %v9316_v27, 2102212464  ;;  %v2759_v45 = vsel %vm2758_vm9, 1, %v13624_v32  ;;  %v2777_v31 = vsel %vm2776_vm3, 1, %v13624_v32  ;;  %v2778_v37 = vadd.s32 %v2772_v10, %v2768_v44 }
 0x244   : > { %v2490_v60 = vsel %vm2488_vm5, %v2489_v28, %v9374_v58  ;;  %v2753_v11 = vshrl.u32 %v2748_v22, 16  ;;  %v2761_v50 = vadd.s32 %v2759_v45, %v2757_v48  ;;  %v2779_v5 = vadd.s32 %v2777_v31, %v2771_v29 }
 0x245   : > { %v2337_v21 = vclz %v2336_v43  ;;  %v2644_v55 = vsel %vm2642_vm7, %v2643_v18, %v9381_v24  ;;  %v2773_v6 = vshrl.u32 %v2769_v9, 16  ;;  %vm2780_vm13 = vc.u32 %v2778_v37, %v2774_v47 }
 0x246   : > { %v2729_v27 = vsel %vm2725_vm8, %v2709_v35, %v9319_v30  ;;  %v2731_v38 = vsel %vm2727_vm4, %v9314_v53, %v2730_v4  ;;  %v2762_v44 = vadd.s32 %v2761_v50, %v2751_v57  ;;  %v2781_v22 = vsel %vm2780_vm13, 1, %v13624_v32  ;;  %v13784_v35 = vld [vmem:[#allocation55_spill] sm:$0xff]  ;;  %v13802_v32 = vld [vmem:[#allocation25_spill] sm:$0xff] }
 0x247   : > { %v1891_v28 = vxor.u32 2147483648, %v9369_v3  ;;  %v2491_v43 = vclz %v2490_v60  ;;  %v2775_v63 = vshrl.u32 %v2770_v7, 16  ;;  %v2783_v29 = vadd.s32 %v2781_v22, %v2779_v5 }
 0x248   : > { %v9413_v9 = vsel %vm6008_vm2, 0, %v9355_v0  ;;  %v2645_v10 = vclz %v2644_v55  ;;  %v9415_v18 = vadd.s32 %v2762_v44, %v2753_v11  ;;  %v9417_v30 = vadd.s32 %v2778_v37, %v2774_v47  ;;  %v13788_v37 = vld [vmem:[#allocation56_spill] sm:$0xff] }
 0x249   : > { %vm1610_vm12 = vcmp.eq.s32.totalorder %v13784_v35, 2  ;;  %v1746_v53 = vmul.f32 %v9269_v42, %v8897_v8  ;;  %v1754_v14 = vadd.f32 -0.16666654, %v9366_v36  ;;  %v2732_v7 = vsel %vm2726_vm10, %v2729_v27, %v2731_v38  ;;  %v13790_v27 = vld [vmem:[#allocation58_spill] sm:$0xff]  ;;  %v13791_v38 = vld [vmem:[#allocation59_spill] sm:$0xff] }
 0x24a   : > { %v2784_v57 = vadd.s32 %v2783_v29, %v2773_v6  ;;  %v13785_v48 = vand.u32 2147483647, %v13783_v2  ;;  %v2041_v47 = vand.u32 2147483647, %v9376_v46  ;;  %v2043_v4 = vcvt.s32.f32 %v9371_v61  ;;  %v13789_v46 = vld [vmem:[#allocation48_spill] sm:$0xff] }
 0x24b   : > { %v6010_v45 = vadd.s32 4294967294, %v2337_v21  ;;  %v1892_v42 = vsel %vm1771_vm15, %v1891_v28, %v9369_v3  ;;  %v2191_v36 = vsub.s32 4294967266, %v9413_v9  ;;  %v6013_v33 = vadd.s32 4294967294, %v2491_v43 }
 0x24c   : > { %vm9427_vm6 = vcmp.le.f32.partialorder %v13785_v48, 0.7853982  ;;  %v2785_v31 = vadd.s32 %v2784_v57, %v2775_v63  ;;  %v9438_v60 = vadd.f32 1.0, %v13788_v37  ;;  %v6016_v11 = vadd.s32 4294967294, %v2645_v10  ;;  %v13793_v63 = vld [vmem:[#allocation53_spill] sm:$0xff] }
 0x24d   : > { %v2786_v50 = vmul.u32 %v9330_v12, %v2732_v7  ;;  %vm2788_vm14 = vc.u32 %v9415_v18, %v9417_v30  ;;  %v9445_v61 = vmul.f32 %v9264_v13, %v13789_v46  ;;  %v1747_v5 = vadd.f32 -0.4999988, %v1746_v53 }
 0x24e   : > { %v1755_v3 = vmul.f32 %v1754_v14, %v8897_v8  ;;  %v2789_v21 = vadd.s32 1, %v2785_v31  ;;  %v9451_v55 = vsel %vm9427_vm6, %v13783_v2, %v1892_v42  ;;  %v2044_v6 = vmul.f32 %v2043_v4, %v2041_v47 }
 0x24f   : > { %v2171_v12 = vadd.s32 %v13791_v38, %v13790_v27  ;;  %vm6011_vm8 = vcmp.lt.s32.totalorder %v6010_v45, 0  ;;  %v2187_v44 = vsub.s32 32, %v9413_v9  ;;  %v2192_v22 = vadd.s32 127, %v2191_v36  ;;  %v13800_v38 = vld [vmem:[#allocation14_spill] sm:$0xff] }
 0x250   : > { %vm6014_vm4 = vcmp.lt.s32.totalorder %v6013_v33, 0  ;;  %v2790_v13 = vsel %vm2788_vm14, %v2789_v21, %v2785_v31  ;;  %v1611_v28 = vxor.u32 2147483648, %v9438_v60  ;;  %v13794_v29 = vsel %vm8834_vm1, 0, %v13793_v63  ;;  %v13796_v21 = vld [vmem:[#allocation57_spill] sm:$0xff] }
 0x251   : > { %v9461_v10 = vand.u32 3, %v13794_v29  ;;  %vm6017_vm10 = vcmp.lt.s32.totalorder %v6016_v11, 0  ;;  %v2791_v53 = vadd.s32 %v2790_v13, %v2786_v50  ;;  %v1748_v7 = vmul.f32 %v1747_v5, %v8897_v8 }
 0x252   : > { %v1756_v57 = vadd.f32 1.0, %v1755_v3  ;;  %v9465_v48 = vsel %vm6011_vm8, 0, %v6010_v45  ;;  %v9469_v47 = vmul.f32 %v9451_v55, %v9451_v55  ;;  %v2045_v4 = vxor.u32 2147483648, %v2044_v6  ;;  %v13795_v45 = vld [vmem:[#allocation40_spill] sm:$0xff] }
 0x253   : > { %v9471_v42 = vsel %vm6014_vm4, 0, %v6013_v33  ;;  %v2792_v36 = vadd.s32 536870912, %v2791_v53  ;;  %v2188_v31 = vshll.u32 %v9255_v40, %v9413_v9  ;;  %v2189_v37 = vshrl.u32 %v2171_v12, %v2187_v44 }
 0x254   : > { %v2193_v50 = vshll.u32 %v2192_v22, 23  ;;  %v9475_v46 = vsel %vm6017_vm10, 0, %v6016_v11  ;;  %v9480_v8 = vsel %vm1610_vm12, %v1611_v28, %v9445_v61  ;;  %vm1925_vm1 = vcmp.lt.s32.totalorder %v13795_v45, 0 }
 0x255   : > { %v2345_v5 = vsub.s32 4294967266, %v9465_v48  ;;  %v9484_v3 = vshrl.u32 %v2792_v36, 30  ;;  %v9486_v33 = vadd.f32 1.0, %v1748_v7  ;;  %v9489_v27 = vmul.f32 %v1756_v57, %v13796_v21 }
 0x256   : > { %v13797_v40 = vand.u32 2147483647, %v13795_v45  ;;  %v2499_v11 = vsub.s32 4294967266, %v9471_v42  ;;  %v1893_v12 = vsub.s32 4, %v13800_v38  ;;  %v1898_v44 = vmul.f32 -0.001358992, %v9469_v47 }
 0x257   : > { %v2653_v22 = vsub.s32 4294967266, %v9475_v46  ;;  %v2794_v13 = vshll.u32 %v9484_v3, 30  ;;  %v1905_v28 = vmul.f32 -0.00019511016, %v9469_v47  ;;  %v2046_v43 = vsel %vm1925_vm1, %v2045_v4, %v2044_v6 }
 0x258   : > { %vm9493_vm11 = vcmp.le.f32.partialorder %v13797_v40, 0.7853982  ;;  %v2190_v63 = vor.u32 %v2189_v37, %v2188_v31  ;;  %v2194_v29 = vor.u32 4788187, %v2193_v50  ;;  %vm1607_vm2 = vcmp.eq.s32.totalorder %v13784_v35, 0 }
 0x259   : > { %v2325_v7 = vadd.s32 %v9173_v62, %v9168_v19  ;;  %v2341_v57 = vsub.s32 32, %v9465_v48  ;;  %v2346_v36 = vadd.s32 127, %v2345_v5  ;;  %v9509_v21 = vsub.s32 %v2791_v53, %v2794_v13 }
 0x25a   : > { %v2479_v40 = vadd.s32 %v9227_v56, %v9222_v59  ;;  %v2495_v39 = vsub.s32 32, %v9471_v42  ;;  %v2500_v14 = vadd.s32 127, %v2499_v11  ;;  %v2633_v6 = vadd.s32 %v9237_v51, %v9235_v1 }
 0x25b   : > { %v2649_v4 = vsub.s32 32, %v9475_v46  ;;  %v2654_v31 = vadd.s32 127, %v2653_v22  ;;  %vm2796_vm5 = vcmp.lt.s32.totalorder %v9509_v21, 0  ;;  %v2797_v19 = vsub.s32 0, %v9509_v21 }
 0x25c   : > { %v1906_v62 = vadd.f32 0.008332121, %v1905_v28  ;;  %v9522_v53 = vsel %vm9493_vm11, %v13795_v45, %v2046_v43  ;;  %v2195_v59 = vand.u32 2147483647, %v2194_v29  ;;  %v2197_v56 = vcvt.s32.f32 %v2190_v63  ;;  %v13801_v28 = vld [vmem:[#allocation16_spill] sm:$0xff]  ;;  %v13803_v43 = vld [vmem:[#allocation33_spill] sm:$0xff] }
 0x25d   : > { %v2342_v37 = vshll.u32 %v9333_v41, %v9465_v48  ;;  %v2343_v50 = vshrl.u32 %v2325_v7, %v2341_v57  ;;  %v2347_v1 = vshll.u32 %v2346_v36, 23  ;;  %v2798_v51 = vsel %vm2796_vm5, %v2797_v19, %v9509_v21  ;;  %v13804_v7 = vld [vmem:[#allocation34_spill] sm:$0xff] }
 0x25e   : > { %v2496_v5 = vshll.u32 %v9374_v58, %v9471_v42  ;;  %v2497_v11 = vshrl.u32 %v2479_v40, %v2495_v39  ;;  %v2501_v22 = vshll.u32 %v2500_v14, 23  ;;  %v2799_v13 = vclz %v2798_v51 }
 0x25f   : > { %vm988_vm0 = vweird.f32 %v13801_v28  ;;  %vm1142_vm7 = vweird.f32 %v13802_v32  ;;  %vm1296_vm9 = vweird.f32 %v13803_v43  ;;  %v1899_v63 = vadd.f32 0.041655596, %v1898_v44 }
 0x260   : > { %v2650_v41 = vshll.u32 %v9381_v24, %v9475_v46  ;;  %v2651_v48 = vshrl.u32 %v2633_v6, %v2649_v4  ;;  %v2655_v29 = vshll.u32 %v2654_v31, 23  ;;  %vm1450_vm3 = vweird.f32 %v13804_v7 }
 0x261   : > { %vm1761_vm13 = vcmp.eq.s32.totalorder %v9461_v10, 0  ;;  %vm1764_vm12 = vcmp.eq.s32.totalorder %v9461_v10, 2  ;;  %v1907_v39 = vmul.f32 %v1906_v62, %v9469_v47  ;;  %v2198_v58 = vmul.f32 %v2197_v56, %v2195_v59 }
 0x262   : > { %vm1606_vm14 = vcmp.lt.s32.totalorder %v13784_v35, 2  ;;  %vm1760_vm8 = vcmp.lt.s32.totalorder %v9461_v10, 2  ;;  %v9542_v14 = vmul.f32 %v9522_v53, %v9522_v53  ;;  %v2344_v24 = vor.u32 %v2343_v50, %v2342_v37  ;;  %v13806_v37 = vld [vmem:[#allocation41_spill] sm:$0xff]  ;;  %v13814_v10 = vld [vmem:[#allocation42_spill] sm:$0xff] }
 0x263   : > { %v2348_v42 = vor.u32 4788187, %v2347_v1  ;;  %v6019_v46 = vadd.s32 4294967294, %v2799_v13  ;;  %v1762_v44 = vxor.u32 2147483648, %v9489_v27  ;;  %v1765_v57 = vxor.u32 2147483648, %v9486_v33 }
 0x264   : > { %v2498_v36 = vor.u32 %v2497_v11, %v2496_v5  ;;  %v2502_v40 = vor.u32 4788187, %v2501_v22  ;;  %v1894_v6 = vsel %vm1771_vm15, %v1893_v12, %v13800_v38  ;;  %v1900_v4 = vmul.f32 %v1899_v63, %v9469_v47 }
 0x265   : > { %v2652_v31 = vor.u32 %v2651_v48, %v2650_v41  ;;  %v2656_v19 = vor.u32 4788187, %v2655_v29  ;;  %v13805_v62 = vxor.u32 2147483648, %v9445_v61  ;;  %v1908_v56 = vadd.f32 -0.16666654, %v1907_v39 }
 0x266   : > { %vm2079_vm4 = vcmp.lt.s32.totalorder %v13806_v37, 0  ;;  %v2199_v50 = vxor.u32 2147483648, %v2198_v58  ;;  %v2059_v1 = vmul.f32 -0.00019511016, %v9542_v14  ;;  %v2349_v51 = vand.u32 2147483647, %v2348_v42 }
 0x267   : > { %v1609_v59 = vsel %vm1607_vm2, %v9438_v60, %v13805_v62  ;;  %v2351_v5 = vcvt.s32.f32 %v2344_v24  ;;  %vm6020_vm10 = vcmp.lt.s32.totalorder %v6019_v46, 0  ;;  %v1766_v38 = vsel %vm1764_vm12, %v1765_v57, %v9489_v27 }
 0x268   : > { %v1896_v61 = vsel %vm9427_vm6, 0, %v1894_v6  ;;  %v2503_v12 = vand.u32 2147483647, %v2502_v40  ;;  %v2505_v11 = vcvt.s32.f32 %v2498_v36  ;;  %v1763_v60 = vsel %vm1761_vm13, %v9486_v33, %v1762_v44  ;;  %v13810_v44 = vld [vmem:[#allocation13_spill] sm:$0xff]  ;;  %v13811_v36 = vld [vmem:[#allocation27_spill] sm:$0xff] }
 0x269   : > { %v1901_v22 = vadd.f32 -0.4999988, %v1900_v4  ;;  %v2657_v13 = vand.u32 2147483647, %v2656_v19  ;;  %v2659_v63 = vcvt.s32.f32 %v2652_v31  ;;  %v1909_v41 = vmul.f32 %v1908_v56, %v9469_v47  ;;  %v13812_v6 = vld [vmem:[#allocation15_spill] sm:$0xff] }
 0x26a   : > { %v13807_v48 = vand.u32 2147483647, %v13806_v37  ;;  %v2200_v0 = vsel %vm2079_vm4, %v2199_v50, %v2198_v58  ;;  %v9574_v27 = vsel %vm6020_vm10, 0, %v6019_v46  ;;  %v9576_v39 = vand.u32 3, %v1896_v61  ;;  %v13813_v4 = vld [vmem:[#allocation51_spill] sm:$0xff] }
 0x26b   : > { %v2052_v33 = vmul.f32 -0.001358992, %v9542_v14  ;;  %v2060_v24 = vadd.f32 0.008332121, %v2059_v1  ;;  %v2352_v42 = vmul.f32 %v2351_v5, %v2349_v51  ;;  %v9582_v57 = vsel %vm988_vm0, nan, %v13810_v44 }
 0x26c   : > { %vm9568_vm15 = vcmp.le.f32.partialorder %v13807_v48, 0.7853982  ;;  %v9587_v40 = vsel %vm1142_vm7, nan, %v13811_v36  ;;  %v9592_v58 = vsel %vm1296_vm9, nan, %v13812_v6  ;;  %v2506_v46 = vmul.f32 %v2505_v11, %v2503_v12 }
 0x26d   : > { %v9597_v31 = vsel %vm1450_vm3, nan, %v13813_v4  ;;  %v9602_v28 = vsel %vm9568_vm15, %v13806_v37, %v2200_v0  ;;  %v2660_v19 = vmul.f32 %v2659_v63, %v2657_v13  ;;  %v2807_v32 = vsub.s32 4294967266, %v9574_v27  ;;  %v13817_v13 = vld [vmem:[#allocation19_spill] sm:$0xff] }
 0x26e   : > { %v9608_v43 = vsel %vm1606_vm14, %v1609_v59, %v9480_v8  ;;  %v9612_v62 = vsel %vm1760_vm8, %v1763_v60, %v1766_v38  ;;  %v1902_v7 = vmul.f32 %v1901_v22, %v9469_v47  ;;  %v1910_v56 = vadd.f32 1.0, %v1909_v41  ;;  %v13815_v8 = vld [vmem:[#allocation24_spill] sm:$0xff]  ;;  %v13816_v60 = vld [vmem:[#allocation54_spill] sm:$0xff]  ;;  %v13818_v63 = vld [vmem:[#allocation35_spill] sm:$0xff] }
 0x26f   : > { %vm1918_vm6 = vcmp.eq.s32.totalorder %v9576_v39, 2  ;;  %v2053_v50 = vadd.f32 0.041655596, %v2052_v33  ;;  %v2061_v1 = vmul.f32 %v2060_v24, %v9542_v14  ;;  %v2353_v51 = vxor.u32 2147483648, %v2352_v42  ;;  %v13819_v41 = vld [vmem:[#allocation36_spill] sm:$0xff] }
 0x270   : > { %vm1915_vm2 = vcmp.eq.s32.totalorder %v9576_v39, 0  ;;  %v9622_v35 = vmul.f32 %v9602_v28, %v9602_v28  ;;  %vm2233_vm5 = vcmp.lt.s32.totalorder %v13814_v10, 0  ;;  %vm2387_vm0 = vcmp.lt.s32.totalorder %v13815_v8, 0 }
 0x271   : > { %v2507_v47 = vxor.u32 2147483648, %v2506_v46  ;;  %v2661_v59 = vxor.u32 2147483648, %v2660_v19  ;;  %v2787_v5 = vadd.s32 %v9417_v30, %v9415_v18  ;;  %v2803_v38 = vsub.s32 32, %v9574_v27 }
 0x272   : > { %v2808_v61 = vadd.s32 127, %v2807_v32  ;;  %v1903_v12 = vadd.f32 1.0, %v1902_v7  ;;  %v1911_v11 = vmul.f32 %v1910_v56, %v9451_v55  ;;  %v2047_v22 = vsub.s32 4, %v13816_v60 }
 0x273   : > { %vm2541_vm7 = vcmp.lt.s32.totalorder %v13817_v13, 0  ;;  %vm1604_vm9 = vweird.f32 %v13818_v63  ;;  %vm1758_vm3 = vweird.f32 %v13819_v41  ;;  %v2054_v48 = vmul.f32 %v2053_v50, %v9542_v14 }
 0x274   : > { %v2062_v0 = vadd.f32 -0.16666654, %v2061_v1  ;;  %v13820_v18 = vand.u32 2147483647, %v13814_v10  ;;  %v2354_v55 = vsel %vm2233_vm5, %v2353_v51, %v2352_v42  ;;  %v2213_v33 = vmul.f32 -0.00019511016, %v9622_v35 }
 0x275   : > { %v13823_v24 = vand.u32 2147483647, %v13815_v8  ;;  %v2508_v36 = vsel %vm2387_vm0, %v2507_v47, %v2506_v46  ;;  %v13826_v6 = vand.u32 2147483647, %v13817_v13  ;;  %v2662_v42 = vsel %vm2541_vm7, %v2661_v59, %v2660_v19  ;;  %v13830_v19 = vld [vmem:[#allocation22_spill] sm:$0xff] }
 0x276   : > { %vm9639_vm13 = vcmp.le.f32.partialorder %v13820_v18, 0.7853982  ;;  %v2804_v32 = vshll.u32 %v9509_v21, %v9574_v27  ;;  %v2805_v7 = vshrl.u32 %v2787_v5, %v2803_v38  ;;  %v2809_v56 = vshll.u32 %v2808_v61, 23  ;;  %v13829_v27 = vld [vmem:[#allocation47_spill] sm:$0xff]  ;;  %v13831_v61 = vld [vmem:[#allocation12_spill] sm:$0xff] }
 0x277   : > { %vm9648_vm12 = vcmp.le.f32.partialorder %v13823_v24, 0.7853982  ;;  %vm9656_vm14 = vcmp.le.f32.partialorder %v13826_v6, 0.7853982  ;;  %v1916_v50 = vxor.u32 2147483648, %v1911_v11  ;;  %v1919_v1 = vxor.u32 2147483648, %v1903_v12 }
 0x278   : > { %v2048_v46 = vsel %vm1925_vm1, %v2047_v22, %v13816_v60  ;;  %v9670_v51 = vsel %vm9639_vm13, %v13814_v10, %v2354_v55  ;;  %v2055_v47 = vadd.f32 -0.4999988, %v2054_v48  ;;  %v2063_v18 = vmul.f32 %v2062_v0, %v9542_v14  ;;  %v13832_v60 = vld [vmem:[#allocation23_spill] sm:$0xff] }
 0x279   : > { %v9676_v21 = vsel %vm9648_vm12, %v13815_v8, %v2508_v36  ;;  %v2847_v59 = vmul.f32 %v13830_v19, %v13829_v27  ;;  %v2206_v5 = vmul.f32 -0.001358992, %v9622_v35  ;;  %v9684_v38 = vsel %vm9656_vm14, %v13817_v13, %v2662_v42 }
 0x27a   : > { %v2848_v22 = vmul.f32 %v13832_v60, %v13831_v61  ;;  %v9689_v48 = vstv %s9617_s27  ;;  %v2214_v0 = vadd.f32 0.008332121, %v2213_v33  ;;  %v9693_v55 = vmul.f32 %v9670_v51, %v9670_v51  ;;  %s6334_s27 = sshra.s32 %s5828_s24, 4  ;;  %s6335_s27 = int_to_ptr.hbm [resolvable:$true] %s6334_s27 }
 0x27b   : > { %v2806_v24 = vor.u32 %v2805_v7, %v2804_v32  ;;  %v2810_v36 = vor.u32 4788187, %v2809_v56  ;;  %vm1914_vm1 = vcmp.lt.s32.totalorder %v9576_v39, 2  ;;  %v1920_v6 = vsel %vm1918_vm6, %v1919_v1, %v1911_v11  ;;  %p6341_p10 = scmp.lt.s32.totalorder %s6335_s27, %s13329_s4 }
 0x27c   : > { %v2050_v42 = vsel %vm9493_vm11, 0, %v2048_v46  ;;  %v9702_v27 = vmul.f32 %v9676_v21, %v9676_v21  ;;  %v1917_v33 = vsel %vm1915_vm2, %v1903_v12, %v1916_v50  ;;  %v2056_v19 = vmul.f32 %v2055_v47, %v9542_v14 }
 0x27d   : > { %v9709_v32 = vmul.f32 %v9684_v38, %v9684_v38  ;;  %v2864_v7 = vmul.f32 %v9689_v48, %v2847_v59  ;;  %v2064_v56 = vadd.f32 1.0, %v2063_v18  ;;  %v2207_v11 = vadd.f32 0.041655596, %v2206_v5 }
 0x27e   : > { %v2865_v9 = vmul.f32 %v9689_v48, %v2848_v22  ;;  %v9714_v1 = vstv %s9632_s5  ;;  %v2215_v46 = vmul.f32 %v2214_v0, %v9622_v35  ;;  %v2367_v61 = vmul.f32 -0.00019511016, %v9693_v55  ;;  %s6336_s5 = scalar_lea.hbm %s6335_s27, 128 }
 0x27f   : > { %v2811_v60 = vand.u32 2147483647, %v2810_v36  ;;  %v2813_v12 = vcvt.s32.f32 %v2806_v24  ;;  %v9721_v14 = vsel %vm1604_vm9, nan, %v9608_v43  ;;  %v9726_v50 = vsel %vm1758_vm3, nan, %v9612_v62  ;;  %p6337_p3 = scmp.ne.s32.totalorder %s6335_s27, %s6336_s5 }
 0x280   : > { %v9728_v47 = vand.u32 3, %v2050_v42  ;;  %v2521_v18 = vmul.f32 -0.00019511016, %v9702_v27  ;;  %vm1912_vm11 = vweird.f32 %v13783_v2  ;;  %v1921_v59 = vsel %vm1914_vm1, %v1917_v33, %v1920_v6 }
 0x281   : > { %v2675_v5 = vmul.f32 -0.00019511016, %v9709_v32  ;;  %v2881_v63 = vadd.f32 %v9714_v1, %v2864_v7  ;;  %v2057_v43 = vadd.f32 1.0, %v2056_v19  ;;  %v2208_v22 = vmul.f32 %v2207_v11, %v9622_v35  ;;  %p6338_p5 = pnand %p6337_p3, %p6493_p8 }
 0x282   : > { %v2360_v41 = vmul.f32 -0.001358992, %v9693_v55  ;;  %v2882_v62 = vadd.f32 %v9714_v1, %v2865_v9  ;;  %v2065_v0 = vmul.f32 %v2064_v56, %v9522_v53  ;;  %v2216_v24 = vadd.f32 -0.16666654, %v2215_v46 }
 0x283   : > { %v2368_v36 = vadd.f32 0.008332121, %v2367_v61  ;;  %v2814_v42 = vmul.f32 %v2813_v12, %v2811_v60  ;;  %v9740_v2 = vsel %vm1912_vm11, nan, %v1921_v59  ;;  %vm2069_vm8 = vcmp.eq.s32.totalorder %v9728_v47, 0  ;;  %p6339_p7 = pneg %p6338_p5 }
 0x284   : > { %vm2072_vm10 = vcmp.eq.s32.totalorder %v9728_v47, 2  ;;  %v2514_v39 = vmul.f32 -0.001358992, %v9702_v27  ;;  %v2522_v6 = vadd.f32 0.008332121, %v2521_v18  ;;  %v2201_v33 = vsub.s32 4, %v9181_v20 }
 0x285   : > { %v2668_v19 = vmul.f32 -0.001358992, %v9709_v32  ;;  %v2676_v7 = vadd.f32 0.008332121, %v2675_v5  ;;  %v2897_v11 = vmul.f32 %v2881_v63, %v2881_v63  ;;  %v2073_v9 = vxor.u32 2147483648, %v2057_v43 }
 0x286   : > { %v2209_v53 = vadd.f32 -0.4999988, %v2208_v22  ;;  %v2361_v56 = vadd.f32 0.041655596, %v2360_v41  ;;  %v2898_v46 = vmul.f32 %v2882_v62, %v2882_v62  ;;  %vm2068_vm6 = vcmp.lt.s32.totalorder %v9728_v47, 2 }
 0x287   : > { %v2070_v61 = vxor.u32 2147483648, %v2065_v0  ;;  %v2217_v60 = vmul.f32 %v2216_v24, %v9622_v35  ;;  %v2369_v12 = vmul.f32 %v2368_v36, %v9693_v55  ;;  %v2815_v59 = vxor.u32 2147483648, %v2814_v42 }
 0x288   : > { %v2355_v18 = vsub.s32 4, %v9279_v52  ;;  %v2515_v17 = vadd.f32 0.041655596, %v2514_v39  ;;  %v2523_v15 = vmul.f32 %v2522_v6, %v9702_v27  ;;  %vm2695_vm2 = vcmp.lt.s32.totalorder %v13768_v54, 0 }
 0x289   : > { %v2202_v5 = vsel %vm2079_vm4, %v2201_v33, %v9181_v20  ;;  %v2669_v63 = vadd.f32 0.041655596, %v2668_v19  ;;  %v2677_v22 = vmul.f32 %v2676_v7, %v9709_v32  ;;  %v9757_v41 = vadd.f32 1.0, %v2897_v11 }
 0x28a   : > { %v2074_v62 = vsel %vm2072_vm10, %v2073_v9, %v2065_v0  ;;  %v2210_v24 = vmul.f32 %v2209_v53, %v9622_v35  ;;  %v2362_v36 = vmul.f32 %v2361_v56, %v9693_v55  ;;  %v9763_v39 = vadd.f32 1.0, %v2898_v46 }
 0x28b   : > { %v2218_v6 = vadd.f32 1.0, %v2217_v60  ;;  %v2370_v49 = vadd.f32 -0.16666654, %v2369_v12  ;;  %v13833_v25 = vand.u32 2147483647, %v13768_v54  ;;  %v2816_v33 = vsel %vm2695_vm2, %v2815_v59, %v2814_v42 }
 0x28c   : > { %v2204_v0 = vsel %vm9568_vm15, 0, %v2202_v5  ;;  %v2356_v35 = vsel %vm2233_vm5, %v2355_v18, %v9279_v52  ;;  %v2516_v19 = vmul.f32 %v2515_v17, %v9702_v27  ;;  %v2524_v7 = vadd.f32 -0.16666654, %v2523_v15 }
 0x28d   : > { %vm9767_vm9 = vcmp.le.f32.partialorder %v13833_v25, 0.7853982  ;;  %v2509_v11 = vsub.s32 4, %v9323_v34  ;;  %v2670_v25 = vmul.f32 %v2669_v63, %v9709_v32  ;;  %v2678_v9 = vadd.f32 -0.16666654, %v2677_v22  ;;  %v13836_v63 = vld [vmem:[#allocation49_spill] sm:$0xff] }
 0x28e   : > { %6195 = vrsqrt.f32 %v9757_v41  ;;  %v2211_v53 = vadd.f32 1.0, %v2210_v24  ;;  %v2363_v56 = vadd.f32 -0.4999988, %v2362_v36  ;;  %v9785_v29 = vsel %vm9767_vm9, %v13768_v54, %v2816_v33  ;;  %v13837_v22 = vld [vmem:[#allocation26_spill] sm:$0xff] }
 0x28f   : > { %6197 = vrsqrt.f32 %v9763_v39  ;;  %v2071_v52 = vsel %vm2069_vm8, %v2057_v43, %v2070_v61  ;;  %v2219_v15 = vmul.f32 %v2218_v6, %v9602_v28  ;;  %v9791_v17 = vand.u32 3, %v2204_v0 }
 0x290   : > { %v2371_v42 = vmul.f32 %v2370_v49, %v9693_v55  ;;  %v2358_v46 = vsel %vm9639_vm13, 0, %v2356_v35  ;;  %v2517_v60 = vadd.f32 -0.4999988, %v2516_v19  ;;  %v2525_v12 = vmul.f32 %v2524_v7, %v9702_v27 }
 0x291   : > { %v2663_v59 = vsub.s32 4, %v9335_v16  ;;  %v2510_v18 = vsel %vm2387_vm0, %v2509_v11, %v9323_v34  ;;  %v2671_v5 = vadd.f32 -0.4999988, %v2670_v25  ;;  %v2679_v43 = vmul.f32 %v2678_v9, %v9709_v32 }
 0x292   : > { %v9804_v28 = vmul.f32 %v9785_v29, %v9785_v29  ;;  %v9808_v49 = vsel %vm2068_vm6, %v2071_v52, %v2074_v62  ;;  %v2227_v30 = vxor.u32 2147483648, %v2211_v53  ;;  %v2364_v61 = vmul.f32 %v2363_v56, %v9693_v55 }
 0x293   : > { %v2849_v24 = vmul.f32 %v13837_v22, %v13836_v63  ;;  %v2224_v34 = vxor.u32 2147483648, %v2219_v15  ;;  %vm2226_vm4 = vcmp.eq.s32.totalorder %v9791_v17, 2  ;;  %v2372_v6 = vadd.f32 1.0, %v2371_v42 }
 0x294   : > { %v9813_v36 = vpop.eup %6195  ;;  %v9816_v33 = vand.u32 3, %v2358_v46  ;;  %v2512_v47 = vsel %vm9648_vm12, 0, %v2510_v18  ;;  %v2518_v62 = vmul.f32 %v2517_v60, %v9702_v27  ;;  %v2526_v35 = vadd.f32 1.0, %v2525_v12 }
 0x295   : > { %v9818_v0 = vpop.eup %6197  ;;  %v2664_v55 = vsel %vm2541_vm7, %v2663_v59, %v9335_v16  ;;  %vm2223_vm15 = vcmp.eq.s32.totalorder %v9791_v17, 0  ;;  %v2672_v19 = vmul.f32 %v2671_v5, %v9709_v32  ;;  %v2680_v7 = vadd.f32 1.0, %v2679_v43 }
 0x296   : > { %v2829_v11 = vmul.f32 -0.00019511016, %v9804_v28  ;;  %v2228_v25 = vsel %vm2226_vm4, %v2227_v30, %v2219_v15  ;;  %v2365_v9 = vadd.f32 1.0, %v2364_v61  ;;  %v2866_v56 = vmul.f32 %v9689_v48, %v2849_v24 }
 0x297   : > { %v2930_v44 = vmul.f32 %v9813_v36, %v9757_v41  ;;  %vm2222_vm5 = vcmp.lt.s32.totalorder %v9791_v17, 2  ;;  %v2373_v27 = vmul.f32 %v2372_v6, %v9670_v51  ;;  %vm2376_vm0 = vcmp.lt.s32.totalorder %v9816_v33, 2 }
 0x298   : > { %v2529_v16 = vand.u32 3, %v2512_v47  ;;  %v2666_v32 = vsel %vm9656_vm14, 0, %v2664_v55  ;;  %v2940_v52 = vmul.f32 %v9818_v0, %v9763_v39  ;;  %v2225_v15 = vsel %vm2223_vm15, %v2211_v53, %v2224_v34 }
 0x299   : > { %vm2377_vm7 = vcmp.eq.s32.totalorder %v9816_v33, 0  ;;  %v2519_v42 = vadd.f32 1.0, %v2518_v62  ;;  %v2527_v46 = vmul.f32 %v2526_v35, %v9676_v21  ;;  %v2673_v60 = vadd.f32 1.0, %v2672_v19 }
 0x29a   : > { %v2681_v12 = vmul.f32 %v2680_v7, %v9684_v38  ;;  %v2822_v51 = vmul.f32 -0.001358992, %v9804_v28  ;;  %v2830_v59 = vadd.f32 0.008332121, %v2829_v11  ;;  %vm2380_vm3 = vcmp.eq.s32.totalorder %v9816_v33, 2 }
 0x29b   : > { %v2683_v18 = vand.u32 3, %v2666_v32  ;;  %v2883_v4 = vadd.f32 %v9714_v1, %v2866_v56  ;;  %v2931_v5 = vmul.f32 %v9813_v36, %v2930_v44  ;;  %vm2066_vm13 = vweird.f32 %v13795_v45 }
 0x29c   : > { %v2378_v53 = vxor.u32 2147483648, %v2373_v27  ;;  %v2381_v43 = vxor.u32 2147483648, %v2365_v9  ;;  %vm2531_vm12 = vcmp.eq.s32.totalorder %v2529_v16, 0  ;;  %v2941_v21 = vmul.f32 %v9818_v0, %v2940_v52 }
 0x29d   : > { %vm2220_vm14 = vweird.f32 %v13806_v37  ;;  %vm2374_vm1 = vweird.f32 %v13814_v10  ;;  %v2532_v38 = vxor.u32 2147483648, %v2527_v46  ;;  %vm2534_vm11 = vcmp.eq.s32.totalorder %v2529_v16, 2  ;;  %v13841_v37 = vld [vmem:[#allocation29_spill] sm:$0xff]  ;;  %v13842_v10 = vld [vmem:[#allocation30_spill] sm:$0xff] }
 0x29e   : > { %v2535_v30 = vxor.u32 2147483648, %v2519_v42  ;;  %v2817_v61 = vsub.s32 4, %v9484_v3  ;;  %v2686_v63 = vxor.u32 2147483648, %v2681_v12  ;;  %v2689_v22 = vxor.u32 2147483648, %v2673_v60 }
 0x29f   : > { %v2823_v24 = vadd.f32 0.041655596, %v2822_v51  ;;  %v2831_v34 = vmul.f32 %v2830_v59, %v9804_v28  ;;  %vm2685_vm8 = vcmp.eq.s32.totalorder %v2683_v18, 0  ;;  %vm2688_vm10 = vcmp.eq.s32.totalorder %v2683_v18, 2 }
 0x2a0   : > { %v2899_v6 = vmul.f32 %v2883_v4, %v2883_v4  ;;  %v2932_v47 = vmul.f32 0.5, %v2931_v5  ;;  %v2379_v62 = vsel %vm2377_vm7, %v2365_v9, %v2378_v53  ;;  %v2382_v35 = vsel %vm2380_vm3, %v2381_v43, %v2373_v27  ;;  %v13840_v5 = vld [vmem:[#allocation28_spill] sm:$0xff] }
 0x2a1   : > { %vm2530_vm6 = vcmp.lt.s32.totalorder %v2529_v16, 2  ;;  %v2942_v55 = vmul.f32 0.5, %v2941_v21  ;;  %v2533_v19 = vsel %vm2531_vm12, %v2519_v42, %v2532_v38  ;;  %v2536_v7 = vsel %vm2534_vm11, %v2535_v30, %v2527_v46 }
 0x2a2   : > { %vm2684_vm4 = vcmp.lt.s32.totalorder %v2683_v18, 2  ;;  %v2818_v11 = vsel %vm2695_vm2, %v2817_v61, %v9484_v3  ;;  %v2687_v56 = vsel %vm2685_vm8, %v2673_v60, %v2686_v63  ;;  %v2690_v44 = vsel %vm2688_vm10, %v2689_v22, %v2681_v12  ;;  %v13844_v61 = vld [vmem:[#allocation32_spill] sm:$0xff]  ;;  %v13846_v63 = vld [vmem:[#allocation39_spill] sm:$0xff] }
 0x2a3   : > { %v2824_v32 = vmul.f32 %v2823_v24, %v9804_v28  ;;  %v2832_v52 = vadd.f32 -0.16666654, %v2831_v34  ;;  %v2229_v9 = vsel %vm2222_vm5, %v2225_v15, %v2228_v25  ;;  %v2383_v27 = vsel %vm2376_vm0, %v2379_v62, %v2382_v35  ;;  %v13847_v24 = vld [vmem:[#allocation43_spill] sm:$0xff]  ;;  %v13851_v62 = vld [vmem:[#allocation17_spill] sm:$0xff] }
 0x2a4   : > { %v9866_v51 = vadd.f32 1.0, %v2899_v6  ;;  %v2933_v42 = vsub.f32 1.5, %v2932_v47  ;;  %vm2528_vm15 = vweird.f32 %v13815_v8  ;;  %vm2682_vm7 = vweird.f32 %v13817_v13  ;;  %v13843_v13 = vld [vmem:[#allocation31_spill] sm:$0xff] }
 0x2a5   : > { %v2820_v3 = vsel %vm9767_vm9, 0, %v2818_v11  ;;  %v2943_v46 = vsub.f32 1.5, %v2942_v55  ;;  %v2537_v60 = vsel %vm2530_vm6, %v2533_v19, %v2536_v7  ;;  %v2691_v12 = vsel %vm2684_vm4, %v2687_v56, %v2690_v44 }
 0x2a6   : > { %vm2935_vm2 = vweird.f32 %v9757_v41  ;;  %vm2936_vm5 = vweird.f32 %v9813_v36  ;;  %v2825_v17 = vadd.f32 -0.4999988, %v2824_v32  ;;  %v2833_v33 = vmul.f32 %v2832_v52, %v9804_v28 }
 0x2a7   : > { %vm2945_vm0 = vweird.f32 %v9763_v39  ;;  %vm2946_vm3 = vweird.f32 %v9818_v0  ;;  %v2076_v20 = vsel %vm2066_vm13, nan, %v9808_v49  ;;  %v9883_v25 = vand.u32 3, %v2820_v3  ;;  %vm9893_vm9 = vmor %vm2935_vm2, %vm2936_vm5 }
 0x2a8   : > { %v2934_v16 = vmul.f32 %v9813_v36, %v2933_v42  ;;  %6199 = vrsqrt.f32 %v9866_v51  ;;  %v2230_v15 = vsel %vm2220_vm14, nan, %v2229_v9  ;;  %v2384_v59 = vsel %vm2374_vm1, nan, %v2383_v27  ;;  %vm2947_vm13 = vmor %vm2945_vm0, %vm2946_vm3 }
 0x2a9   : > { %v2538_v18 = vsel %vm2528_vm15, nan, %v2537_v60  ;;  %v2944_v45 = vmul.f32 %v9818_v0, %v2943_v46  ;;  %v2692_v49 = vsel %vm2682_vm7, nan, %v2691_v12  ;;  %v2850_v53 = vmul.f32 %v13840_v5, %v9582_v57 }
 0x2aa   : > { %v2851_v43 = vmul.f32 %v13841_v37, %v9587_v40  ;;  %v2852_v21 = vmul.f32 %v13842_v10, %v9592_v58  ;;  %v2826_v8 = vmul.f32 %v2825_v17, %v9804_v28  ;;  %v2834_v38 = vadd.f32 1.0, %v2833_v33  ;;  %v13845_v40 = vld [vmem:[#allocation38_spill] sm:$0xff] }
 0x2ab   : > { %v2853_v30 = vmul.f32 %v13843_v13, %v9597_v31  ;;  %v2854_v57 = vmul.f32 %v13844_v61, %v9721_v14  ;;  %vm2839_vm12 = vcmp.eq.s32.totalorder %v9883_v25, 0  ;;  %vm2842_vm14 = vcmp.eq.s32.totalorder %v9883_v25, 2  ;;  %v13849_v31 = vld [vmem:[#allocation44_spill] sm:$0xff]  ;;  %v13850_v14 = vld [vmem:[#allocation21_spill] sm:$0xff] }
 0x2ac   : > { %v2855_v58 = vmul.f32 %v13845_v40, %v9726_v50  ;;  %v2856_v22 = vmul.f32 %v13846_v63, %v9740_v2  ;;  %v2857_v34 = vmul.f32 %v13847_v24, %v2076_v20  ;;  %v9925_v28 = vsel %vm9893_vm9, %v9813_v36, %v2934_v16  ;;  %v13853_v2 = vld [vmem:[#allocation18_spill] sm:$0xff] }
 0x2ad   : > { %13848 = vst [vmem:[#allocation20_spill] sm:$0xff] %v9925_v28  ;;  %v2858_v6 = vmul.f32 %v13849_v31, %v2230_v15  ;;  %v2859_v47 = vmul.f32 %v13850_v14, %v2384_v59  ;;  %v2860_v35 = vmul.f32 %v13851_v62, %v2538_v18  ;;  %v9931_v55 = vsel %vm2947_vm13, %v9818_v0, %v2944_v45 }
 0x2ae   : > { %13852 = vst [vmem:[#allocation63_spill] sm:$0xff] %v9931_v55  ;;  %v9933_v50 = vpop.eup %6199  ;;  %v2861_v19 = vmul.f32 %v13853_v2, %v2692_v49  ;;  %v2867_v7 = vmul.f32 %v9689_v48, %v2850_v53  ;;  %v2868_v11 = vmul.f32 %v9689_v48, %v2851_v43  ;;  %v2869_v36 = vmul.f32 %v9689_v48, %v2852_v21 }
 0x2af   : > { %v2827_v56 = vadd.f32 1.0, %v2826_v8  ;;  %v2835_v44 = vmul.f32 %v2834_v38, %v9785_v29  ;;  %vm2838_vm1 = vcmp.lt.s32.totalorder %v9883_v25, 2  ;;  %v2870_v32 = vmul.f32 %v9689_v48, %v2853_v30 }
 0x2b0   : > { %v3089_v0 = vmul.f32 %v9925_v28, %v9757_v41  ;;  %v2871_v52 = vmul.f32 %v9689_v48, %v2854_v57  ;;  %v2872_v9 = vmul.f32 %v9689_v48, %v2855_v58  ;;  %v3090_v27 = vmul.f32 %v9931_v55, %v9763_v39 }
 0x2b1   : > { %v9949_v42 = vstv %s9878_s6  ;;  %v2873_v3 = vmul.f32 %v9689_v48, %v2856_v22  ;;  %v2874_v29 = vmul.f32 %v9689_v48, %v2857_v34  ;;  %v2875_v46 = vmul.f32 %v9689_v48, %v2858_v6 }
 0x2b2   : > { %13854 = vst [vmem:[#allocation61_spill] sm:$0xff] %v9949_v42  ;;  %v2950_v60 = vmul.f32 %v9933_v50, %v9866_v51  ;;  %vm2836_vm11 = vweird.f32 %v13768_v54  ;;  %v2876_v41 = vmul.f32 %v9689_v48, %v2859_v47  ;;  %v2877_v12 = vmul.f32 %v9689_v48, %v2860_v35  ;;  %v13857_v54 = vld [vmem:[#allocation45_spill] sm:$0xff] }
 0x2b3   : > { %v2878_v17 = vmul.f32 %v9689_v48, %v2861_v19  ;;  %v2884_v39 = vadd.f32 %v9714_v1, %v2867_v7  ;;  %v2840_v33 = vxor.u32 2147483648, %v2835_v44  ;;  %v2843_v20 = vxor.u32 2147483648, %v2827_v56 }
 0x2b4   : > { %v2885_v16 = vadd.f32 %v9714_v1, %v2868_v11  ;;  %v9963_v15 = vmul.f32 %v9949_v42, %v3089_v0  ;;  %v2886_v59 = vadd.f32 %v9714_v1, %v2869_v36  ;;  %v2887_v18 = vadd.f32 %v9714_v1, %v2870_v32 }
 0x2b5   : > { %v2888_v4 = vadd.f32 %v9714_v1, %v2871_v52  ;;  %v9969_v45 = vmul.f32 %v9949_v42, %v3090_v27  ;;  %v2889_v49 = vadd.f32 %v9714_v1, %v2872_v9  ;;  %v2890_v5 = vadd.f32 %v9714_v1, %v2873_v3 }
 0x2b6   : > { %13855 = vst [vmem:[#allocation64_spill] sm:$0xff] %v9963_v15  ;;  %v2891_v53 = vadd.f32 %v9714_v1, %v2874_v29  ;;  %v2951_v37 = vmul.f32 %v9933_v50, %v2950_v60  ;;  %v2892_v43 = vadd.f32 %v9714_v1, %v2875_v46  ;;  %v2893_v10 = vadd.f32 %v9714_v1, %v2876_v41 }
 0x2b7   : > { %13856 = vst [vmem:[#allocation62_spill] sm:$0xff] %v9969_v45  ;;  %v2894_v21 = vadd.f32 %v9714_v1, %v2877_v12  ;;  %v2895_v8 = vadd.f32 %v9714_v1, %v2878_v17  ;;  %v2841_v38 = vsel %vm2839_vm12, %v2827_v56, %v2840_v33  ;;  %v2844_v13 = vsel %vm2842_vm14, %v2843_v20, %v2835_v44 }
 0x2b8   : > { %v2900_v30 = vmul.f32 %v2884_v39, %v2884_v39  ;;  %v3125_v61 = vand.u32 2139095040, %v9963_v15  ;;  %v2901_v57 = vmul.f32 %v2885_v16, %v2885_v16  ;;  %v2902_v40 = vmul.f32 %v2886_v59, %v2886_v59 }
 0x2b9   : > { %v2903_v58 = vmul.f32 %v2887_v18, %v2887_v18  ;;  %v3280_v63 = vand.u32 2139095040, %v9969_v45  ;;  %v2904_v22 = vmul.f32 %v2888_v4, %v2888_v4  ;;  %v2905_v24 = vmul.f32 %v2889_v49, %v2889_v49 }
 0x2ba   : > { %v2952_v34 = vmul.f32 0.5, %v2951_v37  ;;  %v3126_v31 = vshrl.u32 %v3125_v61, 23  ;;  %v2845_v6 = vsel %vm2838_vm1, %v2841_v38, %v2844_v13  ;;  %v2906_v14 = vmul.f32 %v2890_v5, %v2890_v5 }
 0x2bb   : > { %v2907_v47 = vmul.f32 %v2891_v53, %v2891_v53  ;;  %v3281_v62 = vshrl.u32 %v3280_v63, 23  ;;  %v2908_v35 = vmul.f32 %v2892_v43, %v2892_v43  ;;  %v9987_v2 = vmul.f32 %v2893_v10, %v2893_v10 }
 0x2bc   : > { %v9989_v19 = vmul.f32 %v2894_v21, %v2894_v21  ;;  %v6021_v7 = vadd.s32 4294967169, %v3126_v31  ;;  %v9991_v11 = vmul.f32 %v2895_v8, %v2895_v8  ;;  %v9993_v36 = vadd.f32 1.0, %v2900_v30 }
 0x2bd   : > { %v9995_v56 = vadd.f32 1.0, %v2901_v57  ;;  %v13459_v44 = vand.u32 2147483647, %v9963_v15  ;;  %v2846_v25 = vsel %vm2836_vm11, nan, %v2845_v6  ;;  %v10000_v32 = vadd.f32 1.0, %v2902_v40 }
 0x2be   : > { %v2953_v0 = vsub.f32 1.5, %v2952_v34  ;;  %v3132_v52 = vadd.s32 1, %v6021_v7  ;;  %v10002_v9 = vadd.f32 1.0, %v2903_v58  ;;  %v10004_v27 = vadd.f32 1.0, %v2904_v22 }
 0x2bf   : > { %v10006_v3 = vadd.f32 1.0, %v2905_v24  ;;  %v6024_v29 = vadd.s32 4294967169, %v3281_v62  ;;  %v10008_v46 = vadd.f32 1.0, %v2906_v14  ;;  %vm2955_vm8 = vweird.f32 %v9866_v51 }
 0x2c0   : > { %vm2956_vm10 = vweird.f32 %v9933_v50  ;;  %vm3133_vm6 = vcmp.gt.s32.totalorder %v3132_v52, 0  ;;  %v2862_v60 = vmul.f32 %v13857_v54, %v2846_v25  ;;  %6201 = vrsqrt.f32 %v9993_v36 }
 0x2c1   : > { %v3129_v41 = vand.u32 8388607, %v13459_v44  ;;  %v3134_v12 = vsel %vm3133_vm6, %v3132_v52, 0  ;;  %v10016_v17 = vadd.f32 1.0, %v2907_v47  ;;  %v2954_v39 = vmul.f32 %v9933_v50, %v2953_v0  ;;  %vm2957_vm4 = vmor %vm2955_vm8, %vm2956_vm10 }
 0x2c2   : > { %6203 = vrsqrt.f32 %v9995_v56  ;;  %v3136_v33 = vand.u32 31, %v3134_v12  ;;  %v10020_v20 = vadd.f32 1.0, %v2908_v35  ;;  %v10023_v16 = vshrl.u32 %v3134_v12, 5 }
 0x2c3   : > { %6205 = vrsqrt.f32 %v10000_v32  ;;  %v3287_v59 = vadd.s32 1, %v6024_v29  ;;  %v13859_v5 = vmov 2131351028   ;;  %v2879_v37 = vmul.f32 %v9689_v48, %v2862_v60 }
 0x2c4   : > { %13858 = vst [vmem:[#allocation50_spill] sm:$0xff] %v10020_v20  ;;  %v10025_v18 = vsub.s32 32, %v3136_v33  ;;  %v3139_v4 = vshll.u32 %v13629_v26, %v3136_v33  ;;  %v3142_v49 = vshll.u32 %v13777_v23, %v3136_v33  ;;  %v3145_v53 = vshll.u32 %v13859_v5, %v3136_v33 }
 0x2c5   : > { %v3130_v43 = vor.u32 8388608, %v3129_v41  ;;  %v13860_v10 = vmov 2102212464   ;;  %v13861_v8 = vmov 920167782   ;;  %v10034_v13 = vsel %vm2957_vm4, %v9933_v50, %v2954_v39 }
 0x2c6   : > { %v3148_v21 = vshll.u32 %v13860_v10, %v3136_v33  ;;  %v3151_v38 = vshll.u32 %v13861_v8, %v3136_v33  ;;  %13862 = vst [vmem:[#allocation46_spill] sm:$0xff] %v10034_v13  ;;  %v3140_v30 = vshrl.u32 %v13777_v23, %v10025_v18  ;;  %v3143_v61 = vshrl.u32 %v13859_v5, %v10025_v18  ;;  %v10042_v40 = vpop.eup %6201 }
 0x2c7   : > { %v3146_v57 = vshrl.u32 %v13860_v10, %v10025_v18  ;;  %v3149_v48 = vshrl.u32 %v13861_v8, %v10025_v18  ;;  %v13863_v58 = vmov 1326507024   ;;  %vm3154_vm15 = vcmp.lt.s32.totalorder %v10023_v16, 1 }
 0x2c8   : > { %v3152_v63 = vshrl.u32 %v13863_v58, %v10025_v18  ;;  %vm3288_vm7 = vcmp.gt.s32.totalorder %v3287_v59, 0  ;;  %v10049_v50 = vpop.eup %6203  ;;  %v10051_v22 = vor.u32 %v3140_v30, %v3139_v4  ;;  %v10053_v24 = vor.u32 %v3143_v61, %v3142_v49 }
 0x2c9   : > { %v10055_v34 = vor.u32 %v3146_v57, %v3145_v53  ;;  %vm3157_vm2 = vcmp.lt.s32.totalorder %v10023_v16, 4  ;;  %v10058_v31 = vpop.eup %6205  ;;  %v3150_v6 = vor.u32 %v3149_v48, %v3148_v21  ;;  %vm3156_vm5 = vcmp.lt.s32.totalorder %v10023_v16, 3 }
 0x2ca   : > { %v3153_v14 = vor.u32 %v3152_v63, %v3151_v38  ;;  %v10061_v47 = vshll.u32 %v3130_v43, 8  ;;  %v2960_v62 = vmul.f32 %v10042_v40, %v9993_v36  ;;  %vm3155_vm0 = vcmp.lt.s32.totalorder %v10023_v16, 2 }
 0x2cb   : > { %v3162_v35 = vsel %vm3154_vm15, %v10051_v22, %v10053_v24  ;;  %v3166_v7 = vsel %vm3154_vm15, %v10053_v24, %v10055_v34  ;;  %v3091_v25 = vmul.f32 %v10034_v13, %v9866_v51  ;;  %v3163_v0 = vsel %vm3157_vm2, %v3150_v6, 920167782 }
 0x2cc   : > { %v3167_v52 = vsel %vm3157_vm2, %v3153_v14, 1326507024  ;;  %v3289_v29 = vsel %vm3288_vm7, %v3287_v59, 0  ;;  %v10082_v54 = vadd.f32 1.0, %v9987_v2  ;;  %v10085_v60 = vadd.f32 1.0, %v9989_v19 }
 0x2cd   : > { %v3164_v41 = vsel %vm3156_vm5, %v10055_v34, %v3163_v0  ;;  %v3168_v51 = vsel %vm3156_vm5, %v3150_v6, %v3167_v52  ;;  %6207 = vrsqrt.f32 %v10002_v9  ;;  %v3171_v2 = vand.u32 65535, %v10061_v47 }
 0x2ce   : > { %13864 = vst [vmem:[#allocation60_spill] sm:$0xff] %v10082_v54  ;;  %v3165_v12 = vsel %vm3155_vm0, %v3162_v35, %v3164_v41  ;;  %v3169_v39 = vsel %vm3155_vm0, %v3166_v7, %v3168_v51  ;;  %v2970_v19 = vmul.f32 %v10049_v50, %v9995_v56  ;;  %v3291_v4 = vand.u32 31, %v3289_v29 }
 0x2cf   : > { %13865 = vst [vmem:[#allocation37_spill] sm:$0xff] %v10085_v60  ;;  %v3174_v33 = vshrl.u32 %v3169_v39, 16  ;;  %v3196_v59 = vshrl.u32 %v3165_v12, 16  ;;  %v2896_v49 = vadd.f32 %v9714_v1, %v2879_v37  ;;  %v2961_v53 = vmul.f32 %v10042_v40, %v2960_v62 }
 0x2d0   : > { %v10103_v43 = vmul.f32 %v9949_v42, %v3091_v25  ;;  %v13458_v21 = vand.u32 2147483647, %v9969_v45  ;;  %v10107_v38 = vadd.f32 1.0, %v9991_v11  ;;  %6209 = vrsqrt.f32 %v10004_v27 }
 0x2d1   : > { %v3172_v30 = vshrl.u32 %v10061_v47, 16  ;;  %v3195_v61 = vand.u32 65535, %v3165_v12  ;;  %6211 = vrsqrt.f32 %v10006_v3  ;;  %v3173_v57 = vand.u32 65535, %v3169_v39 }
 0x2d2   : > { %13866 = vst [vmem:[#allocation55_spill] sm:$0xff] %v10103_v43  ;;  %v10112_v48 = vmul.u32 %v3174_v33, %v3171_v2  ;;  %v10114_v1 = vmul.u32 %v3196_v59, %v3171_v2  ;;  %v2971_v37 = vmul.f32 %v10049_v50, %v2970_v19  ;;  %v2980_v63 = vmul.f32 %v10058_v31, %v10000_v32 }
 0x2d3   : > { %13867 = vst [vmem:[#allocation56_spill] sm:$0xff] %v10107_v38  ;;  %6213 = vrsqrt.f32 %v10008_v46  ;;  %v10120_v11 = vsub.s32 32, %v3291_v4  ;;  %v10122_v6 = vpop.eup %6207  ;;  %v10124_v14 = vmul.f32 %v2896_v49, %v2896_v49  ;;  %v10126_v62 = vmul.f32 0.5, %v2961_v53 }
 0x2d4   : > { %v10130_v35 = vand.u32 8388607, %v13458_v21  ;;  %v3435_v7 = vand.u32 2139095040, %v10103_v43  ;;  %v3197_v25 = vmul.u32 %v3195_v61, %v3171_v2  ;;  %v10133_v0 = vmul.u32 %v3195_v61, %v3172_v30 }
 0x2d5   : > { %13868 = vst [vmem:[#allocation48_spill] sm:$0xff] %v10120_v11  ;;  %v3201_v52 = vshll.u32 %v10114_v1, 16  ;;  %v10136_v41 = vshrl.u32 %v3289_v29, 5  ;;  %v3175_v51 = vmul.u32 %v3173_v57, %v3171_v2  ;;  %v10138_v12 = vmul.u32 %v3173_v57, %v3172_v30 }
 0x2d6   : > { %v3179_v39 = vshll.u32 %v10112_v48, 16  ;;  %v3294_v19 = vshll.u32 %v13629_v26, %v3291_v4  ;;  %v10142_v49 = vpop.eup %6209  ;;  %v3297_v53 = vshll.u32 %v13777_v23, %v3291_v4  ;;  %v3303_v21 = vshll.u32 %v13860_v10, %v3291_v4 }
 0x2d7   : > { %v3304_v61 = vshrl.u32 %v13861_v8, %v10120_v11  ;;  %v3306_v44 = vshll.u32 %v13861_v8, %v3291_v4  ;;  %v10149_v29 = vpop.eup %6211  ;;  %v3295_v2 = vshrl.u32 %v13777_v23, %v10120_v11  ;;  %v3298_v57 = vshrl.u32 %v13859_v5, %v10120_v11 }
 0x2d8   : > { %v3300_v13 = vshll.u32 %v13859_v5, %v3291_v4  ;;  %v3301_v55 = vshrl.u32 %v13860_v10, %v10120_v11  ;;  %vm3205_vm3 = vc.u32 %v3197_v25, %v3201_v52  ;;  %v10161_v15 = vadd.s32 %v3201_v52, %v3197_v25 }
 0x2d9   : > { %v10158_v28 = vpop.eup %6213  ;;  %v3307_v42 = vshrl.u32 %v13863_v58, %v10120_v11  ;;  %v3181_v38 = vshll.u32 %v10138_v12, 16  ;;  %vm3183_vm9 = vc.u32 %v3175_v51, %v3179_v39  ;;  %v3185_v60 = vadd.s32 %v3179_v39, %v3175_v51 }
 0x2da   : > { %v3436_v54 = vshrl.u32 %v3435_v7, 23  ;;  %v3200_v20 = vmul.u32 %v3196_v59, %v3172_v30  ;;  %v3305_v4 = vor.u32 %v3304_v61, %v3303_v21  ;;  %vm3312_vm13 = vcmp.lt.s32.totalorder %v10136_v41, 4 }
 0x2db   : > { %v3308_v5 = vor.u32 %v3307_v42, %v3306_v44  ;;  %v3178_v23 = vmul.u32 %v3174_v33, %v3172_v30  ;;  %v13869_v10 = vmov 0   ;;  %v3285_v45 = vor.u32 8388608, %v10130_v35 }
 0x2dc   : > { %v3206_v8 = vsel %vm3205_vm3, 1, %v13869_v10  ;;  %v10169_v25 = vor.u32 %v3295_v2, %v3294_v19  ;;  %v3184_v52 = vsel %vm3183_vm9, 1, %v13869_v10  ;;  %v13870_v11 = vshll.u32 %v10133_v0, 16 }
 0x2dd   : > { %v10179_v59 = vor.u32 %v3298_v57, %v3297_v53  ;;  %v10181_v42 = vor.u32 %v3301_v55, %v3300_v13  ;;  %vm3187_vm14 = vc.u32 %v3185_v60, %v3181_v38  ;;  %vm3309_vm1 = vcmp.lt.s32.totalorder %v10136_v41, 1 }
 0x2de   : > { %vm10175_vm12 = vc.u32 %v10161_v15, %v13870_v11  ;;  %vm3311_vm11 = vcmp.lt.s32.totalorder %v10136_v41, 3  ;;  %v3322_v44 = vsel %vm3312_vm13, %v3308_v5, 1326507024  ;;  %vm2965_vm8 = vweird.f32 %v9993_v36 }
 0x2df   : > { %vm2966_vm10 = vweird.f32 %v10042_v40  ;;  %v2981_v33 = vmul.f32 %v10058_v31, %v2980_v63  ;;  %v3208_v21 = vadd.s32 %v3206_v8, %v3200_v20  ;;  %v3318_v30 = vsel %vm3312_vm13, %v3305_v4, 920167782 }
 0x2e0   : > { %v6027_v55 = vadd.s32 4294967169, %v3436_v54  ;;  %v2972_v13 = vmul.f32 0.5, %v2971_v37  ;;  %v2990_v60 = vmul.f32 %v10122_v6, %v10002_v9  ;;  %v3186_v38 = vadd.s32 %v3184_v52, %v3178_v23 }
 0x2e1   : > { %v3210_v5 = vsel %vm10175_vm12, 1, %v13869_v10  ;;  %v3188_v11 = vsel %vm3187_vm14, 1, %v13869_v10  ;;  %vm3310_vm6 = vcmp.lt.s32.totalorder %v10136_v41, 2  ;;  %v3321_v20 = vsel %vm3309_vm1, %v10179_v59, %v10181_v42  ;;  %vm2967_vm14 = vmor %vm2965_vm8, %vm2966_vm10 }
 0x2e2   : > { %v3323_v8 = vsel %vm3311_vm11, %v3305_v4, %v3322_v44  ;;  %v2963_v54 = vsub.f32 1.5, %v10126_v62  ;;  %vm2975_vm4 = vweird.f32 %v9995_v56  ;;  %v3317_v23 = vsel %vm3309_vm1, %v10169_v25, %v10179_v59 }
 0x2e3   : > { %v3319_v37 = vsel %vm3311_vm11, %v10181_v42, %v3318_v30  ;;  %v10214_v63 = vshll.u32 %v3285_v45, 8  ;;  %vm2976_vm7 = vweird.f32 %v10049_v50  ;;  %vm2985_vm3 = vweird.f32 %v10000_v32 }
 0x2e4   : > { %v3202_v35 = vshrl.u32 %v10114_v1, 16  ;;  %v3212_v62 = vadd.s32 %v3210_v5, %v3208_v21  ;;  %v3442_v7 = vadd.s32 1, %v6027_v55  ;;  %vm2986_vm9 = vweird.f32 %v10058_v31 }
 0x2e5   : > { %v3180_v39 = vshrl.u32 %v10112_v48, 16  ;;  %v3190_v19 = vadd.s32 %v3188_v11, %v3186_v38  ;;  %v10223_v53 = vsel %vm3310_vm6, %v3321_v20, %v3323_v8  ;;  %v2973_v61 = vsub.f32 1.5, %v2972_v13  ;;  %vm2987_vm8 = vmor %vm2985_vm3, %vm2986_vm9 }
 0x2e6   : > { %v2982_v45 = vmul.f32 0.5, %v2981_v33  ;;  %v2991_v2 = vmul.f32 %v10122_v6, %v2990_v60  ;;  %v10228_v57 = vsel %vm3310_vm6, %v3317_v23, %v3319_v37  ;;  %v10231_v1 = vadd.f32 1.0, %v10124_v14 }
 0x2e7   : > { %v2964_v4 = vmul.f32 %v10042_v40, %v2963_v54  ;;  %v3138_v48 = vshrl.u32 %v13629_v26, %v10025_v18  ;;  %v3326_v52 = vand.u32 65535, %v10214_v63  ;;  %v3204_v51 = vshrl.u32 %v10133_v0, 16 }
 0x2e8   : > { %v3213_v44 = vadd.s32 %v3212_v62, %v3202_v35  ;;  %v3329_v33 = vshrl.u32 %v10223_v53, 16  ;;  %vm3443_vm12 = vcmp.gt.s32.totalorder %v3442_v7, 0  ;;  %v3159_v21 = vsel %vm3157_vm2, %v10055_v34, 2102212464 }
 0x2e9   : > { %v3182_v14 = vshrl.u32 %v10138_v12, 16  ;;  %v3191_v30 = vadd.s32 %v3190_v19, %v3180_v39  ;;  %v3351_v55 = vshrl.u32 %v10228_v57, 16  ;;  %v2974_v13 = vmul.f32 %v10049_v50, %v2973_v61 }
 0x2ea   : > { %v2983_v18 = vsub.f32 1.5, %v2982_v45  ;;  %v2992_v60 = vmul.f32 0.5, %v2991_v2  ;;  %v3000_v38 = vmul.f32 %v10142_v49, %v10004_v27  ;;  %v3010_v34 = vmul.f32 %v10149_v29, %v10006_v3 }
 0x2eb   : > { %v3158_v12 = vsel %vm3154_vm15, %v3138_v48, %v10051_v22  ;;  %v3327_v5 = vshrl.u32 %v10214_v63, 16  ;;  %v3444_v11 = vsel %vm3443_vm12, %v3442_v7, 0  ;;  %v3160_v20 = vsel %vm3156_vm5, %v10053_v24, %v3159_v21  ;;  %vm2977_vm15 = vmor %vm2975_vm4, %vm2976_vm7 }
 0x2ec   : > { %v3214_v8 = vadd.s32 %v3213_v44, %v3204_v51  ;;  %v3328_v54 = vand.u32 65535, %v10223_v53  ;;  %v10263_v23 = vmul.u32 %v3329_v33, %v3326_v52  ;;  %v10265_v37 = vadd.s32 %v3191_v30, %v3182_v14 }
 0x2ed   : > { %v13873_v35 = vshll.u32 %v10133_v0, 16  ;;  %v3350_v62 = vand.u32 65535, %v10228_v57  ;;  %v10273_v7 = vmul.u32 %v3351_v55, %v3326_v52  ;;  %v10276_v24 = vsel %vm2967_vm14, %v10042_v40, %v2964_v4 }
 0x2ee   : > { %13874 = vst [vmem:[#allocation58_spill] sm:$0xff] %v10276_v24  ;;  %v2984_v39 = vmul.f32 %v10058_v31, %v2983_v18  ;;  %v2993_v19 = vsub.f32 1.5, %v2992_v60  ;;  %vm2995_vm2 = vweird.f32 %v10002_v9  ;;  %vm2996_vm5 = vweird.f32 %v10122_v6 }
 0x2ef   : > { %v10270_v22 = vadd.s32 %v10161_v15, %v13873_v35  ;;  %v3446_v15 = vand.u32 31, %v3444_v11  ;;  %v3001_v40 = vmul.f32 %v10142_v49, %v3000_v38  ;;  %v3011_v0 = vmul.f32 %v10149_v29, %v3010_v34  ;;  %vm2997_vm3 = vmor %vm2995_vm2, %vm2996_vm5 }
 0x2f0   : > { %v3020_v61 = vmul.f32 %v10158_v28, %v10008_v46  ;;  %v3161_v45 = vsel %vm3155_vm0, %v3158_v12, %v3160_v20  ;;  %v3218_v2 = vadd.s32 1, %v3214_v8  ;;  %v3330_v57 = vmul.u32 %v3328_v54, %v3326_v52 }
 0x2f1   : > { %v10295_v4 = vmul.u32 %v3328_v54, %v3327_v5  ;;  %v3334_v48 = vshll.u32 %v10263_v23, 16  ;;  %v10299_v51 = vsel %vm2977_vm15, %v10049_v50, %v2974_v13  ;;  %vm3217_vm10 = vc.u32 %v10265_v37, %v10270_v22 }
 0x2f2   : > { %13875 = vst [vmem:[#allocation59_spill] sm:$0xff] %v10299_v51  ;;  %v3352_v44 = vmul.u32 %v3350_v62, %v3326_v52  ;;  %v3356_v21 = vshll.u32 %v10273_v7, 16  ;;  %v10305_v14 = vsel %vm2987_vm8, %v10058_v31, %v2984_v39  ;;  %v2994_v16 = vmul.f32 %v10122_v6, %v2993_v19 }
 0x2f3   : > { %13876 = vst [vmem:[#allocation52_spill] sm:$0xff] %v10305_v14  ;;  %v10308_v30 = vmul.u32 %v3350_v62, %v3327_v5  ;;  %v10310_v18 = vsub.s32 32, %v3446_v15  ;;  %v10312_v60 = vmul.f32 0.5, %v3001_v40  ;;  %v10314_v38 = vmul.f32 0.5, %v3011_v0 }
 0x2f4   : > { %6215 = vrsqrt.f32 %v10016_v17  ;;  %v3215_v50 = vmul.u32 %v10061_v47, %v3161_v45  ;;  %v10319_v52 = vmul.f32 %v10158_v28, %v3020_v61  ;;  %v3219_v13 = vsel %vm3217_vm10, %v3218_v2, %v3214_v8 }
 0x2f5   : > { %v3336_v31 = vshll.u32 %v10295_v4, 16  ;;  %v3340_v34 = vadd.s32 %v3334_v48, %v3330_v57  ;;  %vm3338_vm0 = vc.u32 %v3330_v57, %v3334_v48  ;;  %v3355_v12 = vmul.u32 %v3351_v55, %v3327_v5 }
 0x2f6   : > { %vm3360_vm4 = vc.u32 %v3352_v44, %v3356_v21  ;;  %v13483_v20 = vand.u32 2147483647, %v10103_v43  ;;  %v13481_v54 = vshll.u32 %v10308_v30, 16  ;;  %v10324_v35 = vadd.s32 %v3356_v21, %v3352_v44 }
 0x2f7   : > { %v13877_v62 = vmov 920167782   ;;  %v3462_v47 = vshrl.u32 %v13863_v58, %v10310_v18  ;;  %v10329_v19 = vadd.s32 %v3219_v13, %v3215_v50  ;;  %v10331_v8 = vshrl.u32 %v3444_v11, 5 }
 0x2f8   : > { %v3461_v39 = vshll.u32 %v13877_v62, %v3446_v15  ;;  %v13878_v40 = vmov 2102212464   ;;  %v3459_v55 = vshrl.u32 %v13877_v62, %v10310_v18  ;;  %v3333_v61 = vmul.u32 %v3329_v33, %v3327_v5 }
 0x2f9   : > { %v3458_v0 = vshll.u32 %v13878_v40, %v3446_v15  ;;  %v3339_v45 = vsel %vm3338_vm0, 1, %v13869_v10  ;;  %vm10339_vm7 = vc.u32 %v3340_v34, %v3336_v31  ;;  %v3361_v57 = vsel %vm3360_vm4, 1, %v13869_v10 }
 0x2fa   : > { %v10344_v48 = vpop.eup %6215  ;;  %v13881_v11 = vmov 2475754826   ;;  %v13882_v53 = vmov 2131351028   ;;  %v3456_v21 = vshrl.u32 %v13878_v40, %v10310_v18  ;;  %vm3005_vm9 = vweird.f32 %v10004_v27 }
 0x2fb   : > { %v3452_v44 = vshll.u32 %v13881_v11, %v3446_v15  ;;  %v3453_v33 = vshrl.u32 %v13882_v53, %v10310_v18  ;;  %v3455_v5 = vshll.u32 %v13882_v53, %v3446_v15  ;;  %vm3006_vm12 = vweird.f32 %v10142_v49 }
 0x2fc   : > { %vm3364_vm14 = vc.u32 %v10324_v35, %v13481_v54  ;;  %v3449_v50 = vshll.u32 %v13629_v26, %v3446_v15  ;;  %v3450_v13 = vshrl.u32 %v13881_v11, %v10310_v18  ;;  %v3463_v31 = vor.u32 %v3462_v47, %v3461_v39  ;;  %v13884_v15 = vld [vmem:[#allocation50_spill] sm:$0xff] }
 0x2fd   : > { %v3221_v34 = vadd.s32 536870912, %v10329_v19  ;;  %v3439_v58 = vand.u32 8388607, %v13483_v20  ;;  %v3460_v62 = vor.u32 %v3459_v55, %v3458_v0  ;;  %vm3467_vm15 = vcmp.lt.s32.totalorder %v10331_v8, 4 }
 0x2fe   : > { %v10369_v40 = vsel %vm2997_vm3, %v10122_v6, %v2994_v16  ;;  %vm3015_vm2 = vweird.f32 %v10006_v3  ;;  %vm3016_vm5 = vweird.f32 %v10149_v29  ;;  %6217 = vrsqrt.f32 %v13884_v15  ;;  %vm3007_vm3 = vmor %vm3005_vm9, %vm3006_vm12 }
 0x2ff   : > { %13883 = vst [vmem:[#allocation53_spill] sm:$0xff] %v10369_v40  ;;  %v3341_v54 = vadd.s32 %v3339_v45, %v3333_v61  ;;  %v3363_v53 = vadd.s32 %v3361_v57, %v3355_v12  ;;  %v3343_v39 = vsel %vm10339_vm7, 1, %v13869_v10  ;;  %v3365_v47 = vsel %vm3364_vm14, 1, %v13869_v10 }
 0x300   : > { %v10378_v0 = vor.u32 %v3453_v33, %v3452_v44  ;;  %v10380_v55 = vor.u32 %v3456_v21, %v3455_v5  ;;  %v10382_v6 = vor.u32 %v3450_v13, %v3449_v50  ;;  %vm3464_vm8 = vcmp.lt.s32.totalorder %v10331_v8, 1  ;;  %v13886_v13 = vld [vmem:[#allocation48_spill] sm:$0xff] }
 0x301   : > { %vm3466_vm10 = vcmp.lt.s32.totalorder %v10331_v8, 3  ;;  %v3477_v16 = vsel %vm3467_vm15, %v3463_v31, 1326507024  ;;  %v3003_v12 = vsub.f32 1.5, %v10312_v60  ;;  %v10389_v61 = vshrl.u32 %v3221_v34, 30 }
 0x302   : > { %v3440_v45 = vor.u32 8388608, %v3439_v58  ;;  %v3473_v2 = vsel %vm3467_vm15, %v3460_v62, 920167782  ;;  %v3013_v57 = vsub.f32 1.5, %v10314_v38  ;;  %v3335_v44 = vshrl.u32 %v10263_v23, 16 }
 0x303   : > { %13885 = vst [vmem:[#allocation40_spill] sm:$0xff] %v10389_v61  ;;  %v3357_v33 = vshrl.u32 %v10273_v7, 16  ;;  %v3367_v5 = vadd.s32 %v3365_v47, %v3363_v53  ;;  %v3345_v21 = vadd.s32 %v3343_v39, %v3341_v54  ;;  %vm3465_vm0 = vcmp.lt.s32.totalorder %v10331_v8, 2 }
 0x304   : > { %v3476_v60 = vsel %vm3464_vm8, %v10378_v0, %v10380_v55  ;;  %v3478_v58 = vsel %vm3466_vm10, %v3460_v62, %v3477_v16  ;;  %v10403_v50 = vpop.eup %6217  ;;  %v3022_v38 = vmul.f32 0.5, %v10319_v52  ;;  %v3293_v23 = vshrl.u32 %v13629_v26, %v13886_v13  ;;  %v13887_v62 = vld [vmem:[#allocation60_spill] sm:$0xff] }
 0x305   : > { %v3472_v7 = vsel %vm3464_vm8, %v10382_v6, %v10378_v0  ;;  %v3474_v54 = vsel %vm3466_vm10, %v10380_v55, %v3473_v2  ;;  %v3004_v53 = vmul.f32 %v10142_v49, %v3003_v12  ;;  %vm3025_vm4 = vweird.f32 %v10008_v46  ;;  %v13888_v12 = vld [vmem:[#allocation37_spill] sm:$0xff]  ;;  %v13889_v13 = vld [vmem:[#allocation56_spill] sm:$0xff] }
 0x306   : > { %vm3026_vm7 = vweird.f32 %v10158_v28  ;;  %6219 = vrsqrt.f32 %v13887_v62  ;;  %v3223_v52 = vshll.u32 %v10389_v61, 30  ;;  %v10420_v31 = vshll.u32 %v3440_v45, 8 }
 0x307   : > { %v3314_v34 = vsel %vm3312_vm13, %v10181_v42, 2102212464  ;;  %v3359_v39 = vshrl.u32 %v10308_v30, 16  ;;  %v3368_v47 = vadd.s32 %v3367_v5, %v3357_v33  ;;  %v10428_v16 = vsel %vm3465_vm0, %v3476_v60, %v3478_v58  ;;  %vm3017_vm13 = vmor %vm3015_vm2, %vm3016_vm5 }
 0x308   : > { %6221 = vrsqrt.f32 %v13888_v12  ;;  %v3337_v45 = vshrl.u32 %v10295_v4, 16  ;;  %v3346_v2 = vadd.s32 %v3345_v21, %v3335_v44  ;;  %v10438_v42 = vsel %vm3465_vm0, %v3472_v7, %v3474_v54 }
 0x309   : > { %v3014_v33 = vmul.f32 %v10149_v29, %v3013_v57  ;;  %v3023_v5 = vsub.f32 1.5, %v3022_v38  ;;  %6223 = vrsqrt.f32 %v13889_v13  ;;  %v3313_v60 = vsel %vm3309_vm1, %v3293_v23, %v10169_v25 }
 0x30a   : > { %v10450_v4 = vsub.s32 %v10329_v19, %v3223_v52  ;;  %v3315_v44 = vsel %vm3311_vm11, %v10179_v59, %v3314_v34  ;;  %v3481_v57 = vand.u32 65535, %v10420_v31  ;;  %v3484_v21 = vshrl.u32 %v10428_v16, 16 }
 0x30b   : > { %v10458_v58 = vsel %vm3007_vm3, %v10142_v49, %v3004_v53  ;;  %6225 = vrsqrt.f32 %v10231_v1  ;;  %v3369_v25 = vadd.s32 %v3368_v47, %v3359_v39  ;;  %v3506_v38 = vshrl.u32 %v10438_v42, 16 }
 0x30c   : > { %13890 = vst [vmem:[#allocation57_spill] sm:$0xff] %v10458_v58  ;;  %v10462_v23 = vpop.eup %6219  ;;  %v3092_v19 = vmul.f32 %v10276_v24, %v9993_v36  ;;  %v10468_v59 = vmul.f32 %v10299_v51, %v9995_v56  ;;  %v10470_v7 = vadd.s32 %v3346_v2, %v3337_v45  ;;  %v13891_v54 = vshll.u32 %v10308_v30, 16 }
 0x30d   : > { %v10478_v53 = vsel %vm3017_vm13, %v10149_v29, %v3014_v33  ;;  %v3024_v52 = vmul.f32 %v10158_v28, %v3023_v5  ;;  %v3030_v34 = vmul.f32 %v10344_v48, %v10016_v17  ;;  %v3316_v36 = vsel %vm3310_vm6, %v3313_v60, %v3315_v44  ;;  %vm3027_vm6 = vmor %vm3025_vm4, %vm3026_vm7  ;;  %v13895_v44 = vld [vmem:[#allocation61_spill] sm:$0xff] }
 0x30e   : > { %v10475_v49 = vadd.s32 %v10324_v35, %v13891_v54  ;;  %13892 = vst [vmem:[#allocation14_spill] sm:$0xff] %v10478_v53  ;;  %v10485_v56 = vpop.eup %6221  ;;  %v3226_v39 = vsub.s32 0, %v10450_v4  ;;  %v3482_v30 = vshrl.u32 %v10420_v31, 16  ;;  %v3483_v35 = vand.u32 65535, %v10428_v16 }
 0x30f   : > { %v10490_v47 = vmul.u32 %v3484_v21, %v3481_v57  ;;  %v10492_v29 = vpop.eup %6223  ;;  %vm3225_vm1 = vcmp.lt.s32.totalorder %v10450_v4, 0  ;;  %v3373_v45 = vadd.s32 1, %v3369_v25  ;;  %v3505_v2 = vand.u32 65535, %v10438_v42 }
 0x310   : > { %v10496_v33 = vmul.u32 %v3506_v38, %v3481_v57  ;;  %v3040_v41 = vmul.f32 %v10403_v50, %v13884_v15  ;;  %v10502_v5 = vmul.f32 %v10305_v14, %v10000_v32  ;;  %v10506_v16 = vmul.f32 %v10369_v40, %v10002_v9 }
 0x311   : > { %vm3372_vm11 = vc.u32 %v10470_v7, %v10475_v49  ;;  %v10510_v60 = vpop.eup %6225  ;;  %v3031_v42 = vmul.f32 %v10344_v48, %v3030_v34  ;;  %v3050_v32 = vmul.f32 %v10462_v23, %v13887_v62  ;;  %v10520_v54 = vmul.f32 %v13895_v44, %v3092_v19 }
 0x312   : > { %13893 = vst [vmem:[#allocation16_spill] sm:$0xff] %v10502_v5  ;;  %v3370_v9 = vmul.u32 %v10214_v63, %v3316_v36  ;;  %v3227_v20 = vsel %vm3225_vm1, %v3226_v39, %v10450_v4  ;;  %v3485_v40 = vmul.u32 %v3483_v35, %v3481_v57  ;;  %v10524_v14 = vmul.u32 %v3483_v35, %v3482_v30 }
 0x313   : > { %13894 = vst [vmem:[#allocation25_spill] sm:$0xff] %v10506_v16  ;;  %v3489_v51 = vshll.u32 %v10490_v47, 16  ;;  %v3374_v24 = vsel %vm3372_vm11, %v3373_v45, %v3369_v25  ;;  %v3507_v43 = vmul.u32 %v3505_v2, %v3481_v57  ;;  %v10527_v61 = vmul.u32 %v3505_v2, %v3482_v30 }
 0x314   : > { %13896 = vst [vmem:[#allocation33_spill] sm:$0xff] %v10520_v54  ;;  %v3511_v34 = vshll.u32 %v10496_v33, 16  ;;  %v10531_v16 = vsel %vm3027_vm6, %v10158_v28, %v3024_v52  ;;  %v3041_v19 = vmul.f32 %v10403_v50, %v3040_v41  ;;  %v3060_v63 = vmul.f32 %v10485_v56, %v13888_v12 }
 0x315   : > { %13897 = vst [vmem:[#allocation34_spill] sm:$0xff] %v10531_v16  ;;  %v10538_v36 = vmul.f32 %v10458_v58, %v10004_v27  ;;  %v3032_v39 = vmul.f32 0.5, %v3031_v42  ;;  %v3051_v25 = vmul.f32 %v10462_v23, %v3050_v32  ;;  %v3070_v57 = vmul.f32 %v10492_v29, %v13889_v13 }
 0x316   : > { %v3228_v35 = vclz %v3227_v20  ;;  %v10543_v45 = vadd.s32 %v3374_v24, %v3370_v9  ;;  %v3491_v28 = vshll.u32 %v10524_v14, 16  ;;  %vm3493_vm9 = vc.u32 %v3485_v40, %v3489_v51 }
 0x317   : > { %13898 = vst [vmem:[#allocation41_spill] sm:$0xff] %v10538_v36  ;;  %v3495_v52 = vadd.s32 %v3489_v51, %v3485_v40  ;;  %v13493_v2 = vshll.u32 %v10527_v61, 16  ;;  %vm3515_vm12 = vc.u32 %v3507_v43, %v3511_v34  ;;  %v10547_v41 = vadd.s32 %v3511_v34, %v3507_v43 }
 0x318   : > { %v3590_v27 = vand.u32 2139095040, %v10520_v54  ;;  %v3042_v42 = vmul.f32 0.5, %v3041_v19  ;;  %v3061_v32 = vmul.f32 %v10485_v56, %v3060_v63  ;;  %v3080_v58 = vmul.f32 %v10510_v60, %v10231_v1 }
 0x319   : > { %v3488_v20 = vmul.u32 %v3484_v21, %v3482_v30  ;;  %v6022_v24 = vadd.s32 4294967294, %v3228_v35  ;;  %v3494_v9 = vsel %vm3493_vm9, 1, %v13869_v10  ;;  %v3510_v36 = vmul.u32 %v3506_v38, %v3482_v30 }
 0x31a   : > { %v3591_v5 = vshrl.u32 %v3590_v27, 23  ;;  %v3033_v51 = vsub.f32 1.5, %v3032_v39  ;;  %v10554_v40 = vmul.f32 0.5, %v3051_v25  ;;  %vm3497_vm14 = vc.u32 %v3495_v52, %v3491_v28 }
 0x31b   : > { %v3516_v43 = vsel %vm3515_vm12, 1, %v13869_v10  ;;  %v3071_v34 = vmul.f32 %v10492_v29, %v3070_v57  ;;  %v3376_v19 = vadd.s32 536870912, %v10543_v45  ;;  %vm3519_vm2 = vc.u32 %v10547_v41, %v13493_v2 }
 0x31c   : > { %v6030_v21 = vadd.s32 4294967169, %v3591_v5  ;;  %v3043_v63 = vsub.f32 1.5, %v3042_v42  ;;  %v10562_v35 = vmul.f32 0.5, %v3061_v32  ;;  %v10566_v38 = vmul.f32 %v10478_v53, %v10006_v3 }
 0x31d   : > { %v3496_v30 = vadd.s32 %v3494_v9, %v3488_v20  ;;  %vm6023_vm5 = vcmp.lt.s32.totalorder %v6022_v24, 0  ;;  %v3498_v39 = vsel %vm3497_vm14, 1, %v13869_v10  ;;  %v3518_v25 = vadd.s32 %v3516_v43, %v3510_v36 }
 0x31e   : > { %13899 = vst [vmem:[#allocation13_spill] sm:$0xff] %v10566_v38  ;;  %v3597_v57 = vadd.s32 1, %v6030_v21  ;;  %v10570_v28 = vmul.f32 %v10344_v48, %v3033_v51  ;;  %v10573_v52 = vmul.f32 %v10510_v60, %v3080_v58  ;;  %v10577_v5 = vmul.f32 %v10531_v16, %v10008_v46 }
 0x31f   : > { %v3520_v27 = vsel %vm3519_vm2, 1, %v13869_v10  ;;  %v10581_v42 = vmul.f32 0.5, %v3071_v34  ;;  %v10583_v32 = vshrl.u32 %v3376_v19, 30  ;;  %v10585_v36 = vsel %vm6023_vm5, 0, %v6022_v24 }
 0x320   : > { %13900 = vst [vmem:[#allocation27_spill] sm:$0xff] %v10577_v5  ;;  %vm3598_vm4 = vcmp.gt.s32.totalorder %v3597_v57, 0  ;;  %v3490_v20 = vshrl.u32 %v10490_v47, 16  ;;  %v3500_v9 = vadd.s32 %v3498_v39, %v3496_v30  ;;  %vm3035_vm7 = vweird.f32 %v10016_v17 }
 0x321   : > { %13901 = vst [vmem:[#allocation15_spill] sm:$0xff] %v10583_v32  ;;  %v3599_v58 = vsel %vm3598_vm4, %v3597_v57, 0  ;;  %vm3036_vm3 = vweird.f32 %v10344_v48  ;;  %v10591_v46 = vmul.f32 %v10403_v50, %v3043_v63  ;;  %v3512_v51 = vshrl.u32 %v10496_v33, 16 }
 0x322   : > { %v3522_v43 = vadd.s32 %v3520_v27, %v3518_v25  ;;  %v13494_v34 = vand.u32 2147483647, %v10520_v54  ;;  %v10598_v24 = vmul.f32 %v13895_v44, %v10468_v59  ;;  %v3216_v47 = vadd.s32 %v10270_v22, %v10265_v37 }
 0x323   : > { %v3601_v21 = vand.u32 31, %v3599_v58  ;;  %v3232_v30 = vsub.s32 32, %v10585_v36  ;;  %v3236_v63 = vsub.s32 4294967266, %v10585_v36  ;;  %v3378_v39 = vshll.u32 %v10583_v32, 30 }
 0x324   : > { %13902 = vst [vmem:[#allocation51_spill] sm:$0xff] %v10598_v24  ;;  %v3448_v33 = vshrl.u32 %v13629_v26, %v10310_v18  ;;  %v3469_v25 = vsel %vm3467_vm15, %v10380_v55, 2102212464  ;;  %v3492_v59 = vshrl.u32 %v10524_v14, 16  ;;  %v3501_v57 = vadd.s32 %v3500_v9, %v3490_v20 }
 0x325   : > { %v10611_v27 = vsub.s32 32, %v3601_v21  ;;  %v3514_v37 = vshrl.u32 %v10527_v61, 16  ;;  %v3523_v22 = vadd.s32 %v3522_v43, %v3512_v51  ;;  %v3594_v19 = vand.u32 8388607, %v13494_v34 }
 0x326   : > { %v3604_v3 = vshll.u32 %v13629_v26, %v3601_v21  ;;  %vm3045_vm13 = vweird.f32 %v13884_v15  ;;  %vm3046_vm1 = vweird.f32 %v10403_v50  ;;  %v3607_v14 = vshll.u32 %v13881_v11, %v3601_v21 }
 0x327   : > { %v3605_v18 = vshrl.u32 %v13881_v11, %v10611_v27  ;;  %v13903_v55 = vmov 2131351028   ;;  %v13904_v9 = vmov 2102212464   ;;  %v10626_v51 = vsub.s32 %v10543_v45, %v3378_v39 }
 0x328   : > { %v3608_v20 = vshrl.u32 %v13903_v55, %v10611_v27  ;;  %v3613_v2 = vshll.u32 %v13904_v9, %v3601_v21  ;;  %v10628_v43 = vshrl.u32 %v3599_v58, 5  ;;  %v3610_v34 = vshll.u32 %v13903_v55, %v3601_v21 }
 0x329   : > { %v3611_v16 = vshrl.u32 %v13904_v9, %v10611_v27  ;;  %v3468_v53 = vsel %vm3464_vm8, %v3448_v33, %v10382_v6  ;;  %v3470_v54 = vsel %vm3466_vm10, %v10378_v0, %v3469_v25  ;;  %v10639_v32 = vadd.s32 %v3501_v57, %v3492_v59  ;;  %vm3037_vm8 = vmor %vm3035_vm7, %vm3036_vm3 }
 0x32a   : > { %v13905_v45 = vmov 920167782   ;;  %v13906_v58 = vshll.u32 %v10527_v61, 16  ;;  %v3524_v38 = vadd.s32 %v3523_v22, %v3514_v37  ;;  %v3595_v44 = vor.u32 8388608, %v3594_v19 }
 0x32b   : > { %v3614_v39 = vshrl.u32 %v13905_v45, %v10611_v27  ;;  %v10648_v9 = vor.u32 %v3605_v18, %v3604_v3  ;;  %v10650_v55 = vor.u32 %v3608_v20, %v3607_v14  ;;  %v3616_v33 = vshll.u32 %v13905_v45, %v3601_v21 }
 0x32c   : > { %v10646_v5 = vadd.s32 %v10547_v41, %v13906_v58  ;;  %v13907_v0 = vmov 1326507024   ;;  %v3237_v59 = vadd.s32 127, %v3236_v63  ;;  %v3381_v57 = vsub.s32 0, %v10626_v51 }
 0x32d   : > { %v3615_v6 = vor.u32 %v3614_v39, %v3613_v2  ;;  %v3617_v25 = vshrl.u32 %v13907_v0, %v10611_v27  ;;  %v10656_v11 = vor.u32 %v3611_v16, %v3610_v34  ;;  %vm3619_vm15 = vcmp.lt.s32.totalorder %v10628_v43, 1 }
 0x32e   : > { %vm3380_vm10 = vcmp.lt.s32.totalorder %v10626_v51, 0  ;;  %v3471_v61 = vsel %vm3465_vm0, %v3468_v53, %v3470_v54  ;;  %vm3621_vm11 = vcmp.lt.s32.totalorder %v10628_v43, 3  ;;  %vm3622_vm6 = vcmp.lt.s32.totalorder %v10628_v43, 4  ;;  %vm3047_vm0 = vmor %vm3045_vm13, %vm3046_vm1 }
 0x32f   : > { %vm3055_vm9 = vweird.f32 %v13887_v62  ;;  %vm3056_vm12 = vweird.f32 %v10462_v23  ;;  %vm3527_vm14 = vc.u32 %v10639_v32, %v10646_v5  ;;  %v3528_v16 = vadd.s32 1, %v3524_v38 }
 0x330   : > { %v10672_v2 = vshll.u32 %v3595_v44, 8  ;;  %v3745_v41 = vand.u32 2139095040, %v10598_v24  ;;  %v3618_v3 = vor.u32 %v3617_v25, %v3616_v33  ;;  %vm3620_vm2 = vcmp.lt.s32.totalorder %v10628_v43, 2  ;;  %vm3057_vm13 = vmor %vm3055_vm9, %vm3056_vm12 }
 0x331   : > { %v3627_v8 = vsel %vm3619_vm15, %v10648_v9, %v10650_v55  ;;  %v3628_v53 = vsel %vm3622_vm6, %v3615_v6, 920167782  ;;  %v10684_v54 = vsel %vm3037_vm8, %v10344_v48, %v10570_v28  ;;  %v10687_v44 = vmul.f32 0.5, %v10573_v52 }
 0x332   : > { %13908 = vst [vmem:[#allocation42_spill] sm:$0xff] %v10684_v54  ;;  %v3382_v34 = vsel %vm3380_vm10, %v3381_v57, %v10626_v51  ;;  %v3629_v19 = vsel %vm3621_vm11, %v10656_v11, %v3628_v53  ;;  %v13909_v21 = vsub.f32 1.5, %v10554_v40  ;;  %v3233_v37 = vshll.u32 %v10450_v4, %v10585_v36 }
 0x333   : > { %v3234_v48 = vshrl.u32 %v3216_v47, %v3232_v30  ;;  %v3525_v28 = vmul.u32 %v10420_v31, %v3471_v61  ;;  %v3238_v52 = vshll.u32 %v3237_v59, 23  ;;  %v3529_v22 = vsel %vm3527_vm14, %v3528_v16, %v3524_v38 }
 0x334   : > { %v3054_v63 = vmul.f32 %v10462_v23, %v13909_v21  ;;  %v3630_v40 = vsel %vm3620_vm2, %v3627_v8, %v3629_v19  ;;  %v3631_v4 = vsel %vm3619_vm15, %v10650_v55, %v10656_v11  ;;  %v3383_v36 = vclz %v3382_v34 }
 0x335   : > { %v3632_v31 = vsel %vm3622_vm6, %v3618_v3, 1326507024  ;;  %v3636_v47 = vand.u32 65535, %v10672_v2  ;;  %v3746_v30 = vshrl.u32 %v3745_v41, 23  ;;  %vm3065_vm5 = vweird.f32 %v13888_v12 }
 0x336   : > { %vm3066_vm4 = vweird.f32 %v10485_v56  ;;  %v3633_v38 = vsel %vm3621_vm11, %v3615_v6, %v3632_v31  ;;  %v3637_v18 = vshrl.u32 %v10672_v2, 16  ;;  %v3660_v14 = vand.u32 65535, %v3630_v40 }
 0x337   : > { %v3661_v20 = vshrl.u32 %v3630_v40, 16  ;;  %v10724_v39 = vsel %vm3047_vm0, %v10403_v50, %v10591_v46  ;;  %v3073_v58 = vsub.f32 1.5, %v10581_v42  ;;  %vm3075_vm7 = vweird.f32 %v13889_v13  ;;  %vm10764_vm9 = vmor %vm3065_vm5, %vm3066_vm4 }
 0x338   : > { %13910 = vst [vmem:[#allocation24_spill] sm:$0xff] %v10724_v39  ;;  %vm3076_vm3 = vweird.f32 %v10492_v29  ;;  %v10729_v33 = vadd.s32 %v3529_v22, %v3525_v28  ;;  %v3634_v25 = vsel %vm3620_vm2, %v3631_v4, %v3633_v38  ;;  %v13911_v6 = vsub.f32 1.5, %v10562_v35 }
 0x339   : > { %v3235_v57 = vor.u32 %v3234_v48, %v3233_v37  ;;  %v3239_v61 = vor.u32 4788187, %v3238_v52  ;;  %v3638_v16 = vand.u32 65535, %v3634_v25  ;;  %v3083_v50 = vsub.f32 1.5, %v10687_v44  ;;  %vm3077_vm0 = vmor %vm3075_vm7, %vm3076_vm3 }
 0x33a   : > { %v3064_v59 = vmul.f32 %v10485_v56, %v13911_v6  ;;  %v6025_v46 = vadd.s32 4294967294, %v3383_v36  ;;  %v3639_v42 = vshrl.u32 %v3634_v25, 16  ;;  %v6033_v41 = vadd.s32 4294967169, %v3746_v30 }
 0x33b   : > { %v10737_v3 = vmul.u32 %v3638_v16, %v3637_v18  ;;  %v3662_v8 = vmul.u32 %v3660_v14, %v3636_v47  ;;  %v3663_v53 = vmul.u32 %v3661_v20, %v3636_v47  ;;  %v10739_v34 = vmul.u32 %v3660_v14, %v3637_v18 }
 0x33c   : > { %v10747_v35 = vmul.f32 %v10684_v54, %v10016_v17  ;;  %v3531_v44 = vadd.s32 536870912, %v10729_v33  ;;  %v3640_v19 = vmul.u32 %v3638_v16, %v3636_v47  ;;  %v3641_v21 = vmul.u32 %v3639_v42, %v3636_v47 }
 0x33d   : > { %v3240_v37 = vand.u32 2147483647, %v3239_v61  ;;  %v3242_v48 = vcvt.s32.f32 %v3235_v57  ;;  %v3665_v28 = vmul.u32 %v3661_v20, %v3637_v18  ;;  %v3666_v52 = vshll.u32 %v3663_v53, 16 }
 0x33e   : > { %v3643_v22 = vmul.u32 %v3639_v42, %v3637_v18  ;;  %v3644_v40 = vshll.u32 %v3641_v21, 16  ;;  %v3646_v4 = vshll.u32 %v10737_v3, 16  ;;  %v3752_v36 = vadd.s32 1, %v6033_v41 }
 0x33f   : > { %v10752_v31 = vsel %vm3057_vm13, %v10462_v23, %v3054_v63  ;;  %vm6026_vm1 = vcmp.lt.s32.totalorder %v6025_v46, 0  ;;  %v3668_v17 = vshll.u32 %v10739_v34, 16  ;;  %vm3670_vm8 = vc.u32 %v3662_v8, %v3666_v52 }
 0x340   : > { %13912 = vst [vmem:[#allocation54_spill] sm:$0xff] %v10752_v31  ;;  %v10755_v30 = vshrl.u32 %v3531_v44, 30  ;;  %vm3648_vm10 = vc.u32 %v3640_v19, %v3644_v40  ;;  %v3650_v47 = vadd.s32 %v3644_v40, %v3640_v19  ;;  %v3671_v38 = vsel %vm3670_vm8, 1, %v13869_v10 }
 0x341   : > { %v3074_v14 = vmul.f32 %v10492_v29, %v3073_v58  ;;  %v3649_v18 = vsel %vm3648_vm10, 1, %v13869_v10  ;;  %v3672_v20 = vadd.s32 %v3666_v52, %v3662_v8  ;;  %v3673_v25 = vadd.s32 %v3671_v38, %v3665_v28 }
 0x342   : > { %v10768_v63 = vmul.f32 %v3242_v48, %v3240_v37  ;;  %v3651_v6 = vadd.s32 %v3649_v18, %v3643_v22  ;;  %vm3652_vm12 = vc.u32 %v3650_v47, %v3646_v4  ;;  %vm3753_vm14 = vcmp.gt.s32.totalorder %v3752_v36, 0  ;;  %v13917_v22 = vld [vmem:[#allocation64_spill] sm:$0xff] }
 0x343   : > { %v10775_v58 = vsel %vm6026_vm1, 0, %v6025_v46  ;;  %v3653_v57 = vsel %vm3652_vm12, 1, %v13869_v10  ;;  %vm3674_vm13 = vc.u32 %v3672_v20, %v3668_v17  ;;  %v3754_v61 = vsel %vm3753_vm14, %v3752_v36, 0 }
 0x344   : > { %v3533_v16 = vshll.u32 %v10755_v30, 30  ;;  %v3667_v42 = vshrl.u32 %v3663_v53, 16  ;;  %v3675_v41 = vsel %vm3674_vm13, 1, %v13869_v10  ;;  %v13505_v8 = vand.u32 2147483647, %v10598_v24 }
 0x345   : > { %v3645_v44 = vshrl.u32 %v3641_v21, 16  ;;  %v3655_v19 = vadd.s32 %v3653_v57, %v3651_v6  ;;  %v3677_v37 = vadd.s32 %v3675_v41, %v3673_v25  ;;  %v3756_v48 = vand.u32 31, %v3754_v61 }
 0x346   : > { %v10784_v46 = vsel %vm10764_vm9, %v10485_v56, %v3064_v59  ;;  %v10787_v28 = vsel %vm3077_vm0, %v10492_v29, %v3074_v14  ;;  %v10790_v52 = vmul.f32 %v10510_v60, %v3083_v50  ;;  %v10794_v53 = vmul.f32 %v10724_v39, %v13884_v15 }
 0x347   : > { %13915 = vst [vmem:[#allocation19_spill] sm:$0xff] %v10784_v46  ;;  %vm3124_vm5 = vcmp.lt.s32.totalorder %v13917_v22, 0  ;;  %v3244_v21 = vxor.u32 2147483648, %v10768_v63  ;;  %v3371_v40 = vadd.s32 %v10475_v49, %v10470_v7  ;;  %v3603_v56 = vshrl.u32 %v13629_v26, %v10611_v27 }
 0x348   : > { %13916 = vst [vmem:[#allocation35_spill] sm:$0xff] %v10787_v28  ;;  %v10802_v59 = vsub.s32 32, %v3756_v48  ;;  %v3391_v29 = vsub.s32 4294967266, %v10775_v58  ;;  %v3669_v50 = vshrl.u32 %v10739_v34, 16  ;;  %v3678_v4 = vadd.s32 %v3677_v37, %v3667_v42 }
 0x349   : > { %v3749_v15 = vand.u32 8388607, %v13505_v8  ;;  %v10809_v36 = vsub.s32 %v10729_v33, %v3533_v16  ;;  %v3624_v7 = vsel %vm3622_vm6, %v10656_v11, 2102212464  ;;  %v3647_v49 = vshrl.u32 %v10737_v3, 16 }
 0x34a   : > { %v3656_v27 = vadd.s32 %v3655_v19, %v3645_v44  ;;  %vm3085_vm4 = vweird.f32 %v10231_v1  ;;  %vm3086_vm7 = vweird.f32 %v10510_v60  ;;  %v3759_v34 = vshll.u32 %v13629_v26, %v3756_v48 }
 0x34b   : > { %v13918_v47 = vmov 2475754826   ;;  %v13919_v33 = vmov 2131351028   ;;  %v13920_v25 = vand.u32 2147483647, %v13917_v22  ;;  %v3623_v3 = vsel %vm3619_vm15, %v3603_v56, %v10648_v9  ;;  %vm3087_vm10 = vmor %vm3085_vm4, %vm3086_vm7 }
 0x34c   : > { %v3760_v38 = vshrl.u32 %v13918_v47, %v10802_v59  ;;  %v3762_v14 = vshll.u32 %v13918_v47, %v3756_v48  ;;  %v3763_v18 = vshrl.u32 %v13919_v33, %v10802_v59  ;;  %v10832_v23 = vshrl.u32 %v3754_v61, 5 }
 0x34d   : > { %vm10825_vm6 = vcmp.le.f32.partialorder %v13920_v25, 0.7853982  ;;  %v3765_v6 = vshll.u32 %v13919_v33, %v3756_v48  ;;  %v13923_v57 = vmov 2102212464   ;;  %v3625_v42 = vsel %vm3621_vm11, %v10650_v55, %v3624_v7 }
 0x34e   : > { %v3766_v16 = vshrl.u32 %v13923_v57, %v10802_v59  ;;  %v3679_v41 = vadd.s32 %v3678_v4, %v3669_v50  ;;  %v3768_v44 = vshll.u32 %v13923_v57, %v3756_v48  ;;  %v3769_v19 = vshrl.u32 %v13905_v45, %v10802_v59 }
 0x34f   : > { %v10843_v37 = vadd.s32 %v3656_v27, %v3647_v49  ;;  %v10845_v9 = vadd.s32 %v3672_v20, %v3668_v17  ;;  %v3771_v61 = vshll.u32 %v13905_v45, %v3756_v48  ;;  %v3772_v56 = vshrl.u32 %v13907_v0, %v10802_v59 }
 0x350   : > { %v3387_v25 = vsub.s32 32, %v10775_v58  ;;  %v3750_v8 = vor.u32 8388608, %v3749_v15  ;;  %v10851_v39 = vor.u32 %v3760_v38, %v3759_v34  ;;  %v10853_v55 = vor.u32 %v3763_v18, %v3762_v14 }
 0x351   : > { %v10855_v50 = vor.u32 %v3766_v16, %v3765_v6  ;;  %v3770_v4 = vor.u32 %v3769_v19, %v3768_v44  ;;  %v3773_v7 = vor.u32 %v3772_v56, %v3771_v61  ;;  %vm3774_vm15 = vcmp.lt.s32.totalorder %v10832_v23, 1  ;;  %v13924_v16 = vld [vmem:[#allocation16_spill] sm:$0xff] }
 0x352   : > { %v3626_v17 = vsel %vm3620_vm2, %v3623_v3, %v3625_v42  ;;  %v3683_v20 = vadd.s32 1, %v3679_v41  ;;  %vm3776_vm11 = vcmp.lt.s32.totalorder %v10832_v23, 3  ;;  %vm3777_vm3 = vcmp.lt.s32.totalorder %v10832_v23, 4  ;;  %v13925_v42 = vld [vmem:[#allocation61_spill] sm:$0xff] }
 0x353   : > { %v3392_v48 = vadd.s32 127, %v3391_v29  ;;  %v3536_v15 = vsub.s32 0, %v10809_v36  ;;  %vm3682_vm1 = vc.u32 %v10843_v37, %v10845_v9  ;;  %v3783_v49 = vsel %vm3777_vm3, %v3770_v4, 920167782 }
 0x354   : > { %v3245_v27 = vsel %vm3124_vm5, %v3244_v21, %v10768_v63  ;;  %vm3535_vm2 = vcmp.lt.s32.totalorder %v10809_v36, 0  ;;  %vm3775_vm8 = vcmp.lt.s32.totalorder %v10832_v23, 2  ;;  %v3782_v43 = vsel %vm3774_vm15, %v10851_v39, %v10853_v55 }
 0x355   : > { %v3680_v29 = vmul.u32 %v10672_v2, %v3626_v17  ;;  %v3784_v34 = vsel %vm3776_vm11, %v10855_v50, %v3783_v49  ;;  %v3787_v38 = vsel %vm3777_vm3, %v3773_v7, 1326507024  ;;  %v10882_v14 = vshll.u32 %v3750_v8, 8 }
 0x356   : > { %v3388_v63 = vshll.u32 %v10626_v51, %v10775_v58  ;;  %v3389_v21 = vshrl.u32 %v3371_v40, %v3387_v25  ;;  %v3684_v18 = vsel %vm3682_vm1, %v3683_v20, %v3679_v41  ;;  %v3786_v3 = vsel %vm3774_vm15, %v10853_v55, %v10855_v50  ;;  %v13930_v20 = vld [vmem:[#allocation41_spill] sm:$0xff] }
 0x357   : > { %v3393_v2 = vshll.u32 %v3392_v48, 23  ;;  %v3537_v6 = vsel %vm3535_vm2, %v3536_v15, %v10809_v36  ;;  %v3785_v8 = vsel %vm3775_vm8, %v3782_v43, %v3784_v34  ;;  %v3788_v51 = vsel %vm3776_vm11, %v3770_v4, %v3787_v38  ;;  %v13928_v4 = vld [vmem:[#allocation25_spill] sm:$0xff]  ;;  %v13931_v43 = vld [vmem:[#allocation40_spill] sm:$0xff] }
 0x358   : > { %v3101_v58 = vmul.f32 %v10752_v31, %v13887_v62  ;;  %v3102_v40 = vmul.f32 %v10784_v46, %v13888_v12  ;;  %v10905_v41 = vmul.f32 %v13925_v42, %v13924_v16  ;;  %v10910_v44 = vsel %vm10825_vm6, %v13917_v22, %v3245_v27  ;;  %v13933_v38 = vld [vmem:[#allocation13_spill] sm:$0xff] }
 0x359   : > { %v10912_v19 = vadd.s32 %v3684_v18, %v3680_v29  ;;  %v3789_v61 = vsel %vm3775_vm8, %v3786_v3, %v3788_v51  ;;  %v3791_v56 = vand.u32 65535, %v10882_v14  ;;  %v3816_v62 = vshrl.u32 %v3785_v8, 16  ;;  %v13935_v3 = vld [vmem:[#allocation27_spill] sm:$0xff] }
 0x35a   : > { %13926 = vst [vmem:[#allocation36_spill] sm:$0xff] %v10905_v41  ;;  %v10919_v12 = vsel %vm3087_vm10, %v10510_v60, %v10790_v52  ;;  %v10923_v25 = vmul.f32 %v10787_v28, %v13889_v13  ;;  %v10927_v7 = vmul.f32 %v13925_v42, %v13928_v4  ;;  %v3538_v17 = vclz %v3537_v6 }
 0x35b   : > { %13927 = vst [vmem:[#allocation47_spill] sm:$0xff] %v10919_v12  ;;  %v10931_v48 = vmul.f32 %v13925_v42, %v13930_v20  ;;  %v3390_v15 = vor.u32 %v3389_v21, %v3388_v63  ;;  %v3394_v49 = vor.u32 4788187, %v3393_v2  ;;  %v3794_v27 = vshrl.u32 %v3789_v61, 16 }
 0x35c   : > { %13929 = vst [vmem:[#allocation22_spill] sm:$0xff] %v10927_v7  ;;  %v3246_v29 = vsub.s32 4, %v13931_v43  ;;  %v10936_v60 = vmul.f32 %v10910_v44, %v10910_v44  ;;  %v3792_v13 = vshrl.u32 %v10882_v14, 16  ;;  %v3815_v52 = vand.u32 65535, %v3785_v8 }
 0x35d   : > { %v10941_v34 = vmul.f32 %v10919_v12, %v10231_v1  ;;  %v10945_v18 = vmul.f32 %v13925_v42, %v13933_v38  ;;  %v3686_v63 = vadd.s32 536870912, %v10912_v19  ;;  %v10948_v21 = vmul.u32 %v3816_v62, %v3791_v56 }
 0x35e   : > { %v10952_v2 = vmul.f32 %v13925_v42, %v13935_v3  ;;  %v6028_v6 = vadd.s32 4294967294, %v3538_v17  ;;  %v3793_v51 = vand.u32 65535, %v3789_v61  ;;  %v10954_v16 = vmul.u32 %v3794_v27, %v3791_v56 }
 0x35f   : > { %13932 = vst [vmem:[#allocation12_spill] sm:$0xff] %v10941_v34  ;;  %v10958_v1 = vmul.f32 %v13925_v42, %v10747_v35  ;;  %v10962_v8 = vmul.f32 %v13925_v42, %v10794_v53  ;;  %v3395_v4 = vand.u32 2147483647, %v3394_v49  ;;  %v3397_v20 = vcvt.s32.f32 %v3390_v15 }
 0x360   : > { %13934 = vst [vmem:[#allocation23_spill] sm:$0xff] %v10945_v18  ;;  %v10965_v38 = vmul.f32 %v13925_v42, %v3101_v58  ;;  %v3247_v17 = vsel %vm3124_vm5, %v3246_v29, %v13931_v43  ;;  %v3258_v61 = vmul.f32 -0.00019511016, %v10936_v60  ;;  %v10971_v3 = vmul.u32 %v3815_v52, %v3792_v13  ;;  %v13941_v29 = vld [vmem:[#allocation62_spill] sm:$0xff] }
 0x361   : > { %13936 = vst [vmem:[#allocation49_spill] sm:$0xff] %v10952_v2  ;;  %v10974_v35 = vmul.f32 %v13925_v42, %v3102_v40  ;;  %v10976_v12 = vshrl.u32 %v3686_v63, 30  ;;  %v3817_v53 = vmul.u32 %v3815_v52, %v3791_v56  ;;  %v3821_v49 = vshll.u32 %v10948_v21, 16 }
 0x362   : > { %13937 = vst [vmem:[#allocation26_spill] sm:$0xff] %v10958_v1  ;;  %vm6029_vm9 = vcmp.lt.s32.totalorder %v6028_v6, 0  ;;  %v3795_v15 = vmul.u32 %v3793_v51, %v3791_v56  ;;  %v10979_v58 = vmul.u32 %v3793_v51, %v3792_v13  ;;  %v3799_v28 = vshll.u32 %v10954_v16, 16  ;;  %v13945_v56 = vld [vmem:[#allocation15_spill] sm:$0xff] }
 0x363   : > { %13938 = vst [vmem:[#allocation28_spill] sm:$0xff] %v10962_v8  ;;  %v3249_v43 = vsel %vm10825_vm6, 0, %v3247_v17  ;;  %v13942_v46 = vand.u32 2147483647, %v13941_v29  ;;  %vm3279_vm14 = vcmp.lt.s32.totalorder %v13941_v29, 0  ;;  %v3398_v40 = vmul.f32 %v3397_v20, %v3395_v4 }
 0x364   : > { %13939 = vst [vmem:[#allocation29_spill] sm:$0xff] %v10965_v38  ;;  %v3251_v52 = vmul.f32 -0.001358992, %v10936_v60  ;;  %v3259_v63 = vadd.f32 0.008332121, %v3258_v61  ;;  %v3401_v51 = vsub.s32 4, %v13945_v56  ;;  %v3820_v17 = vmul.u32 %v3816_v62, %v3792_v13 }
 0x365   : > { %13940 = vst [vmem:[#allocation30_spill] sm:$0xff] %v10974_v35  ;;  %vm10986_vm12 = vcmp.le.f32.partialorder %v13942_v46, 0.7853982  ;;  %v3541_v35 = vsel %vm6029_vm9, 0, %v6028_v6  ;;  %v3688_v11 = vshll.u32 %v10976_v12, 30  ;;  %vm3825_vm0 = vc.u32 %v3817_v53, %v3821_v49 }
 0x366   : > { %v3801_v46 = vshll.u32 %v10979_v58, 16  ;;  %vm3803_vm13 = vc.u32 %v3795_v15, %v3799_v28  ;;  %v3805_v38 = vadd.s32 %v3799_v28, %v3795_v15  ;;  %v3827_v8 = vadd.s32 %v3821_v49, %v3817_v53 }
 0x367   : > { %v3266_v1 = vadd.s32 3, %v3249_v43  ;;  %v3399_v2 = vxor.u32 2147483648, %v3398_v40  ;;  %v3826_v4 = vsel %vm3825_vm0, 1, %v13869_v10  ;;  %v3900_v20 = vand.u32 2139095040, %v10905_v41 }
 0x368   : > { %v3402_v61 = vsel %vm3279_vm14, %v3401_v51, %v13945_v56  ;;  %v3546_v6 = vsub.s32 4294967266, %v3541_v35  ;;  %v3798_v54 = vmul.u32 %v3794_v27, %v3792_v13  ;;  %v13946_v62 = vshll.u32 %v10971_v3, 16 }
 0x369   : > { %v3252_v34 = vadd.f32 0.041655596, %v3251_v52  ;;  %v3260_v18 = vmul.f32 %v3259_v63, %v10936_v60  ;;  %v3804_v28 = vsel %vm3803_vm13, 1, %v13869_v10  ;;  %v3901_v53 = vshrl.u32 %v3900_v20, 23 }
 0x36a   : > { %vm3829_vm5 = vc.u32 %v3827_v8, %v13946_v62  ;;  %v3526_v49 = vadd.s32 %v10646_v5, %v10639_v32  ;;  %v11008_v15 = vsub.s32 %v10912_v19, %v3688_v11  ;;  %vm3807_vm4 = vc.u32 %v3805_v38, %v3801_v46 }
 0x36b   : > { %v3828_v43 = vadd.s32 %v3826_v4, %v3820_v17  ;;  %v3400_v27 = vsel %vm3279_vm14, %v3399_v2, %v3398_v40  ;;  %v3542_v13 = vsub.s32 32, %v3541_v35  ;;  %v3830_v56 = vsel %vm3829_vm5, 1, %v13869_v10 }
 0x36c   : > { %v6036_v52 = vadd.s32 4294967169, %v3901_v53  ;;  %v11013_v51 = vand.u32 3, %v3266_v1  ;;  %v3404_v63 = vsel %vm10986_vm12, 0, %v3402_v61  ;;  %v3547_v20 = vadd.s32 127, %v3546_v6 }
 0x36d   : > { %v3806_v62 = vadd.s32 %v3804_v28, %v3798_v54  ;;  %v3253_v5 = vmul.f32 %v3252_v34, %v10936_v60  ;;  %v3261_v32 = vadd.f32 -0.16666654, %v3260_v18  ;;  %v3808_v19 = vsel %vm3807_vm4, 1, %v13869_v10 }
 0x36e   : > { %v3907_v38 = vadd.s32 1, %v6036_v52  ;;  %v11022_v2 = vsel %vm10986_vm12, %v13941_v29, %v3400_v27  ;;  %v3691_v40 = vsub.s32 0, %v11008_v15  ;;  %v3822_v1 = vshrl.u32 %v10948_v21, 16 }
 0x36f   : > { %v3832_v11 = vadd.s32 %v3830_v56, %v3828_v43  ;;  %v3543_v17 = vshll.u32 %v10809_v36, %v3541_v35  ;;  %v3544_v46 = vshrl.u32 %v3526_v49, %v3542_v13  ;;  %vm3690_vm7 = vcmp.lt.s32.totalorder %v11008_v15, 0 }
 0x370   : > { %vm3908_vm6 = vcmp.gt.s32.totalorder %v3907_v38, 0  ;;  %v3548_v54 = vshll.u32 %v3547_v20, 23  ;;  %v3800_v34 = vshrl.u32 %v10954_v16, 16  ;;  %v3810_v18 = vadd.s32 %v3808_v19, %v3806_v62 }
 0x371   : > { %v3909_v4 = vsel %vm3908_vm6, %v3907_v38, 0  ;;  %v11031_v31 = vmul.f32 %v11022_v2, %v11022_v2  ;;  %v11033_v61 = vadd.s32 3, %v3404_v63  ;;  %v3758_v21 = vshrl.u32 %v13629_v26, %v10802_v59 }
 0x372   : > { %v3911_v6 = vand.u32 31, %v3909_v4  ;;  %v3692_v36 = vsel %vm3690_vm7, %v3691_v40, %v11008_v15  ;;  %v3779_v35 = vsel %vm3777_vm3, %v10855_v50, 2102212464  ;;  %v3824_v16 = vshrl.u32 %v10971_v3, 16 }
 0x373   : > { %v3833_v28 = vadd.s32 %v3832_v11, %v3822_v1  ;;  %v3254_v53 = vadd.f32 -0.4999988, %v3253_v5  ;;  %v3262_v49 = vmul.f32 %v3261_v32, %v10936_v60  ;;  %v3406_v43 = vmul.f32 -0.001358992, %v11031_v31 }
 0x374   : > { %v11044_v27 = vsub.s32 32, %v3911_v6  ;;  %v3545_v13 = vor.u32 %v3544_v46, %v3543_v17  ;;  %v3549_v56 = vor.u32 4788187, %v3548_v54  ;;  %v3802_v59 = vshrl.u32 %v10979_v58, 16 }
 0x375   : > { %v3811_v52 = vadd.s32 %v3810_v18, %v3800_v34  ;;  %v3693_v63 = vclz %v3692_v36  ;;  %v3778_v50 = vsel %vm3774_vm15, %v3758_v21, %v10851_v39  ;;  %v3780_v20 = vsel %vm3776_vm11, %v10853_v55, %v3779_v35 }
 0x376   : > { %v13518_v62 = vand.u32 2147483647, %v10905_v41  ;;  %v13947_v5 = vshll.u32 %v10971_v3, 16  ;;  %v3834_v19 = vadd.s32 %v3833_v28, %v3824_v16  ;;  %v3914_v38 = vshll.u32 %v13629_v26, %v3911_v6 }
 0x377   : > { %v3923_v58 = vshll.u32 %v13923_v57, %v3911_v6  ;;  %v3915_v40 = vshrl.u32 %v13918_v47, %v11044_v27  ;;  %v3917_v39 = vshll.u32 %v13918_v47, %v3911_v6  ;;  %v3918_v1 = vshrl.u32 %v13919_v33, %v11044_v27 }
 0x378   : > { %v11056_v32 = vadd.s32 %v3827_v8, %v13947_v5  ;;  %v3924_v55 = vshrl.u32 %v13905_v45, %v11044_v27  ;;  %v11067_v11 = vadd.s32 %v3811_v52, %v3802_v59  ;;  %v11069_v8 = vshrl.u32 %v3909_v4, 5 }
 0x379   : > { %v3920_v3 = vshll.u32 %v13919_v33, %v3911_v6  ;;  %v3921_v17 = vshrl.u32 %v13923_v57, %v11044_v27  ;;  %v3413_v46 = vmul.f32 -0.00019511016, %v11031_v31  ;;  %v3552_v54 = vcvt.s32.f32 %v3545_v13  ;;  %v13948_v13 = vld [vmem:[#allocation55_spill] sm:$0xff] }
 0x37a   : > { %v3904_v34 = vand.u32 8388607, %v13518_v62  ;;  %v3926_v18 = vshll.u32 %v13905_v45, %v3911_v6  ;;  %v3550_v21 = vand.u32 2147483647, %v3549_v56  ;;  %v3781_v36 = vsel %vm3775_vm8, %v3778_v50, %v3780_v20 }
 0x37b   : > { %v3925_v35 = vor.u32 %v3924_v55, %v3923_v58  ;;  %v3927_v4 = vshrl.u32 %v13907_v0, %v11044_v27  ;;  %v6031_v16 = vadd.s32 4294967294, %v3693_v63  ;;  %v3838_v28 = vadd.s32 1, %v3834_v19 }
 0x37c   : > { %v11082_v59 = vor.u32 %v3915_v40, %v3914_v38  ;;  %v11084_v52 = vor.u32 %v3918_v1, %v3917_v39  ;;  %vm3434_vm15 = vcmp.lt.s32.totalorder %v13948_v13, 0  ;;  %vm3837_vm11 = vc.u32 %v11067_v11, %v11056_v32 }
 0x37d   : > { %v11089_v6 = vor.u32 %v3921_v17, %v3920_v3  ;;  %vm3929_vm3 = vcmp.lt.s32.totalorder %v11069_v8, 1  ;;  %vm3932_vm1 = vcmp.lt.s32.totalorder %v11069_v8, 4  ;;  %v3407_v23 = vadd.f32 0.041655596, %v3406_v43 }
 0x37e   : > { %v3905_v56 = vor.u32 8388608, %v3904_v34  ;;  %v3928_v50 = vor.u32 %v3927_v4, %v3926_v18  ;;  %vm3931_vm2 = vcmp.lt.s32.totalorder %v11069_v8, 3  ;;  %v3414_v63 = vadd.f32 0.008332121, %v3413_v46 }
 0x37f   : > { %v3553_v20 = vmul.f32 %v3552_v54, %v3550_v21  ;;  %v3835_v5 = vmul.u32 %v10882_v14, %v3781_v36  ;;  %v3938_v38 = vsel %vm3932_vm1, %v3925_v35, 920167782  ;;  %vm6032_vm8 = vcmp.lt.s32.totalorder %v6031_v16, 0 }
 0x380   : > { %v3839_v58 = vsel %vm3837_vm11, %v3838_v28, %v3834_v19  ;;  %vm3930_vm10 = vcmp.lt.s32.totalorder %v11069_v8, 2  ;;  %v3937_v43 = vsel %vm3929_vm3, %v11082_v59, %v11084_v52  ;;  %v3255_v40 = vmul.f32 %v3254_v53, %v10936_v60 }
 0x381   : > { %v3939_v39 = vsel %vm3931_vm2, %v11089_v6, %v3938_v38  ;;  %v3941_v14 = vsel %vm3929_vm3, %v11084_v52, %v11089_v6  ;;  %v4055_v19 = vand.u32 2139095040, %v10927_v7  ;;  %v3263_v1 = vadd.f32 1.0, %v3262_v49 }
 0x382   : > { %v3408_v55 = vmul.f32 %v3407_v23, %v11031_v31  ;;  %v3942_v3 = vsel %vm3932_vm1, %v3928_v50, 1326507024  ;;  %v11114_v17 = vshll.u32 %v3905_v56, 8  ;;  %v3696_v60 = vsel %vm6032_vm8, 0, %v6031_v16 }
 0x383   : > { %v11116_v53 = vadd.s32 %v3839_v58, %v3835_v5  ;;  %v11120_v46 = vsel %vm3930_vm10, %v3937_v43, %v3939_v39  ;;  %v3943_v54 = vsel %vm3931_vm2, %v3925_v35, %v3942_v3  ;;  %vm3269_vm9 = vcmp.eq.s32.totalorder %v11013_v51, 0 }
 0x384   : > { %v3415_v49 = vmul.f32 %v3414_v63, %v11031_v31  ;;  %v3554_v34 = vxor.u32 2147483648, %v3553_v20  ;;  %v11128_v18 = vsel %vm3930_vm10, %v3941_v14, %v3943_v54  ;;  %v3256_v21 = vadd.f32 1.0, %v3255_v40 }
 0x385   : > { %vm3272_vm12 = vcmp.eq.s32.totalorder %v11013_v51, 2  ;;  %v13949_v36 = vand.u32 2147483647, %v13948_v13  ;;  %v4056_v16 = vshrl.u32 %v4055_v19, 23  ;;  %v3701_v35 = vsub.s32 4294967266, %v3696_v60 }
 0x386   : > { %v3946_v28 = vand.u32 65535, %v11114_v17  ;;  %v3949_v23 = vshrl.u32 %v11128_v18, 16  ;;  %v3971_v56 = vshrl.u32 %v11120_v46, 16  ;;  %v3264_v50 = vmul.f32 %v3263_v1, %v10910_v44 }
 0x387   : > { %vm11133_vm14 = vcmp.le.f32.partialorder %v13949_v36, 0.7853982  ;;  %v3409_v63 = vadd.f32 -0.4999988, %v3408_v55  ;;  %v11142_v5 = vand.u32 3, %v11033_v61  ;;  %v3841_v38 = vadd.s32 536870912, %v11116_v53 }
 0x388   : > { %v3416_v58 = vadd.f32 -0.16666654, %v3415_v49  ;;  %v3555_v43 = vsel %vm3434_vm15, %v3554_v34, %v3553_v20  ;;  %v3681_v40 = vadd.s32 %v10845_v9, %v10843_v37  ;;  %v3697_v39 = vsub.s32 32, %v3696_v60 }
 0x389   : > { %v3273_v14 = vxor.u32 2147483648, %v3256_v21  ;;  %v3947_v19 = vshrl.u32 %v11114_v17, 16  ;;  %v3970_v3 = vand.u32 65535, %v11120_v46  ;;  %v6039_v44 = vadd.s32 4294967169, %v4056_v16 }
 0x38a   : > { %v3702_v1 = vadd.s32 127, %v3701_v35  ;;  %v3948_v61 = vand.u32 65535, %v11128_v18  ;;  %v11152_v55 = vmul.u32 %v3949_v23, %v3946_v28  ;;  %v11154_v54 = vmul.u32 %v3971_v56, %v3946_v28 }
 0x38b   : > { %v3270_v49 = vxor.u32 2147483648, %v3264_v50  ;;  %v3410_v20 = vmul.f32 %v3409_v63, %v11031_v31  ;;  %v11160_v37 = vsel %vm11133_vm14, %v13948_v13, %v3555_v43  ;;  %v11162_v9 = vshrl.u32 %v3841_v38, 30 }
 0x38c   : > { %v3417_v46 = vmul.f32 %v3416_v58, %v11031_v31  ;;  %v3556_v34 = vsub.s32 4, %v10755_v30  ;;  %v3698_v18 = vshll.u32 %v11008_v15, %v3696_v60  ;;  %v3699_v36 = vshrl.u32 %v3681_v40, %v3697_v39 }
 0x38d   : > { %13952 = vst [vmem:[#allocation31_spill] sm:$0xff] %v11162_v9  ;;  %v3972_v16 = vmul.u32 %v3970_v3, %v3946_v28  ;;  %v11167_v35 = vmul.u32 %v3970_v3, %v3947_v19  ;;  %v3976_v62 = vshll.u32 %v11154_v54, 16  ;;  %v4062_v63 = vadd.s32 1, %v6039_v44 }
 0x38e   : > { %v11172_v41 = vmul.f32 %v11160_v37, %v11160_v37  ;;  %v3703_v43 = vshll.u32 %v3702_v1, 23  ;;  %v3950_v38 = vmul.u32 %v3948_v61, %v3946_v28  ;;  %v3954_v24 = vshll.u32 %v11152_v55, 16 }
 0x38f   : > { %v11177_v31 = vsel %vm3269_vm9, %v3256_v21, %v3270_v49  ;;  %v11181_v15 = vsel %vm3272_vm12, %v3273_v14, %v3264_v50  ;;  %v3843_v60 = vshll.u32 %v11162_v9, 30  ;;  %v11184_v58 = vmul.u32 %v3948_v61, %v3947_v19 }
 0x390   : > { %v11186_v40 = vadd.f32 1.0, %v3410_v20  ;;  %v11188_v39 = vadd.f32 1.0, %v3417_v46  ;;  %v11193_v28 = vsel %vm3434_vm15, %v3556_v34, %v10755_v30  ;;  %v3561_v21 = vmul.f32 -0.001358992, %v11172_v41 }
 0x391   : > { %v3700_v3 = vor.u32 %v3699_v36, %v3698_v18  ;;  %v13525_v44 = vshll.u32 %v11167_v35, 16  ;;  %v11197_v50 = vadd.s32 %v3976_v62, %v3972_v16  ;;  %vm4063_vm0 = vcmp.gt.s32.totalorder %v4062_v63, 0 }
 0x392   : > { %v3704_v14 = vor.u32 4788187, %v3703_v43  ;;  %vm3958_vm13 = vc.u32 %v3950_v38, %v3954_v24  ;;  %vm3980_vm5 = vc.u32 %v3972_v16, %v3976_v62  ;;  %v4064_v1 = vsel %vm4063_vm0, %v4062_v63, 0 }
 0x393   : > { %v11200_v61 = vsub.s32 %v11116_v53, %v3843_v60  ;;  %v3956_v49 = vshll.u32 %v11184_v58, 16  ;;  %v3960_v20 = vadd.s32 %v3954_v24, %v3950_v38  ;;  %v13526_v30 = vand.u32 2147483647, %v10927_v7 }
 0x394   : > { %v3953_v34 = vmul.u32 %v3949_v23, %v3947_v19  ;;  %v3975_v18 = vmul.u32 %v3971_v56, %v3947_v19  ;;  %v4066_v36 = vand.u32 31, %v4064_v1  ;;  %v3568_v43 = vmul.f32 -0.00019511016, %v11172_v41 }
 0x395   : > { %v3959_v62 = vsel %vm3958_vm13, 1, %v13869_v10  ;;  %v3981_v16 = vsel %vm3980_vm5, 1, %v13869_v10  ;;  %vm3984_vm4 = vc.u32 %v11197_v50, %v13525_v44  ;;  %v3562_v24 = vadd.f32 0.041655596, %v3561_v21 }
 0x396   : > { %v3705_v53 = vand.u32 2147483647, %v3704_v14  ;;  %v3707_v63 = vcvt.s32.f32 %v3700_v3  ;;  %v11213_v38 = vsub.s32 32, %v4066_v36  ;;  %vm3845_vm7 = vcmp.lt.s32.totalorder %v11200_v61, 0 }
 0x397   : > { %v3846_v23 = vsub.s32 0, %v11200_v61  ;;  %vm3962_vm6 = vc.u32 %v3960_v20, %v3956_v49  ;;  %v4059_v56 = vand.u32 8388607, %v13526_v30  ;;  %v3961_v19 = vadd.s32 %v3959_v62, %v3953_v34 }
 0x398   : > { %v3983_v60 = vadd.s32 %v3981_v16, %v3975_v18  ;;  %v3985_v46 = vsel %vm3984_vm4, 1, %v13869_v10  ;;  %v11220_v9 = vshrl.u32 %v4064_v1, 5  ;;  %v4069_v21 = vshll.u32 %v13629_v26, %v4066_v36 }
 0x399   : > { %v4070_v3 = vshrl.u32 %v13918_v47, %v11213_v38  ;;  %v4072_v14 = vshll.u32 %v13918_v47, %v4066_v36  ;;  %v4073_v44 = vshrl.u32 %v13919_v33, %v11213_v38  ;;  %v3963_v49 = vsel %vm3962_vm6, 1, %v13869_v10 }
 0x39a   : > { %v4075_v20 = vshll.u32 %v13919_v33, %v4066_v36  ;;  %v4076_v34 = vshrl.u32 %v13923_v57, %v11213_v38  ;;  %v4078_v1 = vshll.u32 %v13923_v57, %v4066_v36  ;;  %v3847_v18 = vsel %vm3845_vm7, %v3846_v23, %v11200_v61 }
 0x39b   : > { %v3955_v62 = vshrl.u32 %v11152_v55, 16  ;;  %v4060_v16 = vor.u32 8388608, %v4059_v56  ;;  %v4079_v30 = vshrl.u32 %v13905_v45, %v11213_v38  ;;  %v3977_v7 = vshrl.u32 %v11154_v54, 16 }
 0x39c   : > { %v3987_v13 = vadd.s32 %v3985_v46, %v3983_v60  ;;  %v4081_v29 = vshll.u32 %v13905_v45, %v4066_v36  ;;  %v4082_v22 = vshrl.u32 %v13907_v0, %v11213_v38  ;;  %v3965_v33 = vadd.s32 %v3963_v49, %v3961_v19 }
 0x39d   : > { %v11243_v57 = vor.u32 %v4070_v3, %v4069_v21  ;;  %v11245_v47 = vor.u32 %v4073_v44, %v4072_v14  ;;  %vm4084_vm15 = vcmp.lt.s32.totalorder %v11220_v9, 1  ;;  %v11248_v55 = vor.u32 %v4076_v34, %v4075_v20 }
 0x39e   : > { %v4080_v23 = vor.u32 %v4079_v30, %v4078_v1  ;;  %v4083_v56 = vor.u32 %v4082_v22, %v4081_v29  ;;  %vm4087_vm11 = vcmp.lt.s32.totalorder %v11220_v9, 4  ;;  %v3569_v54 = vadd.f32 0.008332121, %v3568_v43 }
 0x39f   : > { %v3708_v46 = vmul.f32 %v3707_v63, %v3705_v53  ;;  %v3913_v36 = vshrl.u32 %v13629_v26, %v11044_v27  ;;  %vm4086_vm8 = vcmp.lt.s32.totalorder %v11220_v9, 3  ;;  %vm3424_vm9 = vcmp.eq.s32.totalorder %v11142_v5, 0 }
 0x3a0   : > { %vm3427_vm12 = vcmp.eq.s32.totalorder %v11142_v5, 2  ;;  %v3848_v44 = vclz %v3847_v18  ;;  %v3979_v19 = vshrl.u32 %v11167_v35, 16  ;;  %v3988_v60 = vadd.s32 %v3987_v13, %v3977_v7 }
 0x3a1   : > { %v4093_v22 = vsel %vm4087_vm11, %v4080_v23, 920167782  ;;  %v3957_v29 = vshrl.u32 %v11184_v58, 16  ;;  %v3966_v30 = vadd.s32 %v3965_v33, %v3955_v62  ;;  %vm4085_vm0 = vcmp.lt.s32.totalorder %v11220_v9, 2 }
 0x3a2   : > { %v4092_v27 = vsel %vm4084_vm15, %v11243_v57, %v11245_v47  ;;  %v3934_v43 = vsel %vm3932_vm1, %v11089_v6, 2102212464  ;;  %v4094_v7 = vsel %vm4086_vm8, %v11248_v55, %v4093_v22  ;;  %v4097_v13 = vsel %vm4087_vm11, %v4083_v56, 1326507024  ;;  %v13954_v56 = vld [vmem:[#allocation33_spill] sm:$0xff] }
 0x3a3   : > { %v11273_v58 = vshll.u32 %v4060_v16, 8  ;;  %v3419_v33 = vmul.f32 %v11188_v39, %v11022_v2  ;;  %v3563_v53 = vmul.f32 %v3562_v24, %v11172_v41  ;;  %v3570_v63 = vmul.f32 %v3569_v54, %v11172_v41 }
 0x3a4   : > { %v4096_v6 = vsel %vm4084_vm15, %v11245_v47, %v11248_v55  ;;  %vm3268_vm1 = vcmp.lt.s32.totalorder %v11013_v51, 2  ;;  %vm3423_vm13 = vcmp.lt.s32.totalorder %v11142_v5, 2  ;;  %v6034_v21 = vadd.s32 4294967294, %v3848_v44 }
 0x3a5   : > { %v3989_v3 = vadd.s32 %v3988_v60, %v3979_v19  ;;  %v11287_v14 = vsel %vm4085_vm0, %v4092_v27, %v4094_v7  ;;  %v4098_v2 = vsel %vm4086_vm8, %v4080_v23, %v4097_v13  ;;  %v3933_v39 = vsel %vm3929_vm3, %v3913_v36, %v11082_v59 }
 0x3a6   : > { %v3935_v24 = vsel %vm3931_vm2, %v11084_v52, %v3934_v43  ;;  %v11297_v49 = vadd.s32 %v3966_v30, %v3957_v29  ;;  %v13953_v20 = vshll.u32 %v11167_v35, 16  ;;  %v3709_v1 = vxor.u32 2147483648, %v3708_v46 }
 0x3a7   : > { %v11306_v18 = vsel %vm4085_vm0, %v4096_v6, %v4098_v2  ;;  %v4101_v62 = vand.u32 65535, %v11273_v58  ;;  %v4126_v59 = vshrl.u32 %v11287_v14, 16  ;;  %v3425_v16 = vxor.u32 2147483648, %v3419_v33 }
 0x3a8   : > { %v11302_v34 = vadd.s32 %v11197_v50, %v13953_v20  ;;  %v3428_v23 = vxor.u32 2147483648, %v11186_v40  ;;  %v3564_v52 = vadd.f32 -0.4999988, %v3563_v53  ;;  %vm3589_vm3 = vcmp.lt.s32.totalorder %v13954_v56, 0 }
 0x3a9   : > { %vm6035_vm2 = vcmp.lt.s32.totalorder %v6034_v21, 0  ;;  %v3936_v35 = vsel %vm3930_vm10, %v3933_v39, %v3935_v24  ;;  %v3993_v50 = vadd.s32 1, %v3989_v3  ;;  %v4104_v54 = vshrl.u32 %v11306_v18, 16 }
 0x3aa   : > { %v3571_v36 = vadd.f32 -0.16666654, %v3570_v63  ;;  %v13955_v44 = vsel %vm11133_vm14, 0, %v11193_v28  ;;  %v13956_v60 = vand.u32 2147483647, %v13954_v56  ;;  %vm3992_vm4 = vc.u32 %v11297_v49, %v11302_v34 }
 0x3ab   : > { %v3576_v19 = vadd.s32 3, %v13955_v44  ;;  %v3710_v8 = vsel %vm3589_vm3, %v3709_v1, %v3708_v46  ;;  %v4102_v29 = vshrl.u32 %v11273_v58, 16  ;;  %v4125_v30 = vand.u32 65535, %v11287_v14 }
 0x3ac   : > { %vm11321_vm5 = vcmp.le.f32.partialorder %v13956_v60, 0.7853982  ;;  %v11331_v4 = vmul.u32 %v4126_v59, %v4101_v62  ;;  %v3426_v28 = vsel %vm3424_vm9, %v11186_v40, %v3425_v16  ;;  %v3429_v27 = vsel %vm3427_vm12, %v3428_v23, %v3419_v33 }
 0x3ad   : > { %v3851_v43 = vsel %vm6035_vm2, 0, %v6034_v21  ;;  %v3990_v7 = vmul.u32 %v11114_v17, %v3936_v35  ;;  %v3565_v13 = vmul.f32 %v3564_v52, %v11172_v41  ;;  %v3994_v53 = vsel %vm3992_vm4, %v3993_v50, %v3989_v3 }
 0x3ae   : > { %v4103_v46 = vand.u32 65535, %v11306_v18  ;;  %v11341_v63 = vmul.u32 %v4104_v54, %v4101_v62  ;;  %v11345_v6 = vmul.f32 %v13925_v42, %v10923_v25  ;;  %v3572_v14 = vmul.f32 %v3571_v36, %v11172_v41 }
 0x3af   : > { %v11348_v40 = vand.u32 3, %v3576_v19  ;;  %v11353_v33 = vsel %vm11321_vm5, %v13954_v56, %v3710_v8  ;;  %v3856_v17 = vsub.s32 4294967266, %v3851_v43  ;;  %v4127_v21 = vmul.u32 %v4125_v30, %v4101_v62 }
 0x3b0   : > { %13959 = vst [vmem:[#allocation32_spill] sm:$0xff] %v11345_v6  ;;  %v11355_v3 = vmul.u32 %v4125_v30, %v4102_v29  ;;  %v4131_v2 = vshll.u32 %v11331_v4, 16  ;;  %v11362_v25 = vsel %vm3268_vm1, %v11177_v31, %v11181_v15  ;;  %v11366_v41 = vsel %vm3423_vm13, %v3426_v28, %v3429_v27 }
 0x3b1   : > { %v11368_v39 = vadd.s32 %v3994_v53, %v3990_v7  ;;  %v4210_v24 = vand.u32 2139095040, %v10931_v48  ;;  %v11371_v20 = vadd.f32 1.0, %v3565_v13  ;;  %v4105_v1 = vmul.u32 %v4103_v46, %v4101_v62 }
 0x3b2   : > { %v11373_v18 = vmul.u32 %v4103_v46, %v4102_v29  ;;  %v4109_v16 = vshll.u32 %v11341_v63, 16  ;;  %v3573_v23 = vadd.f32 1.0, %v3572_v14  ;;  %vm3582_vm10 = vcmp.eq.s32.totalorder %v11348_v40, 2 }
 0x3b3   : > { %v11379_v51 = vmul.f32 %v11353_v33, %v11353_v33  ;;  %v3836_v5 = vadd.s32 %v11056_v32, %v11067_v11  ;;  %v3852_v31 = vsub.s32 32, %v3851_v43  ;;  %v3711_v15 = vsub.s32 4, %v10976_v12 }
 0x3b4   : > { %v3857_v52 = vadd.s32 127, %v3856_v17  ;;  %v4133_v62 = vshll.u32 %v11355_v3, 16  ;;  %vm4135_vm14 = vc.u32 %v4127_v21, %v4131_v2  ;;  %v3996_v50 = vadd.s32 536870912, %v11368_v39 }
 0x3b5   : > { %v3716_v35 = vmul.f32 -0.001358992, %v11379_v51  ;;  %v11387_v36 = vadd.s32 %v4131_v2, %v4127_v21  ;;  %v4211_v44 = vshrl.u32 %v4210_v24, 23  ;;  %v4111_v19 = vshll.u32 %v11373_v18, 16 }
 0x3b6   : > { %vm4113_vm7 = vc.u32 %v4105_v1, %v4109_v16  ;;  %v4115_v60 = vadd.s32 %v4109_v16, %v4105_v1  ;;  %v4130_v8 = vmul.u32 %v4126_v59, %v4102_v29  ;;  %v3853_v32 = vshll.u32 %v11200_v61, %v3851_v43 }
 0x3b7   : > { %v3854_v11 = vshrl.u32 %v3836_v5, %v3852_v31  ;;  %v4136_v30 = vsel %vm4135_vm14, 1, %v13869_v10  ;;  %v6042_v28 = vadd.s32 4294967169, %v4211_v44  ;;  %v11393_v27 = vmul.f32 %v3573_v23, %v11160_v37 }
 0x3b8   : > { %v3858_v7 = vshll.u32 %v3857_v52, 23  ;;  %v4108_v13 = vmul.u32 %v4104_v54, %v4102_v29  ;;  %vm4139_vm6 = vc.u32 %v11387_v36, %v4133_v62  ;;  %v11401_v53 = vsel %vm3589_vm3, %v3711_v15, %v10976_v12 }
 0x3b9   : > { %v11403_v59 = vshrl.u32 %v3996_v50, 30  ;;  %v4114_v61 = vsel %vm4113_vm7, 1, %v13869_v10  ;;  %v4217_v43 = vadd.s32 1, %v6042_v28  ;;  %v3583_v46 = vxor.u32 2147483648, %v11371_v20 }
 0x3ba   : > { %v3723_v37 = vmul.f32 -0.00019511016, %v11379_v51  ;;  %vm4117_vm9 = vc.u32 %v4115_v60, %v4111_v19  ;;  %v4138_v54 = vadd.s32 %v4136_v30, %v4130_v8  ;;  %v3717_v29 = vadd.f32 0.041655596, %v3716_v35 }
 0x3bb   : > { %v3855_v14 = vor.u32 %v3854_v11, %v3853_v32  ;;  %v4140_v17 = vsel %vm4139_vm6, 1, %v13869_v10  ;;  %vm4218_vm12 = vcmp.gt.s32.totalorder %v4217_v43, 0  ;;  %v3859_v21 = vor.u32 4788187, %v3858_v7 }
 0x3bc   : > { %v4116_v2 = vadd.s32 %v4114_v61, %v4108_v13  ;;  %v4219_v24 = vsel %vm4218_vm12, %v4217_v43, 0  ;;  %v3998_v1 = vshll.u32 %v11403_v59, 30  ;;  %v4118_v16 = vsel %vm4117_vm9, 1, %v13869_v10 }
 0x3bd   : > { %v13535_v23 = vand.u32 2147483647, %v10931_v48  ;;  %v4221_v5 = vand.u32 31, %v4219_v24  ;;  %vm3579_vm1 = vcmp.eq.s32.totalorder %v11348_v40, 0  ;;  %v3580_v31 = vxor.u32 2147483648, %v11393_v27 }
 0x3be   : > { %v11420_v15 = vsel %vm3582_vm10, %v3583_v46, %v11393_v27  ;;  %v4132_v52 = vshrl.u32 %v11331_v4, 16  ;;  %v4142_v35 = vadd.s32 %v4140_v17, %v4138_v54  ;;  %v3718_v50 = vmul.f32 %v3717_v29, %v11379_v51 }
 0x3bf   : > { %v3724_v44 = vadd.f32 0.008332121, %v3723_v37  ;;  %v3862_v19 = vcvt.s32.f32 %v3855_v14  ;;  %v11424_v60 = vsub.s32 32, %v4221_v5  ;;  %v3860_v8 = vand.u32 2147483647, %v3859_v21 }
 0x3c0   : > { %v4068_v32 = vshrl.u32 %v13629_v26, %v11213_v38  ;;  %v4110_v11 = vshrl.u32 %v11341_v63, 16  ;;  %v4120_v30 = vadd.s32 %v4118_v16, %v4116_v2  ;;  %v11430_v28 = vsub.s32 %v11368_v39, %v3998_v1 }
 0x3c1   : > { %v4089_v4 = vsel %vm4087_vm11, %v11248_v55, 2102212464  ;;  %v4134_v27 = vshrl.u32 %v11355_v3, 16  ;;  %v4214_v7 = vand.u32 8388607, %v13535_v23  ;;  %v4143_v13 = vadd.s32 %v4142_v35, %v4132_v52  ;;  %v13964_v3 = vld [vmem:[#allocation62_spill] sm:$0xff] }
 0x3c2   : > { %v13960_v61 = vmov 2475754826   ;;  %v13961_v46 = vmov 2131351028   ;;  %v13962_v37 = vmov 2102212464   ;;  %v4234_v55 = vshrl.u32 %v13905_v45, %v11424_v60 }
 0x3c3   : > { %v4227_v43 = vshll.u32 %v13960_v61, %v4221_v5  ;;  %v4230_v38 = vshll.u32 %v13961_v46, %v4221_v5  ;;  %v4233_v63 = vshll.u32 %v13962_v37, %v4221_v5  ;;  %v4228_v39 = vshrl.u32 %v13961_v46, %v11424_v60 }
 0x3c4   : > { %v4231_v54 = vshrl.u32 %v13962_v37, %v11424_v60  ;;  %v4236_v29 = vshll.u32 %v13905_v45, %v4221_v5  ;;  %v4088_v14 = vsel %vm4084_vm15, %v4068_v32, %v11243_v57  ;;  %v4112_v17 = vshrl.u32 %v11373_v18, 16 }
 0x3c5   : > { %v4121_v21 = vadd.s32 %v4120_v30, %v4110_v11  ;;  %v11452_v2 = vshrl.u32 %v4219_v24, 5  ;;  %vm3578_vm11 = vcmp.lt.s32.totalorder %v11348_v40, 2  ;;  %vm4000_vm13 = vcmp.lt.s32.totalorder %v11430_v28, 0  ;;  %v13972_v40 = vld [vmem:[#allocation23_spill] sm:$0xff] }
 0x3c6   : > { %v4090_v1 = vsel %vm4086_vm8, %v11245_v47, %v4089_v4  ;;  %v4215_v16 = vor.u32 8388608, %v4214_v7  ;;  %v4237_v52 = vshrl.u32 %v13907_v0, %v11424_v60  ;;  %v4001_v35 = vsub.s32 0, %v11430_v28 }
 0x3c7   : > { %v4144_v57 = vadd.s32 %v4143_v13, %v4134_v27  ;;  %v4224_v18 = vshll.u32 %v13629_v26, %v4221_v5  ;;  %v4225_v24 = vshrl.u32 %v13960_v61, %v11424_v60  ;;  %v11465_v32 = vor.u32 %v4228_v39, %v4227_v43  ;;  %v13963_v5 = vld [vmem:[#allocation64_spill] sm:$0xff] }
 0x3c8   : > { %v11467_v11 = vor.u32 %v4231_v54, %v4230_v38  ;;  %v4235_v30 = vor.u32 %v4234_v55, %v4233_v63  ;;  %v4238_v23 = vor.u32 %v4237_v52, %v4236_v29  ;;  %v11469_v12 = vadd.s32 %v4121_v21, %v4112_v17  ;;  %v13966_v63 = vld [vmem:[#allocation31_spill] sm:$0xff] }
 0x3c9   : > { %v11474_v47 = vadd.s32 %v11387_v36, %v4133_v62  ;;  %vm4239_vm15 = vcmp.lt.s32.totalorder %v11452_v2, 1  ;;  %vm4242_vm8 = vcmp.lt.s32.totalorder %v11452_v2, 4  ;;  %vm3265_vm3 = vweird.f32 %v13963_v5  ;;  %v13965_v62 = vld [vmem:[#allocation55_spill] sm:$0xff] }
 0x3ca   : > { %v3581_v4 = vsel %vm3579_vm1, %v11371_v20, %v3580_v31  ;;  %v3863_v27 = vmul.f32 %v3862_v19, %v3860_v8  ;;  %v4091_v7 = vsel %vm4085_vm0, %v4088_v14, %v4090_v1  ;;  %v11484_v13 = vshll.u32 %v4215_v16, 8 }
 0x3cb   : > { %vm3420_vm2 = vweird.f32 %v13964_v3  ;;  %vm3575_vm4 = vweird.f32 %v13965_v62  ;;  %v4002_v36 = vsel %vm4000_vm13, %v4001_v35, %v11430_v28  ;;  %v4148_v43 = vadd.s32 1, %v4144_v57 }
 0x3cc   : > { %v11491_v38 = vor.u32 %v4225_v24, %v4224_v18  ;;  %vm4241_vm10 = vcmp.lt.s32.totalorder %v11452_v2, 3  ;;  %vm4240_vm14 = vcmp.lt.s32.totalorder %v11452_v2, 2  ;;  %v4248_v9 = vsel %vm4242_vm8, %v4235_v30, 920167782  ;;  %v13968_v24 = vld [vmem:[#allocation51_spill] sm:$0xff] }
 0x3cd   : > { %v4251_v20 = vsel %vm4239_vm15, %v11465_v32, %v11467_v11  ;;  %v4252_v31 = vsel %vm4242_vm8, %v4238_v23, 1326507024  ;;  %v3719_v19 = vadd.f32 -0.4999988, %v3718_v50  ;;  %v3725_v8 = vmul.f32 %v3724_v44, %v11379_v51 }
 0x3ce   : > { %v3866_v39 = vsub.s32 4, %v13966_v63  ;;  %vm4147_vm0 = vc.u32 %v11469_v12, %v11474_v47  ;;  %v3864_v54 = vxor.u32 2147483648, %v3863_v27  ;;  %v4003_v55 = vclz %v4002_v36 }
 0x3cf   : > { %v4253_v29 = vsel %vm4241_vm10, %v4235_v30, %v4252_v31  ;;  %v4256_v14 = vand.u32 65535, %v11484_v13  ;;  %v4145_v17 = vmul.u32 %v11273_v58, %v4091_v7  ;;  %v4247_v23 = vsel %vm4239_vm15, %v11491_v38, %v11465_v32 }
 0x3d0   : > { %v4249_v50 = vsel %vm4241_vm10, %v11467_v11, %v4248_v9  ;;  %v4254_v44 = vsel %vm4240_vm14, %v4251_v20, %v4253_v29  ;;  %v4149_v21 = vsel %vm4147_vm0, %v4148_v43, %v4144_v57  ;;  %v4257_v1 = vshrl.u32 %v11484_v13, 16 }
 0x3d1   : > { %v4258_v16 = vand.u32 65535, %v4254_v44  ;;  %v4259_v52 = vshrl.u32 %v4254_v44, 16  ;;  %v3585_v58 = vsel %vm3578_vm11, %v3581_v4, %v11420_v15  ;;  %v13967_v35 = vsel %vm11321_vm5, 0, %v11401_v53  ;;  %v13973_v44 = vld [vmem:[#allocation12_spill] sm:$0xff] }
 0x3d2   : > { %v3731_v18 = vadd.s32 3, %v13967_v35  ;;  %v13969_v30 = vand.u32 2147483647, %v13968_v24  ;;  %vm3744_vm6 = vcmp.lt.s32.totalorder %v13968_v24, 0  ;;  %v6037_v57 = vadd.s32 4294967294, %v4003_v55 }
 0x3d3   : > { %v4250_v36 = vsel %vm4240_vm14, %v4247_v23, %v4249_v50  ;;  %v11537_v43 = vmul.u32 %v4259_v52, %v4256_v14  ;;  %v4365_v15 = vand.u32 2139095040, %v13972_v40  ;;  %v3720_v22 = vmul.f32 %v3719_v19, %v11379_v51 }
 0x3d4   : > { %vm11530_vm7 = vcmp.le.f32.partialorder %v13969_v30, 0.7853982  ;;  %v3726_v53 = vadd.f32 -0.16666654, %v3725_v8  ;;  %v11542_v4 = vsel %vm3744_vm6, %v3866_v39, %v13966_v63  ;;  %v11544_v9 = vadd.s32 %v4149_v21, %v4145_v17 }
 0x3d5   : > { %v3865_v20 = vsel %vm3744_vm6, %v3864_v54, %v3863_v27  ;;  %v4260_v31 = vmul.u32 %v4258_v16, %v4256_v14  ;;  %v11546_v29 = vmul.u32 %v4258_v16, %v4257_v1  ;;  %v4264_v55 = vshll.u32 %v11537_v43, 16 }
 0x3d6   : > { %v11551_v23 = vmul.f32 %v13925_v42, %v13973_v44  ;;  %v11556_v19 = vsel %vm3265_vm3, nan, %v11362_v25  ;;  %v4280_v8 = vand.u32 65535, %v4250_v36  ;;  %v4281_v63 = vshrl.u32 %v4250_v36, 16 }
 0x3d7   : > { %13975 = vst [vmem:[#allocation39_spill] sm:$0xff] %v11556_v19  ;;  %v11561_v27 = vsel %vm3420_vm2, nan, %v11366_v41  ;;  %v11565_v39 = vsel %vm3575_vm4, nan, %v3585_v58  ;;  %vm6038_vm5 = vcmp.lt.s32.totalorder %v6037_v57, 0  ;;  %v4366_v54 = vshrl.u32 %v4365_v15, 23  ;;  %v13989_v19 = vld [vmem:[#allocation26_spill] sm:$0xff] }
 0x3d8   : > { %13974 = vst [vmem:[#allocation38_spill] sm:$0xff] %v11551_v23  ;;  %v11567_v42 = vand.u32 3, %v3731_v18  ;;  %v11572_v25 = vsel %vm11530_vm7, %v13968_v24, %v3865_v20  ;;  %v4151_v41 = vadd.s32 536870912, %v11544_v9  ;;  %v11578_v3 = vadd.f32 1.0, %v3720_v22 }
 0x3d9   : > { %13976 = vst [vmem:[#allocation43_spill] sm:$0xff] %v11561_v27  ;;  %v3727_v62 = vmul.f32 %v3726_v53, %v11379_v51  ;;  %v4266_v17 = vshll.u32 %v11546_v29, 16  ;;  %vm4268_vm9 = vc.u32 %v4260_v31, %v4264_v55  ;;  %v11582_v50 = vsel %vm6038_vm5, 0, %v6037_v57 }
 0x3da   : > { %13977 = vst [vmem:[#allocation44_spill] sm:$0xff] %v11565_v39  ;;  %v4270_v21 = vadd.s32 %v4264_v55, %v4260_v31  ;;  %v4282_v16 = vmul.u32 %v4280_v8, %v4256_v14  ;;  %v4283_v58 = vmul.u32 %v4281_v63, %v4256_v14  ;;  %v11586_v35 = vmul.f32 %v11572_v25, %v11572_v25 }
 0x3db   : > { %v4263_v18 = vmul.u32 %v4259_v52, %v4257_v1  ;;  %v11588_v30 = vmul.u32 %v4280_v8, %v4257_v1  ;;  %v6045_v36 = vadd.s32 4294967169, %v4366_v54  ;;  %v11590_v15 = vshrl.u32 %v4151_v41, 30 }
 0x3dc   : > { %v4269_v51 = vsel %vm4268_vm9, 1, %v13869_v10  ;;  %v4285_v22 = vmul.u32 %v4281_v63, %v4257_v1  ;;  %v4286_v53 = vshll.u32 %v4283_v58, 16  ;;  %v3728_v20 = vadd.f32 1.0, %v3727_v62 }
 0x3dd   : > { %v4011_v57 = vsub.s32 4294967266, %v11582_v50  ;;  %vm4272_vm12 = vc.u32 %v4270_v21, %v4266_v17  ;;  %v4288_v14 = vshll.u32 %v11588_v30, 16  ;;  %v3871_v31 = vmul.f32 -0.001358992, %v11586_v35 }
 0x3de   : > { %v3991_v52 = vadd.s32 %v11302_v34, %v11297_v49  ;;  %vm4290_vm1 = vc.u32 %v4282_v16, %v4286_v53  ;;  %v4292_v55 = vadd.s32 %v4286_v53, %v4282_v16  ;;  %v3878_v44 = vmul.f32 -0.00019511016, %v11586_v35 }
 0x3df   : > { %v4271_v8 = vadd.s32 %v4269_v51, %v4263_v18  ;;  %v4291_v54 = vsel %vm4290_vm1, 1, %v13869_v10  ;;  %v4372_v1 = vadd.s32 1, %v6045_v36  ;;  %v4153_v63 = vshll.u32 %v11590_v15, 30 }
 0x3e0   : > { %v4273_v41 = vsel %vm4272_vm12, 1, %v13869_v10  ;;  %v4293_v62 = vadd.s32 %v4291_v54, %v4285_v22  ;;  %vm4294_vm11 = vc.u32 %v4292_v55, %v4288_v14  ;;  %v4007_v17 = vsub.s32 32, %v11582_v50 }
 0x3e1   : > { %v4012_v21 = vadd.s32 127, %v4011_v57  ;;  %v4295_v5 = vsel %vm4294_vm11, 1, %v13869_v10  ;;  %vm4373_vm13 = vcmp.gt.s32.totalorder %v4372_v1, 0  ;;  %v4287_v49 = vshrl.u32 %v4283_v58, 16 }
 0x3e2   : > { %v4297_v34 = vadd.s32 %v4295_v5, %v4293_v62  ;;  %v13536_v16 = vand.u32 2147483647, %v13972_v40  ;;  %v4374_v18 = vsel %vm4373_vm13, %v4372_v1, 0  ;;  %v4223_v36 = vshrl.u32 %v13629_v26, %v11424_v60 }
 0x3e3   : > { %v4265_v51 = vshrl.u32 %v11537_v43, 16  ;;  %v4275_v53 = vadd.s32 %v4273_v41, %v4271_v8  ;;  %v4376_v39 = vand.u32 31, %v4374_v18  ;;  %v11609_v22 = vmul.f32 %v3728_v20, %v11353_v33 }
 0x3e4   : > { %v3872_v54 = vadd.f32 0.041655596, %v3871_v31  ;;  %v11612_v57 = vsub.s32 %v11544_v9, %v4153_v63  ;;  %v4244_v5 = vsel %vm4242_vm8, %v11467_v11, 2102212464  ;;  %v3879_v58 = vadd.f32 0.008332121, %v3878_v44 }
 0x3e5   : > { %v4008_v1 = vshll.u32 %v11430_v28, %v11582_v50  ;;  %v4009_v60 = vshrl.u32 %v3991_v52, %v4007_v17  ;;  %v11619_v62 = vsub.s32 32, %v4376_v39  ;;  %v4013_v43 = vshll.u32 %v4012_v21, 23 }
 0x3e6   : > { %v4289_v8 = vshrl.u32 %v11588_v30, 16  ;;  %v4298_v33 = vadd.s32 %v4297_v34, %v4287_v49  ;;  %v4369_v20 = vand.u32 8388607, %v13536_v16  ;;  %v4243_v9 = vsel %vm4239_vm15, %v4223_v36, %v11491_v38 }
 0x3e7   : > { %v4245_v11 = vsel %vm4241_vm10, %v11465_v32, %v4244_v5  ;;  %v4267_v28 = vshrl.u32 %v11546_v29, 16  ;;  %v4276_v50 = vadd.s32 %v4275_v53, %v4265_v51  ;;  %vm4155_vm8 = vcmp.lt.s32.totalorder %v11612_v57, 0 }
 0x3e8   : > { %v4388_v31 = vshll.u32 %v13962_v37, %v4376_v39  ;;  %v4389_v30 = vshrl.u32 %v13905_v45, %v11619_v62  ;;  %v4391_v52 = vshll.u32 %v13905_v45, %v4376_v39  ;;  %v4382_v44 = vshll.u32 %v13960_v61, %v4376_v39 }
 0x3e9   : > { %v4383_v38 = vshrl.u32 %v13961_v46, %v11619_v62  ;;  %v4385_v63 = vshll.u32 %v13961_v46, %v4376_v39  ;;  %v4386_v32 = vshrl.u32 %v13962_v37, %v11619_v62  ;;  %v4156_v29 = vsub.s32 0, %v11612_v57 }
 0x3ea   : > { %v4299_v41 = vadd.s32 %v4298_v33, %v4289_v8  ;;  %v11643_v17 = vshrl.u32 %v4374_v18, 5  ;;  %v4392_v21 = vshrl.u32 %v13907_v0, %v11619_v62  ;;  %v11647_v49 = vadd.s32 %v4276_v50, %v4267_v28 }
 0x3eb   : > { %v11649_v34 = vadd.s32 %v4292_v55, %v4288_v14  ;;  %v4379_v36 = vshll.u32 %v13629_v26, %v4376_v39  ;;  %v4380_v51 = vshrl.u32 %v13960_v61, %v11619_v62  ;;  %vm3737_vm15 = vcmp.eq.s32.totalorder %v11567_v42, 2 }
 0x3ec   : > { %v3880_v53 = vmul.f32 %v3879_v58, %v11586_v35  ;;  %v4370_v5 = vor.u32 8388608, %v4369_v20  ;;  %v4390_v8 = vor.u32 %v4389_v30, %v4388_v31  ;;  %v4393_v18 = vor.u32 %v4392_v21, %v4391_v52  ;;  %v13978_v21 = vld [vmem:[#allocation36_spill] sm:$0xff] }
 0x3ed   : > { %v4010_v33 = vor.u32 %v4009_v60, %v4008_v1  ;;  %v4246_v16 = vsel %vm4240_vm14, %v4243_v9, %v4245_v11  ;;  %v11658_v28 = vor.u32 %v4383_v38, %v4382_v44  ;;  %v11660_v14 = vor.u32 %v4386_v32, %v4385_v63 }
 0x3ee   : > { %v4157_v39 = vsel %vm4155_vm8, %v4156_v29, %v11612_v57  ;;  %v4303_v55 = vadd.s32 1, %v4299_v41  ;;  %vm4394_vm3 = vcmp.lt.s32.totalorder %v11643_v17, 1  ;;  %vm4397_vm2 = vcmp.lt.s32.totalorder %v11643_v17, 4 }
 0x3ef   : > { %v4014_v58 = vor.u32 4788187, %v4013_v43  ;;  %vm4302_vm4 = vc.u32 %v11647_v49, %v11649_v34  ;;  %v11669_v1 = vor.u32 %v4380_v51, %v4379_v36  ;;  %vm4396_vm10 = vcmp.lt.s32.totalorder %v11643_v17, 3 }
 0x3f0   : > { %vm3733_vm14 = vcmp.lt.s32.totalorder %v11567_v42, 2  ;;  %v3738_v2 = vxor.u32 2147483648, %v11578_v3  ;;  %v4403_v60 = vsel %vm4397_vm2, %v4390_v8, 920167782  ;;  %v4407_v20 = vsel %vm4397_vm2, %v4393_v18, 1326507024 }
 0x3f1   : > { %v11678_v9 = vshll.u32 %v4370_v5, 8  ;;  %v4158_v43 = vclz %v4157_v39  ;;  %v4300_v11 = vmul.u32 %v11484_v13, %v4246_v16  ;;  %vm4395_vm0 = vcmp.lt.s32.totalorder %v11643_v17, 2 }
 0x3f2   : > { %v4406_v50 = vsel %vm4394_vm3, %v11658_v28, %v11660_v14  ;;  %v3873_v31 = vmul.f32 %v3872_v54, %v11586_v35  ;;  %v3881_v30 = vadd.f32 -0.16666654, %v3880_v53  ;;  %v4304_v52 = vsel %vm4302_vm4, %v4303_v55, %v4299_v41 }
 0x3f3   : > { %v4408_v44 = vsel %vm4396_vm10, %v4390_v8, %v4407_v20  ;;  %vm3730_vm6 = vweird.f32 %v13954_v56  ;;  %v4015_v38 = vand.u32 2147483647, %v4014_v58  ;;  %v4017_v63 = vcvt.s32.f32 %v4010_v33 }
 0x3f4   : > { %v4402_v13 = vsel %vm4394_vm3, %v11669_v1, %v11658_v28  ;;  %v4404_v16 = vsel %vm4396_vm10, %v11660_v14, %v4403_v60  ;;  %v3735_v54 = vxor.u32 2147483648, %v11609_v22  ;;  %v4409_v32 = vsel %vm4395_vm0, %v4406_v50, %v4408_v44 }
 0x3f5   : > { %v4411_v29 = vand.u32 65535, %v11678_v9  ;;  %v4412_v41 = vshrl.u32 %v11678_v9, 16  ;;  %vm3734_vm5 = vcmp.eq.s32.totalorder %v11567_v42, 0  ;;  %vm3899_vm9 = vcmp.lt.s32.totalorder %v13978_v21, 0 }
 0x3f6   : > { %v6040_v36 = vadd.s32 4294967294, %v4158_v43  ;;  %v4305_v51 = vadd.s32 %v4304_v52, %v4300_v11  ;;  %v3874_v53 = vadd.f32 -0.4999988, %v3873_v31  ;;  %v4405_v5 = vsel %vm4395_vm0, %v4402_v13, %v4404_v16 }
 0x3f7   : > { %v4413_v8 = vand.u32 65535, %v4409_v32  ;;  %v4414_v18 = vshrl.u32 %v4409_v32, 16  ;;  %v3739_v33 = vsel %vm3737_vm15, %v3738_v2, %v11609_v22  ;;  %v3882_v39 = vmul.f32 %v3881_v30, %v11586_v35 }
 0x3f8   : > { %v13979_v55 = vsel %vm11530_vm7, 0, %v11542_v4  ;;  %v4018_v60 = vmul.f32 %v4017_v63, %v4015_v38  ;;  %v3736_v20 = vsel %vm3734_vm5, %v11578_v3, %v3735_v54  ;;  %vm6041_vm12 = vcmp.lt.s32.totalorder %v6040_v36, 0  ;;  %v13983_v3 = vld [vmem:[#allocation49_spill] sm:$0xff] }
 0x3f9   : > { %v3886_v58 = vadd.s32 3, %v13979_v55  ;;  %v4415_v43 = vmul.u32 %v4413_v8, %v4411_v29  ;;  %v11715_v11 = vmul.u32 %v4414_v18, %v4411_v29  ;;  %v11717_v50 = vmul.u32 %v4413_v8, %v4412_v41 }
 0x3fa   : > { %v4306_v31 = vadd.s32 536870912, %v4305_v51  ;;  %v4435_v52 = vand.u32 65535, %v4405_v5  ;;  %v4436_v44 = vshrl.u32 %v4405_v5, 16  ;;  %v3875_v22 = vmul.f32 %v3874_v53, %v11586_v35 }
 0x3fb   : > { %v13980_v2 = vand.u32 2147483647, %v13978_v21  ;;  %v4419_v4 = vshll.u32 %v11715_v11, 16  ;;  %v4520_v30 = vand.u32 2139095040, %v13983_v3  ;;  %v3740_v38 = vsel %vm3733_vm14, %v3736_v20, %v3739_v33 }
 0x3fc   : > { %v3883_v63 = vadd.f32 1.0, %v3882_v39  ;;  %v4019_v13 = vxor.u32 2147483648, %v4018_v60  ;;  %v4021_v16 = vsub.s32 4, %v11403_v59  ;;  %v11731_v54 = vsel %vm6041_vm12, 0, %v6040_v36 }
 0x3fd   : > { %vm11722_vm1 = vcmp.le.f32.partialorder %v13980_v2, 0.7853982  ;;  %v4421_v35 = vshll.u32 %v11717_v50, 16  ;;  %vm4423_vm7 = vc.u32 %v4415_v43, %v4419_v4  ;;  %v4425_v32 = vadd.s32 %v4419_v4, %v4415_v43 }
 0x3fe   : > { %v11734_v53 = vand.u32 3, %v3886_v58  ;;  %v11736_v5 = vshrl.u32 %v4306_v31, 30  ;;  %v4438_v8 = vmul.u32 %v4436_v44, %v4411_v29  ;;  %v11738_v55 = vmul.u32 %v4435_v52, %v4412_v41 }
 0x3ff   : > { %v11742_v42 = vsel %vm3730_vm6, nan, %v3740_v38  ;;  %v11744_v33 = vadd.f32 1.0, %v3875_v22  ;;  %v4418_v39 = vmul.u32 %v4414_v18, %v4412_v41  ;;  %v4521_v36 = vshrl.u32 %v4520_v30, 23 }
 0x400   : > { %13984 = vst [vmem:[#allocation21_spill] sm:$0xff] %v11742_v42  ;;  %v4020_v20 = vsel %vm3899_vm9, %v4019_v13, %v4018_v60  ;;  %v4166_v43 = vsub.s32 4294967266, %v11731_v54  ;;  %v4424_v58 = vsel %vm4423_vm7, 1, %v13869_v10  ;;  %v4437_v31 = vmul.u32 %v4435_v52, %v4411_v29 }
 0x401   : > { %v11751_v2 = vmul.f32 %v3883_v63, %v11572_v25  ;;  %v11756_v56 = vsel %vm3899_vm9, %v4021_v16, %v11403_v59  ;;  %v4146_v18 = vadd.s32 %v11474_v47, %v11469_v12  ;;  %vm4427_vm11 = vc.u32 %v4425_v32, %v4421_v35 }
 0x402   : > { %v4308_v22 = vshll.u32 %v11736_v5, 30  ;;  %v4440_v60 = vmul.u32 %v4436_v44, %v4412_v41  ;;  %v4441_v4 = vshll.u32 %v4438_v8, 16  ;;  %v4443_v30 = vshll.u32 %v11738_v55, 16 }
 0x403   : > { %v11765_v25 = vsel %vm11722_vm1, %v13978_v21, %v4020_v20  ;;  %v4162_v29 = vsub.s32 32, %v11731_v54  ;;  %v4426_v52 = vadd.s32 %v4424_v58, %v4418_v39  ;;  %v6048_v59 = vadd.s32 4294967169, %v4521_v36 }
 0x404   : > { %v4167_v38 = vadd.s32 127, %v4166_v43  ;;  %v4428_v63 = vsel %vm4427_vm11, 1, %v13869_v10  ;;  %vm4445_vm13 = vc.u32 %v4437_v31, %v4441_v4  ;;  %v4447_v12 = vadd.s32 %v4441_v4, %v4437_v31 }
 0x405   : > { %v4378_v47 = vshrl.u32 %v13629_v26, %v11619_v62  ;;  %v4399_v41 = vsel %vm4397_vm2, %v11660_v14, 2102212464  ;;  %v4446_v44 = vsel %vm4445_vm13, 1, %v13869_v10  ;;  %v4527_v13 = vadd.s32 1, %v6048_v59 }
 0x406   : > { %v11775_v16 = vsub.s32 %v4305_v51, %v4308_v22  ;;  %v4442_v35 = vshrl.u32 %v4438_v8, 16  ;;  %v4448_v32 = vadd.s32 %v4446_v44, %v4440_v60  ;;  %vm4449_vm8 = vc.u32 %v4447_v12, %v4443_v30 }
 0x407   : > { %v4420_v39 = vshrl.u32 %v11715_v11, 16  ;;  %v4430_v36 = vadd.s32 %v4428_v63, %v4426_v52  ;;  %v4450_v20 = vsel %vm4449_vm8, 1, %v13869_v10  ;;  %vm4528_vm15 = vcmp.gt.s32.totalorder %v4527_v13, 0 }
 0x408   : > { %v4163_v62 = vshll.u32 %v11612_v57, %v11731_v54  ;;  %v4452_v43 = vadd.s32 %v4450_v20, %v4448_v32  ;;  %v13537_v14 = vand.u32 2147483647, %v13983_v3  ;;  %v4529_v58 = vsel %vm4528_vm15, %v4527_v13, 0 }
 0x409   : > { %v4164_v31 = vshrl.u32 %v4146_v18, %v4162_v29  ;;  %v4168_v4 = vshll.u32 %v4167_v38, 23  ;;  %v4444_v51 = vshrl.u32 %v11738_v55, 16  ;;  %v4531_v8 = vand.u32 31, %v4529_v58 }
 0x40a   : > { %vm4310_vm2 = vcmp.lt.s32.totalorder %v11775_v16, 0  ;;  %v4398_v11 = vsel %vm4394_vm3, %v4378_v47, %v11669_v1  ;;  %v4400_v22 = vsel %vm4396_vm10, %v11658_v28, %v4399_v41  ;;  %v4453_v57 = vadd.s32 %v4452_v43, %v4442_v35 }
 0x40b   : > { %v4311_v54 = vsub.s32 0, %v11775_v16  ;;  %v4422_v60 = vshrl.u32 %v11717_v50, 16  ;;  %v4431_v18 = vadd.s32 %v4430_v36, %v4420_v39  ;;  %v11792_v29 = vsub.s32 32, %v4531_v8 }
 0x40c   : > { %v4524_v55 = vand.u32 8388607, %v13537_v14  ;;  %v11796_v52 = vshrl.u32 %v4529_v58, 5  ;;  %v4534_v59 = vshll.u32 %v13629_v26, %v4531_v8  ;;  %v4543_v1 = vshll.u32 %v13962_v37, %v4531_v8 }
 0x40d   : > { %v4454_v38 = vadd.s32 %v4453_v57, %v4444_v51  ;;  %v4535_v28 = vshrl.u32 %v13960_v61, %v11792_v29  ;;  %v4537_v63 = vshll.u32 %v13960_v61, %v4531_v8  ;;  %v4538_v50 = vshrl.u32 %v13961_v46, %v11792_v29 }
 0x40e   : > { %v4540_v47 = vshll.u32 %v13961_v46, %v4531_v8  ;;  %v4541_v41 = vshrl.u32 %v13962_v37, %v11792_v29  ;;  %v4544_v44 = vshrl.u32 %v13905_v45, %v11792_v29  ;;  %v4546_v13 = vshll.u32 %v13905_v45, %v4531_v8 }
 0x40f   : > { %v11813_v35 = vmul.f32 %v11765_v25, %v11765_v25  ;;  %v11815_v32 = vadd.s32 %v4431_v18, %v4422_v60  ;;  %v11817_v39 = vadd.s32 %v4447_v12, %v4443_v30  ;;  %v4547_v36 = vshrl.u32 %v13907_v0, %v11792_v29 }
 0x410   : > { %v4165_v20 = vor.u32 %v4164_v31, %v4163_v62  ;;  %v4169_v43 = vor.u32 4788187, %v4168_v4  ;;  %v4401_v58 = vsel %vm4395_vm0, %v4398_v11, %v4400_v22  ;;  %v4545_v51 = vor.u32 %v4544_v44, %v4543_v1 }
 0x411   : > { %v4312_v8 = vsel %vm4310_vm2, %v4311_v54, %v11775_v16  ;;  %v4525_v57 = vor.u32 8388608, %v4524_v55  ;;  %v11826_v14 = vor.u32 %v4535_v28, %v4534_v59  ;;  %v11828_v60 = vor.u32 %v4538_v50, %v4537_v63 }
 0x412   : > { %v4458_v30 = vadd.s32 1, %v4454_v38  ;;  %v11830_v12 = vor.u32 %v4541_v41, %v4540_v47  ;;  %v4548_v18 = vor.u32 %v4547_v36, %v4546_v13  ;;  %vm4549_vm3 = vcmp.lt.s32.totalorder %v11796_v52, 1 }
 0x413   : > { %v4026_v62 = vmul.f32 -0.001358992, %v11813_v35  ;;  %vm4457_vm4 = vc.u32 %v11815_v32, %v11817_v39  ;;  %vm4551_vm10 = vcmp.lt.s32.totalorder %v11796_v52, 3  ;;  %vm4552_vm14 = vcmp.lt.s32.totalorder %v11796_v52, 4 }
 0x414   : > { %v4033_v17 = vmul.f32 -0.00019511016, %v11813_v35  ;;  %v4172_v31 = vcvt.s32.f32 %v4165_v20  ;;  %v4313_v4 = vclz %v4312_v8  ;;  %v4558_v11 = vsel %vm4552_vm14, %v4545_v51, 920167782 }
 0x415   : > { %v4170_v22 = vand.u32 2147483647, %v4169_v43  ;;  %v4455_v54 = vmul.u32 %v11678_v9, %v4401_v58  ;;  %vm4550_vm0 = vcmp.lt.s32.totalorder %v11796_v52, 2  ;;  %v4557_v55 = vsel %vm4549_vm3, %v11826_v14, %v11828_v60 }
 0x416   : > { %v4459_v59 = vsel %vm4457_vm4, %v4458_v30, %v4454_v38  ;;  %v4559_v1 = vsel %vm4551_vm10, %v11830_v12, %v4558_v11  ;;  %v4562_v28 = vsel %vm4552_vm14, %v4548_v18, 1326507024  ;;  %v11852_v63 = vshll.u32 %v4525_v57, 8  ;;  %v13985_v18 = vld [vmem:[#allocation22_spill] sm:$0xff] }
 0x417   : > { %vm3889_vm6 = vcmp.eq.s32.totalorder %v11734_v53, 0  ;;  %vm3892_vm5 = vcmp.eq.s32.totalorder %v11734_v53, 2  ;;  %v3893_v9 = vxor.u32 2147483648, %v11744_v33  ;;  %v4561_v38 = vsel %vm4549_vm3, %v11828_v60, %v11830_v12 }
 0x418   : > { %v4034_v50 = vadd.f32 0.008332121, %v4033_v17  ;;  %v6043_v47 = vadd.s32 4294967294, %v4313_v4  ;;  %v4560_v41 = vsel %vm4550_vm0, %v4557_v55, %v4559_v1  ;;  %v4563_v44 = vsel %vm4551_vm10, %v4545_v51, %v4562_v28 }
 0x419   : > { %v3890_v13 = vxor.u32 2147483648, %v11751_v2  ;;  %v4024_v36 = vsel %vm11722_vm1, 0, %v11756_v56  ;;  %v4027_v20 = vadd.f32 0.041655596, %v4026_v62  ;;  %v4460_v43 = vadd.s32 %v4459_v59, %v4455_v54 }
 0x41a   : > { %v4173_v58 = vmul.f32 %v4172_v31, %v4170_v22  ;;  %v4564_v8 = vsel %vm4550_vm0, %v4561_v38, %v4563_v44  ;;  %v4566_v57 = vand.u32 65535, %v11852_v63  ;;  %v4567_v30 = vshrl.u32 %v11852_v63, 16 }
 0x41b   : > { %vm3888_vm9 = vcmp.lt.s32.totalorder %v11734_v53, 2  ;;  %v3894_v51 = vsel %vm3892_vm5, %v3893_v9, %v11751_v2  ;;  %vm4054_vm12 = vcmp.lt.s32.totalorder %v13985_v18, 0  ;;  %v4591_v7 = vshrl.u32 %v4560_v41, 16 }
 0x41c   : > { %v4035_v56 = vmul.f32 %v4034_v50, %v11813_v35  ;;  %vm6044_vm1 = vcmp.lt.s32.totalorder %v6043_v47, 0  ;;  %v4568_v62 = vand.u32 65535, %v4564_v8  ;;  %v4569_v17 = vshrl.u32 %v4564_v8, 16 }
 0x41d   : > { %v3891_v31 = vsel %vm3889_vm6, %v11744_v33, %v3890_v13  ;;  %v4028_v4 = vmul.f32 %v4027_v20, %v11813_v35  ;;  %v4041_v11 = vadd.s32 3, %v4024_v36  ;;  %v4461_v22 = vadd.s32 536870912, %v4460_v43 }
 0x41e   : > { %v4174_v54 = vxor.u32 2147483648, %v4173_v58  ;;  %v4570_v55 = vmul.u32 %v4568_v62, %v4566_v57  ;;  %v4571_v59 = vmul.u32 %v4569_v17, %v4566_v57  ;;  %v11883_v2 = vmul.u32 %v4568_v62, %v4567_v30 }
 0x41f   : > { %v13986_v1 = vand.u32 2147483647, %v13985_v18  ;;  %v11891_v9 = vsel %vm6044_vm1, 0, %v6043_v47  ;;  %v4590_v38 = vand.u32 65535, %v4560_v41  ;;  %v11893_v50 = vmul.u32 %v4591_v7, %v4566_v57 }
 0x420   : > { %v11897_v33 = vsel %vm3888_vm9, %v3891_v31, %v3894_v51  ;;  %v4036_v44 = vadd.f32 -0.16666654, %v4035_v56  ;;  %v4176_v13 = vsub.s32 4, %v11590_v15  ;;  %v4574_v36 = vshll.u32 %v4571_v59, 16 }
 0x421   : > { %vm11887_vm7 = vcmp.le.f32.partialorder %v13986_v1, 0.7853982  ;;  %v4029_v20 = vadd.f32 -0.4999988, %v4028_v4  ;;  %v11900_v8 = vand.u32 3, %v4041_v11  ;;  %v11902_v62 = vshrl.u32 %v4461_v22, 30 }
 0x422   : > { %v4573_v1 = vmul.u32 %v4569_v17, %v4567_v30  ;;  %v4175_v47 = vsel %vm4054_vm12, %v4174_v54, %v4173_v58  ;;  %v4321_v41 = vsub.s32 4294967266, %v11891_v9  ;;  %v4576_v42 = vshll.u32 %v11883_v2, 16 }
 0x423   : > { %vm4578_vm11 = vc.u32 %v4570_v55, %v4574_v36  ;;  %v4592_v51 = vmul.u32 %v4590_v38, %v4566_v57  ;;  %v4594_v56 = vmul.u32 %v4590_v38, %v4567_v30  ;;  %v4596_v31 = vshll.u32 %v11893_v50, 16 }
 0x424   : > { %v4579_v53 = vsel %vm4578_vm11, 1, %v13869_v10  ;;  %v4037_v4 = vmul.f32 %v4036_v44, %v11813_v35  ;;  %v11914_v17 = vsel %vm4054_vm12, %v4176_v13, %v11590_v15  ;;  %v4301_v58 = vadd.s32 %v11649_v34, %v11647_v49 }
 0x425   : > { %v4580_v11 = vadd.s32 %v4574_v36, %v4570_v55  ;;  %v4463_v22 = vshll.u32 %v11902_v62, 30  ;;  %v4581_v54 = vadd.s32 %v4579_v53, %v4573_v1  ;;  %v4595_v27 = vmul.u32 %v4591_v7, %v4567_v30 }
 0x426   : > { %v4675_v57 = vand.u32 2139095040, %v13989_v19  ;;  %v11923_v38 = vsel %vm11887_vm7, %v13985_v18, %v4175_v47  ;;  %v4317_v44 = vsub.s32 32, %v11891_v9  ;;  %v4575_v23 = vshrl.u32 %v4571_v59, 16 }
 0x427   : > { %vm4582_vm13 = vc.u32 %v4580_v11, %v4576_v42  ;;  %v4322_v15 = vadd.s32 127, %v4321_v41  ;;  %v4598_v49 = vshll.u32 %v4594_v56, 16  ;;  %vm4600_vm8 = vc.u32 %v4592_v51, %v4596_v31 }
 0x428   : > { %v4583_v13 = vsel %vm4582_vm13, 1, %v13869_v10  ;;  %v4533_v34 = vshrl.u32 %v13629_v26, %v11792_v29  ;;  %v4554_v30 = vsel %vm4552_vm14, %v11830_v12, 2102212464  ;;  %v4601_v55 = vsel %vm4600_vm8, 1, %v13869_v10 }
 0x429   : > { %v4585_v7 = vadd.s32 %v4583_v13, %v4581_v54  ;;  %v11933_v36 = vsub.s32 %v4460_v43, %v4463_v22  ;;  %v4602_v1 = vadd.s32 %v4596_v31, %v4592_v51  ;;  %v4603_v59 = vadd.s32 %v4601_v55, %v4595_v27 }
 0x42a   : > { %v4676_v42 = vshrl.u32 %v4675_v57, 23  ;;  %v11937_v47 = vmul.f32 %v11923_v38, %v11923_v38  ;;  %v4318_v41 = vshll.u32 %v11775_v16, %v11891_v9  ;;  %v4577_v29 = vshrl.u32 %v11883_v2, 16 }
 0x42b   : > { %v4586_v53 = vadd.s32 %v4585_v7, %v4575_v23  ;;  %v4319_v11 = vshrl.u32 %v4301_v58, %v4317_v44  ;;  %v4597_v12 = vshrl.u32 %v11893_v50, 16  ;;  %vm4604_vm15 = vc.u32 %v4602_v1, %v4598_v49 }
 0x42c   : > { %v6051_v54 = vadd.s32 4294967169, %v4676_v42  ;;  %v4323_v43 = vshll.u32 %v4322_v15, 23  ;;  %v4553_v27 = vsel %vm4549_vm3, %v4533_v34, %v11826_v14  ;;  %v4555_v51 = vsel %vm4551_vm10, %v11828_v60, %v4554_v30 }
 0x42d   : > { %v4605_v31 = vsel %vm4604_vm15, 1, %v13869_v10  ;;  %v4466_v16 = vsub.s32 0, %v11933_v36  ;;  %v4599_v2 = vshrl.u32 %v4594_v56, 16  ;;  %v4030_v50 = vmul.f32 %v4029_v20, %v11813_v35 }
 0x42e   : > { %v4607_v23 = vadd.s32 %v4605_v31, %v4603_v59  ;;  %v4682_v9 = vadd.s32 1, %v6051_v54  ;;  %vm4465_vm2 = vcmp.lt.s32.totalorder %v11933_v36, 0  ;;  %v11953_v58 = vadd.s32 %v4586_v53, %v4577_v29 }
 0x42f   : > { %v11955_v22 = vadd.s32 %v4602_v1, %v4598_v49  ;;  %v4038_v14 = vadd.f32 1.0, %v4037_v4  ;;  %v4181_v57 = vmul.f32 -0.001358992, %v11937_v47  ;;  %v4320_v60 = vor.u32 %v4319_v11, %v4318_v41 }
 0x430   : > { %v4608_v44 = vadd.s32 %v4607_v23, %v4597_v12  ;;  %vm4683_vm3 = vcmp.gt.s32.totalorder %v4682_v9, 0  ;;  %v4324_v15 = vor.u32 4788187, %v4323_v43  ;;  %v4556_v56 = vsel %vm4550_vm0, %v4553_v27, %v4555_v51 }
 0x431   : > { %v4684_v13 = vsel %vm4683_vm3, %v4682_v9, 0  ;;  %v4467_v34 = vsel %vm4465_vm2, %v4466_v16, %v11933_v36  ;;  %v13540_v20 = vand.u32 2147483647, %v13989_v19  ;;  %v4031_v7 = vadd.f32 1.0, %v4030_v50 }
 0x432   : > { %v4609_v35 = vadd.s32 %v4608_v44, %v4599_v2  ;;  %v4686_v30 = vand.u32 31, %v4684_v13  ;;  %vm4047_vm4 = vcmp.eq.s32.totalorder %v11900_v8, 2  ;;  %v4179_v4 = vsel %vm11887_vm7, 0, %v11914_v17 }
 0x433   : > { %vm4612_vm10 = vc.u32 %v11953_v58, %v11955_v22  ;;  %v4039_v52 = vmul.f32 %v4038_v14, %v11765_v25  ;;  %v4610_v49 = vmul.u32 %v11852_v63, %v4556_v56  ;;  %v4182_v59 = vadd.f32 0.041655596, %v4181_v57 }
 0x434   : > { %v4613_v55 = vadd.s32 1, %v4609_v35  ;;  %v11970_v1 = vsub.s32 32, %v4686_v30  ;;  %v4188_v42 = vmul.f32 -0.00019511016, %v11937_v47  ;;  %v4327_v41 = vcvt.s32.f32 %v4320_v60 }
 0x435   : > { %v4468_v29 = vclz %v4467_v34  ;;  %vm4044_vm14 = vcmp.eq.s32.totalorder %v11900_v8, 0  ;;  %v4325_v53 = vand.u32 2147483647, %v4324_v15  ;;  %v4679_v17 = vand.u32 8388607, %v13540_v20 }
 0x436   : > { %v4614_v28 = vsel %vm4612_vm10, %v4613_v55, %v4609_v35  ;;  %v4689_v11 = vshll.u32 %v13629_v26, %v4686_v30  ;;  %vm4209_vm0 = vcmp.lt.s32.totalorder %v10931_v48, 0  ;;  %v4690_v25 = vshrl.u32 %v13960_v61, %v11970_v1 }
 0x437   : > { %v4692_v63 = vshll.u32 %v13960_v61, %v4686_v30  ;;  %v4693_v12 = vshrl.u32 %v13961_v46, %v11970_v1  ;;  %v4698_v54 = vshll.u32 %v13962_v37, %v4686_v30  ;;  %v11984_v43 = vadd.s32 %v4614_v28, %v4610_v49 }
 0x438   : > { %v11986_v27 = vshrl.u32 %v4684_v13, 5  ;;  %v4695_v51 = vshll.u32 %v13961_v46, %v4686_v30  ;;  %v4696_v31 = vshrl.u32 %v13962_v37, %v11970_v1  ;;  %v4048_v16 = vxor.u32 2147483648, %v4031_v7 }
 0x439   : > { %v4189_v2 = vadd.f32 0.008332121, %v4188_v42  ;;  %v6046_v23 = vadd.s32 4294967294, %v4468_v29  ;;  %v4699_v9 = vshrl.u32 %v13905_v45, %v11970_v1  ;;  %v4183_v50 = vmul.f32 %v4182_v59, %v11937_v47 }
 0x43a   : > { %v4328_v14 = vmul.f32 %v4327_v41, %v4325_v53  ;;  %v4701_v57 = vshll.u32 %v13905_v45, %v4686_v30  ;;  %v4702_v44 = vshrl.u32 %v13907_v0, %v11970_v1  ;;  %vm3885_vm6 = vweird.f32 %v13968_v24 }
 0x43b   : > { %v13990_v60 = vand.u32 2147483647, %v10931_v48  ;;  %v4680_v56 = vor.u32 8388608, %v4679_v17  ;;  %v12004_v13 = vor.u32 %v4690_v25, %v4689_v11  ;;  %v12006_v34 = vor.u32 %v4693_v12, %v4692_v63 }
 0x43c   : > { %v4700_v35 = vor.u32 %v4699_v9, %v4698_v54  ;;  %v4616_v49 = vadd.s32 536870912, %v11984_v43  ;;  %v12009_v30 = vor.u32 %v4696_v31, %v4695_v51  ;;  %vm4704_vm9 = vcmp.lt.s32.totalorder %v11986_v27, 1  ;;  %v13993_v9 = vld [vmem:[#allocation28_spill] sm:$0xff] }
 0x43d   : > { %vm12000_vm5 = vcmp.le.f32.partialorder %v13990_v60, 0.7853982  ;;  %vm4707_vm12 = vcmp.lt.s32.totalorder %v11986_v27, 4  ;;  %vm4043_vm1 = vcmp.lt.s32.totalorder %v11900_v8, 2  ;;  %v4045_v55 = vxor.u32 2147483648, %v4039_v52 }
 0x43e   : > { %v4190_v59 = vmul.f32 %v4189_v2, %v11937_v47  ;;  %vm6047_vm7 = vcmp.lt.s32.totalorder %v6046_v23, 0  ;;  %vm4706_vm11 = vcmp.lt.s32.totalorder %v11986_v27, 3  ;;  %v4049_v42 = vsel %vm4047_vm4, %v4048_v16, %v4039_v52 }
 0x43f   : > { %v4329_v41 = vxor.u32 2147483648, %v4328_v14  ;;  %v4703_v29 = vor.u32 %v4702_v44, %v4701_v57  ;;  %v4713_v53 = vsel %vm4707_vm12, %v4700_v35, 920167782  ;;  %v4196_v28 = vadd.s32 3, %v4179_v4 }
 0x440   : > { %vm4705_vm13 = vcmp.lt.s32.totalorder %v11986_v27, 2  ;;  %v4712_v17 = vsel %vm4704_vm9, %v12004_v13, %v12006_v34  ;;  %v12025_v11 = vshll.u32 %v4680_v56, 8  ;;  %v4184_v25 = vadd.f32 -0.4999988, %v4183_v50 }
 0x441   : > { %v4471_v63 = vsel %vm6047_vm7, 0, %v6046_v23  ;;  %v12027_v12 = vshrl.u32 %v4616_v49, 30  ;;  %v4714_v52 = vsel %vm4706_vm11, %v12009_v30, %v4713_v53  ;;  %v4046_v4 = vsel %vm4044_vm14, %v4031_v7, %v4045_v55 }
 0x442   : > { %v4191_v54 = vadd.f32 -0.16666654, %v4190_v59  ;;  %v4456_v51 = vadd.s32 %v11817_v39, %v11815_v32  ;;  %v4716_v31 = vsel %vm4704_vm9, %v12006_v34, %v12009_v30  ;;  %v4330_v16 = vsel %vm4209_vm0, %v4329_v41, %v4328_v14 }
 0x443   : > { %v4715_v2 = vsel %vm4705_vm13, %v4712_v17, %v4714_v52  ;;  %v4717_v23 = vsel %vm4707_vm12, %v4703_v29, 1326507024  ;;  %v4830_v7 = vand.u32 2139095040, %v13993_v9  ;;  %v4472_v50 = vsub.s32 32, %v4471_v63 }
 0x444   : > { %v4476_v57 = vsub.s32 4294967266, %v4471_v63  ;;  %v4718_v32 = vsel %vm4706_vm11, %v4700_v35, %v4717_v23  ;;  %v4721_v39 = vand.u32 65535, %v12025_v11  ;;  %v4185_v44 = vmul.f32 %v4184_v25, %v11937_v47 }
 0x445   : > { %v4618_v60 = vshll.u32 %v12027_v12, 30  ;;  %v4719_v14 = vsel %vm4705_vm13, %v4716_v31, %v4718_v32  ;;  %v4722_v56 = vshrl.u32 %v12025_v11, 16  ;;  %v4192_v49 = vmul.f32 %v4191_v54, %v11937_v47 }
 0x446   : > { %v4723_v55 = vand.u32 65535, %v4719_v14  ;;  %v4724_v59 = vshrl.u32 %v4719_v14, 16  ;;  %v4746_v41 = vshrl.u32 %v4715_v2, 16  ;;  %v12059_v35 = vsel %vm3885_vm6, nan, %v11897_v33 }
 0x447   : > { %13994 = vst [vmem:[#allocation17_spill] sm:$0xff] %v12059_v35  ;;  %v12064_v29 = vsel %vm12000_vm5, %v10931_v48, %v4330_v16  ;;  %v4473_v53 = vshll.u32 %v11933_v36, %v4471_v63  ;;  %v4831_v17 = vshrl.u32 %v4830_v7, 23  ;;  %v4474_v25 = vshrl.u32 %v4456_v51, %v4472_v50 }
 0x448   : > { %v4477_v52 = vadd.s32 127, %v4476_v57  ;;  %v4726_v31 = vmul.u32 %v4724_v59, %v4721_v39  ;;  %v4745_v47 = vand.u32 65535, %v4715_v2  ;;  %v12069_v54 = vsel %vm4043_vm1, %v4046_v4, %v4049_v42 }
 0x449   : > { %v12071_v23 = vand.u32 3, %v4196_v28  ;;  %v12074_v24 = vsub.s32 %v11984_v43, %v4618_v60  ;;  %v4727_v33 = vmul.u32 %v4723_v55, %v4722_v56  ;;  %v12076_v32 = vadd.f32 1.0, %v4185_v44 }
 0x44a   : > { %v4193_v16 = vadd.f32 1.0, %v4192_v49  ;;  %v4725_v14 = vmul.u32 %v4723_v55, %v4721_v39  ;;  %v4748_v36 = vmul.u32 %v4746_v41, %v4721_v39  ;;  %v12080_v63 = vmul.f32 %v12064_v29, %v12064_v29 }
 0x44b   : > { %v4688_v8 = vshrl.u32 %v13629_v26, %v11970_v1  ;;  %v4729_v42 = vshll.u32 %v4726_v31, 16  ;;  %v6054_v4 = vadd.s32 4294967169, %v4831_v17  ;;  %v12084_v28 = vor.u32 %v4474_v25, %v4473_v53 }
 0x44c   : > { %v4478_v51 = vshll.u32 %v4477_v52, 23  ;;  %v4728_v43 = vmul.u32 %v4724_v59, %v4722_v56  ;;  %v4749_v2 = vmul.u32 %v4745_v47, %v4722_v56  ;;  %v4621_v7 = vsub.s32 0, %v12074_v24 }
 0x44d   : > { %v4709_v50 = vsel %vm4707_vm12, %v12009_v30, 2102212464  ;;  %v4731_v57 = vshll.u32 %v4727_v33, 16  ;;  %v4747_v44 = vmul.u32 %v4745_v47, %v4721_v39  ;;  %vm4620_vm8 = vcmp.lt.s32.totalorder %v12074_v24, 0 }
 0x44e   : > { %vm4733_vm15 = vc.u32 %v4725_v14, %v4729_v42  ;;  %v4735_v60 = vadd.s32 %v4729_v42, %v4725_v14  ;;  %v4751_v1 = vshll.u32 %v4748_v36, 16  ;;  %v4708_v49 = vsel %vm4704_vm9, %v4688_v8, %v12004_v13 }
 0x44f   : > { %v4734_v55 = vsel %vm4733_vm15, 1, %v13869_v10  ;;  %v4750_v59 = vmul.u32 %v4746_v41, %v4722_v56  ;;  %v4837_v53 = vadd.s32 1, %v6054_v4  ;;  %v4730_v17 = vshrl.u32 %v4726_v31, 16 }
 0x450   : > { %v4736_v25 = vadd.s32 %v4734_v55, %v4728_v43  ;;  %vm4737_vm2 = vc.u32 %v4735_v60, %v4731_v57  ;;  %v4753_v52 = vshll.u32 %v4749_v2, 16  ;;  %v4622_v30 = vsel %vm4620_vm8, %v4621_v7, %v12074_v24 }
 0x451   : > { %v4710_v39 = vsel %vm4706_vm11, %v12006_v34, %v4709_v50  ;;  %v4738_v47 = vsel %vm4737_vm2, 1, %v13869_v10  ;;  %vm4755_vm3 = vc.u32 %v4747_v44, %v4751_v1  ;;  %v4732_v14 = vshrl.u32 %v4727_v33, 16 }
 0x452   : > { %v4740_v42 = vadd.s32 %v4738_v47, %v4736_v25  ;;  %v4756_v13 = vsel %vm4755_vm3, 1, %v13869_v10  ;;  %v4757_v8 = vadd.s32 %v4751_v1, %v4747_v44  ;;  %v4479_v56 = vor.u32 4788187, %v4478_v51 }
 0x453   : > { %v4758_v41 = vadd.s32 %v4756_v13, %v4750_v59  ;;  %v13539_v31 = vand.u32 2147483647, %v13993_v9  ;;  %vm4838_vm4 = vcmp.gt.s32.totalorder %v4837_v53, 0  ;;  %v4752_v43 = vshrl.u32 %v4748_v36, 16 }
 0x454   : > { %v4741_v4 = vadd.s32 %v4740_v42, %v4730_v17  ;;  %vm4759_vm10 = vc.u32 %v4757_v8, %v4753_v52  ;;  %v4839_v7 = vsel %vm4838_vm4, %v4837_v53, 0  ;;  %v4623_v57 = vclz %v4622_v30 }
 0x455   : > { %v4711_v34 = vsel %vm4705_vm13, %v4708_v49, %v4710_v39  ;;  %v4760_v50 = vsel %vm4759_vm10, 1, %v13869_v10  ;;  %v4841_v33 = vand.u32 31, %v4839_v7  ;;  %v4754_v55 = vshrl.u32 %v4749_v2, 16 }
 0x456   : > { %v12105_v60 = vadd.s32 %v4741_v4, %v4732_v14  ;;  %v12107_v44 = vadd.s32 %v4757_v8, %v4753_v52  ;;  %v4762_v51 = vadd.s32 %v4760_v50, %v4758_v41  ;;  %v4194_v1 = vmul.f32 %v4193_v16, %v11923_v38 }
 0x457   : > { %v4203_v59 = vxor.u32 2147483648, %v12076_v32  ;;  %v4331_v36 = vsub.s32 4, %v11736_v5  ;;  %v12112_v53 = vsub.s32 32, %v4841_v33  ;;  %v4336_v27 = vmul.f32 -0.001358992, %v12080_v63 }
 0x458   : > { %v4343_v49 = vmul.f32 -0.00019511016, %v12080_v63  ;;  %v4482_v17 = vcvt.s32.f32 %v12084_v28  ;;  %v4763_v25 = vadd.s32 %v4762_v51, %v4752_v43  ;;  %vm4199_vm14 = vcmp.eq.s32.totalorder %v12071_v23, 0 }
 0x459   : > { %vm4202_vm6 = vcmp.eq.s32.totalorder %v12071_v23, 2  ;;  %v4480_v2 = vand.u32 2147483647, %v4479_v56  ;;  %v6049_v52 = vadd.s32 4294967294, %v4623_v57  ;;  %v4765_v38 = vmul.u32 %v12025_v11, %v4711_v34 }
 0x45a   : > { %v4834_v16 = vand.u32 8388607, %v13539_v31  ;;  %v4764_v30 = vadd.s32 %v4763_v25, %v4754_v55  ;;  %vm4767_vm9 = vc.u32 %v12105_v60, %v12107_v44  ;;  %v4847_v39 = vshll.u32 %v13960_v61, %v4841_v33 }
 0x45b   : > { %v4853_v28 = vshll.u32 %v13962_v37, %v4841_v33  ;;  %v4848_v47 = vshrl.u32 %v13961_v46, %v12112_v53  ;;  %v4850_v14 = vshll.u32 %v13961_v46, %v4841_v33  ;;  %v4851_v42 = vshrl.u32 %v13962_v37, %v12112_v53 }
 0x45c   : > { %v4854_v11 = vshrl.u32 %v13905_v45, %v12112_v53  ;;  %vm4040_vm12 = vweird.f32 %v13978_v21  ;;  %v4768_v13 = vadd.s32 1, %v4764_v30  ;;  %v12134_v8 = vshrl.u32 %v4839_v7, 5 }
 0x45d   : > { %v4856_v56 = vshll.u32 %v13905_v45, %v4841_v33  ;;  %v4857_v41 = vshrl.u32 %v13907_v0, %v12112_v53  ;;  %vm4198_vm1 = vcmp.lt.s32.totalorder %v12071_v23, 2  ;;  %v4200_v4 = vxor.u32 2147483648, %v4194_v1 }
 0x45e   : > { %v4483_v43 = vmul.f32 %v4482_v17, %v4480_v2  ;;  %v4844_v57 = vshll.u32 %v13629_v26, %v4841_v33  ;;  %v4845_v34 = vshrl.u32 %v13960_v61, %v12112_v53  ;;  %v13995_v50 = vand.u32 2147483647, %v13972_v40 }
 0x45f   : > { %v4769_v7 = vsel %vm4767_vm9, %v4768_v13, %v4764_v30  ;;  %v4835_v51 = vor.u32 8388608, %v4834_v16  ;;  %v4855_v25 = vor.u32 %v4854_v11, %v4853_v28  ;;  %v4858_v31 = vor.u32 %v4857_v41, %v4856_v56 }
 0x460   : > { %vm12145_vm7 = vcmp.le.f32.partialorder %v13995_v50, 0.7853982  ;;  %v4337_v20 = vadd.f32 0.041655596, %v4336_v27  ;;  %v4770_v17 = vadd.s32 %v4769_v7, %v4765_v38  ;;  %v12152_v2 = vor.u32 %v4848_v47, %v4847_v39 }
 0x461   : > { %v12154_v33 = vor.u32 %v4851_v42, %v4850_v14  ;;  %v4344_v35 = vadd.f32 0.008332121, %v4343_v49  ;;  %vm6050_vm11 = vcmp.lt.s32.totalorder %v6049_v52, 0  ;;  %vm4859_vm13 = vcmp.lt.s32.totalorder %v12134_v8, 1 }
 0x462   : > { %vm4862_vm8 = vcmp.lt.s32.totalorder %v12134_v8, 4  ;;  %v4484_v50 = vxor.u32 2147483648, %v4483_v43  ;;  %v4771_v6 = vadd.s32 536870912, %v4770_v17  ;;  %v12158_v9 = vor.u32 %v4845_v34, %v4844_v57 }
 0x463   : > { %vm4861_vm15 = vcmp.lt.s32.totalorder %v12134_v8, 3  ;;  %vm4364_vm2 = vcmp.lt.s32.totalorder %v13972_v40, 0  ;;  %v4868_v27 = vsel %vm4862_vm8, %v4855_v25, 920167782  ;;  %v4872_v38 = vsel %vm4862_vm8, %v4858_v31, 1326507024 }
 0x464   : > { %v12166_v49 = vshll.u32 %v4835_v51, 8  ;;  %v4626_v16 = vsel %vm6050_vm11, 0, %v6049_v52  ;;  %v12168_v30 = vshrl.u32 %v4771_v6, 30  ;;  %vm4860_vm3 = vcmp.lt.s32.totalorder %v12134_v8, 2 }
 0x465   : > { %v4871_v39 = vsel %vm4859_vm13, %v12152_v2, %v12154_v33  ;;  %v4201_v28 = vsel %vm4199_vm14, %v12076_v32, %v4200_v4  ;;  %v4204_v47 = vsel %vm4202_vm6, %v4203_v59, %v4194_v1  ;;  %v4332_v31 = vsel %vm4209_vm0, %v4331_v36, %v11736_v5 }
 0x466   : > { %v4873_v6 = vsel %vm4861_vm15, %v4855_v25, %v4872_v38  ;;  %v4485_v52 = vsel %vm4364_vm2, %v4484_v50, %v4483_v43  ;;  %v4773_v14 = vshll.u32 %v12168_v30, 30  ;;  %v4867_v32 = vsel %vm4859_vm13, %v12158_v9, %v12152_v2 }
 0x467   : > { %v4869_v1 = vsel %vm4861_vm15, %v12154_v33, %v4868_v27  ;;  %v4631_v59 = vsub.s32 4294967266, %v4626_v16  ;;  %v4874_v5 = vsel %vm4860_vm3, %v4871_v39, %v4873_v6  ;;  %v4876_v36 = vand.u32 65535, %v12166_v49 }
 0x468   : > { %v4877_v42 = vshrl.u32 %v12166_v49, 16  ;;  %v12202_v11 = vsel %vm4040_vm12, nan, %v12069_v54  ;;  %v4334_v13 = vsel %vm12000_vm5, 0, %v4332_v31  ;;  %v4338_v56 = vmul.f32 %v4337_v20, %v12080_v63 }
 0x469   : > { %13998 = vst [vmem:[#allocation18_spill] sm:$0xff] %v12202_v11  ;;  %v4345_v41 = vmul.f32 %v4344_v35, %v12080_v63  ;;  %v12210_v4 = vsel %vm4198_vm1, %v4201_v28, %v4204_v47  ;;  %v4870_v43 = vsel %vm4860_vm3, %v4867_v32, %v4869_v1  ;;  %v4878_v57 = vand.u32 65535, %v4874_v5 }
 0x46a   : > { %v4879_v34 = vshrl.u32 %v4874_v5, 16  ;;  %v12217_v21 = vsel %vm12145_vm7, %v13972_v40, %v4485_v52  ;;  %v4611_v15 = vadd.s32 %v11955_v22, %v11953_v58  ;;  %v4627_v20 = vsub.s32 32, %v4626_v16 }
 0x46b   : > { %v12221_v54 = vsub.s32 %v4770_v17, %v4773_v14  ;;  %v4632_v35 = vadd.s32 127, %v4631_v59  ;;  %v4880_v23 = vmul.u32 %v4878_v57, %v4876_v36  ;;  %v12223_v51 = vmul.u32 %v4878_v57, %v4877_v42 }
 0x46c   : > { %v4881_v7 = vmul.u32 %v4879_v34, %v4876_v36  ;;  %v4339_v25 = vadd.f32 -0.4999988, %v4338_v56  ;;  %v4346_v50 = vadd.f32 -0.16666654, %v4345_v41  ;;  %v4486_v27 = vsub.s32 4, %v11902_v62 }
 0x46d   : > { %v4901_v38 = vshrl.u32 %v4870_v43, 16  ;;  %v12228_v39 = vmul.f32 %v12217_v21, %v12217_v21  ;;  %v4628_v28 = vshll.u32 %v12074_v24, %v4626_v16  ;;  %v4886_v22 = vshll.u32 %v12223_v51, 16 }
 0x46e   : > { %v4884_v58 = vshll.u32 %v4881_v7, 16  ;;  %v4629_v17 = vshrl.u32 %v4611_v15, %v4627_v20  ;;  %v4776_v47 = vsub.s32 0, %v12221_v54  ;;  %v4883_v31 = vmul.u32 %v4879_v34, %v4877_v42 }
 0x46f   : > { %v4900_v6 = vand.u32 65535, %v4870_v43  ;;  %v4633_v52 = vshll.u32 %v4632_v35, 23  ;;  %vm4775_vm0 = vcmp.lt.s32.totalorder %v12221_v54, 0  ;;  %v4340_v32 = vmul.f32 %v4339_v25, %v12080_v63 }
 0x470   : > { %vm4888_vm5 = vc.u32 %v4880_v23, %v4884_v58  ;;  %v4890_v14 = vadd.s32 %v4884_v58, %v4880_v23  ;;  %v4351_v1 = vadd.s32 3, %v4334_v13  ;;  %v4903_v5 = vmul.u32 %v4901_v38, %v4876_v36 }
 0x471   : > { %v4889_v59 = vsel %vm4888_vm5, 1, %v13869_v10  ;;  %v4347_v24 = vmul.f32 %v4346_v50, %v12080_v63  ;;  %v4487_v16 = vsel %vm4364_vm2, %v4486_v27, %v11902_v62  ;;  %v4491_v56 = vmul.f32 -0.001358992, %v12228_v39  ;;  %v13999_v62 = vld [vmem:[#allocation29_spill] sm:$0xff] }
 0x472   : > { %vm4892_vm4 = vc.u32 %v4890_v14, %v4886_v22  ;;  %v4777_v41 = vsel %vm4775_vm0, %v4776_v47, %v12221_v54  ;;  %v4891_v43 = vadd.s32 %v4889_v59, %v4883_v31  ;;  %v4902_v57 = vmul.u32 %v4900_v6, %v4876_v36 }
 0x473   : > { %v4904_v34 = vmul.u32 %v4900_v6, %v4877_v42  ;;  %v4498_v15 = vmul.f32 -0.00019511016, %v12228_v39  ;;  %v4630_v13 = vor.u32 %v4629_v17, %v4628_v28  ;;  %v4634_v20 = vor.u32 4788187, %v4633_v52 }
 0x474   : > { %v4893_v35 = vsel %vm4892_vm4, 1, %v13869_v10  ;;  %v4489_v63 = vsel %vm12145_vm7, 0, %v4487_v16  ;;  %v4905_v23 = vmul.u32 %v4901_v38, %v4877_v42  ;;  %v4906_v25 = vshll.u32 %v4903_v5, 16 }
 0x475   : > { %v4985_v50 = vand.u32 2139095040, %v13999_v62  ;;  %v4348_v27 = vadd.f32 1.0, %v4347_v24  ;;  %v4492_v58 = vadd.f32 0.041655596, %v4491_v56  ;;  %v4778_v22 = vclz %v4777_v41 }
 0x476   : > { %v4885_v47 = vshrl.u32 %v4881_v7, 16  ;;  %v4895_v31 = vadd.s32 %v4893_v35, %v4891_v43  ;;  %v4908_v36 = vshll.u32 %v4904_v34, 16  ;;  %vm4910_vm10 = vc.u32 %v4902_v57, %v4906_v25 }
 0x477   : > { %v4912_v6 = vadd.s32 %v4906_v25, %v4902_v57  ;;  %v4499_v14 = vadd.f32 0.008332121, %v4498_v15  ;;  %v4635_v28 = vand.u32 2147483647, %v4634_v20  ;;  %v4637_v17 = vcvt.s32.f32 %v4630_v13 }
 0x478   : > { %v4911_v52 = vsel %vm4910_vm10, 1, %v13869_v10  ;;  %v4907_v59 = vshrl.u32 %v4903_v5, 16  ;;  %v4986_v42 = vshrl.u32 %v4985_v50, 23  ;;  %v4493_v38 = vmul.f32 %v4492_v58, %v12228_v39 }
 0x479   : > { %v4913_v55 = vadd.s32 %v4911_v52, %v4905_v23  ;;  %vm4914_vm14 = vc.u32 %v4912_v6, %v4908_v36  ;;  %v6052_v16 = vadd.s32 4294967294, %v4778_v22  ;;  %v4887_v24 = vshrl.u32 %v12223_v51, 16 }
 0x47a   : > { %v4915_v7 = vsel %vm4914_vm14, 1, %v13869_v10  ;;  %v4896_v56 = vadd.s32 %v4895_v31, %v4885_v47  ;;  %v4909_v41 = vshrl.u32 %v4904_v34, 16  ;;  %v6057_v57 = vadd.s32 4294967169, %v4986_v42 }
 0x47b   : > { %v4917_v43 = vadd.s32 %v4915_v7, %v4913_v55  ;;  %v12251_v15 = vadd.f32 1.0, %v4340_v32  ;;  %v12253_v13 = vand.u32 3, %v4351_v1  ;;  %v4500_v5 = vmul.f32 %v4499_v14, %v12228_v39 }
 0x47c   : > { %v4843_v20 = vshrl.u32 %v13629_v26, %v12112_v53  ;;  %v4638_v35 = vmul.f32 %v4637_v17, %v4635_v28  ;;  %v4864_v51 = vsel %vm4862_vm8, %v12154_v33, 2102212464  ;;  %v4992_v25 = vadd.s32 1, %v6057_v57 }
 0x47d   : > { %v4918_v23 = vadd.s32 %v4917_v43, %v4907_v59  ;;  %v12262_v34 = vmul.f32 %v4348_v27, %v12064_v29  ;;  %v4494_v50 = vadd.f32 -0.4999988, %v4493_v38  ;;  %v4506_v32 = vadd.s32 3, %v4489_v63 }
 0x47e   : > { %vm6053_vm6 = vcmp.lt.s32.totalorder %v6052_v16, 0  ;;  %v12264_v1 = vadd.s32 %v4896_v56, %v4887_v24  ;;  %v12266_v58 = vadd.s32 %v4912_v6, %v4908_v36  ;;  %vm4993_vm9 = vcmp.gt.s32.totalorder %v4992_v25, 0 }
 0x47f   : > { %v4919_v22 = vadd.s32 %v4918_v23, %v4909_v41  ;;  %v4501_v53 = vadd.f32 -0.16666654, %v4500_v5  ;;  %v4863_v47 = vsel %vm4859_vm13, %v4843_v20, %v12158_v9  ;;  %v4865_v33 = vsel %vm4861_vm15, %v12152_v2, %v4864_v51 }
 0x480   : > { %v4994_v29 = vsel %vm4993_vm9, %v4992_v25, 0  ;;  %v4639_v27 = vxor.u32 2147483648, %v4638_v35  ;;  %v4641_v63 = vsub.s32 4, %v12027_v12  ;;  %v13543_v31 = vand.u32 2147483647, %v13999_v62 }
 0x481   : > { %v4996_v14 = vand.u32 31, %v4994_v29  ;;  %v14000_v36 = vand.u32 2147483647, %v13983_v3  ;;  %vm4519_vm1 = vcmp.lt.s32.totalorder %v13983_v3, 0  ;;  %v4781_v9 = vsel %vm6053_vm6, 0, %v6052_v16 }
 0x482   : > { %v4923_v28 = vadd.s32 1, %v4919_v22  ;;  %v4358_v17 = vxor.u32 2147483648, %v12251_v15  ;;  %v4866_v2 = vsel %vm4860_vm3, %v4863_v47, %v4865_v33  ;;  %vm4922_vm7 = vc.u32 %v12264_v1, %v12266_v58 }
 0x483   : > { %vm12278_vm12 = vcmp.le.f32.partialorder %v14000_v36, 0.7853982  ;;  %v12288_v52 = vsub.s32 32, %v4996_v14  ;;  %v4355_v59 = vxor.u32 2147483648, %v12262_v34  ;;  %v4495_v55 = vmul.f32 %v4494_v50, %v12228_v39 }
 0x484   : > { %v4502_v42 = vmul.f32 %v4501_v53, %v12228_v39  ;;  %v12293_v38 = vand.u32 3, %v4506_v32  ;;  %v4640_v16 = vsel %vm4519_vm1, %v4639_v27, %v4638_v35  ;;  %v12296_v24 = vsel %vm4519_vm1, %v4641_v63, %v12027_v12 }
 0x485   : > { %v4786_v7 = vsub.s32 4294967266, %v4781_v9  ;;  %v4989_v8 = vand.u32 8388607, %v13543_v31  ;;  %v4766_v56 = vadd.s32 %v12107_v44, %v12105_v60  ;;  %v4920_v41 = vmul.u32 %v12166_v49, %v4866_v2 }
 0x486   : > { %v4924_v43 = vsel %vm4922_vm7, %v4923_v28, %v4919_v22  ;;  %v5002_v57 = vshll.u32 %v13960_v61, %v4996_v14  ;;  %v5003_v39 = vshrl.u32 %v13961_v46, %v12288_v52  ;;  %v5005_v5 = vshll.u32 %v13961_v46, %v4996_v14 }
 0x487   : > { %v5006_v12 = vshrl.u32 %v13962_v37, %v12288_v52  ;;  %v5008_v20 = vshll.u32 %v13962_v37, %v4996_v14  ;;  %v12313_v35 = vsel %vm12278_vm12, %v13983_v3, %v4640_v16  ;;  %v4782_v60 = vsub.s32 32, %v4781_v9 }
 0x488   : > { %v12315_v44 = vshrl.u32 %v4994_v29, 5  ;;  %v5009_v49 = vshrl.u32 %v13905_v45, %v12288_v52  ;;  %v4787_v51 = vadd.s32 127, %v4786_v7  ;;  %v4990_v23 = vor.u32 8388608, %v4989_v8 }
 0x489   : > { %v5011_v25 = vshll.u32 %v13905_v45, %v4996_v14  ;;  %v5012_v50 = vshrl.u32 %v13907_v0, %v12288_v52  ;;  %v4644_v32 = vsel %vm12278_vm12, 0, %v12296_v24  ;;  %v12325_v22 = vadd.s32 %v4924_v43, %v4920_v41 }
 0x48a   : > { %v4999_v53 = vshll.u32 %v13629_v26, %v4996_v14  ;;  %v5000_v47 = vshrl.u32 %v13960_v61, %v12288_v52  ;;  %v12330_v33 = vor.u32 %v5003_v39, %v5002_v57  ;;  %v12332_v29 = vor.u32 %v5006_v12, %v5005_v5 }
 0x48b   : > { %v5010_v27 = vor.u32 %v5009_v49, %v5008_v20  ;;  %v5013_v63 = vor.u32 %v5012_v50, %v5011_v25  ;;  %vm4357_vm11 = vcmp.eq.s32.totalorder %v12253_v13, 2  ;;  %v4503_v36 = vadd.f32 1.0, %v4502_v42  ;;  %v14003_v42 = vld [vmem:[#allocation30_spill] sm:$0xff] }
 0x48c   : > { %v12337_v6 = vmul.f32 %v12313_v35, %v12313_v35  ;;  %v4783_v28 = vshll.u32 %v12221_v54, %v4781_v9  ;;  %vm5014_vm13 = vcmp.lt.s32.totalorder %v12315_v44, 1  ;;  %vm4354_vm8 = vcmp.eq.s32.totalorder %v12253_v13, 0 }
 0x48d   : > { %v4784_v14 = vshrl.u32 %v4766_v56, %v4782_v60  ;;  %v4788_v2 = vshll.u32 %v4787_v51, 23  ;;  %vm5017_vm15 = vcmp.lt.s32.totalorder %v12315_v44, 4  ;;  %v12343_v16 = vshll.u32 %v4990_v23, 8 }
 0x48e   : > { %v4926_v24 = vadd.s32 536870912, %v12325_v22  ;;  %v12346_v7 = vor.u32 %v5000_v47, %v4999_v53  ;;  %vm5016_vm2 = vcmp.lt.s32.totalorder %v12315_v44, 3  ;;  %v5140_v8 = vand.u32 2139095040, %v14003_v42 }
 0x48f   : > { %vm5015_vm3 = vcmp.lt.s32.totalorder %v12315_v44, 2  ;;  %v5023_v54 = vsel %vm5017_vm15, %v5010_v27, 920167782  ;;  %v5026_v9 = vsel %vm5014_vm13, %v12330_v33, %v12332_v29  ;;  %v5027_v56 = vsel %vm5017_vm15, %v5013_v63, 1326507024 }
 0x490   : > { %v4496_v41 = vadd.f32 1.0, %v4495_v55  ;;  %v4504_v43 = vmul.f32 %v4503_v36, %v12217_v21  ;;  %v4646_v57 = vmul.f32 -0.001358992, %v12337_v6  ;;  %v4653_v39 = vmul.f32 -0.00019511016, %v12337_v6 }
 0x491   : > { %v4785_v5 = vor.u32 %v4784_v14, %v4783_v28  ;;  %v4789_v12 = vor.u32 4788187, %v4788_v2  ;;  %v5028_v20 = vsel %vm5016_vm2, %v5010_v27, %v5027_v56  ;;  %v5031_v60 = vand.u32 65535, %v12343_v16 }
 0x492   : > { %v5022_v49 = vsel %vm5014_vm13, %v12346_v7, %v12330_v33  ;;  %v5024_v21 = vsel %vm5016_vm2, %v12332_v29, %v5023_v54  ;;  %v5029_v55 = vsel %vm5015_vm3, %v5026_v9, %v5028_v20  ;;  %v5032_v51 = vshrl.u32 %v12343_v16, 16 }
 0x493   : > { %v12375_v23 = vshrl.u32 %v4926_v24, 30  ;;  %v5033_v25 = vand.u32 65535, %v5029_v55  ;;  %v5034_v50 = vshrl.u32 %v5029_v55, 16  ;;  %v5141_v53 = vshrl.u32 %v5140_v8, 23 }
 0x494   : > { %vm4509_vm0 = vcmp.eq.s32.totalorder %v12293_v38, 0  ;;  %v4510_v47 = vxor.u32 2147483648, %v4504_v43  ;;  %vm4512_vm5 = vcmp.eq.s32.totalorder %v12293_v38, 2  ;;  %v4513_v27 = vxor.u32 2147483648, %v4496_v41 }
 0x495   : > { %v4647_v63 = vadd.f32 0.041655596, %v4646_v57  ;;  %v4661_v36 = vadd.s32 3, %v4644_v32  ;;  %v5025_v28 = vsel %vm5015_vm3, %v5022_v49, %v5024_v21  ;;  %v5036_v14 = vmul.u32 %v5034_v50, %v5031_v60 }
 0x496   : > { %v4654_v2 = vadd.f32 0.008332121, %v4653_v39  ;;  %v4790_v54 = vand.u32 2147483647, %v4789_v12  ;;  %v4792_v9 = vcvt.s32.f32 %v4785_v5  ;;  %v5037_v24 = vmul.u32 %v5033_v25, %v5032_v51 }
 0x497   : > { %v12386_v8 = vsel %vm4357_vm11, %v4358_v17, %v12262_v34  ;;  %v4928_v56 = vshll.u32 %v12375_v23, 30  ;;  %v5035_v20 = vmul.u32 %v5033_v25, %v5031_v60  ;;  %v6060_v57 = vadd.s32 4294967169, %v5141_v53 }
 0x498   : > { %v12394_v32 = vsel %vm4354_vm8, %v12251_v15, %v4355_v59  ;;  %v12396_v39 = vsel %vm4512_vm5, %v4513_v27, %v4504_v43  ;;  %v5055_v5 = vand.u32 65535, %v5025_v28  ;;  %v5056_v12 = vshrl.u32 %v5025_v28, 16 }
 0x499   : > { %v12400_v49 = vsel %vm4509_vm0, %v4496_v41, %v4510_v47  ;;  %v12402_v17 = vand.u32 3, %v4661_v36  ;;  %v5038_v21 = vmul.u32 %v5034_v50, %v5032_v51  ;;  %v5039_v55 = vshll.u32 %v5036_v14, 16 }
 0x49a   : > { %v4648_v25 = vmul.f32 %v4647_v63, %v12337_v6  ;;  %v4655_v34 = vmul.f32 %v4654_v2, %v12337_v6  ;;  %v4793_v53 = vmul.f32 %v4792_v9, %v4790_v54  ;;  %v5041_v31 = vshll.u32 %v5037_v24, 16 }
 0x49b   : > { %vm4674_vm4 = vcmp.lt.s32.totalorder %v13989_v19, 0  ;;  %v12408_v15 = vsub.s32 %v12325_v22, %v4928_v56  ;;  %vm5043_vm10 = vc.u32 %v5035_v20, %v5039_v55  ;;  %v5045_v59 = vadd.s32 %v5039_v55, %v5035_v20 }
 0x49c   : > { %v5147_v43 = vadd.s32 1, %v6060_v57  ;;  %v5044_v41 = vsel %vm5043_vm10, 1, %v13869_v10  ;;  %v5057_v47 = vmul.u32 %v5055_v5, %v5031_v60  ;;  %v5058_v27 = vmul.u32 %v5056_v12, %v5031_v60 }
 0x49d   : > { %v5059_v50 = vmul.u32 %v5055_v5, %v5032_v51  ;;  %v5040_v36 = vshrl.u32 %v5036_v14, 16  ;;  %v5046_v28 = vadd.s32 %v5044_v41, %v5038_v21  ;;  %vm5047_vm14 = vc.u32 %v5045_v59, %v5041_v31 }
 0x49e   : > { %v13544_v63 = vand.u32 2147483647, %v14003_v42  ;;  %v5048_v2 = vsel %vm5047_vm14, 1, %v13869_v10  ;;  %v5060_v54 = vmul.u32 %v5056_v12, %v5032_v51  ;;  %v5061_v9 = vshll.u32 %v5058_v27, 16 }
 0x49f   : > { %v5063_v11 = vshll.u32 %v5059_v50, 16  ;;  %v4794_v22 = vxor.u32 2147483648, %v4793_v53  ;;  %v4931_v56 = vsub.s32 0, %v12408_v15  ;;  %v4998_v20 = vshrl.u32 %v13629_v26, %v12288_v52 }
 0x4a0   : > { %v5050_v57 = vadd.s32 %v5048_v2, %v5046_v28  ;;  %v5019_v60 = vsel %vm5017_vm15, %v12332_v29, 2102212464  ;;  %vm5065_vm6 = vc.u32 %v5057_v47, %v5061_v9  ;;  %v5067_v31 = vadd.s32 %v5061_v9, %v5057_v47 }
 0x4a1   : > { %vm5148_vm9 = vcmp.gt.s32.totalorder %v5147_v43, 0  ;;  %v14004_v14 = vand.u32 2147483647, %v13989_v19  ;;  %v5042_v5 = vshrl.u32 %v5037_v24, 16  ;;  %v5066_v21 = vsel %vm5065_vm6, 1, %v13869_v10 }
 0x4a2   : > { %v5051_v12 = vadd.s32 %v5050_v57, %v5040_v36  ;;  %v5149_v55 = vsel %vm5148_vm9, %v5147_v43, 0  ;;  %vm4930_vm1 = vcmp.lt.s32.totalorder %v12408_v15, 0  ;;  %v5062_v52 = vshrl.u32 %v5058_v27, 16 }
 0x4a3   : > { %vm12421_vm12 = vcmp.le.f32.partialorder %v14004_v14, 0.7853982  ;;  %v5068_v59 = vadd.s32 %v5066_v21, %v5060_v54  ;;  %vm5069_vm7 = vc.u32 %v5067_v31, %v5063_v11  ;;  %v5018_v29 = vsel %vm5014_vm13, %v4998_v20, %v12346_v7 }
 0x4a4   : > { %v5020_v41 = vsel %vm5016_vm2, %v12330_v33, %v5019_v60  ;;  %v5070_v47 = vsel %vm5069_vm7, 1, %v13869_v10  ;;  %v5151_v24 = vand.u32 31, %v5149_v55  ;;  %v4649_v36 = vadd.f32 -0.4999988, %v4648_v25 }
 0x4a5   : > { %v4656_v28 = vadd.f32 -0.16666654, %v4655_v34  ;;  %v5064_v2 = vshrl.u32 %v5059_v50, 16  ;;  %v5072_v43 = vadd.s32 %v5070_v47, %v5068_v59  ;;  %v4932_v9 = vsel %vm4930_vm1, %v4931_v56, %v12408_v15 }
 0x4a6   : > { %v12435_v27 = vadd.s32 %v5051_v12, %v5042_v5  ;;  %v12437_v54 = vadd.s32 %v5067_v31, %v5063_v11  ;;  %v12439_v57 = vsub.s32 32, %v5151_v24  ;;  %v4795_v7 = vsel %vm4674_vm4, %v4794_v22, %v4793_v53 }
 0x4a7   : > { %v5021_v33 = vsel %vm5015_vm3, %v5018_v29, %v5020_v41  ;;  %v5073_v20 = vadd.s32 %v5072_v43, %v5062_v52  ;;  %v5144_v25 = vand.u32 8388607, %v13544_v63  ;;  %vm4195_vm11 = vweird.f32 %v13985_v18 }
 0x4a8   : > { %v5154_v34 = vshll.u32 %v13629_v26, %v5151_v24  ;;  %v5155_v11 = vshrl.u32 %v13960_v61, %v12439_v57  ;;  %v5157_v50 = vshll.u32 %v13960_v61, %v5151_v24  ;;  %v5158_v56 = vshrl.u32 %v13961_v46, %v12439_v57 }
 0x4a9   : > { %vm4353_vm13 = vcmp.lt.s32.totalorder %v12253_v13, 2  ;;  %vm4508_vm8 = vcmp.lt.s32.totalorder %v12293_v38, 2  ;;  %v4933_v44 = vclz %v4932_v9  ;;  %v5074_v53 = vadd.s32 %v5073_v20, %v5064_v2 }
 0x4aa   : > { %v12456_v22 = vshrl.u32 %v5149_v55, 5  ;;  %v5163_v60 = vshll.u32 %v13962_v37, %v5151_v24  ;;  %v5075_v31 = vmul.u32 %v12343_v16, %v5021_v33  ;;  %vm5077_vm15 = vc.u32 %v12435_v27, %v12437_v54 }
 0x4ab   : > { %v5160_v14 = vshll.u32 %v13961_v46, %v5151_v24  ;;  %v5161_v5 = vshrl.u32 %v13962_v37, %v12439_v57  ;;  %v4657_v12 = vmul.f32 %v4656_v28, %v12337_v6  ;;  %v5078_v21 = vadd.s32 1, %v5074_v53 }
 0x4ac   : > { %v5164_v52 = vshrl.u32 %v13905_v45, %v12439_v57  ;;  %v5166_v55 = vshll.u32 %v13905_v45, %v5151_v24  ;;  %v5145_v59 = vor.u32 8388608, %v5144_v25  ;;  %v12469_v29 = vor.u32 %v5155_v11, %v5154_v34 }
 0x4ad   : > { %v12471_v16 = vor.u32 %v5158_v56, %v5157_v50  ;;  %v5167_v41 = vshrl.u32 %v13907_v0, %v12439_v57  ;;  %v12478_v47 = vsel %vm12421_vm12, %v13989_v19, %v4795_v7  ;;  %v5079_v28 = vsel %vm5077_vm15, %v5078_v21, %v5074_v53 }
 0x4ae   : > { %v5165_v2 = vor.u32 %v5164_v52, %v5163_v60  ;;  %vm5169_vm2 = vcmp.lt.s32.totalorder %v12456_v22, 1  ;;  %v6055_v43 = vadd.s32 4294967294, %v4933_v44  ;;  %v5080_v9 = vadd.s32 %v5079_v28, %v5075_v31 }
 0x4af   : > { %v12481_v24 = vor.u32 %v5161_v5, %v5160_v14  ;;  %vm5172_vm3 = vcmp.lt.s32.totalorder %v12456_v22, 4  ;;  %v4650_v33 = vmul.f32 %v4649_v36, %v12337_v6  ;;  %v4796_v20 = vsub.s32 4, %v12168_v30 }
 0x4b0   : > { %v5168_v25 = vor.u32 %v5167_v41, %v5166_v55  ;;  %vm5171_vm0 = vcmp.lt.s32.totalorder %v12456_v22, 3  ;;  %v4658_v34 = vadd.f32 1.0, %v4657_v12  ;;  %v5081_v7 = vadd.s32 536870912, %v5080_v9 }
 0x4b1   : > { %vm5170_vm5 = vcmp.lt.s32.totalorder %v12456_v22, 2  ;;  %v5177_v11 = vsel %vm5169_vm2, %v12469_v29, %v12471_v16  ;;  %v12494_v50 = vmul.f32 %v12478_v47, %v12478_v47  ;;  %v5178_v6 = vsel %vm5172_vm3, %v5165_v2, 920167782 }
 0x4b2   : > { %v5182_v36 = vsel %vm5172_vm3, %v5168_v25, 1326507024  ;;  %v12500_v56 = vshll.u32 %v5145_v59, 8  ;;  %vm6056_vm10 = vcmp.lt.s32.totalorder %v6055_v43, 0  ;;  %v12502_v44 = vshrl.u32 %v5081_v7, 30 }
 0x4b3   : > { %v5179_v53 = vsel %vm5171_vm0, %v12481_v24, %v5178_v6  ;;  %v5181_v60 = vsel %vm5169_vm2, %v12471_v16, %v12481_v24  ;;  %v12514_v31 = vsel %vm4195_vm11, nan, %v12210_v4  ;;  %v4651_v14 = vadd.f32 1.0, %v4650_v33 }
 0x4b4   : > { %14007 = vst [vmem:[#allocation45_spill] sm:$0xff] %v12502_v44  ;;  %v5180_v5 = vsel %vm5170_vm5, %v5177_v11, %v5179_v53  ;;  %v5183_v12 = vsel %vm5171_vm0, %v5165_v2, %v5182_v36  ;;  %v12524_v21 = vsel %vm4353_vm13, %v12394_v32, %v12386_v8  ;;  %v12530_v18 = vsel %vm4508_vm8, %v12400_v49, %v12396_v39 }
 0x4b5   : > { %14008 = vst [vmem:[#allocation50_spill] sm:$0xff] %v12514_v31  ;;  %v4801_v4 = vmul.f32 -0.001358992, %v12494_v50  ;;  %v5083_v52 = vshll.u32 %v12502_v44, 30  ;;  %vm4664_vm14 = vcmp.eq.s32.totalorder %v12402_v17, 0  ;;  %v12535_v55 = vsel %vm6056_vm10, 0, %v6055_v43 }
 0x4b6   : > { %v5184_v59 = vsel %vm5170_vm5, %v5181_v60, %v5183_v12  ;;  %v5186_v13 = vand.u32 65535, %v12500_v56  ;;  %v5187_v8 = vshrl.u32 %v12500_v56, 16  ;;  %v4659_v32 = vmul.f32 %v4658_v34, %v12313_v35 }
 0x4b7   : > { %v12545_v38 = vsel %vm4674_vm4, %v4796_v20, %v12168_v30  ;;  %v12547_v39 = vsub.s32 %v5080_v9, %v5083_v52  ;;  %v5211_v49 = vshrl.u32 %v5180_v5, 16  ;;  %v4668_v41 = vxor.u32 2147483648, %v4651_v14 }
 0x4b8   : > { %v4808_v28 = vmul.f32 -0.00019511016, %v12494_v50  ;;  %v5188_v2 = vand.u32 65535, %v5184_v59  ;;  %v5189_v43 = vshrl.u32 %v5184_v59, 16  ;;  %vm4667_vm6 = vcmp.eq.s32.totalorder %v12402_v17, 2 }
 0x4b9   : > { %v4802_v33 = vadd.f32 0.041655596, %v4801_v4  ;;  %v4941_v25 = vsub.s32 4294967266, %v12535_v55  ;;  %v5086_v35 = vsub.s32 0, %v12547_v39  ;;  %vm5085_vm9 = vcmp.lt.s32.totalorder %v12547_v39, 0 }
 0x4ba   : > { %v5190_v34 = vmul.u32 %v5188_v2, %v5186_v13  ;;  %v5191_v30 = vmul.u32 %v5189_v43, %v5186_v13  ;;  %v12554_v20 = vmul.u32 %v5188_v2, %v5187_v8  ;;  %v4665_v9 = vxor.u32 2147483648, %v4659_v32 }
 0x4bb   : > { %v5210_v11 = vand.u32 65535, %v5180_v5  ;;  %v12559_v6 = vmul.u32 %v5211_v49, %v5186_v13  ;;  %v12561_v36 = vsel %vm4667_vm6, %v4668_v41, %v4659_v32  ;;  %v4809_v53 = vadd.f32 0.008332121, %v4808_v28 }
 0x4bc   : > { %v5193_v60 = vmul.u32 %v5189_v43, %v5187_v8  ;;  %v5194_v12 = vshll.u32 %v5191_v30, 16  ;;  %v4803_v4 = vmul.f32 %v4802_v33, %v12494_v50  ;;  %v4921_v52 = vadd.s32 %v12266_v58, %v12264_v1 }
 0x4bd   : > { %v5087_v59 = vsel %vm5085_vm9, %v5086_v35, %v12547_v39  ;;  %v5196_v2 = vshll.u32 %v12554_v20, 16  ;;  %v4937_v63 = vsub.s32 32, %v12535_v55  ;;  %v4942_v7 = vadd.s32 127, %v4941_v25 }
 0x4be   : > { %vm5198_vm4 = vc.u32 %v5190_v34, %v5194_v12  ;;  %v5200_v5 = vadd.s32 %v5194_v12, %v5190_v34  ;;  %v5212_v41 = vmul.u32 %v5210_v11, %v5186_v13  ;;  %v5214_v28 = vmul.u32 %v5210_v11, %v5187_v8 }
 0x4bf   : > { %v5199_v32 = vsel %vm5198_vm4, 1, %v13869_v10  ;;  %v5216_v43 = vshll.u32 %v12559_v6, 16  ;;  %v4810_v33 = vmul.f32 %v4809_v53, %v12494_v50  ;;  %v5088_v31 = vclz %v5087_v59  ;;  %v14009_v53 = vld [vmem:[#allocation28_spill] sm:$0xff] }
 0x4c0   : > { %v5201_v19 = vadd.s32 %v5199_v32, %v5193_v60  ;;  %vm5202_vm1 = vc.u32 %v5200_v5, %v5196_v2  ;;  %vm4663_vm7 = vcmp.lt.s32.totalorder %v12402_v17, 2  ;;  %v4666_v1 = vsel %vm4664_vm14, %v4651_v14, %v4665_v9 }
 0x4c1   : > { %v4938_v58 = vshll.u32 %v12408_v15, %v12535_v55  ;;  %v5203_v25 = vsel %vm5202_vm1, 1, %v13869_v10  ;;  %v5215_v35 = vmul.u32 %v5211_v49, %v5187_v8  ;;  %v4939_v13 = vshrl.u32 %v4921_v52, %v4937_v63  ;;  %v14010_v8 = vld [vmem:[#allocation32_spill] sm:$0xff] }
 0x4c2   : > { %v4943_v34 = vshll.u32 %v4942_v7, 23  ;;  %v5195_v11 = vshrl.u32 %v5191_v30, 16  ;;  %v5205_v12 = vadd.s32 %v5203_v25, %v5201_v19  ;;  %v4804_v44 = vadd.f32 -0.4999988, %v4803_v4 }
 0x4c3   : > { %vm4829_vm11 = vcmp.lt.s32.totalorder %v14009_v53, 0  ;;  %v4951_v60 = vsub.s32 4, %v12375_v23  ;;  %v5218_v59 = vshll.u32 %v5214_v28, 16  ;;  %vm5220_vm13 = vc.u32 %v5212_v41, %v5216_v43 }
 0x4c4   : > { %v4811_v2 = vadd.f32 -0.16666654, %v4810_v33  ;;  %v6058_v5 = vadd.s32 4294967294, %v5088_v31  ;;  %v5153_v14 = vshrl.u32 %v13629_v26, %v12439_v57  ;;  %v5221_v15 = vsel %vm5220_vm13, 1, %v13869_v10 }
 0x4c5   : > { %vm4350_vm8 = vweird.f32 %v10931_v48  ;;  %vm4505_vm15 = vweird.f32 %v13972_v40  ;;  %v5174_v19 = vsel %vm5172_vm3, %v12481_v24, 2102212464  ;;  %v5222_v63 = vadd.s32 %v5216_v43, %v5212_v41 }
 0x4c6   : > { %v5223_v55 = vadd.s32 %v5221_v15, %v5215_v35  ;;  %v5295_v49 = vand.u32 2139095040, %v14010_v8  ;;  %v4940_v30 = vor.u32 %v4939_v13, %v4938_v58  ;;  %v4944_v9 = vor.u32 4788187, %v4943_v34 }
 0x4c7   : > { %v5197_v31 = vshrl.u32 %v12554_v20, 16  ;;  %v5206_v7 = vadd.s32 %v5205_v12, %v5195_v11  ;;  %v4805_v57 = vmul.f32 %v4804_v44, %v12494_v50  ;;  %v5217_v4 = vshrl.u32 %v12559_v6, 16 }
 0x4c8   : > { %vm5224_vm10 = vc.u32 %v5222_v63, %v5218_v59  ;;  %v5296_v52 = vshrl.u32 %v5295_v49, 23  ;;  %vm6059_vm14 = vcmp.lt.s32.totalorder %v6058_v5, 0  ;;  %v5173_v24 = vsel %vm5169_vm2, %v5153_v14, %v12469_v29 }
 0x4c9   : > { %v5175_v32 = vsel %vm5171_vm0, %v12471_v16, %v5174_v19  ;;  %v5225_v41 = vsel %vm5224_vm10, 1, %v13869_v10  ;;  %v4812_v20 = vmul.f32 %v4811_v2, %v12494_v50  ;;  %v5219_v43 = vshrl.u32 %v5214_v28, 16 }
 0x4ca   : > { %v5227_v33 = vadd.s32 %v5225_v41, %v5223_v55  ;;  %v6063_v44 = vadd.s32 4294967169, %v5296_v52  ;;  %v4945_v58 = vand.u32 2147483647, %v4944_v9  ;;  %v4947_v6 = vcvt.s32.f32 %v4940_v30 }
 0x4cb   : > { %v12600_v25 = vadd.s32 %v5206_v7, %v5197_v31  ;;  %v12602_v35 = vadd.s32 %v5222_v63, %v5218_v59  ;;  %v5091_v13 = vsel %vm6059_vm14, 0, %v6058_v5  ;;  %v5176_v29 = vsel %vm5170_vm5, %v5173_v24, %v5175_v32 }
 0x4cc   : > { %v5228_v34 = vadd.s32 %v5227_v33, %v5217_v4  ;;  %v5302_v11 = vadd.s32 1, %v6063_v44  ;;  %vm4660_vm2 = vweird.f32 %v13983_v3  ;;  %v4670_v16 = vsel %vm4663_vm7, %v4666_v1, %v12561_v36 }
 0x4cd   : > { %v14011_v50 = vsel %vm12421_vm12, 0, %v12545_v38  ;;  %v12617_v12 = vsel %vm4829_vm11, %v4951_v60, %v12375_v23  ;;  %v12619_v22 = vadd.f32 1.0, %v4805_v57  ;;  %v4813_v59 = vadd.f32 1.0, %v4812_v20 }
 0x4ce   : > { %v4816_v28 = vadd.s32 3, %v14011_v50  ;;  %v5229_v2 = vadd.s32 %v5228_v34, %v5219_v43  ;;  %vm5303_vm3 = vcmp.gt.s32.totalorder %v5302_v11, 0  ;;  %v5096_v5 = vsub.s32 4294967266, %v5091_v13 }
 0x4cf   : > { %v5230_v14 = vmul.u32 %v12500_v56, %v5176_v29  ;;  %vm5232_vm0 = vc.u32 %v12600_v25, %v12602_v35  ;;  %v5304_v17 = vsel %vm5303_vm3, %v5302_v11, 0  ;;  %v4948_v51 = vmul.f32 %v4947_v6, %v4945_v58  ;;  %v14015_v6 = vld [vmem:[#allocation38_spill] sm:$0xff] }
 0x4d0   : > { %v5233_v38 = vadd.s32 1, %v5229_v2  ;;  %v13549_v36 = vand.u32 2147483647, %v14010_v8  ;;  %v5306_v1 = vand.u32 31, %v5304_v17  ;;  %v12628_v23 = vsel %vm4350_vm8, nan, %v12524_v21 }
 0x4d1   : > { %v12633_v60 = vsel %vm4505_vm15, nan, %v12530_v18  ;;  %v5076_v56 = vadd.s32 %v12437_v54, %v12435_v27  ;;  %v5092_v15 = vsub.s32 32, %v5091_v13  ;;  %v12639_v19 = vsel %vm4660_vm2, nan, %v4670_v16 }
 0x4d2   : > { %v14012_v63 = vand.u32 2147483647, %v14009_v53  ;;  %v5234_v48 = vsel %vm5232_vm0, %v5233_v38, %v5229_v2  ;;  %v12647_v21 = vsub.s32 32, %v5306_v1  ;;  %v12649_v40 = vand.u32 3, %v4816_v28 }
 0x4d3   : > { %v5097_v54 = vadd.s32 127, %v5096_v5  ;;  %v5235_v18 = vadd.s32 %v5234_v48, %v5230_v14  ;;  %v12655_v3 = vmul.f32 %v4813_v59, %v12478_v47  ;;  %v4823_v49 = vxor.u32 2147483648, %v12619_v22 }
 0x4d4   : > { %vm12643_vm12 = vcmp.le.f32.partialorder %v14012_v63, 0.7853982  ;;  %v4949_v30 = vxor.u32 2147483648, %v4948_v51  ;;  %v5299_v9 = vand.u32 8388607, %v13549_v36  ;;  %v5093_v31 = vshll.u32 %v12547_v39, %v5091_v13 }
 0x4d5   : > { %v5094_v7 = vshrl.u32 %v5076_v56, %v5092_v15  ;;  %v5236_v57 = vadd.s32 536870912, %v5235_v18  ;;  %v5312_v4 = vshll.u32 %v13960_v61, %v5306_v1  ;;  %v5313_v52 = vshrl.u32 %v13961_v46, %v12647_v21 }
 0x4d6   : > { %v5315_v24 = vshll.u32 %v13961_v46, %v5306_v1  ;;  %v5316_v47 = vshrl.u32 %v13962_v37, %v12647_v21  ;;  %v5318_v32 = vshll.u32 %v13962_v37, %v5306_v1  ;;  %v5098_v41 = vshll.u32 %v5097_v54, 23 }
 0x4d7   : > { %v12668_v20 = vshrl.u32 %v5236_v57, 30  ;;  %v12670_v43 = vshrl.u32 %v5304_v17, 5  ;;  %v5319_v39 = vshrl.u32 %v13905_v45, %v12647_v21  ;;  %vm4822_vm5 = vcmp.eq.s32.totalorder %v12649_v40, 2 }
 0x4d8   : > { %v5300_v33 = vor.u32 8388608, %v5299_v9  ;;  %v5321_v44 = vshll.u32 %v13905_v45, %v5306_v1  ;;  %v5322_v58 = vshrl.u32 %v13907_v0, %v12647_v21  ;;  %v5450_v13 = vand.u32 2139095040, %v14015_v6 }
 0x4d9   : > { %v4950_v29 = vsel %vm4829_vm11, %v4949_v30, %v4948_v51  ;;  %v5238_v34 = vshll.u32 %v12668_v20, 30  ;;  %v5309_v11 = vshll.u32 %v13629_v26, %v5306_v1  ;;  %v5310_v16 = vshrl.u32 %v13960_v61, %v12647_v21 }
 0x4da   : > { %v12685_v50 = vor.u32 %v5313_v52, %v5312_v4  ;;  %v5317_v28 = vor.u32 %v5316_v47, %v5315_v24  ;;  %v5320_v59 = vor.u32 %v5319_v39, %v5318_v32  ;;  %v5323_v2 = vor.u32 %v5322_v58, %v5321_v44 }
 0x4db   : > { %v5095_v5 = vor.u32 %v5094_v7, %v5093_v31  ;;  %v5099_v14 = vor.u32 4788187, %v5098_v41  ;;  %v12687_v17 = vsub.s32 %v5235_v18, %v5238_v34  ;;  %vm5324_vm6 = vcmp.lt.s32.totalorder %v12670_v43, 1 }
 0x4dc   : > { %v12693_v51 = vsel %vm12643_vm12, %v14009_v53, %v4950_v29  ;;  %vm5327_vm9 = vcmp.lt.s32.totalorder %v12670_v43, 4  ;;  %v12696_v38 = vshll.u32 %v5300_v33, 8  ;;  %v5451_v1 = vshrl.u32 %v5450_v13, 23 }
 0x4dd   : > { %vm5240_vm4 = vcmp.lt.s32.totalorder %v12687_v17, 0  ;;  %v5241_v56 = vsub.s32 0, %v12687_v17  ;;  %v12700_v15 = vor.u32 %v5310_v16, %v5309_v11  ;;  %vm5326_vm1 = vcmp.lt.s32.totalorder %v12670_v43, 3 }
 0x4de   : > { %vm5325_vm7 = vcmp.lt.s32.totalorder %v12670_v43, 2  ;;  %v5333_v63 = vsel %vm5327_vm9, %v5320_v59, 920167782  ;;  %v5336_v48 = vsel %vm5324_vm6, %v12685_v50, %v5317_v28  ;;  %v5337_v54 = vsel %vm5327_vm9, %v5323_v2, 1326507024 }
 0x4df   : > { %v12713_v18 = vmul.f32 %v12693_v51, %v12693_v51  ;;  %v5100_v30 = vand.u32 2147483647, %v5099_v14  ;;  %v5102_v9 = vcvt.s32.f32 %v5095_v5  ;;  %v5242_v31 = vsel %vm5240_vm4, %v5241_v56, %v12687_v17 }
 0x4e0   : > { %v5243_v7 = vclz %v5242_v31  ;;  %v5338_v57 = vsel %vm5326_vm1, %v5320_v59, %v5337_v54  ;;  %v5341_v4 = vand.u32 65535, %v12696_v38  ;;  %v5342_v52 = vshrl.u32 %v12696_v38, 16 }
 0x4e1   : > { %v5332_v24 = vsel %vm5324_vm6, %v12700_v15, %v12685_v50  ;;  %v5334_v47 = vsel %vm5326_vm1, %v5317_v28, %v5333_v63  ;;  %v5339_v32 = vsel %vm5325_vm7, %v5336_v48, %v5338_v57  ;;  %v6066_v41 = vadd.s32 4294967169, %v5451_v1 }
 0x4e2   : > { %v6061_v39 = vadd.s32 4294967294, %v5243_v7  ;;  %v5343_v33 = vand.u32 65535, %v5339_v32  ;;  %v5344_v44 = vshrl.u32 %v5339_v32, 16  ;;  %v13548_v58 = vand.u32 2147483647, %v14015_v6 }
 0x4e3   : > { %v12733_v29 = vsel %vm4822_vm5, %v4823_v49, %v12655_v3  ;;  %v4956_v34 = vmul.f32 -0.001358992, %v12713_v18  ;;  %vm4984_vm11 = vcmp.lt.s32.totalorder %v13999_v62, 0  ;;  %v5103_v11 = vmul.f32 %v5102_v9, %v5100_v30 }
 0x4e4   : > { %v5231_v16 = vadd.s32 %v12602_v35, %v12600_v25  ;;  %vm6062_vm13 = vcmp.lt.s32.totalorder %v6061_v39, 0  ;;  %v5335_v59 = vsel %vm5325_vm7, %v5332_v24, %v5334_v47  ;;  %v5346_v2 = vmul.u32 %v5344_v44, %v5341_v4 }
 0x4e5   : > { %v4963_v5 = vmul.f32 -0.00019511016, %v12713_v18  ;;  %v5246_v14 = vsel %vm6062_vm13, 0, %v6061_v39  ;;  %v5347_v1 = vmul.u32 %v5343_v33, %v5342_v52  ;;  %v5457_v56 = vadd.s32 1, %v6066_v41 }
 0x4e6   : > { %v5247_v49 = vsub.s32 32, %v5246_v14  ;;  %v5251_v63 = vsub.s32 4294967266, %v5246_v14  ;;  %v5345_v48 = vmul.u32 %v5343_v33, %v5341_v4  ;;  %v12744_v54 = vand.u32 8388607, %v13548_v58 }
 0x4e7   : > { %v5104_v30 = vxor.u32 2147483648, %v5103_v11  ;;  %v5248_v25 = vshll.u32 %v12687_v17, %v5246_v14  ;;  %v5365_v35 = vand.u32 65535, %v5335_v59  ;;  %v5366_v9 = vshrl.u32 %v5335_v59, 16 }
 0x4e8   : > { %v14016_v31 = vand.u32 2147483647, %v13999_v62  ;;  %v5249_v57 = vshrl.u32 %v5231_v16, %v5247_v49  ;;  %v5252_v24 = vadd.s32 127, %v5251_v63  ;;  %v5348_v47 = vmul.u32 %v5344_v44, %v5342_v52 }
 0x4e9   : > { %v5349_v32 = vshll.u32 %v5346_v2, 16  ;;  %v5308_v41 = vshrl.u32 %v13629_v26, %v12647_v21  ;;  %v5329_v39 = vsel %vm5327_vm9, %v5317_v28, 2102212464  ;;  %v5351_v33 = vshll.u32 %v5347_v1, 16 }
 0x4ea   : > { %vm12749_vm8 = vcmp.le.f32.partialorder %v14016_v31, 0.7853982  ;;  %vm5458_vm15 = vcmp.gt.s32.totalorder %v5457_v56, 0  ;;  %v5253_v17 = vshll.u32 %v5252_v24, 23  ;;  %v5350_v59 = vshrl.u32 %v5346_v2, 16 }
 0x4eb   : > { %vm5353_vm10 = vc.u32 %v5345_v48, %v5349_v32  ;;  %v5355_v14 = vadd.s32 %v5349_v32, %v5345_v48  ;;  %v5367_v58 = vmul.u32 %v5365_v35, %v5341_v4  ;;  %v5368_v36 = vmul.u32 %v5366_v9, %v5341_v4 }
 0x4ec   : > { %v5354_v31 = vsel %vm5353_vm10, 1, %v13869_v10  ;;  %v5369_v16 = vmul.u32 %v5365_v35, %v5342_v52  ;;  %v5250_v49 = vor.u32 %v5249_v57, %v5248_v25  ;;  %v5370_v63 = vmul.u32 %v5366_v9, %v5342_v52 }
 0x4ed   : > { %v5356_v44 = vadd.s32 %v5354_v31, %v5348_v47  ;;  %vm5357_vm14 = vc.u32 %v5355_v14, %v5351_v33  ;;  %v5254_v13 = vor.u32 4788187, %v5253_v17  ;;  %v5371_v27 = vshll.u32 %v5368_v36, 16 }
 0x4ee   : > { %v5358_v21 = vsel %vm5357_vm14, 1, %v13869_v10  ;;  %v5373_v28 = vshll.u32 %v5369_v16, 16  ;;  %v5105_v24 = vsel %vm4984_vm11, %v5104_v30, %v5103_v11  ;;  %v5328_v2 = vsel %vm5324_vm6, %v5308_v41, %v12700_v15 }
 0x4ef   : > { %v5330_v4 = vsel %vm5326_vm1, %v12685_v50, %v5329_v39  ;;  %v5360_v48 = vadd.s32 %v5358_v21, %v5356_v44  ;;  %v5352_v25 = vshrl.u32 %v5347_v1, 16  ;;  %vm5375_vm2 = vc.u32 %v5367_v58, %v5371_v27 }
 0x4f0   : > { %v5377_v52 = vadd.s32 %v5371_v27, %v5367_v58  ;;  %v5459_v35 = vsel %vm5458_vm15, %v5457_v56, 0  ;;  %v5257_v9 = vcvt.s32.f32 %v5250_v49  ;;  %v5372_v47 = vshrl.u32 %v5368_v36, 16 }
 0x4f1   : > { %v5361_v57 = vadd.s32 %v5360_v48, %v5350_v59  ;;  %v5376_v32 = vsel %vm5375_vm2, 1, %v13869_v10  ;;  %v5255_v11 = vand.u32 2147483647, %v5254_v13  ;;  %v5461_v33 = vand.u32 31, %v5459_v35 }
 0x4f2   : > { %v5378_v30 = vadd.s32 %v5376_v32, %v5370_v63  ;;  %vm5379_vm3 = vc.u32 %v5377_v52, %v5373_v28  ;;  %v4957_v15 = vadd.f32 0.041655596, %v4956_v34  ;;  %v4964_v41 = vadd.f32 0.008332121, %v4963_v5 }
 0x4f3   : > { %v5380_v17 = vsel %vm5379_vm3, 1, %v13869_v10  ;;  %v5455_v50 = vor.u32 8388608, %v12744_v54  ;;  %v12774_v27 = vsel %vm12749_vm8, %v13999_v62, %v5105_v24  ;;  %v5374_v58 = vshrl.u32 %v5369_v16, 16 }
 0x4f4   : > { %v5382_v1 = vadd.s32 %v5380_v17, %v5378_v30  ;;  %v12776_v36 = vsub.s32 32, %v5461_v33  ;;  %v5331_v13 = vsel %vm5325_vm7, %v5328_v2, %v5330_v4  ;;  %v12780_v56 = vadd.s32 %v5361_v57, %v5352_v25 }
 0x4f5   : > { %v12782_v34 = vadd.s32 %v5377_v52, %v5373_v28  ;;  %v5464_v5 = vshll.u32 %v13629_v26, %v5461_v33  ;;  %v5258_v39 = vmul.f32 %v5257_v9, %v5255_v11  ;;  %v5467_v14 = vshll.u32 %v13960_v61, %v5461_v33 }
 0x4f6   : > { %v5383_v54 = vadd.s32 %v5382_v1, %v5372_v47  ;;  %v5465_v59 = vshrl.u32 %v13960_v61, %v12776_v36  ;;  %v12788_v31 = vshrl.u32 %v5459_v35, 5  ;;  %v5468_v16 = vshrl.u32 %v13961_v46, %v12776_v36 }
 0x4f7   : > { %v5470_v43 = vshll.u32 %v13961_v46, %v5461_v33  ;;  %v5473_v49 = vshll.u32 %v13962_v37, %v5461_v33  ;;  %vm4819_vm0 = vcmp.eq.s32.totalorder %v12649_v40, 0  ;;  %v5471_v63 = vshrl.u32 %v13962_v37, %v12776_v36 }
 0x4f8   : > { %v5384_v44 = vadd.s32 %v5383_v54, %v5374_v58  ;;  %v5474_v21 = vshrl.u32 %v13905_v45, %v12776_v36  ;;  %v5476_v61 = vshll.u32 %v13905_v45, %v5461_v33  ;;  %v12802_v28 = vmul.f32 %v12774_v27, %v12774_v27 }
 0x4f9   : > { %v5385_v24 = vmul.u32 %v12696_v38, %v5331_v13  ;;  %vm5387_vm5 = vc.u32 %v12780_v56, %v12782_v34  ;;  %v12807_v46 = vor.u32 %v5465_v59, %v5464_v5  ;;  %v12809_v4 = vor.u32 %v5468_v16, %v5467_v14 }
 0x4fa   : > { %v5388_v2 = vadd.s32 1, %v5384_v44  ;;  %v5475_v37 = vor.u32 %v5474_v21, %v5473_v49  ;;  %v5477_v48 = vshrl.u32 %v13907_v0, %v12776_v36  ;;  %v4958_v45 = vmul.f32 %v4957_v15, %v12713_v18  ;;  %v14024_v21 = vld [vmem:[#allocation45_spill] sm:$0xff] }
 0x4fb   : > { %v4965_v25 = vmul.f32 %v4964_v41, %v12713_v18  ;;  %vm5479_vm6 = vcmp.lt.s32.totalorder %v12788_v31, 1  ;;  %vm5482_vm9 = vcmp.lt.s32.totalorder %v12788_v31, 4  ;;  %v5259_v38 = vxor.u32 2147483648, %v5258_v39 }
 0x4fc   : > { %v5389_v52 = vsel %vm5387_vm5, %v5388_v2, %v5384_v44  ;;  %v12817_v35 = vor.u32 %v5471_v63, %v5470_v43  ;;  %v5478_v9 = vor.u32 %v5477_v48, %v5476_v61  ;;  %vm5139_vm4 = vcmp.lt.s32.totalorder %v14003_v42, 0 }
 0x4fd   : > { %v5390_v57 = vadd.s32 %v5389_v52, %v5385_v24  ;;  %vm5481_vm1 = vcmp.lt.s32.totalorder %v12788_v31, 3  ;;  %v12821_v47 = vshll.u32 %v5455_v50, 8  ;;  %v5118_v0 = vmul.f32 -0.00019511016, %v12802_v28 }
 0x4fe   : > { %vm5480_vm7 = vcmp.lt.s32.totalorder %v12788_v31, 2  ;;  %v5487_v32 = vsel %vm5479_vm6, %v12807_v46, %v12809_v4  ;;  %v5488_v11 = vsel %vm5482_vm9, %v5475_v37, 920167782  ;;  %v4959_v30 = vadd.f32 -0.4999988, %v4958_v45 }
 0x4ff   : > { %v14019_v33 = vsel %vm12643_vm12, 0, %v12617_v12  ;;  %v14020_v41 = vand.u32 2147483647, %v14003_v42  ;;  %v5391_v50 = vadd.s32 536870912, %v5390_v57  ;;  %v5111_v58 = vmul.f32 -0.001358992, %v12802_v28 }
 0x500   : > { %v4971_v15 = vadd.s32 3, %v14019_v33  ;;  %v5260_v1 = vsel %vm5139_vm4, %v5259_v38, %v5258_v39  ;;  %v5489_v13 = vsel %vm5481_vm1, %v12817_v35, %v5488_v11  ;;  %v5492_v12 = vsel %vm5482_vm9, %v5478_v9, 1326507024 }
 0x501   : > { %vm12837_vm13 = vcmp.le.f32.partialorder %v14020_v41, 0.7853982  ;;  %v12849_v55 = vshrl.u32 %v5391_v50, 30  ;;  %v5490_v5 = vsel %vm5480_vm7, %v5487_v32, %v5489_v13  ;;  %v5491_v54 = vsel %vm5479_vm6, %v12809_v4, %v12817_v35 }
 0x502   : > { %v5496_v59 = vand.u32 65535, %v12821_v47  ;;  %v4966_v39 = vadd.f32 -0.16666654, %v4965_v25  ;;  %v5119_v14 = vadd.f32 0.008332121, %v5118_v0  ;;  %v5493_v16 = vsel %vm5481_vm1, %v5475_v37, %v5492_v12 }
 0x503   : > { %v5521_v43 = vshrl.u32 %v5490_v5, 16  ;;  %v14023_v49 = vxor.u32 2147483648, %v12655_v3  ;;  %v12867_v63 = vand.u32 3, %v4971_v15  ;;  %v5106_v61 = vsub.s32 4, %v14024_v21 }
 0x504   : > { %v5393_v24 = vshll.u32 %v12849_v55, 30  ;;  %v5112_v2 = vadd.f32 0.041655596, %v5111_v58  ;;  %v12874_v48 = vsel %vm12837_vm13, %v14003_v42, %v5260_v1  ;;  %v5494_v3 = vsel %vm5480_vm7, %v5491_v54, %v5493_v16 }
 0x505   : > { %v12865_v44 = vsel %vm4819_vm0, %v12619_v22, %v14023_v49  ;;  %v5497_v37 = vshrl.u32 %v12821_v47, 16  ;;  %v12880_v22 = vmul.f32 %v4959_v30, %v12713_v18  ;;  %v5520_v25 = vand.u32 65535, %v5490_v5 }
 0x506   : > { %v5394_v45 = vsub.s32 %v5390_v57, %v5393_v24  ;;  %v12882_v38 = vmul.u32 %v5521_v43, %v5496_v59  ;;  %v4967_v52 = vmul.f32 %v4966_v39, %v12713_v18  ;;  %v5120_v9 = vmul.f32 %v5119_v14, %v12802_v28 }
 0x507   : > { %v5498_v0 = vand.u32 65535, %v5494_v3  ;;  %v5499_v32 = vshrl.u32 %v5494_v3, 16  ;;  %v12889_v11 = vsel %vm4984_vm11, %v5106_v61, %v14024_v21  ;;  %v12893_v33 = vmul.f32 %v12874_v48, %v12874_v48 }
 0x508   : > { %vm5395_vm12 = vcmp.lt.s32.totalorder %v5394_v45, 0  ;;  %v5396_v57 = vsub.s32 0, %v5394_v45  ;;  %v12896_v30 = vmul.f32 %v5112_v2, %v12802_v28  ;;  %v5522_v58 = vmul.u32 %v5520_v25, %v5496_v59 }
 0x509   : > { %v5500_v15 = vmul.u32 %v5498_v0, %v5496_v59  ;;  %v5501_v18 = vmul.u32 %v5499_v32, %v5496_v59  ;;  %v5502_v41 = vmul.u32 %v5498_v0, %v5497_v37  ;;  %v12898_v1 = vmul.u32 %v5520_v25, %v5497_v37 }
 0x50a   : > { %v5397_v50 = vsel %vm5395_vm12, %v5396_v57, %v5394_v45  ;;  %v5526_v13 = vshll.u32 %v12882_v38, 16  ;;  %v5121_v12 = vadd.f32 -0.16666654, %v5120_v9  ;;  %v5503_v54 = vmul.u32 %v5499_v32, %v5497_v37 }
 0x50b   : > { %v5398_v5 = vclz %v5397_v50  ;;  %v5504_v39 = vshll.u32 %v5501_v18, 16  ;;  %v5273_v14 = vmul.f32 -0.00019511016, %v12893_v33  ;;  %v5386_v16 = vadd.s32 %v12782_v34, %v12780_v56 }
 0x50c   : > { %v5463_v49 = vshrl.u32 %v13629_v26, %v12776_v36  ;;  %v5506_v21 = vshll.u32 %v5502_v41, 16  ;;  %v5525_v24 = vmul.u32 %v5521_v43, %v5497_v37  ;;  %v5505_v2 = vshrl.u32 %v5501_v18, 16 }
 0x50d   : > { %v6064_v61 = vadd.s32 4294967294, %v5398_v5  ;;  %vm5508_vm11 = vc.u32 %v5500_v15, %v5504_v39  ;;  %v5510_v59 = vadd.s32 %v5504_v39, %v5500_v15  ;;  %v5528_v25 = vshll.u32 %v12898_v1, 16 }
 0x50e   : > { %v5509_v3 = vsel %vm5508_vm11, 1, %v13869_v10  ;;  %vm5530_vm15 = vc.u32 %v5522_v58, %v5526_v13  ;;  %v5532_v0 = vadd.s32 %v5526_v13, %v5522_v58  ;;  %v5484_v26 = vsel %vm5482_vm9, %v12817_v35, 2102212464 }
 0x50f   : > { %vm6065_vm10 = vcmp.lt.s32.totalorder %v6064_v61, 0  ;;  %v5511_v9 = vadd.s32 %v5509_v3, %v5503_v54  ;;  %vm5512_vm14 = vc.u32 %v5510_v59, %v5506_v21  ;;  %v5531_v56 = vsel %vm5530_vm15, 1, %v13869_v10 }
 0x510   : > { %v5401_v32 = vsel %vm6065_vm10, 0, %v6064_v61  ;;  %v5513_v36 = vsel %vm5512_vm14, 1, %v13869_v10  ;;  %v5266_v15 = vmul.f32 -0.001358992, %v12893_v33  ;;  %v5507_v18 = vshrl.u32 %v5502_v41, 16 }
 0x511   : > { %v5402_v34 = vsub.s32 32, %v5401_v32  ;;  %v5403_v43 = vshll.u32 %v5394_v45, %v5401_v32  ;;  %v5406_v37 = vsub.s32 4294967266, %v5401_v32  ;;  %v5515_v57 = vadd.s32 %v5513_v36, %v5511_v9 }
 0x512   : > { %v5527_v50 = vshrl.u32 %v12882_v38, 16  ;;  %v5533_v5 = vadd.s32 %v5531_v56, %v5525_v24  ;;  %vm5534_vm2 = vc.u32 %v5532_v0, %v5528_v25  ;;  %v5274_v39 = vadd.f32 0.008332121, %v5273_v14 }
 0x513   : > { %v5404_v58 = vshrl.u32 %v5386_v16, %v5402_v34  ;;  %v5407_v13 = vadd.s32 127, %v5406_v37  ;;  %v5516_v54 = vadd.s32 %v5515_v57, %v5505_v2  ;;  %v5483_v35 = vsel %vm5479_vm6, %v5463_v49, %v12807_v46  ;;  %v14025_v34 = vld [vmem:[#allocation26_spill] sm:$0xff] }
 0x514   : > { %v5485_v45 = vsel %vm5481_vm1, %v12809_v4, %v5484_v26  ;;  %v5535_v21 = vsel %vm5534_vm2, 1, %v13869_v10  ;;  %v5529_v38 = vshrl.u32 %v12898_v1, 16  ;;  %vm4818_vm3 = vcmp.lt.s32.totalorder %v12649_v40, 2 }
 0x515   : > { %v5405_v61 = vor.u32 %v5404_v58, %v5403_v43  ;;  %v5408_v41 = vshll.u32 %v5407_v13, 23  ;;  %v5537_v59 = vadd.s32 %v5535_v21, %v5533_v5  ;;  %v4968_v16 = vadd.f32 1.0, %v4967_v52 }
 0x516   : > { %v5267_v24 = vadd.f32 0.041655596, %v5266_v15  ;;  %v12924_v14 = vadd.s32 %v5516_v54, %v5507_v18  ;;  %v12926_v2 = vadd.s32 %v5532_v0, %v5528_v25  ;;  %v5486_v4 = vsel %vm5480_vm7, %v5483_v35, %v5485_v45 }
 0x517   : > { %v5409_v46 = vor.u32 4788187, %v5408_v41  ;;  %v5412_v49 = vcvt.s32.f32 %v5405_v61  ;;  %v5538_v3 = vadd.s32 %v5537_v59, %v5527_v50  ;;  %vm4974_vm0 = vcmp.eq.s32.totalorder %v12867_v63, 0 }
 0x518   : > { %v5109_v10 = vsel %vm12749_vm8, 0, %v12889_v11  ;;  %v5114_v1 = vadd.f32 -0.4999988, %v12896_v30  ;;  %v5261_v52 = vsub.s32 4, %v12668_v20  ;;  %v5275_v9 = vmul.f32 %v5274_v39, %v12893_v33 }
 0x519   : > { %vm4977_vm5 = vcmp.eq.s32.totalorder %v12867_v63, 2  ;;  %v5122_v25 = vmul.f32 %v5121_v12, %v12802_v28  ;;  %v5410_v0 = vand.u32 2147483647, %v5409_v46  ;;  %v5539_v31 = vadd.s32 %v5538_v3, %v5529_v38 }
 0x51a   : > { %v4961_v32 = vadd.f32 1.0, %v12880_v22  ;;  %v5268_v26 = vmul.f32 %v5267_v24, %v12893_v33  ;;  %v5540_v36 = vmul.u32 %v12821_v47, %v5486_v4  ;;  %vm5542_vm8 = vc.u32 %v12924_v14, %v12926_v2 }
 0x51b   : > { %v4969_v7 = vmul.f32 %v4968_v16, %v12693_v51  ;;  %v5126_v11 = vadd.s32 3, %v5109_v10  ;;  %v5413_v30 = vmul.f32 %v5412_v49, %v5410_v0  ;;  %v5543_v56 = vadd.s32 1, %v5539_v31 }
 0x51c   : > { %vm4815_vm6 = vweird.f32 %v14025_v34  ;;  %v5115_v12 = vmul.f32 %v5114_v1, %v12802_v28  ;;  %v5262_v22 = vsel %vm5139_vm4, %v5261_v52, %v12668_v20  ;;  %v5276_v43 = vadd.f32 -0.16666654, %v5275_v9 }
 0x51d   : > { %vm5294_vm9 = vcmp.lt.s32.totalorder %v14010_v8, 0  ;;  %v5123_v47 = vadd.f32 1.0, %v5122_v25  ;;  %v14026_v37 = vand.u32 2147483647, %v14010_v8  ;;  %v5414_v51 = vxor.u32 2147483648, %v5413_v30 }
 0x51e   : > { %v5544_v15 = vsel %vm5542_vm8, %v5543_v56, %v5539_v31  ;;  %v4978_v18 = vxor.u32 2147483648, %v4961_v32  ;;  %v5269_v50 = vadd.f32 -0.4999988, %v5268_v26  ;;  %v5416_v28 = vsub.s32 4, %v12849_v55 }
 0x51f   : > { %vm12953_vm1 = vcmp.le.f32.partialorder %v14026_v37, 0.7853982  ;;  %v5545_v5 = vadd.s32 %v5544_v15, %v5540_v36  ;;  %v4975_v58 = vxor.u32 2147483648, %v4969_v7  ;;  %v5127_v13 = vand.u32 3, %v5126_v11 }
 0x520   : > { %v5264_v20 = vsel %vm12837_vm13, 0, %v5262_v22  ;;  %v5415_v54 = vsel %vm5294_vm9, %v5414_v51, %v5413_v30  ;;  %v5116_v39 = vadd.f32 1.0, %v5115_v12  ;;  %v5277_v35 = vmul.f32 %v5276_v43, %v12893_v33 }
 0x521   : > { %v12966_v45 = vsel %vm12953_vm1, %v14010_v8, %v5415_v54  ;;  %v5546_v21 = vadd.s32 536870912, %v5545_v5  ;;  %v4825_v61 = vsel %vm4818_vm3, %v12865_v44, %v12733_v29  ;;  %vm4970_vm4 = vweird.f32 %v14009_v53 }
 0x522   : > { %vm4973_vm7 = vcmp.lt.s32.totalorder %v12867_v63, 2  ;;  %v5124_v17 = vmul.f32 %v5123_v47, %v12774_v27  ;;  %v5420_v41 = vmul.f32 %v12966_v45, %v12966_v45  ;;  %v5270_v38 = vmul.f32 %v5269_v50, %v12893_v33 }
 0x523   : > { %v5281_v59 = vadd.s32 3, %v5264_v20  ;;  %v5417_v16 = vsel %vm5294_vm9, %v5416_v28, %v12849_v55  ;;  %v5547_v24 = vshrl.u32 %v5546_v21, 30  ;;  %v4976_v40 = vsel %vm4974_vm0, %v4961_v32, %v4975_v58 }
 0x524   : > { %v4979_v29 = vsel %vm4977_vm5, %v4978_v18, %v4969_v7  ;;  %v5421_v27 = vmul.f32 -0.001358992, %v5420_v41  ;;  %v5428_v44 = vmul.f32 -0.00019511016, %v5420_v41  ;;  %vm5129_vm13 = vcmp.eq.s32.totalorder %v5127_v13, 0 }
 0x525   : > { %v5133_v46 = vxor.u32 2147483648, %v5116_v39  ;;  %v5278_v49 = vadd.f32 1.0, %v5277_v35  ;;  %v5548_v33 = vshll.u32 %v5547_v24, 30  ;;  %v5130_v4 = vxor.u32 2147483648, %v5124_v17  ;;  %v6260_v35 = vld [vmem:[%s6549_s0 + $0x8] sm:$0xff] }
 0x526   : > { %v5419_v3 = vsel %vm12953_vm1, 0, %v5417_v16  ;;  %v5422_v55 = vadd.f32 0.041655596, %v5421_v27  ;;  %v5429_v10 = vadd.f32 0.008332121, %v5428_v44  ;;  %vm5132_vm12 = vcmp.eq.s32.totalorder %v5127_v13, 2 }
 0x527   : > { %v5271_v1 = vadd.f32 1.0, %v5270_v38  ;;  %v12989_v52 = vand.u32 3, %v5281_v59  ;;  %v12991_v9 = vsub.s32 %v5545_v5, %v5548_v33  ;;  %v12995_v25 = vsel %vm4815_vm6, nan, %v4825_v61  ;;  %v6262_v16 = vld [vmem:[%s6549_s0 + $0x18] sm:$0xff]  ;;  %v6264_v44 = vld [vmem:[%s6549_s0 + $0x28] sm:$0xff] }
 0x528   : > { %v4980_v0 = vsel %vm4973_vm7, %v4976_v40, %v4979_v29  ;;  %v5423_v31 = vmul.f32 %v5422_v55, %v5420_v41  ;;  %v5430_v32 = vmul.f32 %v5429_v10, %v5420_v41  ;;  %v5279_v26 = vmul.f32 %v5278_v49, %v12874_v48  ;;  %v6263_v29 = vld [vmem:[%s6549_s0 + $0x20] sm:$0xff] }
 0x529   : > { %v5436_v36 = vadd.s32 3, %v5419_v3  ;;  %vm5550_vm11 = vcmp.lt.s32.totalorder %v12991_v9, 0  ;;  %v5551_v7 = vsub.s32 0, %v12991_v9  ;;  %vm5128_vm15 = vcmp.lt.s32.totalorder %v5127_v13, 2  ;;  %v6259_v13 = vld [vmem:[%s6549_s0] sm:$0xff] }
 0x52a   : > { %v5131_v11 = vsel %vm5129_vm13, %v5116_v39, %v5130_v4  ;;  %v5134_v30 = vsel %vm5132_vm12, %v5133_v46, %v5124_v17  ;;  %v5431_v56 = vadd.f32 -0.16666654, %v5430_v32  ;;  %vm5287_vm10 = vcmp.eq.s32.totalorder %v12989_v52, 2 }
 0x52b   : > { %v5288_v34 = vxor.u32 2147483648, %v5271_v1  ;;  %v5552_v63 = vsel %vm5550_vm11, %v5551_v7, %v12991_v9  ;;  %v5571_v12 = vsub.s32 4, %v5547_v24  ;;  %v5424_v22 = vadd.f32 -0.4999988, %v5423_v31 }
 0x52c   : > { %v5432_v43 = vmul.f32 %v5431_v56, %v5420_v41  ;;  %v5553_v48 = vclz %v5552_v63  ;;  %v13006_v47 = vstv %s12981_s11  ;;  %v13010_v37 = vsel %vm4970_vm4, nan, %v4980_v0  ;;  %v6266_v0 = vld [vmem:[%s6549_s0 + $0x38] sm:$0xff] }
 0x52d   : > { %v13012_v57 = vsel %vm5128_vm15, %v5131_v11, %v5134_v30  ;;  %v5285_v51 = vxor.u32 2147483648, %v5279_v26  ;;  %v13014_v15 = vand.u32 3, %v5436_v36  ;;  %vm5284_vm14 = vcmp.eq.s32.totalorder %v12989_v52, 0  ;;  %v6267_v36 = vld [vmem:[%s6549_s0 + $0x40] sm:$0xff]  ;;  %v6268_v11 = vld [vmem:[%s6549_s0 + $0x48] sm:$0xff] }
 0x52e   : > { %v14029_v18 = vand.u32 2147483647, %v14015_v6  ;;  %vm5449_vm3 = vcmp.lt.s32.totalorder %v14015_v6, 0  ;;  %v6067_v53 = vadd.s32 4294967294, %v5553_v48  ;;  %v13026_v28 = vsel %vm5287_vm10, %v5288_v34, %v5279_v26 }
 0x52f   : > { %v5541_v5 = vadd.s32 %v12926_v2, %v12924_v14  ;;  %v13032_v58 = vsel %vm5449_vm3, %v5571_v12, %v5547_v24  ;;  %v5603_v20 = vmul.f32 %v6259_v13, %v13006_v47  ;;  %v5425_v54 = vmul.f32 %v5424_v22, %v5420_v41  ;;  %v6261_v2 = vld [vmem:[%s6549_s0 + $0x10] sm:$0xff] }
 0x530   : > { %vm13019_vm2 = vcmp.le.f32.partialorder %v14029_v18, 0.7853982  ;;  %v5433_v39 = vadd.f32 1.0, %v5432_v43  ;;  %vm6068_vm0 = vcmp.lt.s32.totalorder %v6067_v53, 0  ;;  %v5604_v21 = vmul.f32 %v6260_v35, %v13006_v47 }
 0x531   : > { %v13038_v61 = vsel %vm5284_vm14, %v5271_v1, %v5285_v51  ;;  %vm5442_vm5 = vcmp.eq.s32.totalorder %v13014_v15, 2  ;;  %v5556_v14 = vsel %vm6068_vm0, 0, %v6067_v53  ;;  %v5605_v17 = vmul.f32 %v6261_v2, %v13006_v47  ;;  %v6265_v1 = vld [vmem:[%s6549_s0 + $0x30] sm:$0xff] }
 0x532   : > { %vm5439_vm8 = vcmp.eq.s32.totalorder %v13014_v15, 0  ;;  %v5557_v38 = vsub.s32 32, %v5556_v14  ;;  %v5558_v41 = vshll.u32 %v12991_v9, %v5556_v14  ;;  %v5574_v59 = vsel %vm13019_vm2, 0, %v13032_v58 }
 0x533   : > { %v5606_v24 = vmul.f32 %v6262_v16, %v13006_v47  ;;  %vm5283_vm6 = vcmp.lt.s32.totalorder %v12989_v52, 2  ;;  %v5561_v40 = vsub.s32 4294967266, %v5556_v14  ;;  %v5607_v27 = vmul.f32 %v6263_v29, %v13006_v47 }
 0x534   : > { %v5608_v46 = vmul.f32 %v6264_v44, %v13006_v47  ;;  %v5619_v49 = vmul.f32 1.442695, %v5603_v20  ;;  %v5426_v33 = vadd.f32 1.0, %v5425_v54  ;;  %v5434_v4 = vmul.f32 %v5433_v39, %v12966_v45  ;;  %v6269_v45 = vld [vmem:[%s6549_s0 + $0x50] sm:$0xff]  ;;  %v6271_v20 = vld [vmem:[%s6549_s0 + $0x60] sm:$0xff] }
 0x535   : > { %v5559_v3 = vshrl.u32 %v5541_v5, %v5557_v38  ;;  %v5621_v55 = vmul.f32 1.442695, %v5604_v21  ;;  %vm5438_vm9 = vcmp.lt.s32.totalorder %v13014_v15, 2  ;;  %v5562_v10 = vadd.s32 127, %v5561_v40  ;;  %v6270_v5 = vld [vmem:[%s6549_s0 + $0x58] sm:$0xff]  ;;  %v6272_v21 = vld [vmem:[%s6549_s0 + $0x68] sm:$0xff] }
 0x536   : > { %v5609_v9 = vmul.f32 %v6265_v1, %v13006_v47  ;;  %v5610_v31 = vmul.f32 %v6266_v0, %v13006_v47  ;;  %v5623_v32 = vmul.f32 1.442695, %v5605_v17  ;;  %v5611_v7 = vmul.f32 %v6267_v36, %v13006_v47  ;;  %v6273_v38 = vld [vmem:[%s6549_s0 + $0x70] sm:$0xff] }
 0x537   : > { %v5560_v26 = vor.u32 %v5559_v3, %v5558_v41  ;;  %v5612_v30 = vmul.f32 %v6268_v11, %v13006_v47  ;;  %v5613_v56 = vmul.f32 %v6269_v45, %v13006_v47  ;;  %vm5125_vm1 = vweird.f32 %v13999_v62 }
 0x538   : > { %v5563_v34 = vshll.u32 %v5562_v10, 23  ;;  %6227 = vpow2.f32 %v5619_v49  ;;  %v5625_v63 = vmul.f32 1.442695, %v5606_v24  ;;  %v5627_v12 = vmul.f32 1.442695, %v5607_v27  ;;  %v6274_v49 = vld [vmem:[%s6549_s0 + $0x78] sm:$0xff] }
 0x539   : > { %vm5280_vm4 = vweird.f32 %v14003_v42  ;;  %v5440_v22 = vxor.u32 2147483648, %v5434_v4  ;;  %v5443_v43 = vxor.u32 2147483648, %v5426_v33  ;;  %6229 = vpow2.f32 %v5621_v55  ;;  %s5825_s0 = sshll.u32 %s13262_s30, 4  ;;  %s5826_s0 = int_to_ptr.vmem [resolvable:$true] %s5825_s0 }
 0x53a   : > { %v5629_v48 = vmul.f32 1.442695, %v5608_v46  ;;  %v5564_v51 = vor.u32 4788187, %v5563_v34  ;;  %v5567_v18 = vcvt.s32.f32 %v5560_v26  ;;  %6231 = vpow2.f32 %v5623_v32 }
 0x53b   : > { %v5631_v53 = vmul.f32 1.442695, %v5609_v9  ;;  %v5614_v13 = vmul.f32 %v6270_v5, %v13006_v47  ;;  %v5615_v54 = vmul.f32 %v6271_v20, %v13006_v47  ;;  %6233 = vpow2.f32 %v5625_v63 }
 0x53c   : > { %v5633_v39 = vmul.f32 1.442695, %v5610_v31  ;;  %v5565_v35 = vand.u32 2147483647, %v5564_v51  ;;  %v5616_v14 = vmul.f32 %v6272_v21, %v13006_v47  ;;  %6235 = vpow2.f32 %v5627_v12 }
 0x53d   : > { %v5635_v2 = vmul.f32 1.442695, %v5611_v7  ;;  %v5444_v17 = vsel %vm5442_vm5, %v5443_v43, %v5434_v4  ;;  %v5617_v41 = vmul.f32 %v6273_v38, %v13006_v47  ;;  %6237 = vpow2.f32 %v5629_v48 }
 0x53e   : > { %v5637_v16 = vmul.f32 1.442695, %v5612_v30  ;;  %v6228_v24 = vpop.eup %6227  ;;  %v5441_v40 = vsel %vm5439_vm8, %v5426_v33, %v5440_v22  ;;  %v5568_v29 = vmul.f32 %v5567_v18, %v5565_v35  ;;  %6239 = vpow2.f32 %v5631_v53  ;;  %v14033_v35 = vld [vmem:[#allocation43_spill] sm:$0xff] }
 0x53f   : > { %v5639_v27 = vmul.f32 1.442695, %v5613_v56  ;;  %v6230_v44 = vpop.eup %6229  ;;  %v5290_v46 = vsel %vm5283_vm6, %v13038_v61, %v13026_v28  ;;  %v5618_v4 = vmul.f32 %v6274_v49, %v13006_v47  ;;  %6241 = vpow2.f32 %v5633_v39 }
 0x540   : > { %v5641_v3 = vmul.f32 1.442695, %v5614_v13  ;;  %v6232_v55 = vpop.eup %6231  ;;  %v5569_v10 = vxor.u32 2147483648, %v5568_v29  ;;  %v5591_v33 = vadd.s32 3, %v5574_v59  ;;  %6243 = vpow2.f32 %v5635_v2 }
 0x541   : > { %v5643_v1 = vmul.f32 1.442695, %v5615_v54  ;;  %v6234_v9 = vpop.eup %6233  ;;  %vm5435_vm7 = vweird.f32 %v14010_v8  ;;  %v5445_v52 = vsel %vm5438_vm9, %v5441_v40, %v5444_v17  ;;  %6245 = vpow2.f32 %v5637_v16  ;;  %v14032_v8 = vld [vmem:[#allocation39_spill] sm:$0xff] }
 0x542   : > { %v5645_v47 = vmul.f32 1.442695, %v5616_v14  ;;  %v6236_v28 = vpop.eup %6235  ;;  %v5570_v61 = vsel %vm5449_vm3, %v5569_v10, %v5568_v29  ;;  %6247 = vpow2.f32 %v5639_v27  ;;  %v5647_v0 = vmul.f32 1.442695, %v5617_v41  ;;  %v14034_v41 = vld [vmem:[#allocation44_spill] sm:$0xff] }
 0x543   : > { %v13101_v31 = vstv %s13069_s12  ;;  %v6238_v58 = vpop.eup %6237  ;;  %v13106_v59 = vsel %vm5125_vm1, nan, %v13012_v57  ;;  %v13111_v15 = vsel %vm13019_vm2, %v14015_v6, %v5570_v61  ;;  %6249 = vpow2.f32 %v5641_v3  ;;  %s6340_s12 = scalar_lea.hbm %s13329_s4, 1024 }
 0x544   : > { %v5649_v32 = vmul.f32 1.442695, %v5618_v4  ;;  %v6240_v26 = vpop.eup %6239  ;;  %v13115_v36 = vsel %vm5280_vm4, nan, %v5290_v46  ;;  %v5575_v7 = vmul.f32 %v13111_v15, %v13111_v15  ;;  %v13119_v11 = vand.u32 3, %v5591_v33  ;;  %p6342_p11 = scmp.lt.s32.totalorder %s6340_s12, %s6336_s5 }
 0x545   : > { %6251 = vpow2.f32 %v5643_v1  ;;  %v6242_v62 = vpop.eup %6241  ;;  %v13123_v57 = vsel %vm5435_vm7, nan, %v5445_v52  ;;  %v5652_v50 = vmul.f32 %v6228_v24, %v13101_v31  ;;  %v5653_v30 = vmul.f32 %v6230_v44, %v13101_v31  ;;  %v14035_v52 = vld [vmem:[#allocation21_spill] sm:$0xff] }
 0x546   : > { %6253 = vpow2.f32 %v5645_v47  ;;  %v6244_v45 = vpop.eup %6243  ;;  %v5576_v42 = vmul.f32 -0.001358992, %v5575_v7  ;;  %v5583_v56 = vmul.f32 -0.00019511016, %v5575_v7  ;;  %v13128_v34 = vstv %s13081_s13  ;;  %p6343_p12 = por %p6342_p11, %p6341_p10 }
 0x547   : > { %6255 = vpow2.f32 %v5647_v0  ;;  %v6246_v63 = vpop.eup %6245  ;;  %v5654_v12 = vmul.f32 %v6232_v55, %v13101_v31  ;;  %v5655_v22 = vmul.f32 %v6234_v9, %v13101_v31  ;;  %v13134_v43 = vmul.f32 %v14032_v8, %v14032_v8 }
 0x548   : > { %6257 = vpow2.f32 %v5649_v32  ;;  %v6248_v48 = vpop.eup %6247  ;;  %v5577_v51 = vadd.f32 0.041655596, %v5576_v42  ;;  %v5584_v18 = vadd.f32 0.008332121, %v5583_v56  ;;  %v5656_v53 = vmul.f32 %v6236_v28, %v13101_v31  ;;  %p6344_p13 = pnand %p6343_p12, %p6339_p7 }
 0x549   : > { %v5657_v5 = vmul.f32 %v6238_v58, %v13101_v31  ;;  %v6250_v13 = vpop.eup %6249  ;;  %v5658_v20 = vmul.f32 %v6240_v26, %v13101_v31  ;;  %v5669_v54 = vadd.f32 %v13128_v34, %v5652_v50  ;;  %v5670_v39 = vadd.f32 %v13128_v34, %v5653_v30  ;;  %v14036_v50 = vld [vmem:[#allocation17_spill] sm:$0xff] }
 0x54a   : > { %v5686_v21 = vmul.f32 %v14033_v35, %v14033_v35  ;;  %v5578_v2 = vmul.f32 %v5577_v51, %v5575_v7  ;;  %v5585_v17 = vmul.f32 %v5584_v18, %v5575_v7  ;;  %v5659_v38 = vmul.f32 %v6242_v62, %v13101_v31 }
 0x54b   : > { %v6252_v14 = vpop.eup %6251  ;;  %v5687_v16 = vmul.f32 %v14034_v41, %v14034_v41  ;;  %v5660_v40 = vmul.f32 %v6244_v45, %v13101_v31  ;;  %v5661_v29 = vmul.f32 %v6246_v63, %v13101_v31  ;;  %v5671_v27 = vadd.f32 %v13128_v34, %v5654_v12 }
 0x54c   : > { %v6254_v24 = vpop.eup %6253  ;;  %v5672_v44 = vadd.f32 %v13128_v34, %v5655_v22  ;;  %v5579_v49 = vadd.f32 -0.4999988, %v5578_v2  ;;  %v5586_v4 = vadd.f32 -0.16666654, %v5585_v17  ;;  %vm5594_vm13 = vcmp.eq.s32.totalorder %v13119_v11, 0  ;;  %v14037_v22 = vld [vmem:[#allocation18_spill] sm:$0xff] }
 0x54d   : > { %v6256_v46 = vpop.eup %6255  ;;  %vm5597_vm12 = vcmp.eq.s32.totalorder %v13119_v11, 2  ;;  %v5673_v3 = vadd.f32 %v13128_v34, %v5656_v53  ;;  %v5674_v55 = vadd.f32 %v13128_v34, %v5657_v5  ;;  %v5662_v33 = vmul.f32 %v6248_v48, %v13101_v31  ;;  %v14038_v48 = vld [vmem:[#allocation50_spill] sm:$0xff] }
 0x54e   : > { %v6258_v10 = vpop.eup %6257  ;;  %v5663_v1 = vmul.f32 %v6250_v13, %v13101_v31  ;;  %v5675_v9 = vadd.f32 %v13128_v34, %v5658_v20  ;;  %v5688_v47 = vmul.f32 %v14035_v52, %v14035_v52  ;;  %v5580_v28 = vmul.f32 %v5579_v49, %v5575_v7 }
 0x54f   : > { %v5587_v61 = vmul.f32 %v5586_v4, %v5575_v7  ;;  %v5664_v0 = vmul.f32 %v6252_v14, %v13101_v31  ;;  %v5676_v58 = vadd.f32 %v13128_v34, %v5659_v38  ;;  %vm5593_vm11 = vcmp.lt.s32.totalorder %v13119_v11, 2  ;;  %v14039_v4 = vld [vmem:[#allocation20_spill] sm:$0xff] }
 0x550   : > { %v5665_v32 = vmul.f32 %v6254_v24, %v13101_v31  ;;  %v5677_v26 = vadd.f32 %v13128_v34, %v5660_v40  ;;  %v5678_v62 = vadd.f32 %v13128_v34, %v5661_v29  ;;  %v5689_v30 = vmul.f32 %v14036_v50, %v14036_v50 }
 0x551   : > { %v5581_v45 = vadd.f32 1.0, %v5580_v28  ;;  %v5588_v42 = vadd.f32 1.0, %v5587_v61  ;;  %v5666_v56 = vmul.f32 %v6256_v46, %v13101_v31  ;;  %v5667_v7 = vmul.f32 %v6258_v10, %v13101_v31  ;;  %v14040_v10 = vld [vmem:[#allocation63_spill] sm:$0xff]  ;;  %v14044_v28 = vld [vmem:[#allocation52_spill] sm:$0xff] }
 0x552   : > { %v5679_v63 = vadd.f32 %v13128_v34, %v5662_v33  ;;  %v5680_v12 = vadd.f32 %v13128_v34, %v5663_v1  ;;  %v5690_v8 = vmul.f32 %v14037_v22, %v14037_v22  ;;  %v5691_v51 = vmul.f32 %v14038_v48, %v14038_v48  ;;  %v14043_v1 = vld [vmem:[#allocation59_spill] sm:$0xff] }
 0x553   : > { %v5589_v18 = vmul.f32 %v5588_v42, %v13111_v15  ;;  %vm5590_vm15 = vweird.f32 %v14015_v6  ;;  %v5681_v53 = vadd.f32 %v13128_v34, %v5664_v0  ;;  %v5692_v5 = vmul.f32 %v12628_v23, %v12628_v23  ;;  %v14045_v0 = vld [vmem:[#allocation53_spill] sm:$0xff] }
 0x554   : > { %v5693_v31 = vmul.f32 %v12633_v60, %v12633_v60  ;;  %v5598_v13 = vxor.u32 2147483648, %v5581_v45  ;;  %v5682_v20 = vadd.f32 %v13128_v34, %v5665_v32  ;;  %v5694_v35 = vmul.f32 %v12639_v19, %v12639_v19  ;;  %v5749_v32 = vld [vmem:[%s13326_s1] sm:$0x3] }
 0x555   : > { %v5695_v14 = vmul.f32 %v12995_v25, %v12995_v25  ;;  %v5595_v15 = vxor.u32 2147483648, %v5589_v18  ;;  %v5683_v2 = vadd.f32 %v13128_v34, %v5666_v56  ;;  %v13189_v17 = vadd.f32 %v13128_v34, %v5667_v7  ;;  %v14047_v56 = vld [vmem:[#allocation14_spill] sm:$0xff] }
 0x556   : > { %v5696_v23 = vmul.f32 %v13010_v37, %v13010_v37  ;;  %v5697_v60 = vmul.f32 %v13106_v59, %v13106_v59  ;;  %v5698_v38 = vmul.f32 %v13115_v36, %v13115_v36  ;;  %v5699_v19 = vmul.f32 %v13123_v57, %v13123_v57 }
 0x557   : > { %v5701_v25 = vmul.f32 %v13134_v43, %v5669_v54  ;;  %v5702_v41 = vmul.f32 %v5686_v21, %v5670_v39  ;;  %v5703_v24 = vmul.f32 %v5687_v16, %v5671_v27  ;;  %v5704_v40 = vmul.f32 %v5688_v47, %v5672_v44  ;;  %v14041_v43 = vld [vmem:[#allocation46_spill] sm:$0xff] }
 0x558   : > { %v5705_v29 = vmul.f32 %v5689_v30, %v5673_v3  ;;  %v5596_v34 = vsel %vm5594_vm13, %v5581_v45, %v5595_v15  ;;  %v5599_v37 = vsel %vm5597_vm12, %v5598_v13, %v5589_v18  ;;  %v5706_v46 = vmul.f32 %v5690_v8, %v5674_v55  ;;  %v14042_v27 = vld [vmem:[#allocation58_spill] sm:$0xff]  ;;  %v5771_v45 = vld [vmem:[%s13327_s2] sm:$0x3] }
 0x559   : > { %v5707_v59 = vmul.f32 %v5691_v51, %v5675_v9  ;;  %v5708_v49 = vmul.f32 %v5692_v5, %v5676_v58  ;;  %v5717_v36 = vmul.f32 %v14039_v4, %v14039_v4  ;;  %v5718_v57 = vmul.f32 %v14040_v10, %v14040_v10  ;;  %v14049_v8 = vld [vmem:[#allocation42_spill] sm:$0xff]  ;;  %v14050_v5 = vld [vmem:[#allocation24_spill] sm:$0xff] }
 0x55a   : > { %v5719_v54 = vmul.f32 %v14041_v43, %v14041_v43  ;;  %v5709_v39 = vmul.f32 %v5693_v31, %v5677_v26  ;;  %v5710_v21 = vmul.f32 %v5694_v35, %v5678_v62  ;;  %v5711_v16 = vmul.f32 %v5695_v14, %v5679_v63  ;;  %v14046_v26 = vld [vmem:[#allocation57_spill] sm:$0xff]  ;;  %v14048_v63 = vld [vmem:[#allocation34_spill] sm:$0xff] }
 0x55b   : > { %v5720_v44 = vmul.f32 %v14042_v27, %v14042_v27  ;;  %v5600_v3 = vsel %vm5593_vm11, %v5596_v34, %v5599_v37  ;;  %v5712_v55 = vmul.f32 %v5696_v23, %v5680_v12  ;;  %v5713_v33 = vmul.f32 %v5697_v60, %v5681_v53  ;;  %v14051_v60 = vld [vmem:[#allocation54_spill] sm:$0xff] }
 0x55c   : > { %v5721_v9 = vmul.f32 %v14043_v1, %v14043_v1  ;;  %v5714_v52 = vmul.f32 %v5698_v38, %v5682_v20  ;;  %v5715_v47 = vmul.f32 %v5699_v19, %v5683_v2  ;;  %v5722_v61 = vmul.f32 %v14044_v28, %v14044_v28 }
 0x55d   : > { %v5723_v58 = vmul.f32 %v14045_v0, %v14045_v0  ;;  %v5724_v11 = vmul.f32 %v14046_v26, %v14046_v26  ;;  %v5733_v62 = vmul.f32 %v5717_v36, %v5701_v25  ;;  %v5734_v50 = vmul.f32 %v5718_v57, %v5702_v41  ;;  %v14052_v41 = vld [vmem:[#allocation19_spill] sm:$0xff] }
 0x55e   : > { %v5735_v30 = vmul.f32 %v5719_v54, %v5703_v24  ;;  %v5601_v42 = vsel %vm5590_vm15, nan, %v5600_v3  ;;  %v5725_v7 = vmul.f32 %v14047_v56, %v14047_v56  ;;  %v5726_v12 = vmul.f32 %v14048_v63, %v14048_v63 }
 0x55f   : > { %v5736_v22 = vmul.f32 %v5720_v44, %v5704_v40  ;;  %v5727_v48 = vmul.f32 %v14049_v8, %v14049_v8  ;;  %v5737_v51 = vmul.f32 %v5721_v9, %v5705_v29  ;;  %v13236_v18 = vperm.slane %v5749_v32, 0  ;;  %v14053_v40 = vld [vmem:[#allocation35_spill] sm:$0xff] }
 0x560   : > { %v13238_v53 = vperm.slane %v5749_v32, 1  ;;  %v5728_v31 = vmul.f32 %v14050_v5, %v14050_v5  ;;  %v5738_v6 = vmul.f32 %v5722_v61, %v5706_v46  ;;  %v5739_v13 = vmul.f32 %v5723_v58, %v5707_v59  ;;  %v14054_v46 = vld [vmem:[#allocation47_spill] sm:$0xff] }
 0x561   : > { %v5773_v20 = vperm.slane %v5771_v45, 0  ;;  %v5755_v35 = vsub.f32 %v5733_v62, %v13236_v18  ;;  %v5757_v15 = vsub.f32 %v5735_v30, %v13236_v18  ;;  %v5774_v2 = vperm.slane %v5771_v45, 1 }
 0x562   : > { %v5756_v14 = vsub.f32 %v5734_v50, %v13238_v53  ;;  %v5700_v23 = vmul.f32 %v5601_v42, %v5601_v42  ;;  %v5729_v38 = vmul.f32 %v14051_v60, %v14051_v60  ;;  %v5740_v19 = vmul.f32 %v5724_v11, %v5708_v49 }
 0x563   : > { %v5758_v25 = vsub.f32 %v5736_v22, %v13238_v53  ;;  %v5730_v24 = vmul.f32 %v14052_v41, %v14052_v41  ;;  %v5731_v29 = vmul.f32 %v14053_v40, %v14053_v40  ;;  %v5741_v34 = vmul.f32 %v5725_v7, %v5709_v39 }
 0x564   : > { %v5759_v37 = vsub.f32 %v5737_v51, %v13236_v18  ;;  %v5732_v59 = vmul.f32 %v14054_v46, %v14054_v46  ;;  %v5742_v4 = vmul.f32 %v5726_v12, %v5710_v21  ;;  %v5743_v36 = vmul.f32 %v5727_v48, %v5711_v16 }
 0x565   : > { %v5760_v10 = vsub.f32 %v5738_v6, %v13238_v53  ;;  %v5761_v49 = vsub.f32 %v5739_v13, %v13236_v18  ;;  %v5777_v57 = vmul.f32 %v5773_v20, %v5755_v35  ;;  %v5778_v43 = vmul.f32 %v5774_v2, %v5756_v14 }
 0x566   : > { %v5779_v54 = vmul.f32 %v5773_v20, %v5757_v15  ;;  %v5716_v27 = vmul.f32 %v5700_v23, %v13189_v17  ;;  %v5744_v44 = vmul.f32 %v5728_v31, %v5712_v55  ;;  %v5762_v39 = vsub.f32 %v5740_v19, %v13238_v53 }
 0x567   : > { %v5780_v3 = vmul.f32 %v5774_v2, %v5758_v25  ;;  %v5745_v1 = vmul.f32 %v5729_v38, %v5713_v33  ;;  %v5763_v9 = vsub.f32 %v5741_v34, %v13236_v18  ;;  %v5781_v28 = vmul.f32 %v5773_v20, %v5759_v37  ;;  %5793 = vst [vmem:[%s13262_s30] sm:$0xff] %v5777_v57 }
 0x568   : > { %v5746_v21 = vmul.f32 %v5730_v24, %v5714_v52  ;;  %v5764_v17 = vsub.f32 %v5742_v4, %v13238_v53  ;;  %v5782_v16 = vmul.f32 %v5774_v2, %v5760_v10  ;;  %5794 = vst [vmem:[%s13262_s30 + $0x8] sm:$0xff] %v5778_v43  ;;  %v5747_v55 = vmul.f32 %v5731_v29, %v5715_v47 }
 0x569   : > { %v5765_v33 = vsub.f32 %v5743_v36, %v13236_v18  ;;  %v5783_v61 = vmul.f32 %v5773_v20, %v5761_v49  ;;  %5795 = vst [vmem:[%s13262_s30 + $0x10] sm:$0xff] %v5779_v54  ;;  %v5748_v0 = vmul.f32 %v5732_v59, %v5716_v27  ;;  %v5766_v58 = vsub.f32 %v5744_v44, %v13238_v53 }
 0x56a   : > { %v5784_v32 = vmul.f32 %v5774_v2, %v5762_v39  ;;  %5796 = vst [vmem:[%s13262_s30 + $0x18] sm:$0xff] %v5780_v3  ;;  %v5767_v52 = vsub.f32 %v5745_v1, %v13236_v18  ;;  %v5785_v26 = vmul.f32 %v5773_v20, %v5763_v9  ;;  %v5768_v47 = vsub.f32 %v5746_v21, %v13238_v53 }
 0x56b   : > { %5797 = vst [vmem:[%s13262_s30 + $0x20] sm:$0xff] %v5781_v28  ;;  %v5786_v11 = vmul.f32 %v5774_v2, %v5764_v17  ;;  %v5769_v62 = vsub.f32 %v5747_v55, %v13236_v18  ;;  %v5787_v50 = vmul.f32 %v5773_v20, %v5765_v33  ;;  %v5770_v30 = vsub.f32 %v5748_v0, %v13238_v53 }
 0x56c   : > { %5798 = vst [vmem:[%s13262_s30 + $0x28] sm:$0xff] %v5782_v16  ;;  %v5788_v45 = vmul.f32 %v5774_v2, %v5766_v58  ;;  %v5789_v42 = vmul.f32 %v5773_v20, %v5767_v52  ;;  %v5790_v56 = vmul.f32 %v5774_v2, %v5768_v47 }
 0x56d   : > { %5799 = vst [vmem:[%s13262_s30 + $0x30] sm:$0xff] %v5783_v61  ;;  %v5791_v7 = vmul.f32 %v5773_v20, %v5769_v62  ;;  %v5792_v63 = vmul.f32 %v5774_v2, %v5770_v30 }
 0x56e   : > { %5800 = vst [vmem:[%s13262_s30 + $0x38] sm:$0xff] %v5784_v32 }
 0x56f   : > { %5801 = vst [vmem:[%s13262_s30 + $0x40] sm:$0xff] %v5785_v26 }
 0x570   : > { %5802 = vst [vmem:[%s13262_s30 + $0x48] sm:$0xff] %v5786_v11 }
 0x571   : > { %5803 = vst [vmem:[%s13262_s30 + $0x50] sm:$0xff] %v5787_v50 }
 0x572   : > { %5804 = vst [vmem:[%s13262_s30 + $0x58] sm:$0xff] %v5788_v45 }
 0x573   : > { %5805 = vst [vmem:[%s13262_s30 + $0x60] sm:$0xff] %v5789_v42 }
 0x574   : > { %5806 = vst [vmem:[%s13262_s30 + $0x68] sm:$0xff] %v5790_v56 }
 0x575   : > { %5807 = vst [vmem:[%s13262_s30 + $0x70] sm:$0xff] %v5791_v7 }
 0x576   : > { %5808 = vst [vmem:[%s13262_s30 + $0x78] sm:$0xff] %v5792_v63 }
 0x577   : > { %6347 = shalt.err (!%p6344_p13)
}
 0x578   : > { %s6418_s23 = smov 256   ;;  %s6419_s21 = smov 16  }
 0x579   : > { %6085 = dma.vmem_to_hbm [thread:$0]  (%p6493_p8), %s5826_s0, 2048, %s5828_s24, %s5810_s25, %s6418_s23, %s6418_s23, %s6419_s21  }
 0x57a PF: > { %p6102_p0 = scmp.ge.s32.totalorder %s6406_s20, 2  ;;  %s5842_s28 = sand.u32 1, %s6386_s15  }
 0x57b   : > { %s5843_s30 = scalar_lea.sflag [#allocation4], %s5842_s28 }
 0x57c   : > { %p6096_p1 = pnand %p6102_p0, %p6497_p9 }
 0x57e   : > { %p6097_p2 = pneg %p6096_p1 }
 0x580   : > { %6381 = dma.done.wait (%p6097_p2), %s5843_s30, 2048  }
 0x581   : > { %6383 = vsyncadd (%p6097_p2), %s5843_s30, 4294965248  ;;  %s21_s20 = sadd.s32 1, %s6406_s20   ;;  %s14056_s15 = smov %s6390_s16 }
 0x582   : > { %p18_p4 = scmp.ge.s32.totalorder %s21_s20, 10   ;;  %s14057_s16 = smov %s6394_s17 }
 0x583   : > { %s14058_s17 = smov %s6532_s29  ;;  %s14059_s18 = smov %s6402_s19 }
 0x584   : > { %s14060_s19 = smov %s14062_s7  ;;  %20 = sbr.rel (!%p18_p4) target bundleno = 9 (0x9), region = 92 }
 0x589   :  { %5849 = vsyncpa [#allocation3], 1 }
 0x58a   :  { %5851 = vsyncpa [#allocation3 + $0x1], 1 }
 0x58b   :  { %5852 = vsyncpa [#allocation4], 1 }
 0x58c   :  { %5854 = vsyncpa [#allocation4 + $0x1], 1 }
 0x58d   :  { %5855 = vsyncpa [#allocation5], 1 }
 0x58e   :  { %5857 = vsyncpa [#allocation5 + $0x1], 1 }

</bundles_post_ra>
